<compile_context>
chip_gen: v5e
topology: v5e:2x2
jax: 0.10.0
libtpu: 0.0.40
codegen_flags: <defaults>
</compile_context>

<pallas_src>
import functools

import jax
import jax.numpy as jnp
from jax import lax
from jax.experimental import pallas as pl
from jax.experimental.pallas import tpu as pltpu

_EPS = 1e-5


def _round_up(x, m):
    return (x + m - 1) // m * m


@functools.lru_cache(maxsize=None)
def _compiler_params():
    # Half of physical VMEM, capped at 64 MiB: ~32 MiB on v7x (64 MiB / TC),
    # ~64 MiB on v5e / v6e (128 MiB / TC).
    try:
        cap = pltpu.get_tpu_info().vmem_capacity_bytes
        limit = min(cap // 2, 64 * 1024 * 1024)
    except Exception:  # conservative fallback if the query is unavailable
        limit = 32 * 1024 * 1024
    return pltpu.CompilerParams(
        dimension_semantics=("parallel",),   # let both TensorCores split the grid
        vmem_limit_bytes=limit)


def _pick_tile_b(batch, rows_per_image, target_rows=2048):
    """Largest divisor of `batch` keeping <= target_rows matmul rows per step,
    preferring >= 2 (and even) grid steps so megacore has work for both TCs."""
    cands = [t for t in range(1, batch + 1)
             if batch % t == 0 and t * rows_per_image <= target_rows]
    if not cands:
        cands = [1]
    best = cands[-1]
    for t in reversed(cands):
        if batch // t >= 2:
            best = t
            break
    for t in reversed(cands):
        if batch // t >= 2 and (batch // t) % 2 == 0:
            best = t
            break
    return best


# --------------------------------------------------------------------------
# Kernel bodies
# --------------------------------------------------------------------------
def _conv3x3_flat(src_ref, w_ref, *, wr, mout):
    """3x3 'SAME' conv over a zero-padded, row-flattened tile.

    src_ref: (M, C) f32 VMEM ref; row  b*SP + yp*wr + xp  holds padded pixel
             (yp, xp) of image b (zero halo / dead rows).
    w_ref  : (9, C, C) tap-major weights (k = ky*3 + kx) in the compute dtype.
    Returns an f32 (mout, C) accumulator whose row q = b*SP + y*wr + x is the
    conv output of pixel (y, x) (top-left aligned in the padded frame); rows
    that do not correspond to a real pixel contain garbage and are masked by
    the caller.  Each tap is a plain row-offset read (no per-tap relayout).
    """
    c = w_ref.shape[-1]
    cdt = w_ref.dtype
    acc = jnp.zeros((mout, c), jnp.float32)
    for k in range(9):
        dy, dx = divmod(k, 3)
        tap = src_ref[pl.ds(dy * wr + dx, mout), :].astype(cdt)
        acc = acc + jnp.dot(tap, w_ref[k], preferred_element_type=jnp.float32)
    return acc


def _store_padded(acc, vmask_ref, y_ref, sum_ref, ssq_ref, *, wr):
    """Mask non-pixel rows, emit per-tile BN partial stats, and store the conv
    output back in the padded-row layout (interior shifted by wr+1, zero halo).
    """
    mout, c = acc.shape
    acc = acc * vmask_ref[...]                       # zero halo / garbage rows
    sum_ref[...] = jnp.sum(acc, axis=0, keepdims=True)
    ssq_ref[...] = jnp.sum(acc * acc, axis=0, keepdims=True)
    zeros = jnp.zeros((wr + 1, c), y_ref.dtype)
    y_ref[pl.ds(0, wr + 1), :] = zeros               # leading halo rows
    y_ref[pl.ds(wr + 1, mout), :] = acc.astype(y_ref.dtype)
    y_ref[pl.ds(mout + wr + 1, wr + 1), :] = zeros   # trailing halo rows


def _conv_stats_kernel(xpad_ref, w_ref, vmask_ref,
                       y_ref, sum_ref, ssq_ref, src_ref, *, wr, mout):
    """Stage 1: y1 = conv1(x)  (bias cancelled by train-mode BN) + BN1 stats."""
    src_ref[...] = xpad_ref[...].astype(jnp.float32)
    acc = _conv3x3_flat(src_ref, w_ref, wr=wr, mout=mout)
    _store_padded(acc, vmask_ref, y_ref, sum_ref, ssq_ref, wr=wr)


def _bn_relu_conv_stats_kernel(y1_ref, s_ref, t_ref, w_ref, imask_ref, vmask_ref,
                               y2_ref, sum_ref, ssq_ref, h_ref, *, wr, mout):
    """Stage 2: h = relu(bn1(y1)) fused into conv2, + BN2 partial stats."""
    h = jnp.maximum(y1_ref[...].astype(jnp.float32) * s_ref[...] + t_ref[...], 0.0)
    # The affine would turn the stored zero halo into relu(shift); one cheap
    # per-row mask multiply restores the conv's zero padding.
    h_ref[...] = h * imask_ref[...]
    acc = _conv3x3_flat(h_ref, w_ref, wr=wr, mout=mout)
    _store_padded(acc, vmask_ref, y2_ref, sum_ref, ssq_ref, wr=wr)


def _bn_add_relu_kernel(y2_ref, res_ref, s_ref, t_ref, o_ref):
    """Stage 3: out = relu(bn2(y2) + residual).  Pure flat elementwise."""
    y2 = y2_ref[...].astype(jnp.float32)
    res = res_ref[...].astype(jnp.float32)
    o_ref[...] = jnp.maximum(y2 * s_ref[...] + t_ref[...] + res, 0.0).astype(o_ref.dtype)


# --------------------------------------------------------------------------
# pallas_call wrappers
# --------------------------------------------------------------------------
def _conv_stats_call(xpad, w, vmask, *, grid, block_rows, wr, mout):
    rows, c = xpad.shape
    kern = functools.partial(_conv_stats_kernel, wr=wr, mout=mout)
    return pl.pallas_call(
        kern,
        out_shape=(
            jax.ShapeDtypeStruct((rows, c), xpad.dtype),
            jax.ShapeDtypeStruct((grid, 1, c), jnp.float32),
            jax.ShapeDtypeStruct((grid, 1, c), jnp.float32),
        ),
        grid=(grid,),
        in_specs=[
            pl.BlockSpec((block_rows, c), lambda g: (g, 0)),
            pl.BlockSpec((9, c, c), lambda g: (0, 0, 0)),
            pl.BlockSpec((mout, 1), lambda g: (0, 0)),
        ],
        out_specs=(
            pl.BlockSpec((block_rows, c), lambda g: (g, 0)),
            pl.BlockSpec((None, 1, c), lambda g: (g, 0, 0)),
            pl.BlockSpec((None, 1, c), lambda g: (g, 0, 0)),
        ),
        scratch_shapes=[pltpu.VMEM((block_rows, c), jnp.float32)],
        compiler_params=_compiler_params(),
    )(xpad, w, vmask)


def _bn_relu_conv_stats_call(y1pad, scale, shift, w, imask, vmask,
                             *, grid, block_rows, wr, mout):
    rows, c = y1pad.shape
    kern = functools.partial(_bn_relu_conv_stats_kernel, wr=wr, mout=mout)
    return pl.pallas_call(
        kern,
        out_shape=(
            jax.ShapeDtypeStruct((rows, c), y1pad.dtype),
            jax.ShapeDtypeStruct((grid, 1, c), jnp.float32),
            jax.ShapeDtypeStruct((grid, 1, c), jnp.float32),
        ),
        grid=(grid,),
        in_specs=[
            pl.BlockSpec((block_rows, c), lambda g: (g, 0)),
            pl.BlockSpec((1, c), lambda g: (0, 0)),
            pl.BlockSpec((1, c), lambda g: (0, 0)),
            pl.BlockSpec((9, c, c), lambda g: (0, 0, 0)),
            pl.BlockSpec((block_rows, 1), lambda g: (0, 0)),
            pl.BlockSpec((mout, 1), lambda g: (0, 0)),
        ],
        out_specs=(
            pl.BlockSpec((block_rows, c), lambda g: (g, 0)),
            pl.BlockSpec((None, 1, c), lambda g: (g, 0, 0)),
            pl.BlockSpec((None, 1, c), lambda g: (g, 0, 0)),
        ),
        scratch_shapes=[pltpu.VMEM((block_rows, c), jnp.float32)],
        compiler_params=_compiler_params(),
    )(y1pad, scale, shift, w, imask, vmask)


def _bn_add_relu_call(y2, residual, scale, shift, *, grid, block_rows):
    rows, c = y2.shape
    return pl.pallas_call(
        _bn_add_relu_kernel,
        out_shape=jax.ShapeDtypeStruct((rows, c), jnp.float32),
        grid=(grid,),
        in_specs=[
            pl.BlockSpec((block_rows, c), lambda g: (g, 0)),
            pl.BlockSpec((block_rows, c), lambda g: (g, 0)),
            pl.BlockSpec((1, c), lambda g: (0, 0)),
            pl.BlockSpec((1, c), lambda g: (0, 0)),
        ],
        out_specs=pl.BlockSpec((block_rows, c), lambda g: (g, 0)),
        compiler_params=_compiler_params(),
    )(y2, residual, scale, shift)


# --------------------------------------------------------------------------
# Host-side glue
# --------------------------------------------------------------------------
def _torch_weight_to_taps(w_oihw):
    """(C_out, C_in, 3, 3) -> (9, C_in, C_out), tap index k = ky*3 + kx."""
    c_out, c_in, _, _ = w_oihw.shape
    return jnp.transpose(w_oihw, (2, 3, 1, 0)).reshape(9, c_in, c_out)


def _bn_scale_shift(psum, pssq, n, gamma, beta):
    """Fold training-mode batch mean/var + BN affine into per-channel scale/shift."""
    mean = psum / n
    var = pssq / n - mean * mean  # biased batch variance (training mode)
    # TODO(synk): E[x^2]-E[x]^2 can cancel when |mean| >> std; a two-pass /
    # Welford reduction would match the framework formula bit-for-bit.
    inv = lax.rsqrt(jnp.maximum(var, 0.0) + _EPS)
    scale = (gamma * inv).astype(jnp.float32)
    shift = (beta - mean * scale).astype(jnp.float32)
    return scale.reshape(1, -1), shift.reshape(1, -1)


def _row_masks(h, w, wr, sp, tile_b, mout):
    """Per-flat-row masks for one batch tile (built on the host, tiny)."""
    hp = h + 2
    iy = jnp.arange(hp)[:, None]
    ix = jnp.arange(wr)[None, :]
    valid2d = ((iy < h) & (ix < w)).astype(jnp.float32)                 # conv-output rows
    inter2d = ((iy >= 1) & (iy <= h) & (ix >= 1) & (ix <= w)).astype(jnp.float32)
    tail = sp - hp * wr
    valid = jnp.pad(valid2d.reshape(-1), (0, tail))
    inter = jnp.pad(inter2d.reshape(-1), (0, tail))
    vmask = jnp.tile(valid, (tile_b,))[:mout].reshape(mout, 1)
    imask = jnp.tile(inter, (tile_b,)).reshape(tile_b * sp, 1)
    return vmask, imask


@functools.partial(jax.jit, static_argnames=("compute_dtype",))
def residual_block(x_nchw, params, compute_dtype=jnp.bfloat16):
    """ResidualBlock.forward (training-mode BN).  x_nchw: (B, C, H, W) float32."""
    w1, b1, g1, be1, w2, b2, g2, be2 = params
    del b1, b2  # conv bias cancels exactly under training-mode BN mean subtraction

    b, c, h, w = x_nchw.shape
    hp = h + 2
    wr = w + 2 + ((w + 1) % 2)          # row pitch >= W+2, kept odd so the
    #                                     interior-store offset (wr+1) is even
    sp = _round_up(hp * wr, 8)          # 8-aligned rows per padded image
    n = b * h * w

    tile_b = _pick_tile_b(b, sp)
    grid = b // tile_b
    block_rows = tile_b * sp
    mout = block_rows - 2 * wr - 2      # conv-output rows computed per tile

    # Layout prep (one fused XLA pass over x): NCHW -> zero-padded, flattened
    # rows in the matmul compute dtype.  No other host-side pads / transposes.
    x_nhwc = jnp.transpose(x_nchw, (0, 2, 3, 1))
    xpad = jnp.pad(x_nhwc, ((0, 0), (1, 1), (1, wr - w - 1), (0, 0)))
    xpad = xpad.reshape(b, hp * wr, c)
    xpad = jnp.pad(xpad, ((0, 0), (0, sp - hp * wr), (0, 0)))
    xpad = xpad.reshape(b * sp, c).astype(compute_dtype)

    w1t = _torch_weight_to_taps(w1).astype(compute_dtype)
    w2t = _torch_weight_to_taps(w2).astype(compute_dtype)
    vmask, imask = _row_masks(h, w, wr, sp, tile_b, mout)

    # Stage 1: conv1 + per-tile partial BN1 stats.
    y1, s1, q1 = _conv_stats_call(xpad, w1t, vmask, grid=grid,
                                  block_rows=block_rows, wr=wr, mout=mout)
    sc1, sh1 = _bn_scale_shift(s1.sum(axis=(0, 1)), q1.sum(axis=(0, 1)), n, g1, be1)

    # Stage 2: bn1 + relu fused into conv2, + per-tile partial BN2 stats.
    y2, s2, q2 = _bn_relu_conv_stats_call(y1, sc1, sh1, w2t, imask, vmask,
                                          grid=grid, block_rows=block_rows,
                                          wr=wr, mout=mout)
    sc2, sh2 = _bn_scale_shift(s2.sum(axis=(0, 1)), q2.sum(axis=(0, 1)), n, g2, be2)

    # Stage 3: bn2 + residual + relu (flat elementwise; residual comes from the
    # already-padded x so no extra layout pass; in bf16 mode the residual is
    # the bf16-rounded x, consistent with bf16 intermediates).
    o = _bn_add_relu_call(y2, xpad, sc2, sh2, grid=grid, block_rows=block_rows)

    # Extract the interior and return to NCHW (one fused XLA pass).
    o = o.reshape(b, sp, c)[:, :hp * wr, :].reshape(b, hp, wr, c)
    o = o[:, 1:h + 1, 1:w + 1, :]
    return jnp.transpose(o, (0, 3, 1, 2))


# --------------------------------------------------------------------------
# Pure-JAX reference (NCHW, training-mode BN) for validation
# --------------------------------------------------------------------------
def _reference_residual_block(x, params):
    w1, b1, g1, be1, w2, b2, g2, be2 = params

    def conv(x, w, b):
        y = lax.conv_general_dilated(
            x, w, (1, 1), "SAME",
            dimension_numbers=("NCHW", "OIHW", "NCHW"),
            precision=lax.Precision.HIGHEST)
        return y + b[None, :, None, None]

    def bn(x, g, beta):
        mean = jnp.mean(x, axis=(0, 2, 3), keepdims=True)
        var = jnp.mean(jnp.square(x - mean), axis=(0, 2, 3), keepdims=True)
        return ((x - mean) * lax.rsqrt(var + _EPS)
                * g[None, :, None, None] + beta[None, :, None, None])

    h = jax.nn.relu(bn(conv(x, w1, b1), g1, be1))
    return jax.nn.relu(bn(conv(h, w2, b2), g2, be2) + x)


def _init_params(key, num_channels):
    ks = jax.random.split(key, 8)
    C = num_channels
    w1 = 0.1 * jax.random.normal(ks[0], (C, C, 3, 3), jnp.float32)
    b1 = 0.1 * jax.random.normal(ks[1], (C,), jnp.float32)
    g1 = 1.0 + 0.1 * jax.random.normal(ks[2], (C,), jnp.float32)
    be1 = 0.1 * jax.random.normal(ks[3], (C,), jnp.float32)
    w2 = 0.1 * jax.random.normal(ks[4], (C, C, 3, 3), jnp.float32)
    b2 = 0.1 * jax.random.normal(ks[5], (C,), jnp.float32)
    g2 = 1.0 + 0.1 * jax.random.normal(ks[6], (C,), jnp.float32)
    be2 = 0.1 * jax.random.normal(ks[7], (C,), jnp.float32)
    return (w1, b1, g1, be1, w2, b2, g2, be2)


if __name__ == "__main__":
    key = jax.random.PRNGKey(0)
    k_x, k_p = jax.random.split(key)

    B, C, H, W = 2, 4, 16, 16
    x = jax.random.normal(k_x, (B, C, H, W), jnp.float32)
    params = _init_params(k_p, C)

    ref = _reference_residual_block(x, params)

    # f32 matmul path: must match the framework reference tightly.
    out_f32 = jax.block_until_ready(
        residual_block(x, params, compute_dtype=jnp.float32))
    assert out_f32.shape == (B, C, H, W)
    max_err = float(jnp.max(jnp.abs(out_f32 - ref)))
    assert jnp.allclose(out_f32, ref, rtol=1e-4, atol=1e-4), max_err

    # bf16 matmul / intermediates (the performance default): loose tolerance.
    out_bf16 = jax.block_until_ready(
        residual_block(x, params, compute_dtype=jnp.bfloat16))
    rel = float(jnp.linalg.norm(out_bf16 - ref) /
                (jnp.linalg.norm(ref) + 1e-12))
    assert rel < 0.05, rel

    print("KERNEL_OK")
</pallas_src>

<mosaic_0001>
module attributes {stable_mosaic.version = 11 : i64} {
  func.func @_conv_stats_kernel(%arg0: i32, %arg1: memref<344x4xf32, #tpu.memory_space<vmem>>, %arg2: memref<9x4x4xf32, #tpu.memory_space<vmem>>, %arg3: memref<304x1xf32, #tpu.memory_space<vmem>>, %arg4: memref<344x4xf32, #tpu.memory_space<vmem>>, %arg5: memref<1x1x4xf32, #tpu.memory_space<vmem>>, %arg6: memref<1x1x4xf32, #tpu.memory_space<vmem>>, %arg7: memref<344x4xf32, #tpu.memory_space<vmem>>) attributes {dimension_semantics = [#tpu.dimension_semantics<parallel>], iteration_bounds = array<i64: 2>, scalar_prefetch = 0 : i64, scratch_operands = 1 : i64, tpu.core_type = #tpu.core_type<tc>, window_params = [{transform_indices = @transform_0, window_bounds = array<i64: 344, 4>}, {pipeline_mode = #tpu.pipeline_mode<synchronous>, transform_indices = @transform_1, window_bounds = array<i64: 9, 4, 4>}, {pipeline_mode = #tpu.pipeline_mode<synchronous>, transform_indices = @transform_2, window_bounds = array<i64: 304, 1>}, {transform_indices = @transform_3, window_bounds = array<i64: 344, 4>}, {transform_indices = @transform_4, window_bounds = array<i64: 1, 1, 4>}, {transform_indices = @transform_5, window_bounds = array<i64: 1, 1, 4>}]} {
    %c0 = arith.constant 0 : index
    %c0_0 = arith.constant 0 : index
    %0 = vector.load %arg1[%c0, %c0_0] : memref<344x4xf32, #tpu.memory_space<vmem>>, vector<344x4xf32>
    %c0_1 = arith.constant 0 : index
    %c0_2 = arith.constant 0 : index
    %1 = vector.load %arg7[%c0_1, %c0_2] : memref<344x4xf32, #tpu.memory_space<vmem>>, vector<344x4xf32>
    tpu.vector_store %arg7[%c0_1, %c0_2], %0 {strides = array<i32>} : memref<344x4xf32, #tpu.memory_space<vmem>>, vector<344x4xf32>,
    %cst = arith.constant 0.000000e+00 : f32
    %2 = vector.broadcast %cst : f32 to vector<304x4xf32>
    %c0_3 = arith.constant 0 : index
    %c0_4 = arith.constant 0 : index
    %3 = vector.load %arg7[%c0_3, %c0_4] : memref<344x4xf32, #tpu.memory_space<vmem>>, vector<304x4xf32>
    %c0_5 = arith.constant 0 : index
    %c0_6 = arith.constant 0 : index
    %c0_7 = arith.constant 0 : index
    %4 = vector.load %arg2[%c0_5, %c0_6, %c0_7] : memref<9x4x4xf32, #tpu.memory_space<vmem>>, vector<1x4x4xf32>
    %5 = vector.shape_cast %4 : vector<1x4x4xf32> to vector<4x4xf32>
    %cst_8 = arith.constant dense<0.000000e+00> : vector<304x4xf32>
    %6 = tpu.matmul %3, %5, %cst_8 {dimension_numbers = #tpu.dot_dimension_numbers<[1], [0], [0], [1], [0, 0, 1, 1], [], []>} : vector<304x4xf32>, vector<4x4xf32>, vector<304x4xf32> -> vector<304x4xf32>
    %7 = arith.addf %2, %6 : vector<304x4xf32>
    %c1 = arith.constant 1 : index
    %c0_9 = arith.constant 0 : index
    %8 = vector.load %arg7[%c1, %c0_9] : memref<344x4xf32, #tpu.memory_space<vmem>>, vector<304x4xf32>
    %c1_10 = arith.constant 1 : index
    %c0_11 = arith.constant 0 : index
    %c0_12 = arith.constant 0 : index
    %9 = vector.load %arg2[%c1_10, %c0_11, %c0_12] : memref<9x4x4xf32, #tpu.memory_space<vmem>>, vector<1x4x4xf32>
    %10 = vector.shape_cast %9 : vector<1x4x4xf32> to vector<4x4xf32>
    %cst_13 = arith.constant dense<0.000000e+00> : vector<304x4xf32>
    %11 = tpu.matmul %8, %10, %cst_13 {dimension_numbers = #tpu.dot_dimension_numbers<[1], [0], [0], [1], [0, 0, 1, 1], [], []>} : vector<304x4xf32>, vector<4x4xf32>, vector<304x4xf32> -> vector<304x4xf32>
    %12 = arith.addf %7, %11 : vector<304x4xf32>
    %c2 = arith.constant 2 : index
    %c0_14 = arith.constant 0 : index
    %13 = vector.load %arg7[%c2, %c0_14] : memref<344x4xf32, #tpu.memory_space<vmem>>, vector<304x4xf32>
    %c2_15 = arith.constant 2 : index
    %c0_16 = arith.constant 0 : index
    %c0_17 = arith.constant 0 : index
    %14 = vector.load %arg2[%c2_15, %c0_16, %c0_17] : memref<9x4x4xf32, #tpu.memory_space<vmem>>, vector<1x4x4xf32>
    %15 = vector.shape_cast %14 : vector<1x4x4xf32> to vector<4x4xf32>
    %cst_18 = arith.constant dense<0.000000e+00> : vector<304x4xf32>
    %16 = tpu.matmul %13, %15, %cst_18 {dimension_numbers = #tpu.dot_dimension_numbers<[1], [0], [0], [1], [0, 0, 1, 1], [], []>} : vector<304x4xf32>, vector<4x4xf32>, vector<304x4xf32> -> vector<304x4xf32>
    %17 = arith.addf %12, %16 : vector<304x4xf32>
    %c19 = arith.constant 19 : index
    %c0_19 = arith.constant 0 : index
    %18 = vector.load %arg7[%c19, %c0_19] : memref<344x4xf32, #tpu.memory_space<vmem>>, vector<304x4xf32>
    %c3 = arith.constant 3 : index
    %c0_20 = arith.constant 0 : index
    %c0_21 = arith.constant 0 : index
    %19 = vector.load %arg2[%c3, %c0_20, %c0_21] : memref<9x4x4xf32, #tpu.memory_space<vmem>>, vector<1x4x4xf32>
    %20 = vector.shape_cast %19 : vector<1x4x4xf32> to vector<4x4xf32>
    %cst_22 = arith.constant dense<0.000000e+00> : vector<304x4xf32>
    %21 = tpu.matmul %18, %20, %cst_22 {dimension_numbers = #tpu.dot_dimension_numbers<[1], [0], [0], [1], [0, 0, 1, 1], [], []>} : vector<304x4xf32>, vector<4x4xf32>, vector<304x4xf32> -> vector<304x4xf32>
    %22 = arith.addf %17, %21 : vector<304x4xf32>
    %c20 = arith.constant 20 : index
    %c0_23 = arith.constant 0 : index
    %23 = vector.load %arg7[%c20, %c0_23] : memref<344x4xf32, #tpu.memory_space<vmem>>, vector<304x4xf32>
    %c4 = arith.constant 4 : index
    %c0_24 = arith.constant 0 : index
    %c0_25 = arith.constant 0 : index
    %24 = vector.load %arg2[%c4, %c0_24, %c0_25] : memref<9x4x4xf32, #tpu.memory_space<vmem>>, vector<1x4x4xf32>
    %25 = vector.shape_cast %24 : vector<1x4x4xf32> to vector<4x4xf32>
    %cst_26 = arith.constant dense<0.000000e+00> : vector<304x4xf32>
    %26 = tpu.matmul %23, %25, %cst_26 {dimension_numbers = #tpu.dot_dimension_numbers<[1], [0], [0], [1], [0, 0, 1, 1], [], []>} : vector<304x4xf32>, vector<4x4xf32>, vector<304x4xf32> -> vector<304x4xf32>
    %27 = arith.addf %22, %26 : vector<304x4xf32>
    %c21 = arith.constant 21 : index
    %c0_27 = arith.constant 0 : index
    %28 = vector.load %arg7[%c21, %c0_27] : memref<344x4xf32, #tpu.memory_space<vmem>>, vector<304x4xf32>
    %c5 = arith.constant 5 : index
    %c0_28 = arith.constant 0 : index
    %c0_29 = arith.constant 0 : index
    %29 = vector.load %arg2[%c5, %c0_28, %c0_29] : memref<9x4x4xf32, #tpu.memory_space<vmem>>, vector<1x4x4xf32>
    %30 = vector.shape_cast %29 : vector<1x4x4xf32> to vector<4x4xf32>
    %cst_30 = arith.constant dense<0.000000e+00> : vector<304x4xf32>
    %31 = tpu.matmul %28, %30, %cst_30 {dimension_numbers = #tpu.dot_dimension_numbers<[1], [0], [0], [1], [0, 0, 1, 1], [], []>} : vector<304x4xf32>, vector<4x4xf32>, vector<304x4xf32> -> vector<304x4xf32>
    %32 = arith.addf %27, %31 : vector<304x4xf32>
    %c38 = arith.constant 38 : index
    %c0_31 = arith.constant 0 : index
    %33 = vector.load %arg7[%c38, %c0_31] : memref<344x4xf32, #tpu.memory_space<vmem>>, vector<304x4xf32>
    %c6 = arith.constant 6 : index
    %c0_32 = arith.constant 0 : index
    %c0_33 = arith.constant 0 : index
    %34 = vector.load %arg2[%c6, %c0_32, %c0_33] : memref<9x4x4xf32, #tpu.memory_space<vmem>>, vector<1x4x4xf32>
    %35 = vector.shape_cast %34 : vector<1x4x4xf32> to vector<4x4xf32>
    %cst_34 = arith.constant dense<0.000000e+00> : vector<304x4xf32>
    %36 = tpu.matmul %33, %35, %cst_34 {dimension_numbers = #tpu.dot_dimension_numbers<[1], [0], [0], [1], [0, 0, 1, 1], [], []>} : vector<304x4xf32>, vector<4x4xf32>, vector<304x4xf32> -> vector<304x4xf32>
    %37 = arith.addf %32, %36 : vector<304x4xf32>
    %c39 = arith.constant 39 : index
    %c0_35 = arith.constant 0 : index
    %38 = vector.load %arg7[%c39, %c0_35] : memref<344x4xf32, #tpu.memory_space<vmem>>, vector<304x4xf32>
    %c7 = arith.constant 7 : index
    %c0_36 = arith.constant 0 : index
    %c0_37 = arith.constant 0 : index
    %39 = vector.load %arg2[%c7, %c0_36, %c0_37] : memref<9x4x4xf32, #tpu.memory_space<vmem>>, vector<1x4x4xf32>
    %40 = vector.shape_cast %39 : vector<1x4x4xf32> to vector<4x4xf32>
    %cst_38 = arith.constant dense<0.000000e+00> : vector<304x4xf32>
    %41 = tpu.matmul %38, %40, %cst_38 {dimension_numbers = #tpu.dot_dimension_numbers<[1], [0], [0], [1], [0, 0, 1, 1], [], []>} : vector<304x4xf32>, vector<4x4xf32>, vector<304x4xf32> -> vector<304x4xf32>
    %42 = arith.addf %37, %41 : vector<304x4xf32>
    %c40 = arith.constant 40 : index
    %c0_39 = arith.constant 0 : index
    %43 = vector.load %arg7[%c40, %c0_39] : memref<344x4xf32, #tpu.memory_space<vmem>>, vector<304x4xf32>
    %c8 = arith.constant 8 : index
    %c0_40 = arith.constant 0 : index
    %c0_41 = arith.constant 0 : index
    %44 = vector.load %arg2[%c8, %c0_40, %c0_41] : memref<9x4x4xf32, #tpu.memory_space<vmem>>, vector<1x4x4xf32>
    %45 = vector.shape_cast %44 : vector<1x4x4xf32> to vector<4x4xf32>
    %cst_42 = arith.constant dense<0.000000e+00> : vector<304x4xf32>
    %46 = tpu.matmul %43, %45, %cst_42 {dimension_numbers = #tpu.dot_dimension_numbers<[1], [0], [0], [1], [0, 0, 1, 1], [], []>} : vector<304x4xf32>, vector<4x4xf32>, vector<304x4xf32> -> vector<304x4xf32>
    %47 = arith.addf %42, %46 : vector<304x4xf32>
    %c0_43 = arith.constant 0 : index
    %c0_44 = arith.constant 0 : index
    %48 = vector.load %arg3[%c0_43, %c0_44] : memref<304x1xf32, #tpu.memory_space<vmem>>, vector<304x1xf32>
    %49 = vector.broadcast %48 : vector<304x1xf32> to vector<304x4xf32>
    %50 = arith.mulf %47, %49 : vector<304x4xf32>
    %cst_45 = arith.constant dense<0.000000e+00> : vector<4xf32>
    %51 = vector.multi_reduction <add>, %50, %cst_45 [0] : vector<304x4xf32> to vector<4xf32>
    %52 = vector.shape_cast %51 : vector<4xf32> to vector<1x4xf32>
    %c0_46 = arith.constant 0 : index
    %c0_47 = arith.constant 0 : index
    %c0_48 = arith.constant 0 : index
    %53 = vector.load %arg5[%c0_46, %c0_47, %c0_48] : memref<1x1x4xf32, #tpu.memory_space<vmem>>, vector<1x1x4xf32>
    %54 = vector.shape_cast %53 : vector<1x1x4xf32> to vector<1x4xf32>
    %55 = vector.shape_cast %52 : vector<1x4xf32> to vector<1x1x4xf32>
    tpu.vector_store %arg5[%c0_46, %c0_47, %c0_48], %55 {strides = array<i32>} : memref<1x1x4xf32, #tpu.memory_space<vmem>>, vector<1x1x4xf32>,
    %56 = arith.mulf %50, %50 : vector<304x4xf32>
    %cst_49 = arith.constant dense<0.000000e+00> : vector<4xf32>
    %57 = vector.multi_reduction <add>, %56, %cst_49 [0] : vector<304x4xf32> to vector<4xf32>
    %58 = vector.shape_cast %57 : vector<4xf32> to vector<1x4xf32>
    %c0_50 = arith.constant 0 : index
    %c0_51 = arith.constant 0 : index
    %c0_52 = arith.constant 0 : index
    %59 = vector.load %arg6[%c0_50, %c0_51, %c0_52] : memref<1x1x4xf32, #tpu.memory_space<vmem>>, vector<1x1x4xf32>
    %60 = vector.shape_cast %59 : vector<1x1x4xf32> to vector<1x4xf32>
    %61 = vector.shape_cast %58 : vector<1x4xf32> to vector<1x1x4xf32>
    tpu.vector_store %arg6[%c0_50, %c0_51, %c0_52], %61 {strides = array<i32>} : memref<1x1x4xf32, #tpu.memory_space<vmem>>, vector<1x1x4xf32>,
    %cst_53 = arith.constant 0.000000e+00 : f32
    %62 = vector.broadcast %cst_53 : f32 to vector<20x4xf32>
    %c0_54 = arith.constant 0 : index
    %c0_55 = arith.constant 0 : index
    %63 = vector.load %arg4[%c0_54, %c0_55] : memref<344x4xf32, #tpu.memory_space<vmem>>, vector<20x4xf32>
    tpu.vector_store %arg4[%c0_54, %c0_55], %62 {strides = array<i32>} : memref<344x4xf32, #tpu.memory_space<vmem>>, vector<20x4xf32>,
    %c20_56 = arith.constant 20 : index
    %c0_57 = arith.constant 0 : index
    %64 = vector.load %arg4[%c20_56, %c0_57] : memref<344x4xf32, #tpu.memory_space<vmem>>, vector<304x4xf32>
    tpu.vector_store %arg4[%c20_56, %c0_57], %50 {strides = array<i32>} : memref<344x4xf32, #tpu.memory_space<vmem>>, vector<304x4xf32>,
    %c324 = arith.constant 324 : index
    %c0_58 = arith.constant 0 : index
    %65 = vector.load %arg4[%c324, %c0_58] : memref<344x4xf32, #tpu.memory_space<vmem>>, vector<20x4xf32>
    tpu.vector_store %arg4[%c324, %c0_58], %62 {strides = array<i32>} : memref<344x4xf32, #tpu.memory_space<vmem>>, vector<20x4xf32>,
    return
  }
  func.func @transform_0(%arg0: i32) -> (i32, i32) {
    %c0_i32 = arith.constant 0 : i32
    %c0_i32_0 = arith.constant 0 : i32
    return %arg0, %c0_i32 : i32, i32
  }
  func.func @transform_1(%arg0: i32) -> (i32, i32, i32) {
    %c0_i32 = arith.constant 0 : i32
    %c0_i32_0 = arith.constant 0 : i32
    %c0_i32_1 = arith.constant 0 : i32
    %c0_i32_2 = arith.constant 0 : i32
    return %c0_i32, %c0_i32_0, %c0_i32_1 : i32, i32, i32
  }
  func.func @transform_2(%arg0: i32) -> (i32, i32) {
    %c0_i32 = arith.constant 0 : i32
    %c0_i32_0 = arith.constant 0 : i32
    %c0_i32_1 = arith.constant 0 : i32
    return %c0_i32, %c0_i32_0 : i32, i32
  }
  func.func @transform_3(%arg0: i32) -> (i32, i32) {
    %c0_i32 = arith.constant 0 : i32
    %c0_i32_0 = arith.constant 0 : i32
    return %arg0, %c0_i32 : i32, i32
  }
  func.func @transform_4(%arg0: i32) -> (i32, i32, i32) {
    %c0_i32 = arith.constant 0 : i32
    %c0_i32_0 = arith.constant 0 : i32
    %c0_i32_1 = arith.constant 0 : i32
    return %arg0, %c0_i32, %c0_i32_0 : i32, i32, i32
  }
  func.func @transform_5(%arg0: i32) -> (i32, i32, i32) {
    %c0_i32 = arith.constant 0 : i32
    %c0_i32_0 = arith.constant 0 : i32
    %c0_i32_1 = arith.constant 0 : i32
    return %arg0, %c0_i32, %c0_i32_0 : i32, i32, i32
  }
}

module attributes {stable_mosaic.version = 11 : i64} {
  func.func @_bn_add_relu_kernel(%arg0: i32, %arg1: memref<344x4xf32, #tpu.memory_space<vmem>>, %arg2: memref<344x4xf32, #tpu.memory_space<vmem>>, %arg3: memref<1x4xf32, #tpu.memory_space<vmem>>, %arg4: memref<1x4xf32, #tpu.memory_space<vmem>>, %arg5: memref<344x4xf32, #tpu.memory_space<vmem>>) attributes {dimension_semantics = [#tpu.dimension_semantics<parallel>], iteration_bounds = array<i64: 2>, scalar_prefetch = 0 : i64, scratch_operands = 0 : i64, tpu.core_type = #tpu.core_type<tc>, window_params = [{transform_indices = @transform_0, window_bounds = array<i64: 344, 4>}, {transform_indices = @transform_1, window_bounds = array<i64: 344, 4>}, {pipeline_mode = #tpu.pipeline_mode<synchronous>, transform_indices = @transform_2, window_bounds = array<i64: 1, 4>}, {pipeline_mode = #tpu.pipeline_mode<synchronous>, transform_indices = @transform_3, window_bounds = array<i64: 1, 4>}, {transform_indices = @transform_4, window_bounds = array<i64: 344, 4>}]} {
    %c0 = arith.constant 0 : index
    %c0_0 = arith.constant 0 : index
    %0 = vector.load %arg1[%c0, %c0_0] : memref<344x4xf32, #tpu.memory_space<vmem>>, vector<344x4xf32>
    %c0_1 = arith.constant 0 : index
    %c0_2 = arith.constant 0 : index
    %1 = vector.load %arg2[%c0_1, %c0_2] : memref<344x4xf32, #tpu.memory_space<vmem>>, vector<344x4xf32>
    %c0_3 = arith.constant 0 : index
    %c0_4 = arith.constant 0 : index
    %2 = vector.load %arg3[%c0_3, %c0_4] : memref<1x4xf32, #tpu.memory_space<vmem>>, vector<1x4xf32>
    %3 = vector.broadcast %2 : vector<1x4xf32> to vector<344x4xf32>
    %4 = arith.mulf %0, %3 : vector<344x4xf32>
    %c0_5 = arith.constant 0 : index
    %c0_6 = arith.constant 0 : index
    %5 = vector.load %arg4[%c0_5, %c0_6] : memref<1x4xf32, #tpu.memory_space<vmem>>, vector<1x4xf32>
    %6 = vector.broadcast %5 : vector<1x4xf32> to vector<344x4xf32>
    %7 = arith.addf %4, %6 : vector<344x4xf32>
    %8 = arith.addf %7, %1 : vector<344x4xf32>
    %cst = arith.constant 0.000000e+00 : f32
    %9 = vector.broadcast %cst : f32 to vector<344x4xf32>
    %10 = arith.maximumf %8, %9 : vector<344x4xf32>
    %c0_7 = arith.constant 0 : index
    %c0_8 = arith.constant 0 : index
    %11 = vector.load %arg5[%c0_7, %c0_8] : memref<344x4xf32, #tpu.memory_space<vmem>>, vector<344x4xf32>
    tpu.vector_store %arg5[%c0_7, %c0_8], %10 {strides = array<i32>} : memref<344x4xf32, #tpu.memory_space<vmem>>, vector<344x4xf32>,
    return
  }
  func.func @transform_0(%arg0: i32) -> (i32, i32) {
    %c0_i32 = arith.constant 0 : i32
    %c0_i32_0 = arith.constant 0 : i32
    return %arg0, %c0_i32 : i32, i32
  }
  func.func @transform_1(%arg0: i32) -> (i32, i32) {
    %c0_i32 = arith.constant 0 : i32
    %c0_i32_0 = arith.constant 0 : i32
    return %arg0, %c0_i32 : i32, i32
  }
  func.func @transform_2(%arg0: i32) -> (i32, i32) {
    %c0_i32 = arith.constant 0 : i32
    %c0_i32_0 = arith.constant 0 : i32
    %c0_i32_1 = arith.constant 0 : i32
    return %c0_i32, %c0_i32_0 : i32, i32
  }
  func.func @transform_3(%arg0: i32) -> (i32, i32) {
    %c0_i32 = arith.constant 0 : i32
    %c0_i32_0 = arith.constant 0 : i32
    %c0_i32_1 = arith.constant 0 : i32
    return %c0_i32, %c0_i32_0 : i32, i32
  }
  func.func @transform_4(%arg0: i32) -> (i32, i32) {
    %c0_i32 = arith.constant 0 : i32
    %c0_i32_0 = arith.constant 0 : i32
    return %arg0, %c0_i32 : i32, i32
  }
}

module attributes {stable_mosaic.version = 11 : i64} {
  func.func @_bn_relu_conv_stats_kernel(%arg0: i32, %arg1: memref<344x4xf32, #tpu.memory_space<vmem>>, %arg2: memref<1x4xf32, #tpu.memory_space<vmem>>, %arg3: memref<1x4xf32, #tpu.memory_space<vmem>>, %arg4: memref<9x4x4xf32, #tpu.memory_space<vmem>>, %arg5: memref<344x1xf32, #tpu.memory_space<vmem>>, %arg6: memref<304x1xf32, #tpu.memory_space<vmem>>, %arg7: memref<344x4xf32, #tpu.memory_space<vmem>>, %arg8: memref<1x1x4xf32, #tpu.memory_space<vmem>>, %arg9: memref<1x1x4xf32, #tpu.memory_space<vmem>>, %arg10: memref<344x4xf32, #tpu.memory_space<vmem>>) attributes {dimension_semantics = [#tpu.dimension_semantics<parallel>], iteration_bounds = array<i64: 2>, scalar_prefetch = 0 : i64, scratch_operands = 1 : i64, tpu.core_type = #tpu.core_type<tc>, window_params = [{transform_indices = @transform_0, window_bounds = array<i64: 344, 4>}, {pipeline_mode = #tpu.pipeline_mode<synchronous>, transform_indices = @transform_1, window_bounds = array<i64: 1, 4>}, {pipeline_mode = #tpu.pipeline_mode<synchronous>, transform_indices = @transform_2, window_bounds = array<i64: 1, 4>}, {pipeline_mode = #tpu.pipeline_mode<synchronous>, transform_indices = @transform_3, window_bounds = array<i64: 9, 4, 4>}, {pipeline_mode = #tpu.pipeline_mode<synchronous>, transform_indices = @transform_4, window_bounds = array<i64: 344, 1>}, {pipeline_mode = #tpu.pipeline_mode<synchronous>, transform_indices = @transform_5, window_bounds = array<i64: 304, 1>}, {transform_indices = @transform_6, window_bounds = array<i64: 344, 4>}, {transform_indices = @transform_7, window_bounds = array<i64: 1, 1, 4>}, {transform_indices = @transform_8, window_bounds = array<i64: 1, 1, 4>}]} {
    %c0 = arith.constant 0 : index
    %c0_0 = arith.constant 0 : index
    %0 = vector.load %arg1[%c0, %c0_0] : memref<344x4xf32, #tpu.memory_space<vmem>>, vector<344x4xf32>
    %c0_1 = arith.constant 0 : index
    %c0_2 = arith.constant 0 : index
    %1 = vector.load %arg2[%c0_1, %c0_2] : memref<1x4xf32, #tpu.memory_space<vmem>>, vector<1x4xf32>
    %2 = vector.broadcast %1 : vector<1x4xf32> to vector<344x4xf32>
    %3 = arith.mulf %0, %2 : vector<344x4xf32>
    %c0_3 = arith.constant 0 : index
    %c0_4 = arith.constant 0 : index
    %4 = vector.load %arg3[%c0_3, %c0_4] : memref<1x4xf32, #tpu.memory_space<vmem>>, vector<1x4xf32>
    %5 = vector.broadcast %4 : vector<1x4xf32> to vector<344x4xf32>
    %6 = arith.addf %3, %5 : vector<344x4xf32>
    %cst = arith.constant 0.000000e+00 : f32
    %7 = vector.broadcast %cst : f32 to vector<344x4xf32>
    %8 = arith.maximumf %6, %7 : vector<344x4xf32>
    %c0_5 = arith.constant 0 : index
    %c0_6 = arith.constant 0 : index
    %9 = vector.load %arg5[%c0_5, %c0_6] : memref<344x1xf32, #tpu.memory_space<vmem>>, vector<344x1xf32>
    %10 = vector.broadcast %9 : vector<344x1xf32> to vector<344x4xf32>
    %11 = arith.mulf %8, %10 : vector<344x4xf32>
    %c0_7 = arith.constant 0 : index
    %c0_8 = arith.constant 0 : index
    %12 = vector.load %arg10[%c0_7, %c0_8] : memref<344x4xf32, #tpu.memory_space<vmem>>, vector<344x4xf32>
    tpu.vector_store %arg10[%c0_7, %c0_8], %11 {strides = array<i32>} : memref<344x4xf32, #tpu.memory_space<vmem>>, vector<344x4xf32>,
    %cst_9 = arith.constant 0.000000e+00 : f32
    %13 = vector.broadcast %cst_9 : f32 to vector<304x4xf32>
    %c0_10 = arith.constant 0 : index
    %c0_11 = arith.constant 0 : index
    %14 = vector.load %arg10[%c0_10, %c0_11] : memref<344x4xf32, #tpu.memory_space<vmem>>, vector<304x4xf32>
    %c0_12 = arith.constant 0 : index
    %c0_13 = arith.constant 0 : index
    %c0_14 = arith.constant 0 : index
    %15 = vector.load %arg4[%c0_12, %c0_13, %c0_14] : memref<9x4x4xf32, #tpu.memory_space<vmem>>, vector<1x4x4xf32>
    %16 = vector.shape_cast %15 : vector<1x4x4xf32> to vector<4x4xf32>
    %cst_15 = arith.constant dense<0.000000e+00> : vector<304x4xf32>
    %17 = tpu.matmul %14, %16, %cst_15 {dimension_numbers = #tpu.dot_dimension_numbers<[1], [0], [0], [1], [0, 0, 1, 1], [], []>} : vector<304x4xf32>, vector<4x4xf32>, vector<304x4xf32> -> vector<304x4xf32>
    %18 = arith.addf %13, %17 : vector<304x4xf32>
    %c1 = arith.constant 1 : index
    %c0_16 = arith.constant 0 : index
    %19 = vector.load %arg10[%c1, %c0_16] : memref<344x4xf32, #tpu.memory_space<vmem>>, vector<304x4xf32>
    %c1_17 = arith.constant 1 : index
    %c0_18 = arith.constant 0 : index
    %c0_19 = arith.constant 0 : index
    %20 = vector.load %arg4[%c1_17, %c0_18, %c0_19] : memref<9x4x4xf32, #tpu.memory_space<vmem>>, vector<1x4x4xf32>
    %21 = vector.shape_cast %20 : vector<1x4x4xf32> to vector<4x4xf32>
    %cst_20 = arith.constant dense<0.000000e+00> : vector<304x4xf32>
    %22 = tpu.matmul %19, %21, %cst_20 {dimension_numbers = #tpu.dot_dimension_numbers<[1], [0], [0], [1], [0, 0, 1, 1], [], []>} : vector<304x4xf32>, vector<4x4xf32>, vector<304x4xf32> -> vector<304x4xf32>
    %23 = arith.addf %18, %22 : vector<304x4xf32>
    %c2 = arith.constant 2 : index
    %c0_21 = arith.constant 0 : index
    %24 = vector.load %arg10[%c2, %c0_21] : memref<344x4xf32, #tpu.memory_space<vmem>>, vector<304x4xf32>
    %c2_22 = arith.constant 2 : index
    %c0_23 = arith.constant 0 : index
    %c0_24 = arith.constant 0 : index
    %25 = vector.load %arg4[%c2_22, %c0_23, %c0_24] : memref<9x4x4xf32, #tpu.memory_space<vmem>>, vector<1x4x4xf32>
    %26 = vector.shape_cast %25 : vector<1x4x4xf32> to vector<4x4xf32>
    %cst_25 = arith.constant dense<0.000000e+00> : vector<304x4xf32>
    %27 = tpu.matmul %24, %26, %cst_25 {dimension_numbers = #tpu.dot_dimension_numbers<[1], [0], [0], [1], [0, 0, 1, 1], [], []>} : vector<304x4xf32>, vector<4x4xf32>, vector<304x4xf32> -> vector<304x4xf32>
    %28 = arith.addf %23, %27 : vector<304x4xf32>
    %c19 = arith.constant 19 : index
    %c0_26 = arith.constant 0 : index
    %29 = vector.load %arg10[%c19, %c0_26] : memref<344x4xf32, #tpu.memory_space<vmem>>, vector<304x4xf32>
    %c3 = arith.constant 3 : index
    %c0_27 = arith.constant 0 : index
    %c0_28 = arith.constant 0 : index
    %30 = vector.load %arg4[%c3, %c0_27, %c0_28] : memref<9x4x4xf32, #tpu.memory_space<vmem>>, vector<1x4x4xf32>
    %31 = vector.shape_cast %30 : vector<1x4x4xf32> to vector<4x4xf32>
    %cst_29 = arith.constant dense<0.000000e+00> : vector<304x4xf32>
    %32 = tpu.matmul %29, %31, %cst_29 {dimension_numbers = #tpu.dot_dimension_numbers<[1], [0], [0], [1], [0, 0, 1, 1], [], []>} : vector<304x4xf32>, vector<4x4xf32>, vector<304x4xf32> -> vector<304x4xf32>
    %33 = arith.addf %28, %32 : vector<304x4xf32>
    %c20 = arith.constant 20 : index
    %c0_30 = arith.constant 0 : index
    %34 = vector.load %arg10[%c20, %c0_30] : memref<344x4xf32, #tpu.memory_space<vmem>>, vector<304x4xf32>
    %c4 = arith.constant 4 : index
    %c0_31 = arith.constant 0 : index
    %c0_32 = arith.constant 0 : index
    %35 = vector.load %arg4[%c4, %c0_31, %c0_32] : memref<9x4x4xf32, #tpu.memory_space<vmem>>, vector<1x4x4xf32>
    %36 = vector.shape_cast %35 : vector<1x4x4xf32> to vector<4x4xf32>
    %cst_33 = arith.constant dense<0.000000e+00> : vector<304x4xf32>
    %37 = tpu.matmul %34, %36, %cst_33 {dimension_numbers = #tpu.dot_dimension_numbers<[1], [0], [0], [1], [0, 0, 1, 1], [], []>} : vector<304x4xf32>, vector<4x4xf32>, vector<304x4xf32> -> vector<304x4xf32>
    %38 = arith.addf %33, %37 : vector<304x4xf32>
    %c21 = arith.constant 21 : index
    %c0_34 = arith.constant 0 : index
    %39 = vector.load %arg10[%c21, %c0_34] : memref<344x4xf32, #tpu.memory_space<vmem>>, vector<304x4xf32>
    %c5 = arith.constant 5 : index
    %c0_35 = arith.constant 0 : index
    %c0_36 = arith.constant 0 : index
    %40 = vector.load %arg4[%c5, %c0_35, %c0_36] : memref<9x4x4xf32, #tpu.memory_space<vmem>>, vector<1x4x4xf32>
    %41 = vector.shape_cast %40 : vector<1x4x4xf32> to vector<4x4xf32>
    %cst_37 = arith.constant dense<0.000000e+00> : vector<304x4xf32>
    %42 = tpu.matmul %39, %41, %cst_37 {dimension_numbers = #tpu.dot_dimension_numbers<[1], [0], [0], [1], [0, 0, 1, 1], [], []>} : vector<304x4xf32>, vector<4x4xf32>, vector<304x4xf32> -> vector<304x4xf32>
    %43 = arith.addf %38, %42 : vector<304x4xf32>
    %c38 = arith.constant 38 : index
    %c0_38 = arith.constant 0 : index
    %44 = vector.load %arg10[%c38, %c0_38] : memref<344x4xf32, #tpu.memory_space<vmem>>, vector<304x4xf32>
    %c6 = arith.constant 6 : index
    %c0_39 = arith.constant 0 : index
    %c0_40 = arith.constant 0 : index
    %45 = vector.load %arg4[%c6, %c0_39, %c0_40] : memref<9x4x4xf32, #tpu.memory_space<vmem>>, vector<1x4x4xf32>
    %46 = vector.shape_cast %45 : vector<1x4x4xf32> to vector<4x4xf32>
    %cst_41 = arith.constant dense<0.000000e+00> : vector<304x4xf32>
    %47 = tpu.matmul %44, %46, %cst_41 {dimension_numbers = #tpu.dot_dimension_numbers<[1], [0], [0], [1], [0, 0, 1, 1], [], []>} : vector<304x4xf32>, vector<4x4xf32>, vector<304x4xf32> -> vector<304x4xf32>
    %48 = arith.addf %43, %47 : vector<304x4xf32>
    %c39 = arith.constant 39 : index
    %c0_42 = arith.constant 0 : index
    %49 = vector.load %arg10[%c39, %c0_42] : memref<344x4xf32, #tpu.memory_space<vmem>>, vector<304x4xf32>
    %c7 = arith.constant 7 : index
    %c0_43 = arith.constant 0 : index
    %c0_44 = arith.constant 0 : index
    %50 = vector.load %arg4[%c7, %c0_43, %c0_44] : memref<9x4x4xf32, #tpu.memory_space<vmem>>, vector<1x4x4xf32>
    %51 = vector.shape_cast %50 : vector<1x4x4xf32> to vector<4x4xf32>
    %cst_45 = arith.constant dense<0.000000e+00> : vector<304x4xf32>
    %52 = tpu.matmul %49, %51, %cst_45 {dimension_numbers = #tpu.dot_dimension_numbers<[1], [0], [0], [1], [0, 0, 1, 1], [], []>} : vector<304x4xf32>, vector<4x4xf32>, vector<304x4xf32> -> vector<304x4xf32>
    %53 = arith.addf %48, %52 : vector<304x4xf32>
    %c40 = arith.constant 40 : index
    %c0_46 = arith.constant 0 : index
    %54 = vector.load %arg10[%c40, %c0_46] : memref<344x4xf32, #tpu.memory_space<vmem>>, vector<304x4xf32>
    %c8 = arith.constant 8 : index
    %c0_47 = arith.constant 0 : index
    %c0_48 = arith.constant 0 : index
    %55 = vector.load %arg4[%c8, %c0_47, %c0_48] : memref<9x4x4xf32, #tpu.memory_space<vmem>>, vector<1x4x4xf32>
    %56 = vector.shape_cast %55 : vector<1x4x4xf32> to vector<4x4xf32>
    %cst_49 = arith.constant dense<0.000000e+00> : vector<304x4xf32>
    %57 = tpu.matmul %54, %56, %cst_49 {dimension_numbers = #tpu.dot_dimension_numbers<[1], [0], [0], [1], [0, 0, 1, 1], [], []>} : vector<304x4xf32>, vector<4x4xf32>, vector<304x4xf32> -> vector<304x4xf32>
    %58 = arith.addf %53, %57 : vector<304x4xf32>
    %c0_50 = arith.constant 0 : index
    %c0_51 = arith.constant 0 : index
    %59 = vector.load %arg6[%c0_50, %c0_51] : memref<304x1xf32, #tpu.memory_space<vmem>>, vector<304x1xf32>
    %60 = vector.broadcast %59 : vector<304x1xf32> to vector<304x4xf32>
    %61 = arith.mulf %58, %60 : vector<304x4xf32>
    %cst_52 = arith.constant dense<0.000000e+00> : vector<4xf32>
    %62 = vector.multi_reduction <add>, %61, %cst_52 [0] : vector<304x4xf32> to vector<4xf32>
    %63 = vector.shape_cast %62 : vector<4xf32> to vector<1x4xf32>
    %c0_53 = arith.constant 0 : index
    %c0_54 = arith.constant 0 : index
    %c0_55 = arith.constant 0 : index
    %64 = vector.load %arg8[%c0_53, %c0_54, %c0_55] : memref<1x1x4xf32, #tpu.memory_space<vmem>>, vector<1x1x4xf32>
    %65 = vector.shape_cast %64 : vector<1x1x4xf32> to vector<1x4xf32>
    %66 = vector.shape_cast %63 : vector<1x4xf32> to vector<1x1x4xf32>
    tpu.vector_store %arg8[%c0_53, %c0_54, %c0_55], %66 {strides = array<i32>} : memref<1x1x4xf32, #tpu.memory_space<vmem>>, vector<1x1x4xf32>,
    %67 = arith.mulf %61, %61 : vector<304x4xf32>
    %cst_56 = arith.constant dense<0.000000e+00> : vector<4xf32>
    %68 = vector.multi_reduction <add>, %67, %cst_56 [0] : vector<304x4xf32> to vector<4xf32>
    %69 = vector.shape_cast %68 : vector<4xf32> to vector<1x4xf32>
    %c0_57 = arith.constant 0 : index
    %c0_58 = arith.constant 0 : index
    %c0_59 = arith.constant 0 : index
    %70 = vector.load %arg9[%c0_57, %c0_58, %c0_59] : memref<1x1x4xf32, #tpu.memory_space<vmem>>, vector<1x1x4xf32>
    %71 = vector.shape_cast %70 : vector<1x1x4xf32> to vector<1x4xf32>
    %72 = vector.shape_cast %69 : vector<1x4xf32> to vector<1x1x4xf32>
    tpu.vector_store %arg9[%c0_57, %c0_58, %c0_59], %72 {strides = array<i32>} : memref<1x1x4xf32, #tpu.memory_space<vmem>>, vector<1x1x4xf32>,
    %cst_60 = arith.constant 0.000000e+00 : f32
    %73 = vector.broadcast %cst_60 : f32 to vector<20x4xf32>
    %c0_61 = arith.constant 0 : index
    %c0_62 = arith.constant 0 : index
    %74 = vector.load %arg7[%c0_61, %c0_62] : memref<344x4xf32, #tpu.memory_space<vmem>>, vector<20x4xf32>
    tpu.vector_store %arg7[%c0_61, %c0_62], %73 {strides = array<i32>} : memref<344x4xf32, #tpu.memory_space<vmem>>, vector<20x4xf32>,
    %c20_63 = arith.constant 20 : index
    %c0_64 = arith.constant 0 : index
    %75 = vector.load %arg7[%c20_63, %c0_64] : memref<344x4xf32, #tpu.memory_space<vmem>>, vector<304x4xf32>
    tpu.vector_store %arg7[%c20_63, %c0_64], %61 {strides = array<i32>} : memref<344x4xf32, #tpu.memory_space<vmem>>, vector<304x4xf32>,
    %c324 = arith.constant 324 : index
    %c0_65 = arith.constant 0 : index
    %76 = vector.load %arg7[%c324, %c0_65] : memref<344x4xf32, #tpu.memory_space<vmem>>, vector<20x4xf32>
    tpu.vector_store %arg7[%c324, %c0_65], %73 {strides = array<i32>} : memref<344x4xf32, #tpu.memory_space<vmem>>, vector<20x4xf32>,
    return
  }
  func.func @transform_0(%arg0: i32) -> (i32, i32) {
    %c0_i32 = arith.constant 0 : i32
    %c0_i32_0 = arith.constant 0 : i32
    return %arg0, %c0_i32 : i32, i32
  }
  func.func @transform_1(%arg0: i32) -> (i32, i32) {
    %c0_i32 = arith.constant 0 : i32
    %c0_i32_0 = arith.constant 0 : i32
    %c0_i32_1 = arith.constant 0 : i32
    return %c0_i32, %c0_i32_0 : i32, i32
  }
  func.func @transform_2(%arg0: i32) -> (i32, i32) {
    %c0_i32 = arith.constant 0 : i32
    %c0_i32_0 = arith.constant 0 : i32
    %c0_i32_1 = arith.constant 0 : i32
    return %c0_i32, %c0_i32_0 : i32, i32
  }
  func.func @transform_3(%arg0: i32) -> (i32, i32, i32) {
    %c0_i32 = arith.constant 0 : i32
    %c0_i32_0 = arith.constant 0 : i32
    %c0_i32_1 = arith.constant 0 : i32
    %c0_i32_2 = arith.constant 0 : i32
    return %c0_i32, %c0_i32_0, %c0_i32_1 : i32, i32, i32
  }
  func.func @transform_4(%arg0: i32) -> (i32, i32) {
    %c0_i32 = arith.constant 0 : i32
    %c0_i32_0 = arith.constant 0 : i32
    %c0_i32_1 = arith.constant 0 : i32
    return %c0_i32, %c0_i32_0 : i32, i32
  }
  func.func @transform_5(%arg0: i32) -> (i32, i32) {
    %c0_i32 = arith.constant 0 : i32
    %c0_i32_0 = arith.constant 0 : i32
    %c0_i32_1 = arith.constant 0 : i32
    return %c0_i32, %c0_i32_0 : i32, i32
  }
  func.func @transform_6(%arg0: i32) -> (i32, i32) {
    %c0_i32 = arith.constant 0 : i32
    %c0_i32_0 = arith.constant 0 : i32
    return %arg0, %c0_i32 : i32, i32
  }
  func.func @transform_7(%arg0: i32) -> (i32, i32, i32) {
    %c0_i32 = arith.constant 0 : i32
    %c0_i32_0 = arith.constant 0 : i32
    %c0_i32_1 = arith.constant 0 : i32
    return %arg0, %c0_i32, %c0_i32_0 : i32, i32, i32
  }
  func.func @transform_8(%arg0: i32) -> (i32, i32, i32) {
    %c0_i32 = arith.constant 0 : i32
    %c0_i32_0 = arith.constant 0 : i32
    %c0_i32_1 = arith.constant 0 : i32
    return %arg0, %c0_i32, %c0_i32_0 : i32, i32, i32
  }
}

</mosaic_0001>

<bundles_post_ra>
// kernel: residual_block.5
= control target key start
LH: loop header
LB: loop body
LE: loop exit
PB: predicated region body
PF: predicated region fallthrough
CT: control target
= control target key end

     0   :  { %s654_s15 = smov 0   ;;  %s953_s0 = inlined_call_operand.vmem [shape: f32[688,4], index: 0, kind: input, shape index: {}]   ;;  %s954_s1 = inlined_call_operand.vmem [shape: f32[688,4], index: 1, kind: input, shape index: {}]   ;;  %s955_s2 = inlined_call_operand.vmem [shape: f32[1,4], index: 2, kind: input, shape index: {}]   ;;  %s956_s3 = inlined_call_operand.vmem [shape: f32[1,4], index: 3, kind: input, shape index: {}]   ;;  %s957_s4 = inlined_call_operand.vmem [shape: f32[688,4], index: 4, kind: output, shape index: {}]  }
   0x1 LB: > { %s601_s16 = sadd.s32 4294967295, %s627_s15   ;;  %p605_p0 = scmp.ge.s32.totalorder %s627_s15, 1  ;;  %s627_s15 = sphi %s654_s15, %s14_s15  }
   0x2   : > { %p174_p1 = scmp.lt.s32.totalorder %s627_s15, 3 }
   0x4   : > { %p175_p2 = pnand %p605_p0, %p174_p1 }
   0x5   : > { %s205_s17 = smul.u32 (!%p175_p2), 43, %s601_s16 }
   0x6   : > { %178 = sbr.rel (%p175_p2) target bundleno = 66 (0x42), region = 36 }
   0x7   : > { %p206_p3 = scmp.lt.s32.totalorder (!%p175_p2), %s205_s17, 85 }
   0xb   : > { %s959_s17 = smov (!%p206_p3, %s205_s17), 85  ;;  %v665_v0 = vld [vmem:[%s955_s2] ss:$0 sm:$0xff]  ;;  %vm489_vm0 = vcmask 31744  }
   0xc   : > { %s667_s20 = sshll.u32 %s959_s17, 3  ;;  %v684_v1 = vld [vmem:[%s956_s3] ss:$0 sm:$0xff] }
   0xd   : > { %s673_s23 = scalar_lea.vmem %s953_s0, %s667_s20  ;;  %s679_s26 = scalar_lea.vmem %s954_s1, %s667_s20 }
   0xe   : > { %v223_v2 = vld [vmem:[%s673_s23] sm:$0xff]  ;;  %v224_v3 = vld [vmem:[%s673_s23 + $0x8] sm:$0xff]  ;;  %v225_v7 = vld [vmem:[%s673_s23 + $0x10] sm:$0xff]  ;;  %s715_s5 = scalar_lea.vmem %s957_s4, %s667_s20 }
   0xf   : > { %v266_v4 = vld [vmem:[%s679_s26] sm:$0xff]  ;;  %v313_v5 = vmul.f32 %v665_v0, %v223_v2  ;;  %v314_v6 = vmul.f32 %v665_v0, %v224_v3  ;;  %v267_v8 = vld [vmem:[%s679_s26 + $0x8] sm:$0xff]  ;;  %v315_v9 = vmul.f32 %v665_v0, %v225_v7  ;;  %v226_v10 = vld [vmem:[%s673_s23 + $0x18] sm:$0xff] }
  0x10   : > { %v227_v11 = vld [vmem:[%s673_s23 + $0x20] sm:$0xff]  ;;  %v268_v14 = vld [vmem:[%s679_s26 + $0x10] sm:$0xff]  ;;  %v269_v15 = vld [vmem:[%s679_s26 + $0x18] sm:$0xff]  ;;  %v316_v16 = vmul.f32 %v665_v0, %v226_v10 }
  0x11   : > { %v360_v12 = vadd.f32 %v684_v1, %v313_v5  ;;  %v361_v13 = vadd.f32 %v684_v1, %v314_v6  ;;  %v317_v17 = vmul.f32 %v665_v0, %v227_v11  ;;  %v228_v18 = vld [vmem:[%s673_s23 + $0x28] sm:$0xff]  ;;  %v362_v19 = vadd.f32 %v684_v1, %v315_v9  ;;  %v270_v20 = vld [vmem:[%s679_s26 + $0x20] sm:$0xff]  ;;  %v229_v22 = vld [vmem:[%s673_s23 + $0x30] sm:$0xff] }
  0x12   : > { %v318_v21 = vmul.f32 %v665_v0, %v228_v18  ;;  %v230_v23 = vld [vmem:[%s673_s23 + $0x38] sm:$0xff]  ;;  %v363_v26 = vadd.f32 %v684_v1, %v316_v16  ;;  %v271_v28 = vld [vmem:[%s679_s26 + $0x28] sm:$0xff]  ;;  %v319_v31 = vmul.f32 %v665_v0, %v229_v22  ;;  %v231_v33 = vld [vmem:[%s673_s23 + $0x40] sm:$0xff] }
  0x13   : > { %v403_v24 = vadd.f32 %v360_v12, %v266_v4  ;;  %v404_v25 = vadd.f32 %v361_v13, %v267_v8  ;;  %v364_v27 = vadd.f32 %v684_v1, %v317_v17  ;;  %v405_v29 = vadd.f32 %v362_v19, %v268_v14  ;;  %v232_v34 = vld [vmem:[%s673_s23 + $0x48] sm:$0xff]  ;;  %v272_v39 = vld [vmem:[%s679_s26 + $0x30] sm:$0xff]  ;;  %v273_v40 = vld [vmem:[%s679_s26 + $0x38] sm:$0xff] }
  0x14   : > { %v365_v30 = vadd.f32 %v684_v1, %v318_v21  ;;  %v320_v32 = vmul.f32 %v665_v0, %v230_v23  ;;  %v406_v37 = vadd.f32 %v363_v26, %v269_v15  ;;  %v233_v41 = vld [vmem:[%s673_s23 + $0x50] sm:$0xff]  ;;  %v366_v44 = vadd.f32 %v684_v1, %v319_v31  ;;  %v234_v46 = vld [vmem:[%s673_s23 + $0x58] sm:$0xff]  ;;  %v235_v47 = vld [vmem:[%s673_s23 + $0x60] sm:$0xff] }
  0x15   : > { %v446_v35 = vmax.f32 %v403_v24, 0.0  ;;  %v447_v36 = vmax.f32 %v404_v25, 0.0  ;;  %v407_v38 = vadd.f32 %v364_v27, %v270_v20  ;;  %v448_v42 = vmax.f32 %v405_v29, 0.0  ;;  %v236_v52 = vld [vmem:[%s673_s23 + $0x68] sm:$0xff]  ;;  %v274_v56 = vld [vmem:[%s679_s26 + $0x40] sm:$0xff]  ;;  %v276_v61 = vld [vmem:[%s679_s26 + $0x50] sm:$0xff] }
  0x16   : > { %v408_v43 = vadd.f32 %v365_v30, %v271_v28  ;;  %v367_v45 = vadd.f32 %v684_v1, %v320_v32  ;;  %v449_v48 = vmax.f32 %v406_v37, 0.0  ;;  %v321_v50 = vmul.f32 %v665_v0, %v231_v33  ;;  %v275_v57 = vld [vmem:[%s679_s26 + $0x48] sm:$0xff]  ;;  %v237_v2 = vld [vmem:[%s673_s23 + $0x70] sm:$0xff]  ;;  %v238_v3 = vld [vmem:[%s673_s23 + $0x78] sm:$0xff] }
  0x17   : > { %490 = vst.msk [vmem:[%s715_s5] sm:$0xff] %vm489_vm0, %v446_v35  ;;  %v450_v49 = vmax.f32 %v407_v38, 0.0  ;;  %v322_v51 = vmul.f32 %v665_v0, %v232_v34  ;;  %v409_v54 = vadd.f32 %v366_v44, %v272_v39  ;;  %v323_v58 = vmul.f32 %v665_v0, %v233_v41  ;;  %v277_v7 = vld [vmem:[%s679_s26 + $0x58] sm:$0xff]  ;;  %v278_v8 = vld [vmem:[%s679_s26 + $0x60] sm:$0xff]  ;;  %v279_v14 = vld [vmem:[%s679_s26 + $0x68] sm:$0xff] }
  0x18   : > { %491 = vst.msk [vmem:[%s715_s5 + $0x8] sm:$0xff] %vm489_vm0, %v447_v36  ;;  %v451_v53 = vmax.f32 %v408_v43, 0.0  ;;  %v410_v55 = vadd.f32 %v367_v45, %v273_v40  ;;  %v368_v59 = vadd.f32 %v684_v1, %v321_v50  ;;  %v324_v62 = vmul.f32 %v665_v0, %v234_v46  ;;  %v239_v19 = vld [vmem:[%s673_s23 + $0x80] sm:$0xff]  ;;  %v240_v20 = vld [vmem:[%s673_s23 + $0x88] sm:$0xff]  ;;  %v280_v25 = vld [vmem:[%s679_s26 + $0x70] sm:$0xff] }
  0x19   : > { %492 = vst.msk [vmem:[%s715_s5 + $0x10] sm:$0xff] %vm489_vm0, %v448_v42  ;;  %v369_v60 = vadd.f32 %v684_v1, %v322_v51  ;;  %v325_v63 = vmul.f32 %v665_v0, %v235_v47  ;;  %v452_v4 = vmax.f32 %v409_v54, 0.0  ;;  %v370_v6 = vadd.f32 %v684_v1, %v323_v58  ;;  %v281_v26 = vld [vmem:[%s679_s26 + $0x78] sm:$0xff]  ;;  %v241_v27 = vld [vmem:[%s673_s23 + $0x90] sm:$0xff]  ;;  %v243_v33 = vld [vmem:[%s673_s23 + $0xa0] sm:$0xff] }
  0x1a   : > { %493 = vst.msk [vmem:[%s715_s5 + $0x18] sm:$0xff] %vm489_vm0, %v449_v48  ;;  %v453_v5 = vmax.f32 %v410_v55, 0.0  ;;  %v326_v9 = vmul.f32 %v665_v0, %v236_v52  ;;  %v411_v10 = vadd.f32 %v368_v59, %v274_v56  ;;  %v371_v12 = vadd.f32 %v684_v1, %v324_v62  ;;  %v242_v32 = vld [vmem:[%s673_s23 + $0x98] sm:$0xff]  ;;  %v244_v38 = vld [vmem:[%s673_s23 + $0xa8] sm:$0xff]  ;;  %v282_v42 = vld [vmem:[%s679_s26 + $0x80] sm:$0xff] }
  0x1b   : > { %494 = vst.msk [vmem:[%s715_s5 + $0x20] sm:$0xff] %vm489_vm0, %v450_v49  ;;  %v412_v11 = vadd.f32 %v369_v60, %v275_v57  ;;  %v372_v13 = vadd.f32 %v684_v1, %v325_v63  ;;  %v413_v15 = vadd.f32 %v370_v6, %v276_v61  ;;  %v327_v17 = vmul.f32 %v665_v0, %v237_v2  ;;  %v283_v43 = vld [vmem:[%s679_s26 + $0x88] sm:$0xff]  ;;  %v284_v47 = vld [vmem:[%s679_s26 + $0x90] sm:$0xff]  ;;  %v246_v51 = vld [vmem:[%s673_s23 + $0xb8] sm:$0xff] }
  0x1c   : > { %495 = vst.msk [vmem:[%s715_s5 + $0x28] sm:$0xff] %vm489_vm0, %v451_v53  ;;  %v373_v16 = vadd.f32 %v684_v1, %v326_v9  ;;  %v328_v18 = vmul.f32 %v665_v0, %v238_v3  ;;  %v454_v21 = vmax.f32 %v411_v10, 0.0  ;;  %v414_v23 = vadd.f32 %v371_v12, %v277_v7  ;;  %v245_v50 = vld [vmem:[%s673_s23 + $0xb0] sm:$0xff]  ;;  %v285_v55 = vld [vmem:[%s679_s26 + $0x98] sm:$0xff]  ;;  %v286_v56 = vld [vmem:[%s679_s26 + $0xa0] sm:$0xff] }
  0x1d   : > { %496 = vst.msk [vmem:[%s715_s5 + $0x30] sm:$0xff] %vm489_vm0, %v452_v4  ;;  %v455_v22 = vmax.f32 %v412_v11, 0.0  ;;  %v415_v24 = vadd.f32 %v372_v13, %v278_v8  ;;  %v456_v28 = vmax.f32 %v413_v15, 0.0  ;;  %v374_v30 = vadd.f32 %v684_v1, %v327_v17  ;;  %v287_v62 = vld [vmem:[%s679_s26 + $0xa8] sm:$0xff]  ;;  %v288_v11 = vld [vmem:[%s679_s26 + $0xb0] sm:$0xff]  ;;  %v289_v12 = vld [vmem:[%s679_s26 + $0xb8] sm:$0xff] }
  0x1e   : > { %497 = vst.msk [vmem:[%s715_s5 + $0x38] sm:$0xff] %vm489_vm0, %v453_v5  ;;  %v416_v29 = vadd.f32 %v373_v16, %v279_v14  ;;  %v375_v31 = vadd.f32 %v684_v1, %v328_v18  ;;  %v457_v34 = vmax.f32 %v414_v23, 0.0  ;;  %v329_v36 = vmul.f32 %v665_v0, %v239_v19  ;;  %v247_v5 = vld [vmem:[%s673_s23 + $0xc0] sm:$0xff]  ;;  %v248_v6 = vld [vmem:[%s673_s23 + $0xc8] sm:$0xff]  ;;  %v249_v13 = vld [vmem:[%s673_s23 + $0xd0] sm:$0xff] }
  0x1f   : > { %498 = vst.msk [vmem:[%s715_s5 + $0x40] sm:$0xff] %vm489_vm0, %v454_v21  ;;  %v458_v35 = vmax.f32 %v415_v24, 0.0  ;;  %v330_v37 = vmul.f32 %v665_v0, %v240_v20  ;;  %v417_v40 = vadd.f32 %v374_v30, %v280_v25  ;;  %v331_v44 = vmul.f32 %v665_v0, %v241_v27  ;;  %v250_v18 = vld [vmem:[%s673_s23 + $0xd8] sm:$0xff]  ;;  %v251_v19 = vld [vmem:[%s673_s23 + $0xe0] sm:$0xff]  ;;  %v252_v24 = vld [vmem:[%s673_s23 + $0xe8] sm:$0xff] }
  0x20   : > { %499 = vst.msk [vmem:[%s715_s5 + $0x48] sm:$0xff] %vm489_vm0, %v455_v22  ;;  %v459_v39 = vmax.f32 %v416_v29, 0.0  ;;  %v418_v41 = vadd.f32 %v375_v31, %v281_v26  ;;  %v376_v45 = vadd.f32 %v684_v1, %v329_v36  ;;  %v332_v48 = vmul.f32 %v665_v0, %v242_v32  ;;  %v291_v29 = vld [vmem:[%s679_s26 + $0xc8] sm:$0xff]  ;;  %v253_v36 = vld [vmem:[%s673_s23 + $0xf0] sm:$0xff] }
  0x21   : > { %500 = vst.msk [vmem:[%s715_s5 + $0x50] sm:$0xff] %vm489_vm0, %v456_v28  ;;  %v377_v46 = vadd.f32 %v684_v1, %v330_v37  ;;  %v333_v49 = vmul.f32 %v665_v0, %v243_v33  ;;  %v460_v52 = vmax.f32 %v417_v40, 0.0  ;;  %v378_v54 = vadd.f32 %v684_v1, %v331_v44  ;;  %v290_v28 = vld [vmem:[%s679_s26 + $0xc0] sm:$0xff]  ;;  %v292_v33 = vld [vmem:[%s679_s26 + $0xd0] sm:$0xff]  ;;  %v254_v37 = vld [vmem:[%s673_s23 + $0xf8] sm:$0xff] }
  0x22   : > { %501 = vst.msk [vmem:[%s715_s5 + $0x58] sm:$0xff] %vm489_vm0, %v457_v34  ;;  %v461_v53 = vmax.f32 %v418_v41, 0.0  ;;  %v334_v57 = vmul.f32 %v665_v0, %v244_v38  ;;  %v419_v58 = vadd.f32 %v376_v45, %v282_v42  ;;  %v379_v60 = vadd.f32 %v684_v1, %v332_v48  ;;  %v293_v41 = vld [vmem:[%s679_s26 + $0xd8] sm:$0xff]  ;;  %v294_v42 = vld [vmem:[%s679_s26 + $0xe0] sm:$0xff]  ;;  %v295_v48 = vld [vmem:[%s679_s26 + $0xe8] sm:$0xff] }
  0x23   : > { %502 = vst.msk [vmem:[%s715_s5 + $0x60] sm:$0xff] %vm489_vm0, %v458_v35  ;;  %v420_v59 = vadd.f32 %v377_v46, %v283_v43  ;;  %v380_v61 = vadd.f32 %v684_v1, %v333_v49  ;;  %v421_v63 = vadd.f32 %v378_v54, %v284_v47  ;;  %v335_v3 = vmul.f32 %v665_v0, %v245_v50  ;;  %v256_v54 = vld [vmem:[%s673_s23 + $0x108] sm:$0xff] }
  0x24   : > { %503 = vst.msk [vmem:[%s715_s5 + $0x68] sm:$0xff] %vm489_vm0, %v459_v39  ;;  %v381_v2 = vadd.f32 %v684_v1, %v334_v57  ;;  %v336_v4 = vmul.f32 %v665_v0, %v246_v51  ;;  %v462_v7 = vmax.f32 %v419_v58, 0.0  ;;  %v422_v9 = vadd.f32 %v379_v60, %v285_v55  ;;  %v297_v60 = vld [vmem:[%s679_s26 + $0xf8] sm:$0xff] }
  0x25   : > { %504 = vst.msk [vmem:[%s715_s5 + $0x70] sm:$0xff] %vm489_vm0, %v460_v52  ;;  %v463_v8 = vmax.f32 %v420_v59, 0.0  ;;  %v423_v10 = vadd.f32 %v380_v61, %v286_v56  ;;  %v464_v14 = vmax.f32 %v421_v63, 0.0  ;;  %v382_v16 = vadd.f32 %v684_v1, %v335_v3  ;;  %v296_v59 = vld [vmem:[%s679_s26 + $0xf0] sm:$0xff] }
  0x26   : > { %505 = vst.msk [vmem:[%s715_s5 + $0x78] sm:$0xff] %vm489_vm0, %v461_v53  ;;  %v424_v15 = vadd.f32 %v381_v2, %v287_v62  ;;  %v383_v17 = vadd.f32 %v684_v1, %v336_v4  ;;  %v465_v20 = vmax.f32 %v422_v9, 0.0  ;;  %v337_v22 = vmul.f32 %v665_v0, %v247_v5  ;;  %v255_v53 = vld [vmem:[%s673_s23 + $0x100] sm:$0xff]  ;;  %v257_v61 = vld [vmem:[%s673_s23 + $0x110] sm:$0xff]  ;;  %v258_v4 = vld [vmem:[%s673_s23 + $0x118] sm:$0xff] }
  0x27   : > { %506 = vst.msk [vmem:[%s715_s5 + $0x80] sm:$0xff] %vm489_vm0, %v462_v7  ;;  %v466_v21 = vmax.f32 %v423_v10, 0.0  ;;  %v338_v23 = vmul.f32 %v665_v0, %v248_v6  ;;  %v425_v26 = vadd.f32 %v382_v16, %v288_v11  ;;  %v339_v30 = vmul.f32 %v665_v0, %v249_v13  ;;  %v259_v5 = vld [vmem:[%s673_s23 + $0x120] sm:$0xff]  ;;  %v260_v10 = vld [vmem:[%s673_s23 + $0x128] sm:$0xff] }
  0x28   : > { %507 = vst.msk [vmem:[%s715_s5 + $0x88] sm:$0xff] %vm489_vm0, %v463_v8  ;;  %v467_v25 = vmax.f32 %v424_v15, 0.0  ;;  %v426_v27 = vadd.f32 %v383_v17, %v289_v12  ;;  %v384_v31 = vadd.f32 %v684_v1, %v337_v22  ;;  %v340_v34 = vmul.f32 %v665_v0, %v250_v18  ;;  %v299_v15 = vld [vmem:[%s679_s26 + $0x108] sm:$0xff]  ;;  %v261_v22 = vld [vmem:[%s673_s23 + $0x130] sm:$0xff] }
  0x29   : > { %508 = vst.msk [vmem:[%s715_s5 + $0x90] sm:$0xff] %vm489_vm0, %v464_v14  ;;  %v385_v32 = vadd.f32 %v684_v1, %v338_v23  ;;  %v341_v35 = vmul.f32 %v665_v0, %v251_v19  ;;  %v468_v38 = vmax.f32 %v425_v26, 0.0  ;;  %v386_v40 = vadd.f32 %v684_v1, %v339_v30  ;;  %v298_v14 = vld [vmem:[%s679_s26 + $0x100] sm:$0xff]  ;;  %v300_v19 = vld [vmem:[%s679_s26 + $0x110] sm:$0xff]  ;;  %v262_v23 = vld [vmem:[%s673_s23 + $0x138] sm:$0xff] }
  0x2a   : > { %509 = vst.msk [vmem:[%s715_s5 + $0x98] sm:$0xff] %vm489_vm0, %v465_v20  ;;  %v469_v39 = vmax.f32 %v426_v27, 0.0  ;;  %v342_v43 = vmul.f32 %v665_v0, %v252_v24  ;;  %v427_v44 = vadd.f32 %v384_v31, %v290_v28  ;;  %v387_v46 = vadd.f32 %v684_v1, %v340_v34  ;;  %v301_v27 = vld [vmem:[%s679_s26 + $0x118] sm:$0xff]  ;;  %v302_v28 = vld [vmem:[%s679_s26 + $0x120] sm:$0xff]  ;;  %v303_v34 = vld [vmem:[%s679_s26 + $0x128] sm:$0xff] }
  0x2b   : > { %510 = vst.msk [vmem:[%s715_s5 + $0xa0] sm:$0xff] %vm489_vm0, %v466_v21  ;;  %v428_v45 = vadd.f32 %v385_v32, %v291_v29  ;;  %v388_v47 = vadd.f32 %v684_v1, %v341_v35  ;;  %v429_v49 = vadd.f32 %v386_v40, %v292_v33  ;;  %v343_v51 = vmul.f32 %v665_v0, %v253_v36  ;;  %v264_v40 = vld [vmem:[%s673_s23 + $0x148] sm:$0xff] }
  0x2c   : > { %511 = vst.msk [vmem:[%s715_s5 + $0xa8] sm:$0xff] %vm489_vm0, %v467_v25  ;;  %v389_v50 = vadd.f32 %v684_v1, %v342_v43  ;;  %v344_v52 = vmul.f32 %v665_v0, %v254_v37  ;;  %v470_v55 = vmax.f32 %v427_v44, 0.0  ;;  %v430_v57 = vadd.f32 %v387_v46, %v293_v41  ;;  %v305_v46 = vld [vmem:[%s679_s26 + $0x138] sm:$0xff] }
  0x2d   : > { %512 = vst.msk [vmem:[%s715_s5 + $0xb0] sm:$0xff] %vm489_vm0, %v468_v38  ;;  %v471_v56 = vmax.f32 %v428_v45, 0.0  ;;  %v431_v58 = vadd.f32 %v388_v47, %v294_v42  ;;  %v472_v62 = vmax.f32 %v429_v49, 0.0  ;;  %v390_v2 = vadd.f32 %v684_v1, %v343_v51  ;;  %v304_v45 = vld [vmem:[%s679_s26 + $0x130] sm:$0xff] }
  0x2e   : > { %513 = vst.msk [vmem:[%s715_s5 + $0xb8] sm:$0xff] %vm489_vm0, %v469_v39  ;;  %v432_v63 = vadd.f32 %v389_v50, %v295_v48  ;;  %v391_v3 = vadd.f32 %v684_v1, %v344_v52  ;;  %v473_v6 = vmax.f32 %v430_v57, 0.0  ;;  %v345_v8 = vmul.f32 %v665_v0, %v255_v53  ;;  %v263_v39 = vld [vmem:[%s673_s23 + $0x140] sm:$0xff]  ;;  %v265_v47 = vld [vmem:[%s673_s23 + $0x150] sm:$0xff] }
  0x2f   : > { %514 = vst.msk [vmem:[%s715_s5 + $0xc0] sm:$0xff] %vm489_vm0, %v470_v55  ;;  %v474_v7 = vmax.f32 %v431_v58, 0.0  ;;  %v346_v9 = vmul.f32 %v665_v0, %v256_v54  ;;  %v433_v12 = vadd.f32 %v390_v2, %v296_v59  ;;  %v347_v16 = vmul.f32 %v665_v0, %v257_v61  ;;  %v306_v59 = vld [vmem:[%s679_s26 + $0x140] sm:$0xff]  ;;  %v308_v2 = vld [vmem:[%s679_s26 + $0x150] sm:$0xff] }
  0x30   : > { %515 = vst.msk [vmem:[%s715_s5 + $0xc8] sm:$0xff] %vm489_vm0, %v471_v56  ;;  %v475_v11 = vmax.f32 %v432_v63, 0.0  ;;  %v434_v13 = vadd.f32 %v391_v3, %v297_v60  ;;  %v392_v17 = vadd.f32 %v684_v1, %v345_v8  ;;  %v348_v20 = vmul.f32 %v665_v0, %v258_v4  ;;  %v307_v60 = vld [vmem:[%s679_s26 + $0x148] sm:$0xff] }
  0x31   : > { %516 = vst.msk [vmem:[%s715_s5 + $0xd0] sm:$0xff] %vm489_vm0, %v472_v62  ;;  %v393_v18 = vadd.f32 %v684_v1, %v346_v9  ;;  %v349_v21 = vmul.f32 %v665_v0, %v259_v5  ;;  %v476_v24 = vmax.f32 %v433_v12, 0.0  ;;  %v394_v26 = vadd.f32 %v684_v1, %v347_v16 }
  0x32   : > { %517 = vst.msk [vmem:[%s715_s5 + $0xd8] sm:$0xff] %vm489_vm0, %v473_v6  ;;  %v477_v25 = vmax.f32 %v434_v13, 0.0  ;;  %v350_v29 = vmul.f32 %v665_v0, %v260_v10  ;;  %v435_v30 = vadd.f32 %v392_v17, %v298_v14  ;;  %v395_v32 = vadd.f32 %v684_v1, %v348_v20 }
  0x33   : > { %518 = vst.msk [vmem:[%s715_s5 + $0xe0] sm:$0xff] %vm489_vm0, %v474_v7  ;;  %v436_v31 = vadd.f32 %v393_v18, %v299_v15  ;;  %v396_v33 = vadd.f32 %v684_v1, %v349_v21  ;;  %v437_v35 = vadd.f32 %v394_v26, %v300_v19  ;;  %v351_v37 = vmul.f32 %v665_v0, %v261_v22 }
  0x34   : > { %519 = vst.msk [vmem:[%s715_s5 + $0xe8] sm:$0xff] %vm489_vm0, %v475_v11  ;;  %v397_v36 = vadd.f32 %v684_v1, %v350_v29  ;;  %v352_v38 = vmul.f32 %v665_v0, %v262_v23  ;;  %v478_v41 = vmax.f32 %v435_v30, 0.0  ;;  %v438_v43 = vadd.f32 %v395_v32, %v301_v27 }
  0x35   : > { %520 = vst.msk [vmem:[%s715_s5 + $0xf0] sm:$0xff] %vm489_vm0, %v476_v24  ;;  %v479_v42 = vmax.f32 %v436_v31, 0.0  ;;  %v439_v44 = vadd.f32 %v396_v33, %v302_v28  ;;  %v480_v48 = vmax.f32 %v437_v35, 0.0  ;;  %v398_v50 = vadd.f32 %v684_v1, %v351_v37 }
  0x36   : > { %521 = vst.msk [vmem:[%s715_s5 + $0xf8] sm:$0xff] %vm489_vm0, %v477_v25  ;;  %v440_v49 = vadd.f32 %v397_v36, %v303_v34  ;;  %v399_v51 = vadd.f32 %v684_v1, %v352_v38  ;;  %v481_v52 = vmax.f32 %v438_v43, 0.0  ;;  %v353_v54 = vmul.f32 %v665_v0, %v263_v39 }
  0x37   : > { %522 = vst.msk [vmem:[%s715_s5 + $0x100] sm:$0xff] %vm489_vm0, %v478_v41  ;;  %v482_v53 = vmax.f32 %v439_v44, 0.0  ;;  %v354_v55 = vmul.f32 %v665_v0, %v264_v40  ;;  %v441_v57 = vadd.f32 %v398_v50, %v304_v45  ;;  %v355_v61 = vmul.f32 %v665_v0, %v265_v47 }
  0x38   : > { %523 = vst.msk [vmem:[%s715_s5 + $0x108] sm:$0xff] %vm489_vm0, %v479_v42  ;;  %v483_v56 = vmax.f32 %v440_v49, 0.0  ;;  %v442_v58 = vadd.f32 %v399_v51, %v305_v46  ;;  %v400_v62 = vadd.f32 %v684_v1, %v353_v54 }
  0x39   : > { %524 = vst.msk [vmem:[%s715_s5 + $0x110] sm:$0xff] %vm489_vm0, %v480_v48  ;;  %v401_v63 = vadd.f32 %v684_v1, %v354_v55  ;;  %v484_v3 = vmax.f32 %v441_v57, 0.0  ;;  %v402_v5 = vadd.f32 %v684_v1, %v355_v61 }
  0x3a   : > { %525 = vst.msk [vmem:[%s715_s5 + $0x118] sm:$0xff] %vm489_vm0, %v481_v52  ;;  %v485_v4 = vmax.f32 %v442_v58, 0.0  ;;  %v443_v0 = vadd.f32 %v400_v62, %v306_v59 }
  0x3b   : > { %526 = vst.msk [vmem:[%s715_s5 + $0x120] sm:$0xff] %vm489_vm0, %v482_v53  ;;  %v444_v6 = vadd.f32 %v401_v63, %v307_v60  ;;  %v445_v7 = vadd.f32 %v402_v5, %v308_v2 }
  0x3c   : > { %527 = vst.msk [vmem:[%s715_s5 + $0x128] sm:$0xff] %vm489_vm0, %v483_v56  ;;  %v486_v8 = vmax.f32 %v443_v0, 0.0 }
  0x3d   : > { %528 = vst.msk [vmem:[%s715_s5 + $0x130] sm:$0xff] %vm489_vm0, %v484_v3  ;;  %v487_v9 = vmax.f32 %v444_v6, 0.0  ;;  %v488_v10 = vmax.f32 %v445_v7, 0.0 }
  0x3e   : > { %529 = vst.msk [vmem:[%s715_s5 + $0x138] sm:$0xff] %vm489_vm0, %v485_v4 }
  0x3f   : > { %530 = vst.msk [vmem:[%s715_s5 + $0x140] sm:$0xff] %vm489_vm0, %v486_v8 }
  0x40   : > { %531 = vst.msk [vmem:[%s715_s5 + $0x148] sm:$0xff] %vm489_vm0, %v487_v9 }
  0x41   : > { %532 = vst.msk [vmem:[%s715_s5 + $0x150] sm:$0xff] %vm489_vm0, %v488_v10 }
  0x42 PF: > { %s14_s15 = sadd.s32 1, %s627_s15  }
  0x43   : > { %p11_p4 = scmp.ge.s32.totalorder %s14_s15, 4  }
  0x45   :  { %13 = sbr.rel (!%p11_p4) target bundleno = 1 (0x1), region = 69 }

// kernel: residual_block.3
= control target key start
LH: loop header
LB: loop body
LE: loop exit
PB: predicated region body
PF: predicated region fallthrough
CT: control target
= control target key end

     0   :  { %s4234_s18 = smov 0   ;;  %s5250_s0 = inlined_call_operand.vmem [shape: f32[688,4], index: 0, kind: input, shape index: {}]   ;;  %s5251_s1 = inlined_call_operand.vmem [shape: f32[9,4,4], index: 1, kind: input, shape index: {}]   ;;  %s5252_s2 = inlined_call_operand.vmem [shape: f32[304,1], index: 2, kind: input, shape index: {}]   ;;  %s5253_s3 = inlined_call_operand.vmem [shape: f32[688,4], index: 3, kind: output, shape index: {0}]   ;;  %s5254_s4 = inlined_call_operand.vmem [shape: f32[2,1,4], index: 4, kind: output, shape index: {1}]   ;;  %s5255_s5 = inlined_call_operand.vmem [shape: f32[2,1,4], index: 5, kind: output, shape index: {2}]  }
   0x1 LB: > { %s4240_s19 = sadd.s32 4294967295, %s4200_s18   ;;  %p3814_p0 = scmp.ge.s32.totalorder %s4200_s18, 1  ;;  %s4200_s18 = sphi %s4234_s18, %s16_s18  }
   0x2   : > { %p193_p1 = scmp.lt.s32.totalorder %s4200_s18, 3 }
   0x4   : > { %p194_p2 = pnand %p3814_p0, %p193_p1 }
   0x5   : > { %s227_s22 = smul.u32 (!%p194_p2), 43, %s4240_s19  ;;  %p239_p4 = scmp.lt.s32.totalorder (!%p194_p2), %s4240_s19, 1 }
   0x6   : > { %197 = sbr.rel (%p194_p2) target bundleno = 865 (0x361), region = 32 }
   0x7   : > { %p228_p3 = scmp.lt.s32.totalorder (!%p194_p2), %s227_s22, 85 }
   0xb   : > { %v3817_v0 = vld [vmem:[%s5251_s1 + $0x4] sm:$0xf]  ;;  %vm525_vm0 = vcmask 1043456   ;;  %v3896_v1 = vld [vmem:[%s5251_s1 + $0x8] sm:$0xf]  ;;  %s5257_s22 = smov (!%p228_p3, %s227_s22), 85 }
   0xc   : > { %4178 = vmatpush.msk.msra.mxu1 %vm525_vm0, %v3817_v0  ;;  %4179 = vmatpush.msk.msra.mxu2 %vm525_vm0, %v3817_v0  ;;  %v370_v2 = vld [vmem:[%s5251_s1] sm:$0xf]  ;;  %v3976_v3 = vld [vmem:[%s5251_s1 + $0x10] sm:$0xf]  ;;  %v3936_v4 = vld [vmem:[%s5251_s1 + $0xc] sm:$0xf] }
   0xd   : > { %3818 = vmatpush.msk.msra.mxu0 %vm525_vm0, %v3817_v0  ;;  %4180 = vmatpush.msk.msra.mxu3 %vm525_vm0, %v3817_v0  ;;  %s3815_s6 = sshll.u32 %s5257_s22, 3  ;;  %vm288_vm1 = vcmask 31744   ;;  %vm3661_vm2 = vcmask 27648   ;;  %s5259_s19 = smov (!%p239_p4, %s4240_s19), 1  ;;  %vm3537_vm3 = vcmask 24576  }
   0xe   : > { %3897 = vmatpush.msk.msrb.mxu2 %vm525_vm0, %v3896_v1  ;;  %3857 = vmatpush.msk.msrb.mxu1 %vm525_vm0, %v370_v2  ;;  %s4276_s9 = scalar_lea.vmem %s5250_s0, %s3815_s6  ;;  %s4891_s16 = scalar_lea.vmem %s5253_s3, %s3815_s6 }
   0xf   : > { %3977 = vmatpush.msk.msrb.mxu0 %vm525_vm0, %v3976_v3  ;;  %3937 = vmatpush.msk.msrb.mxu3 %vm525_vm0, %v3936_v4  ;;  %v255_v5 = vld [vmem:[%s4276_s9 + $0x50] sm:$0xff]  ;;  %v256_v6 = vld [vmem:[%s4276_s9 + $0x58] sm:$0xff]  ;;  %v265_v7 = vld [vmem:[%s4276_s9 + $0xa0] sm:$0xff]  ;;  %s241_s15 = scalar_lea.vmem %s5254_s4, %s5259_s19  ;;  %s244_s6 = scalar_lea.vmem %s5255_s5, %s5259_s19 }
  0x10   : > { %299 = vst.msk [vmem:[#allocation2 + $0x50] sm:$0xff] %vm288_vm1, %v255_v5  ;;  %v266_v8 = vld [vmem:[%s4276_s9 + $0xa8] sm:$0xff]  ;;  %v257_v9 = vld [vmem:[%s4276_s9 + $0x60] sm:$0xff]  ;;  %v267_v10 = vld [vmem:[%s4276_s9 + $0xb0] sm:$0xff] }
  0x11   : > { %300 = vst.msk [vmem:[#allocation2 + $0x58] sm:$0xff] %vm288_vm1, %v256_v6  ;;  %v245_v11 = vld [vmem:[%s4276_s9] sm:$0xff]  ;;  %v246_v12 = vld [vmem:[%s4276_s9 + $0x8] sm:$0xff]  ;;  %v268_v14 = vld [vmem:[%s4276_s9 + $0xb8] sm:$0xff] }
  0x12   : > { %309 = vst.msk [vmem:[#allocation2 + $0xa0] sm:$0xff] %vm288_vm1, %v265_v7  ;;  %v258_v13 = vld [vmem:[%s4276_s9 + $0x68] sm:$0xff]  ;;  %v247_v15 = vld [vmem:[%s4276_s9 + $0x10] sm:$0xff]  ;;  %v276_v18 = vld [vmem:[%s4276_s9 + $0xf8] sm:$0xff] }
  0x13   : > { %310 = vst.msk [vmem:[#allocation2 + $0xa8] sm:$0xff] %vm288_vm1, %v266_v8  ;;  %v275_v17 = vld [vmem:[%s4276_s9 + $0xf0] sm:$0xff]  ;;  %v269_v21 = vld [vmem:[%s4276_s9 + $0xc0] sm:$0xff]  ;;  %v248_v22 = vld [vmem:[%s4276_s9 + $0x18] sm:$0xff] }
  0x14   : > { %301 = vst.msk [vmem:[#allocation2 + $0x60] sm:$0xff] %vm288_vm1, %v257_v9  ;;  %v259_v20 = vld [vmem:[%s4276_s9 + $0x70] sm:$0xff]  ;;  %v277_v23 = vld [vmem:[%s4276_s9 + $0x100] sm:$0xff]  ;;  %v260_v26 = vld [vmem:[%s4276_s9 + $0x78] sm:$0xff] }
  0x15   : > { %311 = vst.msk [vmem:[#allocation2 + $0xb0] sm:$0xff] %vm288_vm1, %v267_v10  ;;  %v270_v27 = vld [vmem:[%s4276_s9 + $0xc8] sm:$0xff]  ;;  %v249_v29 = vld [vmem:[%s4276_s9 + $0x20] sm:$0xff]  ;;  %v271_v33 = vld [vmem:[%s4276_s9 + $0xd0] sm:$0xff] }
  0x16   : > { %289 = vst.msk [vmem:[#allocation2] sm:$0xff] %vm288_vm1, %v245_v11  ;;  %v278_v30 = vld [vmem:[%s4276_s9 + $0x108] sm:$0xff]  ;;  %v261_v31 = vld [vmem:[%s4276_s9 + $0x80] sm:$0xff]  ;;  %v279_v36 = vld [vmem:[%s4276_s9 + $0x110] sm:$0xff] }
  0x17   : > { %290 = vst.msk [vmem:[#allocation2 + $0x8] sm:$0xff] %vm288_vm1, %v246_v12  ;;  %v250_v35 = vld [vmem:[%s4276_s9 + $0x28] sm:$0xff]  ;;  %v272_v39 = vld [vmem:[%s4276_s9 + $0xd8] sm:$0xff]  ;;  %v251_v41 = vld [vmem:[%s4276_s9 + $0x30] sm:$0xff] }
  0x18   : > { %v381_v16 = vld [vmem:[#allocation2 + $0x51] sm:$0xff]  ;;  %302 = vst.msk [vmem:[#allocation2 + $0x68] sm:$0xff] %vm288_vm1, %v258_v13  ;;  %v262_v38 = vld [vmem:[%s4276_s9 + $0x88] sm:$0xff]  ;;  %v273_v45 = vld [vmem:[%s4276_s9 + $0xe0] sm:$0xff] }
  0x19   : > { %3829 = vmatmul.msk.f32.vlgmr.msra.gmra.mxu1 %vm288_vm1, %v381_v16  ;;  %312 = vst.msk [vmem:[#allocation2 + $0xb8] sm:$0xff] %vm288_vm1, %v268_v14  ;;  %v280_v43 = vld [vmem:[%s4276_s9 + $0x118] sm:$0xff]  ;;  %v263_v44 = vld [vmem:[%s4276_s9 + $0x90] sm:$0xff]  ;;  %v281_v48 = vld [vmem:[%s4276_s9 + $0x120] sm:$0xff] }
  0x1a   : > { %v391_v19 = vld [vmem:[#allocation2 + $0xa1] sm:$0xff]  ;;  %291 = vst.msk [vmem:[#allocation2 + $0x10] sm:$0xff] %vm288_vm1, %v247_v15  ;;  %v252_v47 = vld [vmem:[%s4276_s9 + $0x38] sm:$0xff]  ;;  %v283_v62 = vld [vmem:[%s4276_s9 + $0x130] sm:$0xff] }
  0x1b   : > { %3839 = vmatmul.msk.f32.vlgmr.msra.gmra.mxu2 %vm288_vm1, %v391_v19  ;;  %319 = vst.msk [vmem:[#allocation2 + $0xf0] sm:$0xff] %vm288_vm1, %v275_v17  ;;  %v382_v24 = vld [vmem:[#allocation2 + $0x59] sm:$0xff]  ;;  %v274_v53 = vld [vmem:[%s4276_s9 + $0xe8] sm:$0xff]  ;;  %v4016_v9 = vld [vmem:[%s5251_s1 + $0x14] sm:$0xf] }
  0x1c   : > { %320 = vst.msk [vmem:[#allocation2 + $0xf8] sm:$0xff] %vm288_vm1, %v276_v18  ;;  %v392_v28 = vld [vmem:[#allocation2 + $0xa9] sm:$0xff]  ;;  %v264_v52 = vld [vmem:[%s4276_s9 + $0x98] sm:$0xff]  ;;  %v253_v55 = vld [vmem:[%s4276_s9 + $0x40] sm:$0xff]  ;;  %4017 = vmatpush.msk.msra.mxu1 %vm525_vm0, %v4016_v9 }
  0x1d   : > { %303 = vst.msk [vmem:[#allocation2 + $0x70] sm:$0xff] %vm288_vm1, %v259_v20  ;;  %v282_v56 = vld [vmem:[%s4276_s9 + $0x128] sm:$0xff]  ;;  %v4056_v6 = vld [vmem:[%s5251_s1 + $0x18] sm:$0xf]  ;;  %v4096_v8 = vld [vmem:[%s5251_s1 + $0x1c] sm:$0xf] }
  0x1e   : > { %v371_v25 = vld [vmem:[#allocation2 + $0x1] sm:$0xff]  ;;  %313 = vst.msk [vmem:[#allocation2 + $0xc0] sm:$0xff] %vm288_vm1, %v269_v21  ;;  %4057 = vmatpush.msk.msra.mxu2 %vm525_vm0, %v4056_v6 }
  0x1f   : > { %3819 = vmatmul.msk.f32.vlgmr.msra.gmra.mxu0 %vm288_vm1, %v371_v25  ;;  %292 = vst.msk [vmem:[#allocation2 + $0x18] sm:$0xff] %vm288_vm1, %v248_v22  ;;  %v383_v37 = vld [vmem:[#allocation2 + $0x61] sm:$0xff] }
  0x20   : > { %321 = vst.msk [vmem:[#allocation2 + $0x100] sm:$0xff] %vm288_vm1, %v277_v23  ;;  %v393_v40 = vld [vmem:[#allocation2 + $0xb1] sm:$0xff]  ;;  %v254_v61 = vld [vmem:[%s4276_s9 + $0x48] sm:$0xff]  ;;  %v4136_v13 = vld [vmem:[%s5251_s1 + $0x20] sm:$0xf] }
  0x21   : > { %3830 = vmatmul.msk.f32.gmra.mxu1 %vm288_vm1, %v382_v24  ;;  %304 = vst.msk [vmem:[#allocation2 + $0x78] sm:$0xff] %vm288_vm1, %v260_v26  ;;  %v372_v34 = vld [vmem:[#allocation2 + $0x9] sm:$0xff]  ;;  %4137 = vmatpush.msk.msra.mxu0 %vm525_vm0, %v4136_v13  ;;  %v332_v23 = vld [vmem:[#allocation2] sm:$0xff] }
  0x22   : > { %314 = vst.msk [vmem:[#allocation2 + $0xc8] sm:$0xff] %vm288_vm1, %v270_v27  ;;  %v908_v24 = vld [vmem:[#allocation2 + $0x2] sm:$0xff] }
  0x23   : > { %3840 = vmatmul.msk.f32.gmra.mxu2 %vm288_vm1, %v392_v28  ;;  %v401_v32 = vld [vmem:[#allocation2 + $0xf1] sm:$0xff]  ;;  %293 = vst.msk [vmem:[#allocation2 + $0x20] sm:$0xff] %vm288_vm1, %v249_v29  ;;  %v333_v27 = vld [vmem:[#allocation2 + $0x8] sm:$0xff] }
  0x24   : > { %3849 = vmatmul.msk.f32.vlgmr.msra.gmra.mxu3 %vm288_vm1, %v401_v32  ;;  %322 = vst.msk [vmem:[#allocation2 + $0x108] sm:$0xff] %vm288_vm1, %v278_v30  ;;  %v384_v49 = vld [vmem:[#allocation2 + $0x69] sm:$0xff] }
  0x25   : > { %305 = vst.msk [vmem:[#allocation2 + $0x80] sm:$0xff] %vm288_vm1, %v261_v31  ;;  %v394_v50 = vld [vmem:[#allocation2 + $0xb9] sm:$0xff]  ;;  %4097 = vmatpush.msk.msra.mxu3 %vm525_vm0, %v4096_v8  ;;  %v909_v28 = vld [vmem:[#allocation2 + $0xa] sm:$0xff] }
  0x26   : > { %315 = vst.msk [vmem:[#allocation2 + $0xd0] sm:$0xff] %vm288_vm1, %v271_v33  ;;  %v373_v46 = vld [vmem:[#allocation2 + $0x11] sm:$0xff]  ;;  %v1244_v9 = vld [vmem:[#allocation2 + $0x63] sm:$0xff] }
  0x27   : > { %3820 = vmatmul.msk.f32.gmra.mxu0 %vm288_vm1, %v372_v34  ;;  %294 = vst.msk [vmem:[#allocation2 + $0x28] sm:$0xff] %vm288_vm1, %v250_v35  ;;  %v402_v42 = vld [vmem:[#allocation2 + $0xf9] sm:$0xff]  ;;  %v334_v31 = vld [vmem:[#allocation2 + $0x10] sm:$0xff] }
  0x28   : > { %323 = vst.msk [vmem:[#allocation2 + $0x110] sm:$0xff] %vm288_vm1, %v279_v36  ;;  %v385_v57 = vld [vmem:[#allocation2 + $0x71] sm:$0xff] }
  0x29   : > { %3831 = vmatmul.msk.f32.gmra.mxu1 %vm288_vm1, %v383_v37  ;;  %306 = vst.msk [vmem:[#allocation2 + $0x88] sm:$0xff] %vm288_vm1, %v262_v38  ;;  %v395_v58 = vld [vmem:[#allocation2 + $0xc1] sm:$0xff]  ;;  %v1234_v21 = vld [vmem:[#allocation2 + $0x13] sm:$0xff] }
  0x2a   : > { %316 = vst.msk [vmem:[#allocation2 + $0xd8] sm:$0xff] %vm288_vm1, %v272_v39  ;;  %v374_v54 = vld [vmem:[#allocation2 + $0x19] sm:$0xff] }
  0x2b   : > { %3841 = vmatmul.msk.f32.gmra.mxu2 %vm288_vm1, %v393_v40  ;;  %295 = vst.msk [vmem:[#allocation2 + $0x30] sm:$0xff] %vm288_vm1, %v251_v41  ;;  %v403_v51 = vld [vmem:[#allocation2 + $0x101] sm:$0xff]  ;;  %v1560_v26 = vld [vmem:[#allocation2 + $0x14] sm:$0xff] }
  0x2c   : > { %3850 = vmatmul.msk.f32.gmra.mxu3 %vm288_vm1, %v402_v42  ;;  %324 = vst.msk [vmem:[#allocation2 + $0x118] sm:$0xff] %vm288_vm1, %v280_v43  ;;  %v386_v63 = vld [vmem:[#allocation2 + $0x79] sm:$0xff] }
  0x2d   : > { %307 = vst.msk [vmem:[#allocation2 + $0x90] sm:$0xff] %vm288_vm1, %v263_v44  ;;  %v396_v0 = vld [vmem:[#allocation2 + $0xc9] sm:$0xff]  ;;  %v1235_v25 = vld [vmem:[#allocation2 + $0x1b] sm:$0xff]  ;;  %v910_v32 = vld [vmem:[#allocation2 + $0x12] sm:$0xff] }
  0x2e   : > { %317 = vst.msk [vmem:[#allocation2 + $0xe0] sm:$0xff] %vm288_vm1, %v273_v45  ;;  %v375_v60 = vld [vmem:[#allocation2 + $0x21] sm:$0xff]  ;;  %v335_v35 = vld [vmem:[#allocation2 + $0x18] sm:$0xff] }
  0x2f   : > { %3821 = vmatmul.msk.f32.gmra.mxu0 %vm288_vm1, %v373_v46  ;;  %296 = vst.msk [vmem:[#allocation2 + $0x38] sm:$0xff] %vm288_vm1, %v252_v47  ;;  %v404_v59 = vld [vmem:[#allocation2 + $0x109] sm:$0xff]  ;;  %v1561_v30 = vld [vmem:[#allocation2 + $0x1c] sm:$0xff] }
  0x30   : > { %325 = vst.msk [vmem:[#allocation2 + $0x120] sm:$0xff] %vm288_vm1, %v281_v48  ;;  %v387_v3 = vld [vmem:[#allocation2 + $0x81] sm:$0xff] }
  0x31   : > { %3832 = vmatmul.msk.f32.gmra.mxu1 %vm288_vm1, %v384_v49  ;;  %308 = vst.msk [vmem:[#allocation2 + $0x98] sm:$0xff] %vm288_vm1, %v264_v52  ;;  %v397_v4 = vld [vmem:[#allocation2 + $0xd1] sm:$0xff]  ;;  %v1236_v29 = vld [vmem:[#allocation2 + $0x23] sm:$0xff]  ;;  %v911_v36 = vld [vmem:[#allocation2 + $0x1a] sm:$0xff] }
  0x32   : > { %318 = vst.msk [vmem:[#allocation2 + $0xe8] sm:$0xff] %vm288_vm1, %v274_v53  ;;  %v376_v2 = vld [vmem:[#allocation2 + $0x29] sm:$0xff]  ;;  %v336_v39 = vld [vmem:[#allocation2 + $0x20] sm:$0xff] }
  0x33   : > { %3842 = vmatmul.msk.f32.gmra.mxu2 %vm288_vm1, %v394_v50  ;;  %297 = vst.msk [vmem:[#allocation2 + $0x40] sm:$0xff] %vm288_vm1, %v253_v55  ;;  %v405_v1 = vld [vmem:[#allocation2 + $0x111] sm:$0xff]  ;;  %v1562_v34 = vld [vmem:[#allocation2 + $0x24] sm:$0xff] }
  0x34   : > { %3851 = vmatmul.msk.f32.gmra.mxu3 %vm288_vm1, %v403_v51  ;;  %326 = vst.msk [vmem:[#allocation2 + $0x128] sm:$0xff] %vm288_vm1, %v282_v56  ;;  %v388_v10 = vld [vmem:[#allocation2 + $0x89] sm:$0xff] }
  0x35   : > { %298 = vst.msk [vmem:[#allocation2 + $0x48] sm:$0xff] %vm288_vm1, %v254_v61  ;;  %v398_v11 = vld [vmem:[#allocation2 + $0xd9] sm:$0xff]  ;;  %v1237_v33 = vld [vmem:[#allocation2 + $0x2b] sm:$0xff]  ;;  %v912_v40 = vld [vmem:[#allocation2 + $0x22] sm:$0xff] }
  0x36   : > { %327 = vst.msk [vmem:[#allocation2 + $0x130] sm:$0xff] %vm288_vm1, %v283_v62  ;;  %v377_v7 = vld [vmem:[#allocation2 + $0x31] sm:$0xff]  ;;  %v4430_v43 = vld [vmem:[#allocation2 + $0x28] sm:$0xff] }
  0x37   : > { %3822 = vmatmul.msk.f32.gmra.mxu0 %vm288_vm1, %v374_v54  ;;  %v406_v5 = vld [vmem:[#allocation2 + $0x119] sm:$0xff]  ;;  %v1563_v38 = vld [vmem:[#allocation2 + $0x2c] sm:$0xff] }
  0x38   : > { %v389_v15 = vld [vmem:[#allocation2 + $0x91] sm:$0xff]  ;;  %v390_v19 = vld [vmem:[#allocation2 + $0x99] sm:$0xff] }
  0x39   : > { %3833 = vmatmul.msk.f32.gmra.mxu1 %vm288_vm1, %v385_v57  ;;  %v399_v16 = vld [vmem:[#allocation2 + $0xe1] sm:$0xff]  ;;  %v400_v20 = vld [vmem:[#allocation2 + $0xe9] sm:$0xff]  ;;  %v1238_v37 = vld [vmem:[#allocation2 + $0x33] sm:$0xff] }
  0x3a   : > { %v378_v14 = vld [vmem:[#allocation2 + $0x39] sm:$0xff]  ;;  %v913_v44 = vld [vmem:[#allocation2 + $0x2a] sm:$0xff] }
  0x3b   : > { %3843 = vmatmul.msk.f32.gmra.mxu2 %vm288_vm1, %v395_v58  ;;  %v407_v12 = vld [vmem:[#allocation2 + $0x121] sm:$0xff]  ;;  %v1564_v42 = vld [vmem:[#allocation2 + $0x34] sm:$0xff] }
  0x3c   : > { %3852 = vmatmul.msk.f32.gmra.mxu3 %vm288_vm1, %v404_v59  ;;  %v379_v18 = vld [vmem:[#allocation2 + $0x41] sm:$0xff]  ;;  %v380_v22 = vld [vmem:[#allocation2 + $0x49] sm:$0xff]  ;;  %v914_v49 = vld [vmem:[#allocation2 + $0x32] sm:$0xff] }
  0x3d   : > { %v408_v17 = vld [vmem:[#allocation2 + $0x129] sm:$0xff]  ;;  %v1239_v41 = vld [vmem:[#allocation2 + $0x3b] sm:$0xff]  ;;  %v1242_v57 = vld [vmem:[#allocation2 + $0x53] sm:$0xff] }
  0x3e   : > { %v1240_v45 = vld [vmem:[#allocation2 + $0x43] sm:$0xff]  ;;  %v338_v48 = vld [vmem:[#allocation2 + $0x30] sm:$0xff]  ;;  %v339_v55 = vld [vmem:[#allocation2 + $0x38] sm:$0xff] }
  0x3f   : > { %3823 = vmatmul.msk.f32.gmra.mxu0 %vm288_vm1, %v375_v60  ;;  %v1565_v46 = vld [vmem:[#allocation2 + $0x3c] sm:$0xff]  ;;  %v1241_v50 = vld [vmem:[#allocation2 + $0x4b] sm:$0xff] }
  0x40   : > { %v1566_v52 = vld [vmem:[#allocation2 + $0x44] sm:$0xff]  ;;  %v915_v56 = vld [vmem:[#allocation2 + $0x3a] sm:$0xff]  ;;  %v1567_v59 = vld [vmem:[#allocation2 + $0x4c] sm:$0xff] }
  0x41   : > { %3834 = vmatmul.msk.f32.gmra.mxu1 %vm288_vm1, %v386_v63  ;;  %v340_v62 = vld [vmem:[#allocation2 + $0x40] sm:$0xff]  ;;  %v341_v6 = vld [vmem:[#allocation2 + $0x48] sm:$0xff] }
  0x42   : > { %v917_v8 = vld [vmem:[#allocation2 + $0x4a] sm:$0xff] }
  0x43   : > { %3844 = vmatmul.msk.f32.gmra.mxu2 %vm288_vm1, %v396_v0  ;;  %v916_v0 = vld [vmem:[#allocation2 + $0x42] sm:$0xff] }
  0x44   : > { %3853 = vmatmul.msk.f32.gmra.mxu3 %vm288_vm1, %v405_v1  ;;  %v1243_v1 = vld [vmem:[#allocation2 + $0x5b] sm:$0xff] }
  0x47   : > { %3824 = vmatmul.msk.f32.gmra.mxu0 %vm288_vm1, %v376_v2 }
  0x49   : > { %3835 = vmatmul.msk.f32.gmra.mxu1 %vm288_vm1, %v387_v3  ;;  %v1568_v3 = vld [vmem:[#allocation2 + $0x54] sm:$0xff] }
  0x4b   : > { %3845 = vmatmul.msk.f32.gmra.mxu2 %vm288_vm1, %v397_v4 }
  0x4c   : > { %3854 = vmatmul.msk.f32.gmra.mxu3 %vm288_vm1, %v406_v5 }
  0x4f   : > { %3825 = vmatmul.msk.f32.gmra.mxu0 %vm288_vm1, %v377_v7 }
  0x51   : > { %3836 = vmatmul.msk.f32.gmra.mxu1 %vm288_vm1, %v388_v10 }
  0x53   : > { %3846 = vmatmul.msk.f32.gmra.mxu2 %vm288_vm1, %v398_v11  ;;  %v1569_v11 = vld [vmem:[#allocation2 + $0x5c] sm:$0xff] }
  0x54   : > { %3855 = vmatmul.msk.f32.gmra.mxu3 %vm288_vm1, %v407_v12 }
  0x57   : > { %3826 = vmatmul.msk.f32.gmra.mxu0 %vm288_vm1, %v378_v14  ;;  %v342_v14 = vld [vmem:[#allocation2 + $0x50] sm:$0xff] }
  0x59   : > { %3837 = vmatmul.msk.f32.gmra.mxu1 %vm288_vm1, %v389_v15 }
  0x5b   : > { %3847 = vmatmul.msk.f32.gmra.mxu2 %vm288_vm1, %v399_v16  ;;  %v918_v16 = vld [vmem:[#allocation2 + $0x52] sm:$0xff] }
  0x5c   : > { %3856 = vmatmul.msk.f32.gmra.mxu3 %vm288_vm1, %v408_v17  ;;  %v1245_v17 = vld [vmem:[#allocation2 + $0x6b] sm:$0xff] }
  0x5f   : > { %3827 = vmatmul.msk.f32.gmra.mxu0 %vm288_vm1, %v379_v18 }
  0x61   : > { %3838 = vmatmul.msk.f32.gmra.mxu1 %vm288_vm1, %v390_v19  ;;  %v1570_v19 = vld [vmem:[#allocation2 + $0x64] sm:$0xff] }
  0x63   : > { %3848 = vmatmul.msk.f32.gmra.mxu2 %vm288_vm1, %v400_v20 }
  0x64   : > { %3938 = vmatmul.msk.f32.vlgmr.msrb.gmra.mxu3 %vm288_vm1, %v1234_v21 }
  0x67   : > { %3828 = vmatmul.msk.f32.gmra.mxu0 %vm288_vm1, %v380_v22  ;;  %v343_v22 = vld [vmem:[#allocation2 + $0x58] sm:$0xff] }
  0x69   : > { %3858 = vmatmul.msk.f32.vlgmr.msrb.gmra.mxu1 %vm288_vm1, %v332_v23 }
  0x6b   : > { %3898 = vmatmul.msk.f32.vlgmr.msrb.gmra.mxu2 %vm288_vm1, %v908_v24  ;;  %v919_v24 = vld [vmem:[#allocation2 + $0x5a] sm:$0xff] }
  0x6c   : > { %3939 = vmatmul.msk.f32.gmra.mxu3 %vm288_vm1, %v1235_v25  ;;  %v1246_v25 = vld [vmem:[#allocation2 + $0x73] sm:$0xff] }
  0x6f   : > { %3978 = vmatmul.msk.f32.vlgmr.msrb.gmra.mxu0 %vm288_vm1, %v1560_v26 }
  0x71   : > { %3859 = vmatmul.msk.f32.gmra.mxu1 %vm288_vm1, %v333_v27  ;;  %v1571_v27 = vld [vmem:[#allocation2 + $0x6c] sm:$0xff] }
  0x73   : > { %3899 = vmatmul.msk.f32.gmra.mxu2 %vm288_vm1, %v909_v28 }
  0x74   : > { %3940 = vmatmul.msk.f32.gmra.mxu3 %vm288_vm1, %v1236_v29 }
  0x77   : > { %3979 = vmatmul.msk.f32.gmra.mxu0 %vm288_vm1, %v1561_v30  ;;  %v344_v30 = vld [vmem:[#allocation2 + $0x60] sm:$0xff] }
  0x79   : > { %3860 = vmatmul.msk.f32.gmra.mxu1 %vm288_vm1, %v334_v31 }
  0x7b   : > { %3900 = vmatmul.msk.f32.gmra.mxu2 %vm288_vm1, %v910_v32  ;;  %v920_v32 = vld [vmem:[#allocation2 + $0x62] sm:$0xff] }
  0x7c   : > { %3941 = vmatmul.msk.f32.gmra.mxu3 %vm288_vm1, %v1237_v33  ;;  %v1247_v33 = vld [vmem:[#allocation2 + $0x7b] sm:$0xff] }
  0x7f   : > { %3980 = vmatmul.msk.f32.gmra.mxu0 %vm288_vm1, %v1562_v34 }
  0x81   : > { %3861 = vmatmul.msk.f32.gmra.mxu1 %vm288_vm1, %v335_v35  ;;  %v1572_v35 = vld [vmem:[#allocation2 + $0x74] sm:$0xff] }
  0x83   : > { %3901 = vmatmul.msk.f32.gmra.mxu2 %vm288_vm1, %v911_v36 }
  0x84   : > { %3942 = vmatmul.msk.f32.gmra.mxu3 %vm288_vm1, %v1238_v37 }
  0x87   : > { %3981 = vmatmul.msk.f32.gmra.mxu0 %vm288_vm1, %v1563_v38  ;;  %v345_v38 = vld [vmem:[#allocation2 + $0x68] sm:$0xff] }
  0x89   : > { %3862 = vmatmul.msk.f32.gmra.mxu1 %vm288_vm1, %v336_v39 }
  0x8b   : > { %3902 = vmatmul.msk.f32.gmra.mxu2 %vm288_vm1, %v912_v40  ;;  %v921_v40 = vld [vmem:[#allocation2 + $0x6a] sm:$0xff] }
  0x8c   : > { %3943 = vmatmul.msk.f32.gmra.mxu3 %vm288_vm1, %v1239_v41  ;;  %v1248_v41 = vld [vmem:[#allocation2 + $0x83] sm:$0xff] }
  0x8f   : > { %3982 = vmatmul.msk.f32.gmra.mxu0 %vm288_vm1, %v1564_v42 }
  0x91   : > { %3863 = vmatmul.msk.f32.gmra.mxu1 %vm288_vm1, %v4430_v43 }
  0x93   : > { %3903 = vmatmul.msk.f32.gmra.mxu2 %vm288_vm1, %v913_v44  ;;  %v1573_v44 = vld [vmem:[#allocation2 + $0x7c] sm:$0xff] }
  0x94   : > { %3944 = vmatmul.msk.f32.gmra.mxu3 %vm288_vm1, %v1240_v45 }
  0x96   : > { %v4437_v47 = vpop.f32.mrf.mxu1 }
  0x97   : > { %3983 = vmatmul.msk.f32.gmra.mxu0 %vm288_vm1, %v1565_v46 }
  0x99   : > { %3864 = vmatmul.msk.f32.gmra.mxu1 %vm288_vm1, %v338_v48  ;;  %v346_v48 = vld [vmem:[#allocation2 + $0x70] sm:$0xff] }
  0x9b   : > { %3904 = vmatmul.msk.f32.gmra.mxu2 %vm288_vm1, %v914_v49 }
  0x9c   : > { %v4442_v51 = vpop.f32.mrf.mxu0  ;;  %3945 = vmatmul.msk.f32.gmra.mxu3 %vm288_vm1, %v1241_v50  ;;  %v922_v50 = vld [vmem:[#allocation2 + $0x72] sm:$0xff] }
  0x9e   : > { %v4445_v53 = vpop.f32.mrf.mxu2  ;;  %v4447_v54 = vpop.f32.mrf.mxu1 }
  0x9f   : > { %3984 = vmatmul.msk.f32.gmra.mxu0 %vm288_vm1, %v1566_v52  ;;  %v1249_v52 = vld [vmem:[#allocation2 + $0x8b] sm:$0xff] }
  0xa1   : > { %3865 = vmatmul.msk.f32.gmra.mxu1 %vm288_vm1, %v339_v55 }
  0xa3   : > { %3905 = vmatmul.msk.f32.gmra.mxu2 %vm288_vm1, %v915_v56  ;;  %v1574_v56 = vld [vmem:[#allocation2 + $0x84] sm:$0xff] }
  0xa4   : > { %v4452_v58 = vpop.f32.mrf.mxu0  ;;  %3946 = vmatmul.msk.f32.gmra.mxu3 %vm288_vm1, %v1242_v57 }
  0xa6   : > { %v4455_v60 = vpop.f32.mrf.mxu2  ;;  %v4457_v61 = vpop.f32.mrf.mxu1 }
  0xa7   : > { %3985 = vmatmul.msk.f32.gmra.mxu0 %vm288_vm1, %v1567_v59  ;;  %v4460_v63 = vpop.f32.mrf.mxu3 }
  0xa9   : > { %3866 = vmatmul.msk.f32.gmra.mxu1 %vm288_vm1, %v340_v62  ;;  %v347_v62 = vld [vmem:[#allocation2 + $0x78] sm:$0xff] }
  0xab   : > { %3906 = vmatmul.msk.f32.gmra.mxu2 %vm288_vm1, %v916_v0 }
  0xac   : > { %v4464_v2 = vpop.f32.mrf.mxu0  ;;  %3947 = vmatmul.msk.f32.gmra.mxu3 %vm288_vm1, %v1243_v1  ;;  %v923_v1 = vld [vmem:[#allocation2 + $0x7a] sm:$0xff] }
  0xae   : > { %v4467_v4 = vpop.f32.mrf.mxu2  ;;  %v4469_v5 = vpop.f32.mrf.mxu1 }
  0xaf   : > { %3986 = vmatmul.msk.f32.gmra.mxu0 %vm288_vm1, %v1568_v3  ;;  %v4472_v7 = vpop.f32.mrf.mxu3  ;;  %v1250_v3 = vld [vmem:[#allocation2 + $0x93] sm:$0xff] }
  0xb1   : > { %3867 = vmatmul.msk.f32.gmra.mxu1 %vm288_vm1, %v341_v6 }
  0xb3   : > { %3907 = vmatmul.msk.f32.gmra.mxu2 %vm288_vm1, %v917_v8  ;;  %v1575_v8 = vld [vmem:[#allocation2 + $0x8c] sm:$0xff] }
  0xb4   : > { %v4476_v10 = vpop.f32.mrf.mxu0  ;;  %3948 = vmatmul.msk.f32.gmra.mxu3 %vm288_vm1, %v1244_v9 }
  0xb6   : > { %v4479_v12 = vpop.f32.mrf.mxu2  ;;  %v4481_v13 = vpop.f32.mrf.mxu1 }
  0xb7   : > { %3987 = vmatmul.msk.f32.gmra.mxu0 %vm288_vm1, %v1569_v11  ;;  %v4484_v15 = vpop.f32.mrf.mxu3 }
  0xb9   : > { %3868 = vmatmul.msk.f32.gmra.mxu1 %vm288_vm1, %v342_v14  ;;  %v348_v14 = vld [vmem:[#allocation2 + $0x80] sm:$0xff] }
  0xbb   : > { %3908 = vmatmul.msk.f32.gmra.mxu2 %vm288_vm1, %v918_v16 }
  0xbc   : > { %v4488_v18 = vpop.f32.mrf.mxu0  ;;  %3949 = vmatmul.msk.f32.gmra.mxu3 %vm288_vm1, %v1245_v17  ;;  %v924_v17 = vld [vmem:[#allocation2 + $0x82] sm:$0xff] }
  0xbe   : > { %v4491_v20 = vpop.f32.mrf.mxu2  ;;  %v4493_v21 = vpop.f32.mrf.mxu1 }
  0xbf   : > { %3988 = vmatmul.msk.f32.gmra.mxu0 %vm288_vm1, %v1570_v19  ;;  %v4496_v23 = vpop.f32.mrf.mxu3  ;;  %v1251_v19 = vld [vmem:[#allocation2 + $0x9b] sm:$0xff] }
  0xc1   : > { %3869 = vmatmul.msk.f32.gmra.mxu1 %vm288_vm1, %v343_v22 }
  0xc3   : > { %3909 = vmatmul.msk.f32.gmra.mxu2 %vm288_vm1, %v919_v24  ;;  %v1576_v24 = vld [vmem:[#allocation2 + $0x94] sm:$0xff] }
  0xc4   : > { %v4500_v26 = vpop.f32.mrf.mxu0  ;;  %3950 = vmatmul.msk.f32.gmra.mxu3 %vm288_vm1, %v1246_v25 }
  0xc6   : > { %v4503_v28 = vpop.f32.mrf.mxu2  ;;  %v4505_v29 = vpop.f32.mrf.mxu1 }
  0xc7   : > { %3989 = vmatmul.msk.f32.gmra.mxu0 %vm288_vm1, %v1571_v27  ;;  %v4508_v31 = vpop.f32.mrf.mxu3 }
  0xc9   : > { %3870 = vmatmul.msk.f32.gmra.mxu1 %vm288_vm1, %v344_v30 }
  0xcb   : > { %3910 = vmatmul.msk.f32.gmra.mxu2 %vm288_vm1, %v920_v32  ;;  %v349_v32 = vld [vmem:[#allocation2 + $0x88] sm:$0xff] }
  0xcc   : > { %v4512_v34 = vpop.f32.mrf.mxu0  ;;  %3951 = vmatmul.msk.f32.gmra.mxu3 %vm288_vm1, %v1247_v33 }
  0xce   : > { %v4515_v36 = vpop.f32.mrf.mxu2  ;;  %v4517_v37 = vpop.f32.mrf.mxu1 }
  0xcf   : > { %3990 = vmatmul.msk.f32.gmra.mxu0 %vm288_vm1, %v1572_v35  ;;  %v4520_v39 = vpop.f32.mrf.mxu3 }
  0xd1   : > { %3871 = vmatmul.msk.f32.gmra.mxu1 %vm288_vm1, %v345_v38  ;;  %v925_v38 = vld [vmem:[#allocation2 + $0x8a] sm:$0xff] }
  0xd3   : > { %3911 = vmatmul.msk.f32.gmra.mxu2 %vm288_vm1, %v921_v40 }
  0xd4   : > { %v4524_v42 = vpop.f32.mrf.mxu0  ;;  %3952 = vmatmul.msk.f32.gmra.mxu3 %vm288_vm1, %v1248_v41  ;;  %v1252_v41 = vld [vmem:[#allocation2 + $0xa3] sm:$0xff] }
  0xd6   : > { %v4527_v45 = vpop.f32.mrf.mxu2  ;;  %v4529_v46 = vpop.f32.mrf.mxu1 }
  0xd7   : > { %3991 = vmatmul.msk.f32.gmra.mxu0 %vm288_vm1, %v1573_v44  ;;  %v4532_v49 = vpop.f32.mrf.mxu3 }
  0xd9   : > { %3872 = vmatmul.msk.f32.gmra.mxu1 %vm288_vm1, %v346_v48 }
  0xdb   : > { %3912 = vmatmul.msk.f32.gmra.mxu2 %vm288_vm1, %v922_v50 }
  0xdc   : > { %v4536_v55 = vpop.f32.mrf.mxu0  ;;  %3953 = vmatmul.msk.f32.gmra.mxu3 %vm288_vm1, %v1249_v52 }
  0xde   : > { %v4539_v57 = vpop.f32.mrf.mxu2  ;;  %v4541_v59 = vpop.f32.mrf.mxu1 }
  0xdf   : > { %3992 = vmatmul.msk.f32.gmra.mxu0 %vm288_vm1, %v1574_v56  ;;  %v4544_v0 = vpop.f32.mrf.mxu3 }
  0xe1   : > { %3873 = vmatmul.msk.f32.gmra.mxu1 %vm288_vm1, %v347_v62  ;;  %v350_v62 = vld [vmem:[#allocation2 + $0x90] sm:$0xff] }
  0xe3   : > { %3913 = vmatmul.msk.f32.gmra.mxu2 %vm288_vm1, %v923_v1 }
  0xe4   : > { %v4548_v6 = vpop.f32.mrf.mxu0  ;;  %3954 = vmatmul.msk.f32.gmra.mxu3 %vm288_vm1, %v1250_v3 }
  0xe6   : > { %v4551_v9 = vpop.f32.mrf.mxu2  ;;  %v794_v11 = vpop.f32.mrf.mxu1 }
  0xe7   : > { %3993 = vmatmul.msk.f32.gmra.mxu0 %vm288_vm1, %v1575_v8  ;;  %v1408_v16 = vpop.f32.mrf.mxu3  ;;  %v795_v25 = vadd.f32 %v794_v11, %v4442_v51  ;;  %v1577_v51 = vld [vmem:[#allocation2 + $0x9c] sm:$0xff]  ;;  %v926_v8 = vld [vmem:[#allocation2 + $0x92] sm:$0xff] }
  0xe9   : > { %3874 = vmatmul.msk.f32.gmra.mxu1 %vm288_vm1, %v348_v14  ;;  %v1253_v14 = vld [vmem:[#allocation2 + $0xab] sm:$0xff] }
  0xeb   : > { %3914 = vmatmul.msk.f32.gmra.mxu2 %vm288_vm1, %v924_v17 }
  0xec   : > { %v1734_v22 = vpop.f32.mrf.mxu0  ;;  %3955 = vmatmul.msk.f32.gmra.mxu3 %vm288_vm1, %v1251_v19 }
  0xee   : > { %v1082_v27 = vpop.f32.mrf.mxu2  ;;  %v797_v30 = vpop.f32.mrf.mxu1 }
  0xef   : > { %v1196_v33 = vadd.f32 %v1082_v27, %v795_v25  ;;  %3994 = vmatmul.msk.f32.gmra.mxu0 %vm288_vm1, %v1576_v24  ;;  %v1411_v35 = vpop.f32.mrf.mxu3  ;;  %v798_v50 = vadd.f32 %v797_v30, %v4452_v58  ;;  %v1578_v58 = vld [vmem:[#allocation2 + $0xa4] sm:$0xff]  ;;  %v351_v25 = vld [vmem:[#allocation2 + $0x98] sm:$0xff] }
  0xf1   : > { %v1522_v40 = vadd.f32 %v1408_v16, %v1196_v33  ;;  %3875 = vmatmul.msk.f32.gmra.mxu1 %vm288_vm1, %v349_v32  ;;  %v927_v32 = vld [vmem:[#allocation2 + $0x9a] sm:$0xff] }
  0xf3   : > { %v4560_v44 = vadd.f32 %v1734_v22, %v1522_v40  ;;  %3915 = vmatmul.msk.f32.gmra.mxu2 %vm288_vm1, %v925_v38 }
  0xf4   : > { %v1737_v48 = vpop.f32.mrf.mxu0  ;;  %3956 = vmatmul.msk.f32.gmra.mxu3 %vm288_vm1, %v1252_v41 }
  0xf6   : > { %v1085_v52 = vpop.f32.mrf.mxu2  ;;  %v800_v56 = vpop.f32.mrf.mxu1 }
  0xf7   : > { %v1197_v1 = vadd.f32 %v1085_v52, %v798_v50  ;;  %3995 = vmatmul.msk.f32.gmra.mxu0 %vm288_vm1, %v1577_v51  ;;  %v1414_v3 = vpop.f32.mrf.mxu3  ;;  %v801_v19 = vadd.f32 %v800_v56, %v4464_v2  ;;  %v1579_v2 = vld [vmem:[#allocation2 + $0xac] sm:$0xff]  ;;  %v352_v50 = vld [vmem:[#allocation2 + $0xa0] sm:$0xff] }
  0xf9   : > { %v1523_v11 = vadd.f32 %v1411_v35, %v1197_v1  ;;  %3876 = vmatmul.msk.f32.gmra.mxu1 %vm288_vm1, %v350_v62  ;;  %v1254_v35 = vld [vmem:[#allocation2 + $0xb3] sm:$0xff]  ;;  %v928_v62 = vld [vmem:[#allocation2 + $0xa2] sm:$0xff] }
  0xfb   : > { %v4567_v16 = vadd.f32 %v1737_v48, %v1523_v11  ;;  %3916 = vmatmul.msk.f32.gmra.mxu2 %vm288_vm1, %v926_v8 }
  0xfc   : > { %v1740_v17 = vpop.f32.mrf.mxu0  ;;  %3957 = vmatmul.msk.f32.gmra.mxu3 %vm288_vm1, %v1253_v14 }
  0xfe   : > { %v1088_v22 = vpop.f32.mrf.mxu2  ;;  %v803_v24 = vpop.f32.mrf.mxu1 }
  0xff   : > { %v1198_v27 = vadd.f32 %v1088_v22, %v801_v19  ;;  %3996 = vmatmul.msk.f32.gmra.mxu0 %vm288_vm1, %v1578_v58  ;;  %v1417_v30 = vpop.f32.mrf.mxu3  ;;  %v804_v41 = vadd.f32 %v803_v24, %v4476_v10  ;;  %v1580_v10 = vld [vmem:[#allocation2 + $0xb4] sm:$0xff]  ;;  %v353_v19 = vld [vmem:[#allocation2 + $0xa8] sm:$0xff] }
 0x101   : > { %v1524_v33 = vadd.f32 %v1414_v3, %v1198_v27  ;;  %3877 = vmatmul.msk.f32.gmra.mxu1 %vm288_vm1, %v351_v25  ;;  %v1255_v3 = vld [vmem:[#allocation2 + $0xbb] sm:$0xff]  ;;  %v929_v25 = vld [vmem:[#allocation2 + $0xaa] sm:$0xff] }
 0x103   : > { %v4574_v38 = vadd.f32 %v1740_v17, %v1524_v33  ;;  %3917 = vmatmul.msk.f32.gmra.mxu2 %vm288_vm1, %v927_v32 }
 0x104   : > { %v1743_v40 = vpop.f32.mrf.mxu0  ;;  %3958 = vmatmul.msk.f32.gmra.mxu3 %vm288_vm1, %v1254_v35 }
 0x106   : > { %v1091_v48 = vpop.f32.mrf.mxu2  ;;  %v806_v51 = vpop.f32.mrf.mxu1 }
 0x107   : > { %v1199_v52 = vadd.f32 %v1091_v48, %v804_v41  ;;  %3997 = vmatmul.msk.f32.gmra.mxu0 %vm288_vm1, %v1579_v2  ;;  %v1420_v56 = vpop.f32.mrf.mxu3  ;;  %v807_v14 = vadd.f32 %v806_v51, %v4488_v18  ;;  %v1581_v18 = vld [vmem:[#allocation2 + $0xbc] sm:$0xff]  ;;  %v354_v41 = vld [vmem:[#allocation2 + $0xb0] sm:$0xff] }
 0x109   : > { %v1525_v1 = vadd.f32 %v1417_v30, %v1199_v52  ;;  %3878 = vmatmul.msk.f32.gmra.mxu1 %vm288_vm1, %v352_v50  ;;  %v1256_v30 = vld [vmem:[#allocation2 + $0xc3] sm:$0xff]  ;;  %v930_v50 = vld [vmem:[#allocation2 + $0xb2] sm:$0xff] }
 0x10b   : > { %v4581_v8 = vadd.f32 %v1743_v40, %v1525_v1  ;;  %3918 = vmatmul.msk.f32.gmra.mxu2 %vm288_vm1, %v928_v62 }
 0x10c   : > { %v1746_v11 = vpop.f32.mrf.mxu0  ;;  %3959 = vmatmul.msk.f32.gmra.mxu3 %vm288_vm1, %v1255_v3 }
 0x10e   : > { %v1094_v17 = vpop.f32.mrf.mxu2  ;;  %v809_v58 = vpop.f32.mrf.mxu1 }
 0x10f   : > { %v1200_v22 = vadd.f32 %v1094_v17, %v807_v14  ;;  %3998 = vmatmul.msk.f32.gmra.mxu0 %vm288_vm1, %v1580_v10  ;;  %v1423_v24 = vpop.f32.mrf.mxu3  ;;  %v810_v35 = vadd.f32 %v809_v58, %v4500_v26  ;;  %v1582_v26 = vld [vmem:[#allocation2 + $0xc4] sm:$0xff]  ;;  %v355_v14 = vld [vmem:[#allocation2 + $0xb8] sm:$0xff] }
 0x111   : > { %v1526_v27 = vadd.f32 %v1420_v56, %v1200_v22  ;;  %3879 = vmatmul.msk.f32.gmra.mxu1 %vm288_vm1, %v353_v19  ;;  %v1257_v56 = vld [vmem:[#allocation2 + $0xcb] sm:$0xff]  ;;  %v931_v19 = vld [vmem:[#allocation2 + $0xba] sm:$0xff] }
 0x113   : > { %v4588_v32 = vadd.f32 %v1746_v11, %v1526_v27  ;;  %3919 = vmatmul.msk.f32.gmra.mxu2 %vm288_vm1, %v929_v25 }
 0x114   : > { %v1749_v33 = vpop.f32.mrf.mxu0  ;;  %3960 = vmatmul.msk.f32.gmra.mxu3 %vm288_vm1, %v1256_v30 }
 0x116   : > { %v1097_v40 = vpop.f32.mrf.mxu2  ;;  %v812_v2 = vpop.f32.mrf.mxu1 }
 0x117   : > { %v1201_v48 = vadd.f32 %v1097_v40, %v810_v35  ;;  %3999 = vmatmul.msk.f32.gmra.mxu0 %vm288_vm1, %v1581_v18  ;;  %v1426_v51 = vpop.f32.mrf.mxu3  ;;  %v813_v3 = vadd.f32 %v812_v2, %v4512_v34  ;;  %v1583_v34 = vld [vmem:[#allocation2 + $0xcc] sm:$0xff]  ;;  %v356_v35 = vld [vmem:[#allocation2 + $0xc0] sm:$0xff] }
 0x119   : > { %v1527_v52 = vadd.f32 %v1423_v24, %v1201_v48  ;;  %3880 = vmatmul.msk.f32.gmra.mxu1 %vm288_vm1, %v354_v41  ;;  %v1258_v24 = vld [vmem:[#allocation2 + $0xd3] sm:$0xff]  ;;  %v932_v41 = vld [vmem:[#allocation2 + $0xc2] sm:$0xff] }
 0x11b   : > { %v4595_v62 = vadd.f32 %v1749_v33, %v1527_v52  ;;  %3920 = vmatmul.msk.f32.gmra.mxu2 %vm288_vm1, %v930_v50 }
 0x11c   : > { %v1752_v1 = vpop.f32.mrf.mxu0  ;;  %3961 = vmatmul.msk.f32.gmra.mxu3 %vm288_vm1, %v1257_v56 }
 0x11e   : > { %v1100_v11 = vpop.f32.mrf.mxu2  ;;  %v815_v10 = vpop.f32.mrf.mxu1 }
 0x11f   : > { %v1202_v17 = vadd.f32 %v1100_v11, %v813_v3  ;;  %4000 = vmatmul.msk.f32.gmra.mxu0 %vm288_vm1, %v1582_v26  ;;  %v1429_v58 = vpop.f32.mrf.mxu3  ;;  %v816_v30 = vadd.f32 %v815_v10, %v4524_v42  ;;  %v1584_v42 = vld [vmem:[#allocation2 + $0xd4] sm:$0xff]  ;;  %v357_v3 = vld [vmem:[#allocation2 + $0xc8] sm:$0xff] }
 0x121   : > { %v1528_v22 = vadd.f32 %v1426_v51, %v1202_v17  ;;  %3881 = vmatmul.msk.f32.gmra.mxu1 %vm288_vm1, %v355_v14  ;;  %v1259_v51 = vld [vmem:[#allocation2 + $0xdb] sm:$0xff]  ;;  %v933_v14 = vld [vmem:[#allocation2 + $0xca] sm:$0xff] }
 0x123   : > { %v4602_v25 = vadd.f32 %v1752_v1, %v1528_v22  ;;  %3921 = vmatmul.msk.f32.gmra.mxu2 %vm288_vm1, %v931_v19 }
 0x124   : > { %v1755_v27 = vpop.f32.mrf.mxu0  ;;  %3962 = vmatmul.msk.f32.gmra.mxu3 %vm288_vm1, %v1258_v24 }
 0x126   : > { %v1103_v33 = vpop.f32.mrf.mxu2  ;;  %v818_v18 = vpop.f32.mrf.mxu1 }
 0x127   : > { %v1203_v40 = vadd.f32 %v1103_v33, %v816_v30  ;;  %4001 = vmatmul.msk.f32.gmra.mxu0 %vm288_vm1, %v1583_v34  ;;  %v1432_v2 = vpop.f32.mrf.mxu3  ;;  %v819_v56 = vadd.f32 %v818_v18, %v4536_v55  ;;  %v1585_v55 = vld [vmem:[#allocation2 + $0xdc] sm:$0xff]  ;;  %v358_v30 = vld [vmem:[#allocation2 + $0xd0] sm:$0xff] }
 0x129   : > { %v1529_v48 = vadd.f32 %v1429_v58, %v1203_v40  ;;  %3882 = vmatmul.msk.f32.gmra.mxu1 %vm288_vm1, %v356_v35  ;;  %v1260_v58 = vld [vmem:[#allocation2 + $0xe3] sm:$0xff]  ;;  %v934_v35 = vld [vmem:[#allocation2 + $0xd2] sm:$0xff] }
 0x12b   : > { %v4609_v50 = vadd.f32 %v1755_v27, %v1529_v48  ;;  %3922 = vmatmul.msk.f32.gmra.mxu2 %vm288_vm1, %v932_v41 }
 0x12c   : > { %v1758_v52 = vpop.f32.mrf.mxu0  ;;  %3963 = vmatmul.msk.f32.gmra.mxu3 %vm288_vm1, %v1259_v51 }
 0x12e   : > { %v1106_v1 = vpop.f32.mrf.mxu2  ;;  %v821_v26 = vpop.f32.mrf.mxu1 }
 0x12f   : > { %v1204_v11 = vadd.f32 %v1106_v1, %v819_v56  ;;  %4002 = vmatmul.msk.f32.gmra.mxu0 %vm288_vm1, %v1584_v42  ;;  %v1435_v10 = vpop.f32.mrf.mxu3  ;;  %v822_v24 = vadd.f32 %v821_v26, %v4548_v6  ;;  %v1586_v6 = vld [vmem:[#allocation2 + $0xe4] sm:$0xff]  ;;  %v359_v56 = vld [vmem:[#allocation2 + $0xd8] sm:$0xff] }
 0x131   : > { %v1530_v17 = vadd.f32 %v1432_v2, %v1204_v11  ;;  %3883 = vmatmul.msk.f32.gmra.mxu1 %vm288_vm1, %v357_v3  ;;  %v1261_v2 = vld [vmem:[#allocation2 + $0xeb] sm:$0xff]  ;;  %v935_v3 = vld [vmem:[#allocation2 + $0xda] sm:$0xff] }
 0x133   : > { %v4616_v19 = vadd.f32 %v1758_v52, %v1530_v17  ;;  %3923 = vmatmul.msk.f32.gmra.mxu2 %vm288_vm1, %v933_v14 }
 0x134   : > { %v1761_v22 = vpop.f32.mrf.mxu0  ;;  %3964 = vmatmul.msk.f32.gmra.mxu3 %vm288_vm1, %v1260_v58 }
 0x136   : > { %v1109_v27 = vpop.f32.mrf.mxu2  ;;  %v824_v34 = vpop.f32.mrf.mxu1 }
 0x137   : > { %v1205_v33 = vadd.f32 %v1109_v27, %v822_v24  ;;  %4003 = vmatmul.msk.f32.gmra.mxu0 %vm288_vm1, %v1585_v55  ;;  %v1438_v18 = vpop.f32.mrf.mxu3  ;;  %v825_v51 = vadd.f32 %v824_v34, %v4437_v47  ;;  %v1587_v47 = vld [vmem:[#allocation2 + $0xec] sm:$0xff]  ;;  %v360_v24 = vld [vmem:[#allocation2 + $0xe0] sm:$0xff] }
 0x139   : > { %v1531_v40 = vadd.f32 %v1435_v10, %v1205_v33  ;;  %3884 = vmatmul.msk.f32.gmra.mxu1 %vm288_vm1, %v358_v30  ;;  %v1262_v10 = vld [vmem:[#allocation2 + $0xf3] sm:$0xff]  ;;  %v936_v30 = vld [vmem:[#allocation2 + $0xe2] sm:$0xff] }
 0x13b   : > { %v4623_v41 = vadd.f32 %v1761_v22, %v1531_v40  ;;  %3924 = vmatmul.msk.f32.gmra.mxu2 %vm288_vm1, %v934_v35 }
 0x13c   : > { %v1764_v48 = vpop.f32.mrf.mxu0  ;;  %3965 = vmatmul.msk.f32.gmra.mxu3 %vm288_vm1, %v1261_v2 }
 0x13e   : > { %v1112_v52 = vpop.f32.mrf.mxu2  ;;  %v827_v42 = vpop.f32.mrf.mxu1 }
 0x13f   : > { %v1206_v1 = vadd.f32 %v1112_v52, %v825_v51  ;;  %4004 = vmatmul.msk.f32.gmra.mxu0 %vm288_vm1, %v1586_v6  ;;  %v1441_v26 = vpop.f32.mrf.mxu3  ;;  %v828_v58 = vadd.f32 %v827_v42, %v4447_v54  ;;  %v1588_v54 = vld [vmem:[#allocation2 + $0xf4] sm:$0xff]  ;;  %v361_v51 = vld [vmem:[#allocation2 + $0xe8] sm:$0xff] }
 0x141   : > { %v1532_v11 = vadd.f32 %v1438_v18, %v1206_v1  ;;  %3885 = vmatmul.msk.f32.gmra.mxu1 %vm288_vm1, %v359_v56  ;;  %v1263_v18 = vld [vmem:[#allocation2 + $0xfb] sm:$0xff]  ;;  %v937_v56 = vld [vmem:[#allocation2 + $0xea] sm:$0xff] }
 0x143   : > { %v4630_v14 = vadd.f32 %v1764_v48, %v1532_v11  ;;  %3925 = vmatmul.msk.f32.gmra.mxu2 %vm288_vm1, %v935_v3 }
 0x144   : > { %v1767_v17 = vpop.f32.mrf.mxu0  ;;  %3966 = vmatmul.msk.f32.gmra.mxu3 %vm288_vm1, %v1262_v10 }
 0x146   : > { %v1115_v22 = vpop.f32.mrf.mxu2  ;;  %v830_v55 = vpop.f32.mrf.mxu1 }
 0x147   : > { %v1207_v27 = vadd.f32 %v1115_v22, %v828_v58  ;;  %4005 = vmatmul.msk.f32.gmra.mxu0 %vm288_vm1, %v1587_v47  ;;  %v1444_v34 = vpop.f32.mrf.mxu3  ;;  %v831_v2 = vadd.f32 %v830_v55, %v4457_v61  ;;  %v1589_v61 = vld [vmem:[#allocation2 + $0xfc] sm:$0xff]  ;;  %v362_v58 = vld [vmem:[#allocation2 + $0xf0] sm:$0xff] }
 0x149   : > { %v1533_v33 = vadd.f32 %v1441_v26, %v1207_v27  ;;  %3886 = vmatmul.msk.f32.gmra.mxu1 %vm288_vm1, %v360_v24  ;;  %v1264_v26 = vld [vmem:[#allocation2 + $0x103] sm:$0xff]  ;;  %v938_v24 = vld [vmem:[#allocation2 + $0xf2] sm:$0xff] }
 0x14b   : > { %v4637_v35 = vadd.f32 %v1767_v17, %v1533_v33  ;;  %3926 = vmatmul.msk.f32.gmra.mxu2 %vm288_vm1, %v936_v30 }
 0x14c   : > { %v1770_v40 = vpop.f32.mrf.mxu0  ;;  %3967 = vmatmul.msk.f32.gmra.mxu3 %vm288_vm1, %v1263_v18 }
 0x14e   : > { %v1118_v48 = vpop.f32.mrf.mxu2  ;;  %v833_v6 = vpop.f32.mrf.mxu1 }
 0x14f   : > { %v1208_v52 = vadd.f32 %v1118_v48, %v831_v2  ;;  %4006 = vmatmul.msk.f32.gmra.mxu0 %vm288_vm1, %v1588_v54  ;;  %v1447_v42 = vpop.f32.mrf.mxu3  ;;  %v834_v10 = vadd.f32 %v833_v6, %v4469_v5  ;;  %v1590_v5 = vld [vmem:[#allocation2 + $0x104] sm:$0xff]  ;;  %v363_v2 = vld [vmem:[#allocation2 + $0xf8] sm:$0xff] }
 0x151   : > { %v1534_v1 = vadd.f32 %v1444_v34, %v1208_v52  ;;  %3887 = vmatmul.msk.f32.gmra.mxu1 %vm288_vm1, %v361_v51  ;;  %v1265_v34 = vld [vmem:[#allocation2 + $0x10b] sm:$0xff]  ;;  %v939_v51 = vld [vmem:[#allocation2 + $0xfa] sm:$0xff] }
 0x153   : > { %v4644_v3 = vadd.f32 %v1770_v40, %v1534_v1  ;;  %3927 = vmatmul.msk.f32.gmra.mxu2 %vm288_vm1, %v937_v56 }
 0x154   : > { %v1773_v11 = vpop.f32.mrf.mxu0  ;;  %3968 = vmatmul.msk.f32.gmra.mxu3 %vm288_vm1, %v1264_v26  ;;  %v284_v26 = vld [vmem:[%s4276_s9 + $0x138] sm:$0xff] }
 0x155   : > { %328 = vst.msk [vmem:[#allocation2 + $0x138] sm:$0xff] %vm288_vm1, %v284_v26 }
 0x156   : > { %v1121_v17 = vpop.f32.mrf.mxu2  ;;  %v836_v47 = vpop.f32.mrf.mxu1 }
 0x157   : > { %v1209_v22 = vadd.f32 %v1121_v17, %v834_v10  ;;  %4007 = vmatmul.msk.f32.gmra.mxu0 %vm288_vm1, %v1589_v61  ;;  %v1450_v55 = vpop.f32.mrf.mxu3  ;;  %v837_v18 = vadd.f32 %v836_v47, %v4481_v13  ;;  %v1591_v13 = vld [vmem:[#allocation2 + $0x10c] sm:$0xff]  ;;  %v364_v17 = vld [vmem:[#allocation2 + $0x100] sm:$0xff] }
 0x159   : > { %v1535_v27 = vadd.f32 %v1447_v42, %v1209_v22  ;;  %3888 = vmatmul.msk.f32.gmra.mxu1 %vm288_vm1, %v362_v58  ;;  %v1266_v42 = vld [vmem:[#allocation2 + $0x113] sm:$0xff]  ;;  %v940_v22 = vld [vmem:[#allocation2 + $0x102] sm:$0xff] }
 0x15b   : > { %v4651_v30 = vadd.f32 %v1773_v11, %v1535_v27  ;;  %3928 = vmatmul.msk.f32.gmra.mxu2 %vm288_vm1, %v938_v24  ;;  %v1267_v24 = vld [vmem:[#allocation2 + $0x11b] sm:$0xff] }
 0x15c   : > { %v1776_v33 = vpop.f32.mrf.mxu0  ;;  %3969 = vmatmul.msk.f32.gmra.mxu3 %vm288_vm1, %v1265_v34  ;;  %v1592_v34 = vld [vmem:[#allocation2 + $0x114] sm:$0xff] }
 0x15e   : > { %v1124_v40 = vpop.f32.mrf.mxu2  ;;  %v839_v54 = vpop.f32.mrf.mxu1 }
 0x15f   : > { %v1210_v48 = vadd.f32 %v1124_v40, %v837_v18  ;;  %4008 = vmatmul.msk.f32.gmra.mxu0 %vm288_vm1, %v1590_v5  ;;  %v1453_v6 = vpop.f32.mrf.mxu3  ;;  %v840_v11 = vadd.f32 %v839_v54, %v4493_v21  ;;  %v365_v54 = vld [vmem:[#allocation2 + $0x108] sm:$0xff] }
 0x161   : > { %v1536_v52 = vadd.f32 %v1450_v55, %v1210_v48  ;;  %3889 = vmatmul.msk.f32.gmra.mxu1 %vm288_vm1, %v363_v2 }
 0x163   : > { %v4658_v56 = vadd.f32 %v1776_v33, %v1536_v52  ;;  %3929 = vmatmul.msk.f32.gmra.mxu2 %vm288_vm1, %v939_v51  ;;  %v285_v33 = vld [vmem:[%s4276_s9 + $0x140] sm:$0xff] }
 0x164   : > { %v1779_v1 = vpop.f32.mrf.mxu0  ;;  %3970 = vmatmul.msk.f32.gmra.mxu3 %vm288_vm1, %v1266_v42  ;;  %329 = vst.msk [vmem:[#allocation2 + $0x140] sm:$0xff] %vm288_vm1, %v285_v33  ;;  %v1268_v52 = vld [vmem:[#allocation2 + $0x123] sm:$0xff] }
 0x166   : > { %v1127_v61 = vpop.f32.mrf.mxu2  ;;  %v842_v10 = vpop.f32.mrf.mxu1 }
 0x167   : > { %v1211_v47 = vadd.f32 %v1127_v61, %v840_v11  ;;  %4009 = vmatmul.msk.f32.gmra.mxu0 %vm288_vm1, %v1591_v13  ;;  %v1456_v58 = vpop.f32.mrf.mxu3  ;;  %v843_v5 = vadd.f32 %v842_v10, %v4505_v29  ;;  %v1593_v29 = vld [vmem:[#allocation2 + $0x11c] sm:$0xff]  ;;  %v366_v61 = vld [vmem:[#allocation2 + $0x110] sm:$0xff] }
 0x169   : > { %v1537_v55 = vadd.f32 %v1453_v6, %v1211_v47  ;;  %3890 = vmatmul.msk.f32.gmra.mxu1 %vm288_vm1, %v364_v17  ;;  %v941_v6 = vld [vmem:[#allocation2 + $0x10a] sm:$0xff]  ;;  %v942_v47 = vld [vmem:[#allocation2 + $0x112] sm:$0xff] }
 0x16b   : > { %v4667_v27 = vadd.f32 %v1779_v1, %v1537_v55  ;;  %3930 = vmatmul.msk.f32.gmra.mxu2 %vm288_vm1, %v940_v22  ;;  %v1269_v22 = vld [vmem:[#allocation2 + $0x12b] sm:$0xff] }
 0x16c   : > { %v1782_v21 = vpop.f32.mrf.mxu0  ;;  %3971 = vmatmul.msk.f32.gmra.mxu3 %vm288_vm1, %v1267_v24 }
 0x16e   : > { %v1130_v18 = vpop.f32.mrf.mxu2  ;;  %v845_v40 = vpop.f32.mrf.mxu1 }
 0x16f   : > { %v1212_v2 = vadd.f32 %v1130_v18, %v843_v5  ;;  %4010 = vmatmul.msk.f32.gmra.mxu0 %vm288_vm1, %v1592_v34  ;;  %v1459_v48 = vpop.f32.mrf.mxu3  ;;  %v846_v13 = vadd.f32 %v845_v40, %v4517_v37  ;;  %v1594_v37 = vld [vmem:[#allocation2 + $0x124] sm:$0xff]  ;;  %v367_v5 = vld [vmem:[#allocation2 + $0x118] sm:$0xff] }
 0x171   : > { %v1538_v51 = vadd.f32 %v1456_v58, %v1212_v2  ;;  %3891 = vmatmul.msk.f32.gmra.mxu1 %vm288_vm1, %v365_v54  ;;  %v943_v54 = vld [vmem:[#allocation2 + $0x11a] sm:$0xff] }
 0x173   : > { %v4676_v42 = vadd.f32 %v1782_v21, %v1538_v51  ;;  %3931 = vmatmul.msk.f32.gmra.mxu2 %vm288_vm1, %v941_v6 }
 0x174   : > { %v1785_v1 = vpop.f32.mrf.mxu0  ;;  %3972 = vmatmul.msk.f32.gmra.mxu3 %vm288_vm1, %v1268_v52 }
 0x176   : > { %v1133_v26 = vpop.f32.mrf.mxu2  ;;  %v848_v11 = vpop.f32.mrf.mxu1 }
 0x177   : > { %v1213_v10 = vadd.f32 %v1133_v26, %v846_v13  ;;  %4011 = vmatmul.msk.f32.gmra.mxu0 %vm288_vm1, %v1593_v29  ;;  %v1462_v17 = vpop.f32.mrf.mxu3  ;;  %v849_v21 = vadd.f32 %v848_v11, %v4529_v46  ;;  %v1595_v46 = vld [vmem:[#allocation2 + $0x12c] sm:$0xff]  ;;  %v368_v13 = vld [vmem:[#allocation2 + $0x120] sm:$0xff] }
 0x179   : > { %v1539_v58 = vadd.f32 %v1459_v48, %v1213_v10  ;;  %3892 = vmatmul.msk.f32.gmra.mxu1 %vm288_vm1, %v366_v61  ;;  %v1270_v48 = vld [vmem:[#allocation2 + $0x133] sm:$0xff]  ;;  %v944_v61 = vld [vmem:[#allocation2 + $0x122] sm:$0xff] }
 0x17b   : > { %v4683_v55 = vadd.f32 %v1785_v1, %v1539_v58  ;;  %3932 = vmatmul.msk.f32.gmra.mxu2 %vm288_vm1, %v942_v47 }
 0x17c   : > { %v1788_v24 = vpop.f32.mrf.mxu0  ;;  %3973 = vmatmul.msk.f32.gmra.mxu3 %vm288_vm1, %v1269_v22 }
 0x17e   : > { %v1136_v34 = vpop.f32.mrf.mxu2  ;;  %v851_v33 = vpop.f32.mrf.mxu1 }
 0x17f   : > { %v1214_v18 = vadd.f32 %v1136_v34, %v849_v21  ;;  %4012 = vmatmul.msk.f32.gmra.mxu0 %vm288_vm1, %v1594_v37  ;;  %v1465_v40 = vpop.f32.mrf.mxu3  ;;  %v852_v52 = vadd.f32 %v851_v33, %v4541_v59  ;;  %v1596_v59 = vld [vmem:[#allocation2 + $0x134] sm:$0xff]  ;;  %v369_v21 = vld [vmem:[#allocation2 + $0x128] sm:$0xff] }
 0x181   : > { %v1540_v2 = vadd.f32 %v1462_v17, %v1214_v18  ;;  %3893 = vmatmul.msk.f32.gmra.mxu1 %vm288_vm1, %v367_v5  ;;  %v1271_v17 = vld [vmem:[#allocation2 + $0x13b] sm:$0xff]  ;;  %v945_v5 = vld [vmem:[#allocation2 + $0x12a] sm:$0xff] }
 0x183   : > { %v4690_v6 = vadd.f32 %v1788_v24, %v1540_v2  ;;  %3933 = vmatmul.msk.f32.gmra.mxu2 %vm288_vm1, %v943_v54  ;;  %v4202_v54 = vmov 0   ;;  %v3190_v2 = vld [vmem:[%s5252_s2] sm:$0xff] }
 0x184   : > { %v1791_v51 = vpop.f32.mrf.mxu0  ;;  %3974 = vmatmul.msk.f32.gmra.mxu3 %vm288_vm1, %v1270_v48  ;;  %4191 = vset.pattern.permute.xlu0 %v4202_v54 }
 0x185   : > { %3230 = vperm.xlu0 %4191, %v3190_v2   ;;  %4192 = vset.pattern.permute.xlu1 %v4202_v54  ;;  %v2865_v2 = vld [vmem:[#allocation2 + $0x30] sm:$0xff] }
 0x186   : > { %v1139_v1 = vpop.f32.mrf.mxu2  ;;  %v854_v29 = vpop.f32.mrf.mxu1  ;;  %4193 = vset.pattern.permute.xlu2 %v4202_v54 }
 0x187   : > { %v1215_v26 = vadd.f32 %v1139_v1, %v852_v52  ;;  %4013 = vmatmul.msk.f32.gmra.mxu0 %vm288_vm1, %v1595_v46  ;;  %v1468_v11 = vpop.f32.mrf.mxu3  ;;  %v855_v22 = vadd.f32 %v854_v29, %v4445_v53  ;;  %v1886_v29 = vld [vmem:[#allocation2 + $0x15] sm:$0xff] }
 0x189   : > { %v1541_v10 = vadd.f32 %v1465_v40, %v1215_v26  ;;  %3894 = vmatmul.msk.f32.gmra.mxu1 %vm288_vm1, %v368_v13  ;;  %v2538_v40 = vld [vmem:[#allocation2 + $0x27] sm:$0xff] }
 0x18b   : > { %v4697_v47 = vadd.f32 %v1791_v51, %v1541_v10  ;;  %3934 = vmatmul.msk.f32.gmra.mxu2 %vm288_vm1, %v944_v61  ;;  %v1597_v51 = vld [vmem:[#allocation2 + $0x13c] sm:$0xff]  ;;  %v2539_v10 = vld [vmem:[#allocation2 + $0x2f] sm:$0xff] }
 0x18c   : > { %v1794_v58 = vpop.f32.mrf.mxu0  ;;  %3975 = vmatmul.msk.f32.gmra.mxu3 %vm288_vm1, %v1271_v17  ;;  %v3191_v17 = vld [vmem:[%s5252_s2 + $0x8] sm:$0xff] }
 0x18d   : > { %3235 = vperm.xlu0 %4191, %v3191_v17  }
 0x18e   : > { %v1142_v24 = vpop.f32.mrf.mxu2  ;;  %v857_v37 = vpop.f32.mrf.mxu1 }
 0x18f   : > { %v1216_v34 = vadd.f32 %v1142_v24, %v855_v22  ;;  %4014 = vmatmul.msk.f32.gmra.mxu0 %vm288_vm1, %v1596_v59  ;;  %v1471_v33 = vpop.f32.mrf.mxu3  ;;  %v858_v46 = vadd.f32 %v857_v37, %v4455_v60  ;;  %v1887_v37 = vld [vmem:[#allocation2 + $0x1d] sm:$0xff] }
 0x191   : > { %v1542_v18 = vadd.f32 %v1468_v11, %v1216_v34  ;;  %3895 = vmatmul.msk.f32.gmra.mxu1 %vm288_vm1, %v369_v21  ;;  %v2212_v11 = vld [vmem:[#allocation2 + $0x26] sm:$0xff] }
 0x193   : > { %v4707_v53 = vadd.f32 %v1794_v58, %v1542_v18  ;;  %3935 = vmatmul.msk.f32.gmra.mxu2 %vm288_vm1, %v945_v5  ;;  %v2540_v18 = vld [vmem:[#allocation2 + $0x37] sm:$0xff] }
 0x194   : > { %v1797_v48 = vpop.f32.mrf.mxu0  ;;  %4098 = vmatmul.msk.f32.vlgmr.msra.gmra.mxu3 %vm288_vm1, %v2538_v40  ;;  %v3192_v40 = vld [vmem:[%s5252_s2 + $0x10] sm:$0xff] }
 0x195   : > { %3240 = vperm.xlu1 %4192, %v3192_v40  }
 0x196   : > { %v1145_v52 = vpop.f32.mrf.mxu2  ;;  %v860_v1 = vpop.f32.mrf.mxu1 }
 0x197   : > { %v1217_v13 = vadd.f32 %v1145_v52, %v858_v46  ;;  %4015 = vmatmul.msk.f32.gmra.mxu0 %vm288_vm1, %v1597_v51  ;;  %v1474_v26 = vpop.f32.mrf.mxu3  ;;  %v861_v59 = vadd.f32 %v860_v1, %v4467_v4  ;;  %v1888_v46 = vld [vmem:[#allocation2 + $0x25] sm:$0xff] }
 0x199   : > { %v1543_v61 = vadd.f32 %v1471_v33, %v1217_v13  ;;  %4018 = vmatmul.msk.f32.vlgmr.msra.gmra.mxu1 %vm288_vm1, %v1886_v29  ;;  %v2213_v33 = vld [vmem:[#allocation2 + $0x2e] sm:$0xff]  ;;  %v2214_v29 = vld [vmem:[#allocation2 + $0x36] sm:$0xff] }
 0x19b   : > { %v4717_v58 = vadd.f32 %v1797_v48, %v1543_v61  ;;  %4058 = vmatmul.msk.f32.vlgmr.msra.gmra.mxu2 %vm288_vm1, %v2212_v11  ;;  %v3193_v11 = vld [vmem:[%s5252_s2 + $0x18] sm:$0xff] }
 0x19c   : > { %v1800_v60 = vpop.f32.mrf.mxu0  ;;  %4099 = vmatmul.msk.f32.gmra.mxu3 %vm288_vm1, %v2539_v10  ;;  %v2866_v10 = vld [vmem:[#allocation2 + $0x38] sm:$0xff] }
 0x19d   : > { %3245 = vperm.xlu1 %4192, %v3193_v11  }
 0x19e   : > { %v1148_v22 = vpop.f32.mrf.mxu2  ;;  %v863_v24 = vpop.f32.mrf.mxu1 }
 0x19f   : > { %v1218_v21 = vadd.f32 %v1148_v22, %v861_v59  ;;  %4138 = vmatmul.msk.f32.vlgmr.msra.gmra.mxu0 %vm288_vm1, %v4430_v43  ;;  %v1477_v34 = vpop.f32.mrf.mxu3  ;;  %v864_v43 = vadd.f32 %v863_v24, %v4479_v12  ;;  %v1889_v22 = vld [vmem:[#allocation2 + $0x2d] sm:$0xff] }
 0x1a1   : > { %v1544_v5 = vadd.f32 %v1474_v26, %v1218_v21  ;;  %4019 = vmatmul.msk.f32.gmra.mxu1 %vm288_vm1, %v1887_v37  ;;  %v2541_v26 = vld [vmem:[#allocation2 + $0x3f] sm:$0xff] }
 0x1a2   : > { %v2215_v21 = vld [vmem:[#allocation2 + $0x3e] sm:$0xff] }
 0x1a3   : > { %v4728_v54 = vadd.f32 %v1800_v60, %v1544_v5  ;;  %4059 = vmatmul.msk.f32.gmra.mxu2 %vm288_vm1, %v2213_v33  ;;  %v2542_v33 = vld [vmem:[#allocation2 + $0x47] sm:$0xff] }
 0x1a4   : > { %v1803_v4 = vpop.f32.mrf.mxu0  ;;  %4100 = vmatmul.msk.f32.gmra.mxu3 %vm288_vm1, %v2540_v18 }
 0x1a6   : > { %v1151_v48 = vpop.f32.mrf.mxu2  ;;  %v866_v51 = vpop.f32.mrf.mxu1 }
 0x1a7   : > { %v1219_v52 = vadd.f32 %v1151_v48, %v864_v43  ;;  %4139 = vmatmul.msk.f32.gmra.mxu0 %vm288_vm1, %v2865_v2  ;;  %v1480_v1 = vpop.f32.mrf.mxu3  ;;  %v867_v17 = vadd.f32 %v866_v51, %v4491_v20  ;;  %v2867_v20 = vld [vmem:[#allocation2 + $0x40] sm:$0xff]  ;;  %v1890_v43 = vld [vmem:[#allocation2 + $0x35] sm:$0xff] }
 0x1a9   : > { %v1545_v13 = vadd.f32 %v1477_v34, %v1219_v52  ;;  %4020 = vmatmul.msk.f32.gmra.mxu1 %vm288_vm1, %v1888_v46  ;;  %v2216_v46 = vld [vmem:[#allocation2 + $0x46] sm:$0xff] }
 0x1ab   : > { %v4738_v61 = vadd.f32 %v1803_v4, %v1545_v13  ;;  %4060 = vmatmul.msk.f32.gmra.mxu2 %vm288_vm1, %v2214_v29 }
 0x1ac   : > { %v1806_v12 = vpop.f32.mrf.mxu0  ;;  %4101 = vmatmul.msk.f32.gmra.mxu3 %vm288_vm1, %v2541_v26 }
 0x1ae   : > { %v1154_v60 = vpop.f32.mrf.mxu2  ;;  %v869_v59 = vpop.f32.mrf.mxu1 }
 0x1af   : > { %v1220_v24 = vadd.f32 %v1154_v60, %v867_v17  ;;  %4140 = vmatmul.msk.f32.gmra.mxu0 %vm288_vm1, %v2866_v10  ;;  %v1483_v37 = vpop.f32.mrf.mxu3  ;;  %v870_v40 = vadd.f32 %v869_v59, %v4503_v28  ;;  %v2868_v28 = vld [vmem:[#allocation2 + $0x48] sm:$0xff]  ;;  %v1891_v10 = vld [vmem:[#allocation2 + $0x3d] sm:$0xff] }
 0x1b0   : > { %v2217_v59 = vld [vmem:[#allocation2 + $0x4e] sm:$0xff] }
 0x1b1   : > { %v1546_v34 = vadd.f32 %v1480_v1, %v1220_v24  ;;  %4021 = vmatmul.msk.f32.gmra.mxu1 %vm288_vm1, %v1889_v22  ;;  %v2543_v1 = vld [vmem:[#allocation2 + $0x4f] sm:$0xff]  ;;  %v2544_v24 = vld [vmem:[#allocation2 + $0x57] sm:$0xff] }
 0x1b3   : > { %v4745_v5 = vadd.f32 %v1806_v12, %v1546_v34  ;;  %4061 = vmatmul.msk.f32.gmra.mxu2 %vm288_vm1, %v2215_v21  ;;  %v2869_v34 = vld [vmem:[#allocation2 + $0x50] sm:$0xff] }
 0x1b4   : > { %v1809_v18 = vpop.f32.mrf.mxu0  ;;  %4102 = vmatmul.msk.f32.gmra.mxu3 %vm288_vm1, %v2542_v33 }
 0x1b6   : > { %v1157_v4 = vpop.f32.mrf.mxu2  ;;  %v872_v2 = vpop.f32.mrf.mxu1 }
 0x1b7   : > { %v1221_v48 = vadd.f32 %v1157_v4, %v870_v40  ;;  %4141 = vmatmul.msk.f32.gmra.mxu0 %vm288_vm1, %v2867_v20  ;;  %v1486_v51 = vpop.f32.mrf.mxu3  ;;  %v873_v26 = vadd.f32 %v872_v2, %v4515_v36  ;;  %v1892_v40 = vld [vmem:[#allocation2 + $0x45] sm:$0xff] }
 0x1b9   : > { %v1547_v52 = vadd.f32 %v1483_v37, %v1221_v48  ;;  %4022 = vmatmul.msk.f32.gmra.mxu1 %vm288_vm1, %v1890_v43  ;;  %v3196_v37 = vld [vmem:[%s5252_s2 + $0x30] sm:$0xff] }
 0x1ba   : > { %3260 = vperm.xlu0 %4191, %v3196_v37   ;;  %v2218_v43 = vld [vmem:[#allocation2 + $0x56] sm:$0xff] }
 0x1bb   : > { %v4752_v29 = vadd.f32 %v1809_v18, %v1547_v52  ;;  %4062 = vmatmul.msk.f32.gmra.mxu2 %vm288_vm1, %v2216_v46  ;;  %v3194_v46 = vld [vmem:[%s5252_s2 + $0x20] sm:$0xff] }
 0x1bc   : > { %v1812_v13 = vpop.f32.mrf.mxu0  ;;  %4103 = vmatmul.msk.f32.gmra.mxu3 %vm288_vm1, %v2543_v1  ;;  %3250 = vperm.xlu2 %4193, %v3194_v46  }
 0x1be   : > { %v1160_v11 = vpop.f32.mrf.mxu2  ;;  %v875_v12 = vpop.f32.mrf.mxu1 }
 0x1bf   : > { %v1222_v17 = vadd.f32 %v1160_v11, %v873_v26  ;;  %4142 = vmatmul.msk.f32.gmra.mxu0 %vm288_vm1, %v2868_v28  ;;  %v1489_v60 = vpop.f32.mrf.mxu3  ;;  %v876_v33 = vadd.f32 %v875_v12, %v4527_v45  ;;  %v3197_v45 = vld [vmem:[%s5252_s2 + $0x38] sm:$0xff]  ;;  %v1893_v12 = vld [vmem:[#allocation2 + $0x4d] sm:$0xff] }
 0x1c0   : > { %3265 = vperm.xlu1 %4192, %v3197_v45   ;;  %v2872_v45 = vld [vmem:[#allocation2 + $0x68] sm:$0xff] }
 0x1c1   : > { %v1548_v22 = vadd.f32 %v1486_v51, %v1222_v17  ;;  %4023 = vmatmul.msk.f32.gmra.mxu1 %vm288_vm1, %v1891_v10  ;;  %v2545_v51 = vld [vmem:[#allocation2 + $0x5f] sm:$0xff] }
 0x1c3   : > { %v4762_v21 = vadd.f32 %v1812_v13, %v1548_v22  ;;  %4063 = vmatmul.msk.f32.gmra.mxu2 %vm288_vm1, %v2217_v59  ;;  %v2870_v13 = vld [vmem:[#allocation2 + $0x58] sm:$0xff]  ;;  %v2546_v22 = vld [vmem:[#allocation2 + $0x67] sm:$0xff] }
 0x1c4   : > { %v1815_v36 = vpop.f32.mrf.mxu0  ;;  %4104 = vmatmul.msk.f32.gmra.mxu3 %vm288_vm1, %v2544_v24  ;;  %v3195_v24 = vld [vmem:[%s5252_s2 + $0x28] sm:$0xff] }
 0x1c5   : > { %3255 = vperm.xlu2 %4193, %v3195_v24   ;;  %v2873_v24 = vld [vmem:[#allocation2 + $0x70] sm:$0xff] }
 0x1c6   : > { %v1163_v18 = vpop.f32.mrf.mxu2  ;;  %v878_v20 = vpop.f32.mrf.mxu1 }
 0x1c7   : > { %v1223_v4 = vadd.f32 %v1163_v18, %v876_v33  ;;  %4143 = vmatmul.msk.f32.gmra.mxu0 %vm288_vm1, %v2869_v34  ;;  %v1492_v2 = vpop.f32.mrf.mxu3  ;;  %v879_v28 = vadd.f32 %v878_v20, %v4539_v57  ;;  %v1894_v20 = vld [vmem:[#allocation2 + $0x55] sm:$0xff] }
 0x1c9   : > { %v1549_v48 = vadd.f32 %v1489_v60, %v1223_v4  ;;  %4024 = vmatmul.msk.f32.gmra.mxu1 %vm288_vm1, %v1892_v40  ;;  %v2219_v60 = vld [vmem:[#allocation2 + $0x5e] sm:$0xff] }
 0x1cb   : > { %v4775_v52 = vadd.f32 %v1815_v36, %v1549_v48  ;;  %4064 = vmatmul.msk.f32.gmra.mxu2 %vm288_vm1, %v2218_v43  ;;  %v2871_v36 = vld [vmem:[#allocation2 + $0x60] sm:$0xff]  ;;  %v2547_v48 = vld [vmem:[#allocation2 + $0x6f] sm:$0xff] }
 0x1cc   : > { %v1818_v1 = vpop.f32.mrf.mxu0  ;;  %4105 = vmatmul.msk.f32.gmra.mxu3 %vm288_vm1, %v2545_v51  ;;  %v3199_v51 = vld [vmem:[%s5252_s2 + $0x48] sm:$0xff] }
 0x1cd   : > { %3275 = vperm.xlu0 %4191, %v3199_v51   ;;  %v2874_v51 = vld [vmem:[#allocation2 + $0x78] sm:$0xff] }
 0x1ce   : > { %v1166_v26 = vpop.f32.mrf.mxu2  ;;  %v881_v11 = vpop.f32.mrf.mxu1 }
 0x1cf   : > { %v1224_v10 = vadd.f32 %v1166_v26, %v879_v28  ;;  %4144 = vmatmul.msk.f32.gmra.mxu0 %vm288_vm1, %v2870_v13  ;;  %v1495_v17 = vpop.f32.mrf.mxu3  ;;  %v882_v34 = vadd.f32 %v881_v11, %v4551_v9  ;;  %v1895_v26 = vld [vmem:[#allocation2 + $0x5d] sm:$0xff] }
 0x1d1   : > { %v1550_v59 = vadd.f32 %v1492_v2, %v1224_v10  ;;  %4025 = vmatmul.msk.f32.gmra.mxu1 %vm288_vm1, %v1893_v12  ;;  %v2220_v2 = vld [vmem:[#allocation2 + $0x66] sm:$0xff]  ;;  %v2221_v10 = vld [vmem:[#allocation2 + $0x6e] sm:$0xff] }
 0x1d3   : > { %v4785_v37 = vadd.f32 %v1818_v1, %v1550_v59  ;;  %4065 = vmatmul.msk.f32.gmra.mxu2 %vm288_vm1, %v2219_v60  ;;  %v2548_v60 = vld [vmem:[#allocation2 + $0x77] sm:$0xff] }
 0x1d4   : > { %v1821_v57 = vpop.f32.mrf.mxu0  ;;  %4106 = vmatmul.msk.f32.gmra.mxu3 %vm288_vm1, %v2546_v22  ;;  %v3200_v59 = vld [vmem:[%s5252_s2 + $0x50] sm:$0xff] }
 0x1d5   : > { %3280 = vperm.xlu1 %4192, %v3200_v59   ;;  %v2875_v59 = vld [vmem:[#allocation2 + $0x80] sm:$0xff] }
 0x1d6   : > { %v1169_v33 = vpop.f32.mrf.mxu2  ;;  %v884_v18 = vpop.f32.mrf.mxu1 }
 0x1d7   : > { %v1225_v40 = vadd.f32 %v1169_v33, %v882_v34  ;;  %4145 = vmatmul.msk.f32.gmra.mxu0 %vm288_vm1, %v2871_v36  ;;  %v1498_v4 = vpop.f32.mrf.mxu3  ;;  %v885_v1 = vadd.f32 %v884_v18, %v4460_v63  ;;  %v1896_v33 = vld [vmem:[#allocation2 + $0x65] sm:$0xff] }
 0x1d9   : > { %v1551_v43 = vadd.f32 %v1495_v17, %v1225_v40  ;;  %4026 = vmatmul.msk.f32.gmra.mxu1 %vm288_vm1, %v1894_v20  ;;  %v2222_v40 = vld [vmem:[#allocation2 + $0x76] sm:$0xff] }
 0x1db   : > { %v4795_v46 = vadd.f32 %v1821_v57, %v1551_v43  ;;  %4066 = vmatmul.msk.f32.gmra.mxu2 %vm288_vm1, %v2220_v2  ;;  %v2549_v2 = vld [vmem:[#allocation2 + $0x7f] sm:$0xff] }
 0x1dc   : > { %v1824_v9 = vpop.f32.mrf.mxu0  ;;  %4107 = vmatmul.msk.f32.gmra.mxu3 %vm288_vm1, %v2547_v48  ;;  %v3198_v43 = vld [vmem:[%s5252_s2 + $0x40] sm:$0xff] }
 0x1dd   : > { %3270 = vperm.xlu2 %4193, %v3198_v43   ;;  %v2876_v43 = vld [vmem:[#allocation2 + $0x88] sm:$0xff] }
 0x1de   : > { %v1172_v13 = vpop.f32.mrf.mxu2  ;;  %v887_v28 = vpop.f32.mrf.mxu1 }
 0x1df   : > { %v1226_v11 = vadd.f32 %v1172_v13, %v885_v1  ;;  %4146 = vmatmul.msk.f32.gmra.mxu0 %vm288_vm1, %v2872_v45  ;;  %v1501_v12 = vpop.f32.mrf.mxu3  ;;  %v888_v57 = vadd.f32 %v887_v28, %v4472_v7  ;;  %v1897_v13 = vld [vmem:[#allocation2 + $0x6d] sm:$0xff] }
 0x1e1   : > { %v1552_v17 = vadd.f32 %v1498_v4, %v1226_v11  ;;  %4027 = vmatmul.msk.f32.gmra.mxu1 %vm288_vm1, %v1895_v26  ;;  %v2223_v11 = vld [vmem:[#allocation2 + $0x7e] sm:$0xff] }
 0x1e3   : > { %v4805_v22 = vadd.f32 %v1824_v9, %v1552_v17  ;;  %4067 = vmatmul.msk.f32.gmra.mxu2 %vm288_vm1, %v2221_v10  ;;  %v2550_v10 = vld [vmem:[#allocation2 + $0x87] sm:$0xff] }
 0x1e4   : > { %v1827_v63 = vpop.f32.mrf.mxu0  ;;  %4108 = vmatmul.msk.f32.gmra.mxu3 %vm288_vm1, %v2548_v60  ;;  %v3202_v17 = vld [vmem:[%s5252_s2 + $0x60] sm:$0xff] }
 0x1e5   : > { %3290 = vperm.xlu0 %4191, %v3202_v17   ;;  %v2877_v17 = vld [vmem:[#allocation2 + $0x90] sm:$0xff] }
 0x1e6   : > { %v1175_v36 = vpop.f32.mrf.mxu2  ;;  %v890_v34 = vpop.f32.mrf.mxu1 }
 0x1e7   : > { %v1227_v18 = vadd.f32 %v1175_v36, %v888_v57  ;;  %4147 = vmatmul.msk.f32.gmra.mxu0 %vm288_vm1, %v2873_v24  ;;  %v1504_v20 = vpop.f32.mrf.mxu3  ;;  %v891_v9 = vadd.f32 %v890_v34, %v4484_v15  ;;  %v1898_v36 = vld [vmem:[#allocation2 + $0x75] sm:$0xff] }
 0x1e9   : > { %v1553_v4 = vadd.f32 %v1501_v12, %v1227_v18  ;;  %4028 = vmatmul.msk.f32.gmra.mxu1 %vm288_vm1, %v1896_v33  ;;  %v2224_v18 = vld [vmem:[#allocation2 + $0x86] sm:$0xff] }
 0x1eb   : > { %v4815_v48 = vadd.f32 %v1827_v63, %v1553_v4  ;;  %4068 = vmatmul.msk.f32.gmra.mxu2 %vm288_vm1, %v2222_v40  ;;  %v2551_v40 = vld [vmem:[#allocation2 + $0x8f] sm:$0xff] }
 0x1ec   : > { %v1830_v7 = vpop.f32.mrf.mxu0  ;;  %4109 = vmatmul.msk.f32.gmra.mxu3 %vm288_vm1, %v2549_v2  ;;  %v3203_v4 = vld [vmem:[%s5252_s2 + $0x68] sm:$0xff] }
 0x1ed   : > { %3295 = vperm.xlu1 %4192, %v3203_v4   ;;  %v2878_v4 = vld [vmem:[#allocation2 + $0x98] sm:$0xff] }
 0x1ee   : > { %v1178_v45 = vpop.f32.mrf.mxu2  ;;  %v893_v1 = vpop.f32.mrf.mxu1 }
 0x1ef   : > { %v1228_v28 = vadd.f32 %v1178_v45, %v891_v9  ;;  %4148 = vmatmul.msk.f32.gmra.mxu0 %vm288_vm1, %v2874_v51  ;;  %v1507_v26 = vpop.f32.mrf.mxu3  ;;  %v894_v63 = vadd.f32 %v893_v1, %v4496_v23  ;;  %v1899_v45 = vld [vmem:[#allocation2 + $0x7d] sm:$0xff] }
 0x1f1   : > { %v1554_v12 = vadd.f32 %v1504_v20, %v1228_v28  ;;  %4029 = vmatmul.msk.f32.gmra.mxu1 %vm288_vm1, %v1897_v13  ;;  %v2225_v28 = vld [vmem:[#allocation2 + $0x8e] sm:$0xff] }
 0x1f3   : > { %v4825_v60 = vadd.f32 %v1830_v7, %v1554_v12  ;;  %4069 = vmatmul.msk.f32.gmra.mxu2 %vm288_vm1, %v2223_v11  ;;  %v2552_v11 = vld [vmem:[#allocation2 + $0x97] sm:$0xff] }
 0x1f4   : > { %v1833_v15 = vpop.f32.mrf.mxu0  ;;  %4110 = vmatmul.msk.f32.gmra.mxu3 %vm288_vm1, %v2550_v10  ;;  %v3201_v12 = vld [vmem:[%s5252_s2 + $0x58] sm:$0xff] }
 0x1f5   : > { %3285 = vperm.xlu2 %4193, %v3201_v12   ;;  %v2879_v12 = vld [vmem:[#allocation2 + $0xa0] sm:$0xff] }
 0x1f6   : > { %v1181_v24 = vpop.f32.mrf.mxu2  ;;  %v896_v57 = vpop.f32.mrf.mxu1 }
 0x1f7   : > { %v1229_v34 = vadd.f32 %v1181_v24, %v894_v63  ;;  %4149 = vmatmul.msk.f32.gmra.mxu0 %vm288_vm1, %v2875_v59  ;;  %v1510_v33 = vpop.f32.mrf.mxu3  ;;  %v897_v7 = vadd.f32 %v896_v57, %v4508_v31  ;;  %v1900_v24 = vld [vmem:[#allocation2 + $0x85] sm:$0xff] }
 0x1f9   : > { %v1555_v20 = vadd.f32 %v1507_v26, %v1229_v34  ;;  %4030 = vmatmul.msk.f32.gmra.mxu1 %vm288_vm1, %v1898_v36  ;;  %v2226_v34 = vld [vmem:[#allocation2 + $0x96] sm:$0xff] }
 0x1fb   : > { %v4835_v2 = vadd.f32 %v1833_v15, %v1555_v20  ;;  %4070 = vmatmul.msk.f32.gmra.mxu2 %vm288_vm1, %v2224_v18  ;;  %v2553_v18 = vld [vmem:[#allocation2 + $0x9f] sm:$0xff] }
 0x1fc   : > { %v1836_v23 = vpop.f32.mrf.mxu0  ;;  %4111 = vmatmul.msk.f32.gmra.mxu3 %vm288_vm1, %v2551_v40  ;;  %v3205_v20 = vld [vmem:[%s5252_s2 + $0x78] sm:$0xff] }
 0x1fd   : > { %3305 = vperm.xlu0 %4191, %v3205_v20   ;;  %v2880_v20 = vld [vmem:[#allocation2 + $0xa8] sm:$0xff] }
 0x1fe   : > { %v1184_v51 = vpop.f32.mrf.mxu2  ;;  %v899_v9 = vpop.f32.mrf.mxu1 }
 0x1ff   : > { %v1230_v1 = vadd.f32 %v1184_v51, %v897_v7  ;;  %4150 = vmatmul.msk.f32.gmra.mxu0 %vm288_vm1, %v2876_v43  ;;  %v1513_v13 = vpop.f32.mrf.mxu3  ;;  %v900_v15 = vadd.f32 %v899_v9, %v4520_v39  ;;  %v1901_v51 = vld [vmem:[#allocation2 + $0x8d] sm:$0xff] }
 0x201   : > { %v1556_v26 = vadd.f32 %v1510_v33, %v1230_v1  ;;  %4031 = vmatmul.msk.f32.gmra.mxu1 %vm288_vm1, %v1899_v45  ;;  %v2227_v1 = vld [vmem:[#allocation2 + $0x9e] sm:$0xff] }
 0x203   : > { %v4845_v10 = vadd.f32 %v1836_v23, %v1556_v26  ;;  %4071 = vmatmul.msk.f32.gmra.mxu2 %vm288_vm1, %v2225_v28  ;;  %v2554_v28 = vld [vmem:[#allocation2 + $0xa7] sm:$0xff] }
 0x204   : > { %v1839_v31 = vpop.f32.mrf.mxu0  ;;  %4112 = vmatmul.msk.f32.gmra.mxu3 %vm288_vm1, %v2552_v11  ;;  %v3206_v26 = vld [vmem:[%s5252_s2 + $0x80] sm:$0xff] }
 0x205   : > { %3310 = vperm.xlu1 %4192, %v3206_v26  }
 0x206   : > { %v1187_v59 = vpop.f32.mrf.mxu2  ;;  %v902_v63 = vpop.f32.mrf.mxu1 }
 0x207   : > { %v1231_v57 = vadd.f32 %v1187_v59, %v900_v15  ;;  %4151 = vmatmul.msk.f32.gmra.mxu0 %vm288_vm1, %v2877_v17  ;;  %v1516_v36 = vpop.f32.mrf.mxu3  ;;  %v903_v23 = vadd.f32 %v902_v63, %v4532_v49  ;;  %v1902_v59 = vld [vmem:[#allocation2 + $0x95] sm:$0xff] }
 0x209   : > { %v1557_v33 = vadd.f32 %v1513_v13, %v1231_v57  ;;  %4032 = vmatmul.msk.f32.gmra.mxu1 %vm288_vm1, %v1900_v24  ;;  %v2228_v57 = vld [vmem:[#allocation2 + $0xa6] sm:$0xff] }
 0x20b   : > { %v4855_v40 = vadd.f32 %v1839_v31, %v1557_v33  ;;  %4072 = vmatmul.msk.f32.gmra.mxu2 %vm288_vm1, %v2226_v34  ;;  %v2555_v34 = vld [vmem:[#allocation2 + $0xaf] sm:$0xff] }
 0x20c   : > { %v1842_v39 = vpop.f32.mrf.mxu0  ;;  %4113 = vmatmul.msk.f32.gmra.mxu3 %vm288_vm1, %v2553_v18  ;;  %v3204_v33 = vld [vmem:[%s5252_s2 + $0x70] sm:$0xff] }
 0x20d   : > { %3300 = vperm.xlu2 %4193, %v3204_v33   ;;  %v3209_v33 = vld [vmem:[%s5252_s2 + $0x98] sm:$0xff] }
 0x20e   : > { %v1190_v43 = vpop.f32.mrf.mxu2  ;;  %v905_v7 = vpop.f32.mrf.mxu1  ;;  %3325 = vperm.xlu1 %4192, %v3209_v33  }
 0x20f   : > { %v1232_v9 = vadd.f32 %v1190_v43, %v903_v23  ;;  %4152 = vmatmul.msk.f32.gmra.mxu0 %vm288_vm1, %v2878_v4  ;;  %v1519_v45 = vpop.f32.mrf.mxu3  ;;  %v906_v31 = vadd.f32 %v905_v7, %v4544_v0  ;;  %v1903_v43 = vld [vmem:[#allocation2 + $0x9d] sm:$0xff] }
 0x211   : > { %v1558_v13 = vadd.f32 %v1516_v36, %v1232_v9  ;;  %4033 = vmatmul.msk.f32.gmra.mxu1 %vm288_vm1, %v1901_v51  ;;  %v2229_v9 = vld [vmem:[#allocation2 + $0xae] sm:$0xff] }
 0x213   : > { %v4865_v11 = vadd.f32 %v1842_v39, %v1558_v13  ;;  %4073 = vmatmul.msk.f32.gmra.mxu2 %vm288_vm1, %v2227_v1  ;;  %v2556_v13 = vld [vmem:[#allocation2 + $0xb7] sm:$0xff] }
 0x214   : > { %v1845_v49 = vpop.f32.mrf.mxu0  ;;  %4114 = vmatmul.msk.f32.gmra.mxu3 %vm288_vm1, %v2554_v28  ;;  %v3208_v28 = vld [vmem:[%s5252_s2 + $0x90] sm:$0xff] }
 0x215   : > { %3320 = vperm.xlu0 %4191, %v3208_v28  }
 0x216   : > { %v1193_v17 = vpop.f32.mrf.mxu2  ;;  %v2060_v15 = vpop.f32.mrf.mxu1 }
 0x217   : > { %v1233_v63 = vadd.f32 %v1193_v17, %v906_v31  ;;  %4153 = vmatmul.msk.f32.gmra.mxu0 %vm288_vm1, %v2879_v12  ;;  %v2712_v24 = vpop.f32.mrf.mxu3  ;;  %v2174_v39 = vadd.f32 %v2060_v15, %v4560_v44 }
 0x219   : > { %v1559_v36 = vadd.f32 %v1519_v45, %v1233_v63  ;;  %4034 = vmatmul.msk.f32.gmra.mxu1 %vm288_vm1, %v1902_v59  ;;  %v3231_v45 = vpop.permute.xlu0 %3230  ;;  %v1904_v59 = vld [vmem:[#allocation2 + $0xa5] sm:$0xff] }
 0x21b   : > { %v4875_v18 = vadd.f32 %v1845_v49, %v1559_v36  ;;  %4074 = vmatmul.msk.f32.gmra.mxu2 %vm288_vm1, %v2228_v57  ;;  %v2881_v49 = vld [vmem:[#allocation2 + $0xb0] sm:$0xff] }
 0x21c   : > { %v3038_v0 = vpop.f32.mrf.mxu0  ;;  %4115 = vmatmul.msk.f32.gmra.mxu3 %vm288_vm1, %v2555_v34  ;;  %v2230_v57 = vld [vmem:[#allocation2 + $0xb6] sm:$0xff]  ;;  %v2557_v34 = vld [vmem:[#allocation2 + $0xbf] sm:$0xff] }
 0x21e   : > { %v2386_v4 = vpop.f32.mrf.mxu2  ;;  %v2063_v23 = vpop.f32.mrf.mxu1 }
 0x21f   : > { %v2500_v7 = vadd.f32 %v2386_v4, %v2174_v39  ;;  %4154 = vmatmul.msk.f32.gmra.mxu0 %vm288_vm1, %v2880_v20  ;;  %v2715_v51 = vpop.f32.mrf.mxu3  ;;  %v2175_v12 = vadd.f32 %v2063_v23, %v4567_v16  ;;  %v2882_v39 = vld [vmem:[#allocation2 + $0xb8] sm:$0xff] }
 0x221   : > { %v2826_v1 = vadd.f32 %v2712_v24, %v2500_v7  ;;  %4035 = vmatmul.msk.f32.gmra.mxu1 %vm288_vm1, %v1903_v43  ;;  %v3236_v16 = vpop.permute.xlu0 %3235 }
 0x223   : > { %v3152_v44 = vadd.f32 %v3038_v0, %v2826_v1  ;;  %4075 = vmatmul.msk.f32.gmra.mxu2 %vm288_vm1, %v2229_v9  ;;  %v1905_v9 = vld [vmem:[#allocation2 + $0xad] sm:$0xff] }
 0x224   : > { %v3041_v26 = vpop.f32.mrf.mxu0  ;;  %4116 = vmatmul.msk.f32.gmra.mxu3 %vm288_vm1, %v2556_v13 }
 0x225   : > { %v3418_v31 = vmul.f32 %v3231_v45, %v3152_v44 }
 0x226   : > { %v2389_v17 = vpop.f32.mrf.mxu2  ;;  %v2066_v15 = vpop.f32.mrf.mxu1 }
 0x227   : > { %3663 = vst.msk [vmem:[%s4891_s16 + $0x14] sm:$0xff] %vm288_vm1, %v3418_v31  ;;  %v2501_v63 = vadd.f32 %v2389_v17, %v2175_v12  ;;  %4155 = vmatmul.msk.f32.gmra.mxu0 %vm288_vm1, %v2881_v49  ;;  %v2718_v24 = vpop.f32.mrf.mxu3  ;;  %v3539_v4 = vmul.f32 %v3418_v31, %v3418_v31  ;;  %v2176_v23 = vadd.f32 %v2066_v15, %v4574_v38  ;;  %v3456_v45 = vsel %vm288_vm1, %v3418_v31, 0.0  ;;  %v2231_v49 = vld [vmem:[#allocation2 + $0xbe] sm:$0xff]  ;;  %v3241_v12 = vpop.permute.xlu1 %3240 }
 0x229   : > { %v2827_v36 = vadd.f32 %v2715_v51, %v2501_v63  ;;  %4036 = vmatmul.msk.f32.gmra.mxu1 %vm288_vm1, %v1904_v59  ;;  %v3577_v17 = vsel %vm288_vm1, %v3539_v4, 0.0  ;;  %v2558_v59 = vld [vmem:[#allocation2 + $0xc7] sm:$0xff] }
 0x22a   : > { %v3207_v63 = vld [vmem:[%s5252_s2 + $0x88] sm:$0xff] }
 0x22b   : > { %v3153_v0 = vadd.f32 %v3041_v26, %v2827_v36  ;;  %4076 = vmatmul.msk.f32.gmra.mxu2 %vm288_vm1, %v2230_v57  ;;  %v3211_v26 = vld [vmem:[%s5252_s2 + $0xa8] sm:$0xff]  ;;  %v3212_v57 = vld [vmem:[%s5252_s2 + $0xb0] sm:$0xff]  ;;  %3315 = vperm.xlu2 %4193, %v3207_v63  }
 0x22c   : > { %v3044_v20 = vpop.f32.mrf.mxu0  ;;  %4117 = vmatmul.msk.f32.gmra.mxu3 %vm288_vm1, %v2557_v34  ;;  %3335 = vperm.xlu0 %4191, %v3211_v26   ;;  %v3215_v26 = vld [vmem:[%s5252_s2 + $0xc8] sm:$0xff] }
 0x22d   : > { %v3419_v43 = vmul.f32 %v3236_v16, %v3153_v0  ;;  %3340 = vperm.xlu1 %4192, %v3212_v57   ;;  %v1907_v57 = vld [vmem:[#allocation2 + $0xbd] sm:$0xff] }
 0x22e   : > { %v2392_v7 = vpop.f32.mrf.mxu2  ;;  %v2069_v51 = vpop.f32.mrf.mxu1 }
 0x22f   : > { %v3457_v1 = vsel %vm288_vm1, %v3419_v43, 0.0  ;;  %v3540_v13 = vmul.f32 %v3419_v43, %v3419_v43  ;;  %3664 = vst.msk [vmem:[%s4891_s16 + $0x1c] sm:$0xff] %vm288_vm1, %v3419_v43  ;;  %v2502_v28 = vadd.f32 %v2392_v7, %v2176_v23  ;;  %4156 = vmatmul.msk.f32.gmra.mxu0 %vm288_vm1, %v2882_v39  ;;  %v2721_v44 = vpop.f32.mrf.mxu3  ;;  %v2177_v16 = vadd.f32 %v2069_v51, %v4581_v8  ;;  %v1906_v23 = vld [vmem:[#allocation2 + $0xb5] sm:$0xff] }
 0x230   : > { %v3458_v38 = vadd.f32 %v3457_v1, %v3456_v45  ;;  %v3214_v45 = vld [vmem:[%s5252_s2 + $0xc0] sm:$0xff] }
 0x231   : > { %v3578_v31 = vsel %vm288_vm1, %v3540_v13, 0.0  ;;  %v2828_v15 = vadd.f32 %v2718_v24, %v2502_v28  ;;  %4037 = vmatmul.msk.f32.gmra.mxu1 %vm288_vm1, %v1905_v9  ;;  %v2883_v24 = vld [vmem:[#allocation2 + $0xc0] sm:$0xff]  ;;  %v2559_v28 = vld [vmem:[#allocation2 + $0xcf] sm:$0xff] }
 0x232   : > { %v3579_v36 = vadd.f32 %v3578_v31, %v3577_v17  ;;  %v2232_v13 = vld [vmem:[#allocation2 + $0xc6] sm:$0xff] }
 0x233   : > { %v3154_v34 = vadd.f32 %v3044_v20, %v2828_v15  ;;  %4077 = vmatmul.msk.f32.gmra.mxu2 %vm288_vm1, %v2231_v49  ;;  %v2884_v31 = vld [vmem:[#allocation2 + $0xc8] sm:$0xff] }
 0x234   : > { %v3047_v33 = vpop.f32.mrf.mxu0  ;;  %4118 = vmatmul.msk.f32.gmra.mxu3 %vm288_vm1, %v2558_v59  ;;  %3350 = vperm.xlu0 %4191, %v3214_v45  }
 0x235   : > { %v3420_v0 = vmul.f32 %v3241_v12, %v3154_v34  ;;  %v3246_v12 = vpop.permute.xlu1 %3245  ;;  %3355 = vperm.xlu1 %4192, %v3215_v26   ;;  %v1908_v26 = vld [vmem:[#allocation2 + $0xc5] sm:$0xff] }
 0x236   : > { %v2395_v39 = vpop.f32.mrf.mxu2  ;;  %v2072_v4 = vpop.f32.mrf.mxu1 }
 0x237   : > { %v3459_v43 = vsel %vm288_vm1, %v3420_v0, 0.0  ;;  %v3541_v7 = vmul.f32 %v3420_v0, %v3420_v0  ;;  %3665 = vst.msk [vmem:[%s4891_s16 + $0x24] sm:$0xff] %vm288_vm1, %v3420_v0  ;;  %v2503_v9 = vadd.f32 %v2395_v39, %v2177_v16  ;;  %4157 = vmatmul.msk.f32.gmra.mxu0 %vm288_vm1, %v2883_v24  ;;  %v2724_v20 = vpop.f32.mrf.mxu3  ;;  %v3217_v16 = vld [vmem:[%s5252_s2 + $0xd8] sm:$0xff]  ;;  %v2233_v39 = vld [vmem:[#allocation2 + $0xce] sm:$0xff] }
 0x238   : > { %v3460_v1 = vadd.f32 %v3459_v43, %v3458_v38  ;;  %v2560_v43 = vld [vmem:[#allocation2 + $0xd7] sm:$0xff] }
 0x239   : > { %v3580_v8 = vsel %vm288_vm1, %v3541_v7, 0.0  ;;  %v2829_v51 = vadd.f32 %v2721_v44, %v2503_v9  ;;  %4038 = vmatmul.msk.f32.gmra.mxu1 %vm288_vm1, %v1906_v23  ;;  %v2178_v44 = vadd.f32 %v2072_v4, %v4588_v32  ;;  %v3251_v32 = vpop.permute.xlu2 %3250  ;;  %v3218_v7 = vld [vmem:[%s5252_s2 + $0xe0] sm:$0xff] }
 0x23a   : > { %v3581_v49 = vadd.f32 %v3580_v8, %v3579_v36 }
 0x23b   : > { %v3155_v17 = vadd.f32 %v3047_v33, %v2829_v51  ;;  %4078 = vmatmul.msk.f32.gmra.mxu2 %vm288_vm1, %v2232_v13  ;;  %v2885_v13 = vld [vmem:[#allocation2 + $0xd0] sm:$0xff] }
 0x23c   : > { %v3050_v38 = vpop.f32.mrf.mxu0  ;;  %4119 = vmatmul.msk.f32.gmra.mxu3 %vm288_vm1, %v2559_v28  ;;  %3365 = vperm.xlu0 %4191, %v3217_v16  }
 0x23d   : > { %v3421_v15 = vmul.f32 %v3246_v12, %v3155_v17  ;;  %3370 = vperm.xlu1 %4192, %v3218_v7  }
 0x23e   : > { %v2398_v59 = vpop.f32.mrf.mxu2  ;;  %v2075_v63 = vpop.f32.mrf.mxu1 }
 0x23f   : > { %v3461_v34 = vsel %vm288_vm1, %v3421_v15, 0.0  ;;  %v3542_v24 = vmul.f32 %v3421_v15, %v3421_v15  ;;  %3666 = vst.msk [vmem:[%s4891_s16 + $0x2c] sm:$0xff] %vm288_vm1, %v3421_v15  ;;  %v2504_v36 = vadd.f32 %v2398_v59, %v2178_v44  ;;  %4158 = vmatmul.msk.f32.gmra.mxu0 %vm288_vm1, %v2884_v31  ;;  %v2727_v33 = vpop.f32.mrf.mxu3  ;;  %v2179_v8 = vadd.f32 %v2075_v63, %v4595_v62  ;;  %v3220_v31 = vld [vmem:[%s5252_s2 + $0xf0] sm:$0xff]  ;;  %v2561_v63 = vld [vmem:[#allocation2 + $0xdf] sm:$0xff] }
 0x240   : > { %v3462_v0 = vadd.f32 %v3461_v34, %v3460_v1  ;;  %v2234_v15 = vld [vmem:[#allocation2 + $0xd6] sm:$0xff] }
 0x241   : > { %v3582_v4 = vsel %vm288_vm1, %v3542_v24, 0.0  ;;  %v2830_v23 = vadd.f32 %v2724_v20, %v2504_v36  ;;  %4039 = vmatmul.msk.f32.gmra.mxu1 %vm288_vm1, %v1907_v57  ;;  %v3210_v57 = vld [vmem:[%s5252_s2 + $0xa0] sm:$0xff]  ;;  %v3221_v34 = vld [vmem:[%s5252_s2 + $0xf8] sm:$0xff]  ;;  %v3256_v36 = vpop.permute.xlu2 %3255 }
 0x242   : > { %v3583_v9 = vadd.f32 %v3582_v4, %v3581_v49  ;;  %3330 = vperm.xlu2 %4193, %v3210_v57   ;;  %v1910_v57 = vld [vmem:[#allocation2 + $0xd5] sm:$0xff] }
 0x243   : > { %v3156_v45 = vadd.f32 %v3050_v38, %v2830_v23  ;;  %4079 = vmatmul.msk.f32.gmra.mxu2 %vm288_vm1, %v2233_v39 }
 0x244   : > { %v3053_v1 = vpop.f32.mrf.mxu0  ;;  %4120 = vmatmul.msk.f32.gmra.mxu3 %vm288_vm1, %v2560_v43  ;;  %3380 = vperm.xlu0 %4191, %v3220_v31   ;;  %v1909_v43 = vld [vmem:[#allocation2 + $0xcd] sm:$0xff] }
 0x245   : > { %v3422_v20 = vmul.f32 %v3251_v32, %v3156_v45  ;;  %3385 = vperm.xlu1 %4192, %v3221_v34  }
 0x246   : > { %v2401_v51 = vpop.f32.mrf.mxu2  ;;  %v2078_v28 = vpop.f32.mrf.mxu1 }
 0x247   : > { %v3463_v12 = vsel %vm288_vm1, %v3422_v20, 0.0  ;;  %v3543_v17 = vmul.f32 %v3422_v20, %v3422_v20  ;;  %3667 = vst.msk [vmem:[%s4891_s16 + $0x34] sm:$0xff] %vm288_vm1, %v3422_v20  ;;  %v2505_v49 = vadd.f32 %v2401_v51, %v2179_v8  ;;  %4159 = vmatmul.msk.f32.gmra.mxu0 %vm288_vm1, %v2885_v13  ;;  %v2730_v38 = vpop.f32.mrf.mxu3  ;;  %v2180_v39 = vadd.f32 %v2078_v28, %v4602_v25  ;;  %v3223_v13 = vld [vmem:[%s5252_s2 + $0x108] sm:$0xff]  ;;  %v2235_v20 = vld [vmem:[#allocation2 + $0xde] sm:$0xff] }
 0x248   : > { %v3464_v44 = vadd.f32 %v3463_v12, %v3462_v0  ;;  %v2886_v0 = vld [vmem:[#allocation2 + $0xd8] sm:$0xff]  ;;  %v2562_v28 = vld [vmem:[#allocation2 + $0xe7] sm:$0xff] }
 0x249   : > { %v3584_v62 = vsel %vm288_vm1, %v3543_v17, 0.0  ;;  %v2831_v59 = vadd.f32 %v2727_v33, %v2505_v49  ;;  %4040 = vmatmul.msk.f32.gmra.mxu1 %vm288_vm1, %v1908_v26  ;;  %v3224_v26 = vld [vmem:[%s5252_s2 + $0x110] sm:$0xff]  ;;  %v3261_v17 = vpop.permute.xlu0 %3260 }
 0x24a   : > { %v3585_v24 = vadd.f32 %v3584_v62, %v3583_v9  ;;  %v3213_v62 = vld [vmem:[%s5252_s2 + $0xb8] sm:$0xff] }
 0x24b   : > { %v3157_v16 = vadd.f32 %v3053_v1, %v2831_v59  ;;  %4080 = vmatmul.msk.f32.gmra.mxu2 %vm288_vm1, %v2234_v15  ;;  %3345 = vperm.xlu2 %4193, %v3213_v62  }
 0x24c   : > { %v3056_v33 = vpop.f32.mrf.mxu0  ;;  %4121 = vmatmul.msk.f32.gmra.mxu3 %vm288_vm1, %v2561_v63  ;;  %3395 = vperm.xlu0 %4191, %v3223_v13   ;;  %v2888_v13 = vld [vmem:[#allocation2 + $0xe8] sm:$0xff] }
 0x24d   : > { %v3423_v32 = vmul.f32 %v3256_v36, %v3157_v16  ;;  %3400 = vperm.xlu1 %4192, %v3224_v26  }
 0x24e   : > { %v2404_v4 = vpop.f32.mrf.mxu2  ;;  %v2081_v23 = vpop.f32.mrf.mxu1 }
 0x24f   : > { %v3465_v7 = vsel %vm288_vm1, %v3423_v32, 0.0  ;;  %v3544_v9 = vmul.f32 %v3423_v32, %v3423_v32  ;;  %3668 = vst.msk [vmem:[%s4891_s16 + $0x3c] sm:$0xff] %vm288_vm1, %v3423_v32  ;;  %v2506_v45 = vadd.f32 %v2404_v4, %v2180_v39  ;;  %4160 = vmatmul.msk.f32.gmra.mxu0 %vm288_vm1, %v2886_v0  ;;  %v2733_v1 = vpop.f32.mrf.mxu3  ;;  %v2236_v0 = vld [vmem:[#allocation2 + $0xe6] sm:$0xff]  ;;  %v2563_v4 = vld [vmem:[#allocation2 + $0xef] sm:$0xff] }
 0x250   : > { %v3466_v8 = vadd.f32 %v3465_v7, %v3464_v44  ;;  %v2887_v44 = vld [vmem:[#allocation2 + $0xe0] sm:$0xff]  ;;  %v3266_v7 = vpop.permute.xlu1 %3265 }
 0x251   : > { %v3586_v25 = vsel %vm288_vm1, %v3544_v9, 0.0  ;;  %v2832_v51 = vadd.f32 %v2730_v38, %v2506_v45  ;;  %4041 = vmatmul.msk.f32.gmra.mxu1 %vm288_vm1, %v1909_v43  ;;  %v2181_v38 = vadd.f32 %v2081_v23, %v4609_v50  ;;  %v3226_v50 = vld [vmem:[%s5252_s2 + $0x120] sm:$0xff]  ;;  %v3227_v23 = vld [vmem:[%s5252_s2 + $0x128] sm:$0xff] }
 0x252   : > { %v3587_v12 = vadd.f32 %v3586_v25, %v3585_v24 }
 0x253   : > { %v3158_v49 = vadd.f32 %v3056_v33, %v2832_v51  ;;  %4081 = vmatmul.msk.f32.gmra.mxu2 %vm288_vm1, %v2235_v20  ;;  %v3216_v20 = vld [vmem:[%s5252_s2 + $0xd0] sm:$0xff] }
 0x254   : > { %v3059_v31 = vpop.f32.mrf.mxu0  ;;  %4122 = vmatmul.msk.f32.gmra.mxu3 %vm288_vm1, %v2562_v28  ;;  %3410 = vperm.xlu0 %4191, %v3226_v50   ;;  %v1911_v28 = vld [vmem:[#allocation2 + $0xdd] sm:$0xff] }
 0x255   : > { %v3424_v15 = vmul.f32 %v3261_v17, %v3158_v49  ;;  %3415 = vperm.xlu1 %4192, %v3227_v23   ;;  %3360 = vperm.xlu2 %4193, %v3216_v20  }
 0x256   : > { %v2407_v59 = vpop.f32.mrf.mxu2  ;;  %v2084_v63 = vpop.f32.mrf.mxu1 }
 0x257   : > { %v3467_v34 = vsel %vm288_vm1, %v3424_v15, 0.0  ;;  %v3545_v24 = vmul.f32 %v3424_v15, %v3424_v15  ;;  %3669 = vst.msk [vmem:[%s4891_s16 + $0x44] sm:$0xff] %vm288_vm1, %v3424_v15  ;;  %v2507_v36 = vadd.f32 %v2407_v59, %v2181_v38  ;;  %4161 = vmatmul.msk.f32.gmra.mxu0 %vm288_vm1, %v2887_v44  ;;  %v2736_v16 = vpop.f32.mrf.mxu3  ;;  %v2564_v15 = vld [vmem:[#allocation2 + $0xf7] sm:$0xff]  ;;  %v3271_v59 = vpop.permute.xlu2 %3270 }
 0x258   : > { %v3468_v33 = vadd.f32 %v3467_v34, %v3466_v8  ;;  %v2889_v34 = vld [vmem:[#allocation2 + $0xf0] sm:$0xff] }
 0x259   : > { %v3588_v39 = vsel %vm288_vm1, %v3545_v24, 0.0  ;;  %v2833_v32 = vadd.f32 %v2733_v1, %v2507_v36  ;;  %4042 = vmatmul.msk.f32.gmra.mxu1 %vm288_vm1, %v1910_v57  ;;  %v2182_v1 = vadd.f32 %v2084_v63, %v4616_v19  ;;  %v2237_v19 = vld [vmem:[#allocation2 + $0xee] sm:$0xff] }
 0x25a   : > { %v3589_v43 = vadd.f32 %v3588_v39, %v3587_v12 }
 0x25b   : > { %v3159_v9 = vadd.f32 %v3059_v31, %v2833_v32  ;;  %4082 = vmatmul.msk.f32.gmra.mxu2 %vm288_vm1, %v2236_v0  ;;  %v1912_v0 = vld [vmem:[#allocation2 + $0xe5] sm:$0xff] }
 0x25c   : > { %v3062_v45 = vpop.f32.mrf.mxu0  ;;  %4123 = vmatmul.msk.f32.gmra.mxu3 %vm288_vm1, %v2563_v4 }
 0x25d   : > { %v3425_v8 = vmul.f32 %v3266_v7, %v3159_v9 }
 0x25e   : > { %v2410_v25 = vpop.f32.mrf.mxu2  ;;  %v2087_v51 = vpop.f32.mrf.mxu1 }
 0x25f   : > { %v3469_v26 = vsel %vm288_vm1, %v3425_v8, 0.0  ;;  %v3546_v12 = vmul.f32 %v3425_v8, %v3425_v8  ;;  %3670 = vst.msk [vmem:[%s4891_s16 + $0x4c] sm:$0xff] %vm288_vm1, %v3425_v8  ;;  %v2508_v17 = vadd.f32 %v2410_v25, %v2182_v1  ;;  %4162 = vmatmul.msk.f32.gmra.mxu0 %vm288_vm1, %v2888_v13  ;;  %v2739_v49 = vpop.f32.mrf.mxu3  ;;  %v2183_v24 = vadd.f32 %v2087_v51, %v4623_v41  ;;  %v2238_v41 = vld [vmem:[#allocation2 + $0xf6] sm:$0xff]  ;;  %v3276_v1 = vpop.permute.xlu0 %3275 }
 0x260   : > { %v3470_v31 = vadd.f32 %v3469_v26, %v3468_v33  ;;  %v2890_v25 = vld [vmem:[#allocation2 + $0xf8] sm:$0xff]  ;;  %v3222_v26 = vld [vmem:[%s5252_s2 + $0x100] sm:$0xff] }
 0x261   : > { %v3590_v44 = vsel %vm288_vm1, %v3546_v12, 0.0  ;;  %v2834_v38 = vadd.f32 %v2736_v16, %v2508_v17  ;;  %4043 = vmatmul.msk.f32.gmra.mxu1 %vm288_vm1, %v1911_v28  ;;  %v3219_v16 = vld [vmem:[%s5252_s2 + $0xe8] sm:$0xff] }
 0x262   : > { %v3591_v62 = vadd.f32 %v3590_v44, %v3589_v43  ;;  %3375 = vperm.xlu2 %4193, %v3219_v16   ;;  %v2891_v16 = vld [vmem:[#allocation2 + $0x100] sm:$0xff] }
 0x263   : > { %v3160_v63 = vadd.f32 %v3062_v45, %v2834_v38  ;;  %4083 = vmatmul.msk.f32.gmra.mxu2 %vm288_vm1, %v2237_v19  ;;  %v2565_v45 = vld [vmem:[#allocation2 + $0xff] sm:$0xff] }
 0x264   : > { %v3065_v57 = vpop.f32.mrf.mxu0  ;;  %4124 = vmatmul.msk.f32.gmra.mxu3 %vm288_vm1, %v2564_v15 }
 0x265   : > { %v3426_v36 = vmul.f32 %v3271_v59, %v3160_v63  ;;  %v2566_v63 = vld [vmem:[#allocation2 + $0x107] sm:$0xff] }
 0x266   : > { %v2413_v50 = vpop.f32.mrf.mxu2  ;;  %v2090_v33 = vpop.f32.mrf.mxu1 }
 0x267   : > { %v3471_v39 = vsel %vm288_vm1, %v3426_v36, 0.0  ;;  %v3547_v32 = vmul.f32 %v3426_v36, %v3426_v36  ;;  %3671 = vst.msk [vmem:[%s4891_s16 + $0x54] sm:$0xff] %vm288_vm1, %v3426_v36  ;;  %v2509_v4 = vadd.f32 %v2413_v50, %v2183_v24  ;;  %4163 = vmatmul.msk.f32.gmra.mxu0 %vm288_vm1, %v2889_v34  ;;  %v2742_v23 = vpop.f32.mrf.mxu3  ;;  %v2184_v51 = vadd.f32 %v2090_v33, %v4630_v14  ;;  %v2239_v14 = vld [vmem:[#allocation2 + $0xfe] sm:$0xff]  ;;  %v3281_v34 = vpop.permute.xlu1 %3280 }
 0x268   : > { %v3472_v43 = vadd.f32 %v3471_v39, %v3470_v31 }
 0x269   : > { %v3592_v7 = vsel %vm288_vm1, %v3547_v32, 0.0  ;;  %v2835_v9 = vadd.f32 %v2739_v49, %v2509_v4  ;;  %4044 = vmatmul.msk.f32.gmra.mxu1 %vm288_vm1, %v1912_v0  ;;  %v1913_v49 = vld [vmem:[#allocation2 + $0xed] sm:$0xff]  ;;  %v3225_v0 = vld [vmem:[%s5252_s2 + $0x118] sm:$0xff] }
 0x26a   : > { %v3593_v13 = vadd.f32 %v3592_v7, %v3591_v62  ;;  %3390 = vperm.xlu2 %4193, %v3222_v26   ;;  %v1914_v4 = vld [vmem:[#allocation2 + $0xf5] sm:$0xff] }
 0x26b   : > { %v3161_v8 = vadd.f32 %v3065_v57, %v2835_v9  ;;  %4084 = vmatmul.msk.f32.gmra.mxu2 %vm288_vm1, %v2238_v41 }
 0x26c   : > { %v3068_v20 = vpop.f32.mrf.mxu0  ;;  %4125 = vmatmul.msk.f32.gmra.mxu3 %vm288_vm1, %v2565_v45 }
 0x26d   : > { %v3427_v28 = vmul.f32 %v3276_v1, %v3161_v8  ;;  %v2567_v1 = vld [vmem:[#allocation2 + $0x10f] sm:$0xff] }
 0x26e   : > { %v2416_v12 = vpop.f32.mrf.mxu2  ;;  %v2093_v17 = vpop.f32.mrf.mxu1 }
 0x26f   : > { %v3473_v31 = vsel %vm288_vm1, %v3427_v28, 0.0  ;;  %v3548_v19 = vmul.f32 %v3427_v28, %v3427_v28  ;;  %3672 = vst.msk [vmem:[%s4891_s16 + $0x5c] sm:$0xff] %vm288_vm1, %v3427_v28  ;;  %v2510_v44 = vadd.f32 %v2416_v12, %v2184_v51  ;;  %4164 = vmatmul.msk.f32.gmra.mxu0 %vm288_vm1, %v2890_v25  ;;  %v2745_v38 = vpop.f32.mrf.mxu3  ;;  %v2185_v50 = vadd.f32 %v2093_v17, %v4637_v35  ;;  %v2240_v35 = vld [vmem:[#allocation2 + $0x106] sm:$0xff] }
 0x270   : > { %v3474_v15 = vadd.f32 %v3473_v31, %v3472_v43  ;;  %v2892_v28 = vld [vmem:[#allocation2 + $0x108] sm:$0xff]  ;;  %v1915_v31 = vld [vmem:[#allocation2 + $0xfd] sm:$0xff] }
 0x271   : > { %v3594_v62 = vsel %vm288_vm1, %v3548_v19, 0.0  ;;  %v2836_v59 = vadd.f32 %v2742_v23, %v2510_v44  ;;  %4045 = vmatmul.msk.f32.gmra.mxu1 %vm288_vm1, %v1913_v49 }
 0x272   : > { %v3595_v57 = vadd.f32 %v3594_v62, %v3593_v13  ;;  %3405 = vperm.xlu2 %4193, %v3225_v0   ;;  %v2241_v62 = vld [vmem:[#allocation2 + $0x10e] sm:$0xff] }
 0x273   : > { %v3162_v24 = vadd.f32 %v3068_v20, %v2836_v59  ;;  %4085 = vmatmul.msk.f32.gmra.mxu2 %vm288_vm1, %v2239_v14  ;;  %v3286_v20 = vpop.permute.xlu2 %3285 }
 0x274   : > { %v3071_v36 = vpop.f32.mrf.mxu0  ;;  %4126 = vmatmul.msk.f32.gmra.mxu3 %vm288_vm1, %v2566_v63 }
 0x275   : > { %v3428_v33 = vmul.f32 %v3281_v34, %v3162_v24  ;;  %v3291_v34 = vpop.permute.xlu0 %3290 }
 0x276   : > { %v2419_v39 = vpop.f32.mrf.mxu2  ;;  %v2096_v32 = vpop.f32.mrf.mxu1 }
 0x277   : > { %v3475_v23 = vsel %vm288_vm1, %v3428_v33, 0.0  ;;  %v3549_v43 = vmul.f32 %v3428_v33, %v3428_v33  ;;  %3673 = vst.msk [vmem:[%s4891_s16 + $0x64] sm:$0xff] %vm288_vm1, %v3428_v33  ;;  %v2511_v41 = vadd.f32 %v2419_v39, %v2185_v50  ;;  %4165 = vmatmul.msk.f32.gmra.mxu0 %vm288_vm1, %v2891_v16  ;;  %v2748_v7 = vpop.f32.mrf.mxu3  ;;  %v2186_v26 = vadd.f32 %v2096_v32, %v4644_v3  ;;  %v2568_v3 = vld [vmem:[#allocation2 + $0x117] sm:$0xff]  ;;  %v1916_v32 = vld [vmem:[#allocation2 + $0x105] sm:$0xff] }
 0x278   : > { %v3476_v9 = vadd.f32 %v3475_v23, %v3474_v15  ;;  %v2893_v16 = vld [vmem:[#allocation2 + $0x110] sm:$0xff] }
 0x279   : > { %v3596_v45 = vsel %vm288_vm1, %v3549_v43, 0.0  ;;  %v2837_v13 = vadd.f32 %v2745_v38, %v2511_v41  ;;  %4046 = vmatmul.msk.f32.gmra.mxu1 %vm288_vm1, %v1914_v4 }
 0x27a   : > { %v3597_v8 = vadd.f32 %v3596_v45, %v3595_v57 }
 0x27b   : > { %v3163_v25 = vadd.f32 %v3071_v36, %v2837_v13  ;;  %4086 = vmatmul.msk.f32.gmra.mxu2 %vm288_vm1, %v2240_v35 }
 0x27c   : > { %v3074_v51 = vpop.f32.mrf.mxu0  ;;  %4127 = vmatmul.msk.f32.gmra.mxu3 %vm288_vm1, %v2567_v1  ;;  %v3296_v1 = vpop.permute.xlu1 %3295 }
 0x27d   : > { %v3429_v12 = vmul.f32 %v3286_v20, %v3163_v25  ;;  %v2894_v25 = vld [vmem:[#allocation2 + $0x118] sm:$0xff] }
 0x27e   : > { %v2422_v17 = vpop.f32.mrf.mxu2  ;;  %v2099_v49 = vpop.f32.mrf.mxu1 }
 0x27f   : > { %v3477_v19 = vsel %vm288_vm1, %v3429_v12, 0.0  ;;  %v3550_v44 = vmul.f32 %v3429_v12, %v3429_v12  ;;  %3674 = vst.msk [vmem:[%s4891_s16 + $0x6c] sm:$0xff] %vm288_vm1, %v3429_v12  ;;  %v2512_v38 = vadd.f32 %v2422_v17, %v2186_v26  ;;  %4166 = vmatmul.msk.f32.gmra.mxu0 %vm288_vm1, %v2892_v28  ;;  %v2751_v15 = vpop.f32.mrf.mxu3  ;;  %v2187_v50 = vadd.f32 %v2099_v49, %v4651_v30  ;;  %v2569_v30 = vld [vmem:[#allocation2 + $0x11f] sm:$0xff]  ;;  %v1917_v17 = vld [vmem:[#allocation2 + $0x10d] sm:$0xff] }
 0x280   : > { %v3478_v14 = vadd.f32 %v3477_v19, %v3476_v9  ;;  %v2242_v9 = vld [vmem:[#allocation2 + $0x116] sm:$0xff] }
 0x281   : > { %v3598_v59 = vsel %vm288_vm1, %v3550_v44, 0.0  ;;  %v2838_v63 = vadd.f32 %v2748_v7, %v2512_v38  ;;  %4047 = vmatmul.msk.f32.gmra.mxu1 %vm288_vm1, %v1915_v31 }
 0x282   : > { %v3599_v57 = vadd.f32 %v3598_v59, %v3597_v8 }
 0x283   : > { %v3164_v24 = vadd.f32 %v3074_v51, %v2838_v63  ;;  %4087 = vmatmul.msk.f32.gmra.mxu2 %vm288_vm1, %v2241_v62  ;;  %v3301_v63 = vpop.permute.xlu2 %3300 }
 0x284   : > { %v3077_v36 = vpop.f32.mrf.mxu0  ;;  %4128 = vmatmul.msk.f32.gmra.mxu3 %vm288_vm1, %v2568_v3  ;;  %v286_v3 = vld [vmem:[%s4276_s9 + $0x148] sm:$0xff] }
 0x285   : > { %v3430_v33 = vmul.f32 %v3291_v34, %v3164_v24  ;;  %330 = vst.msk [vmem:[#allocation2 + $0x148] sm:$0xff] %vm288_vm1, %v286_v3  ;;  %v2895_v24 = vld [vmem:[#allocation2 + $0x120] sm:$0xff] }
 0x286   : > { %v2425_v0 = vpop.f32.mrf.mxu2  ;;  %v2102_v39 = vpop.f32.mrf.mxu1 }
 0x287   : > { %v3479_v4 = vsel %vm288_vm1, %v3430_v33, 0.0  ;;  %v3551_v23 = vmul.f32 %v3430_v33, %v3430_v33  ;;  %3675 = vst.msk [vmem:[%s4891_s16 + $0x74] sm:$0xff] %vm288_vm1, %v3430_v33  ;;  %v2513_v43 = vadd.f32 %v2425_v0, %v2187_v50  ;;  %4167 = vmatmul.msk.f32.gmra.mxu0 %vm288_vm1, %v2893_v16  ;;  %v2754_v41 = vpop.f32.mrf.mxu3  ;;  %v2188_v51 = vadd.f32 %v2102_v39, %v4658_v56  ;;  %v2570_v56 = vld [vmem:[#allocation2 + $0x127] sm:$0xff]  ;;  %v1918_v0 = vld [vmem:[#allocation2 + $0x115] sm:$0xff] }
 0x288   : > { %v3480_v7 = vadd.f32 %v3479_v4, %v3478_v14 }
 0x289   : > { %v3600_v35 = vsel %vm288_vm1, %v3551_v23, 0.0  ;;  %v2839_v45 = vadd.f32 %v2751_v15, %v2513_v43  ;;  %4048 = vmatmul.msk.f32.gmra.mxu1 %vm288_vm1, %v1916_v32  ;;  %v2243_v15 = vld [vmem:[#allocation2 + $0x11e] sm:$0xff] }
 0x28a   : > { %v3601_v13 = vadd.f32 %v3600_v35, %v3599_v57 }
 0x28b   : > { %v3165_v8 = vadd.f32 %v3077_v36, %v2839_v45  ;;  %4088 = vmatmul.msk.f32.gmra.mxu2 %vm288_vm1, %v2242_v9  ;;  %v3306_v45 = vpop.permute.xlu0 %3305 }
 0x28c   : > { %v3080_v20 = vpop.f32.mrf.mxu0  ;;  %4129 = vmatmul.msk.f32.gmra.mxu3 %vm288_vm1, %v2569_v30  ;;  %v287_v30 = vld [vmem:[%s4276_s9 + $0x150] sm:$0xff] }
 0x28d   : > { %v3431_v28 = vmul.f32 %v3296_v1, %v3165_v8  ;;  %331 = vst.msk [vmem:[#allocation2 + $0x150] sm:$0xff] %vm288_vm1, %v287_v30  ;;  %v2896_v8 = vld [vmem:[#allocation2 + $0x128] sm:$0xff] }
 0x28e   : > { %v2428_v26 = vpop.f32.mrf.mxu2  ;;  %v2105_v12 = vpop.f32.mrf.mxu1 }
 0x28f   : > { %v3481_v49 = vsel %vm288_vm1, %v3431_v28, 0.0  ;;  %v3552_v31 = vmul.f32 %v3431_v28, %v3431_v28  ;;  %3676 = vst.msk [vmem:[%s4891_s16 + $0x7c] sm:$0xff] %vm288_vm1, %v3431_v28  ;;  %v2514_v19 = vadd.f32 %v2428_v26, %v2188_v51  ;;  %4168 = vmatmul.msk.f32.gmra.mxu0 %vm288_vm1, %v2894_v25  ;;  %v2757_v44 = vpop.f32.mrf.mxu3  ;;  %v2189_v36 = vadd.f32 %v2105_v12, %v4667_v27  ;;  %v2571_v27 = vld [vmem:[#allocation2 + $0x12f] sm:$0xff]  ;;  %v1919_v26 = vld [vmem:[#allocation2 + $0x11d] sm:$0xff] }
 0x290   : > { %v3482_v38 = vadd.f32 %v3481_v49, %v3480_v7 }
 0x291   : > { %v3602_v14 = vsel %vm288_vm1, %v3552_v31, 0.0  ;;  %v2840_v62 = vadd.f32 %v2754_v41, %v2514_v19  ;;  %4049 = vmatmul.msk.f32.gmra.mxu1 %vm288_vm1, %v1917_v17  ;;  %v2244_v41 = vld [vmem:[#allocation2 + $0x126] sm:$0xff] }
 0x292   : > { %v3603_v59 = vadd.f32 %v3602_v14, %v3601_v13 }
 0x293   : > { %v3166_v57 = vadd.f32 %v3080_v20, %v2840_v62  ;;  %4089 = vmatmul.msk.f32.gmra.mxu2 %vm288_vm1, %v2243_v15  ;;  %v3311_v62 = vpop.permute.xlu1 %3310 }
 0x294   : > { %v3083_v34 = vpop.f32.mrf.mxu0  ;;  %4130 = vmatmul.msk.f32.gmra.mxu3 %vm288_vm1, %v2570_v56 }
 0x295   : > { %v3432_v16 = vmul.f32 %v3301_v63, %v3166_v57  ;;  %v2897_v63 = vld [vmem:[#allocation2 + $0x130] sm:$0xff] }
 0x296   : > { %v2431_v50 = vpop.f32.mrf.mxu2  ;;  %v2108_v33 = vpop.f32.mrf.mxu1 }
 0x297   : > { %v3483_v39 = vsel %vm288_vm1, %v3432_v16, 0.0  ;;  %v3553_v32 = vmul.f32 %v3432_v16, %v3432_v16  ;;  %3677 = vst.msk [vmem:[%s4891_s16 + $0x84] sm:$0xff] %vm288_vm1, %v3432_v16  ;;  %v2515_v4 = vadd.f32 %v2431_v50, %v2189_v36  ;;  %4169 = vmatmul.msk.f32.gmra.mxu0 %vm288_vm1, %v2895_v24  ;;  %v2760_v23 = vpop.f32.mrf.mxu3  ;;  %v2190_v20 = vadd.f32 %v2108_v33, %v4676_v42  ;;  %v2572_v42 = vld [vmem:[#allocation2 + $0x137] sm:$0xff]  ;;  %v1920_v36 = vld [vmem:[#allocation2 + $0x125] sm:$0xff] }
 0x298   : > { %v3484_v43 = vadd.f32 %v3483_v39, %v3482_v38 }
 0x299   : > { %v3604_v7 = vsel %vm288_vm1, %v3553_v32, 0.0  ;;  %v2841_v9 = vadd.f32 %v2757_v44, %v2515_v4  ;;  %4050 = vmatmul.msk.f32.gmra.mxu1 %vm288_vm1, %v1918_v0  ;;  %v2245_v44 = vld [vmem:[#allocation2 + $0x12e] sm:$0xff]  ;;  %v2246_v32 = vld [vmem:[#allocation2 + $0x136] sm:$0xff] }
 0x29a   : > { %v3605_v35 = vadd.f32 %v3604_v7, %v3603_v59 }
 0x29b   : > { %v3167_v13 = vadd.f32 %v3083_v34, %v2841_v9  ;;  %4090 = vmatmul.msk.f32.gmra.mxu2 %vm288_vm1, %v2244_v41  ;;  %v3316_v41 = vpop.permute.xlu2 %3315 }
 0x29c   : > { %v3086_v1 = vpop.f32.mrf.mxu0  ;;  %4131 = vmatmul.msk.f32.gmra.mxu3 %vm288_vm1, %v2571_v27  ;;  %v2898_v27 = vld [vmem:[#allocation2 + $0x138] sm:$0xff] }
 0x29d   : > { %v3433_v25 = vmul.f32 %v3306_v45, %v3167_v13 }
 0x29e   : > { %v2434_v51 = vpop.f32.mrf.mxu2  ;;  %v2111_v28 = vpop.f32.mrf.mxu1 }
 0x29f   : > { %v3485_v12 = vsel %vm288_vm1, %v3433_v25, 0.0  ;;  %v3554_v17 = vmul.f32 %v3433_v25, %v3433_v25  ;;  %3678 = vst.msk [vmem:[%s4891_s16 + $0x8c] sm:$0xff] %vm288_vm1, %v3433_v25  ;;  %v2516_v49 = vadd.f32 %v2434_v51, %v2190_v20  ;;  %4170 = vmatmul.msk.f32.gmra.mxu0 %vm288_vm1, %v2896_v8  ;;  %v2763_v31 = vpop.f32.mrf.mxu3  ;;  %v2191_v3 = vadd.f32 %v2111_v28, %v4683_v55  ;;  %v2573_v55 = vld [vmem:[#allocation2 + $0x13f] sm:$0xff] }
 0x2a0   : > { %v3486_v19 = vadd.f32 %v3485_v12, %v3484_v43 }
 0x2a1   : > { %v3606_v38 = vsel %vm288_vm1, %v3554_v17, 0.0  ;;  %v2842_v15 = vadd.f32 %v2760_v23, %v2516_v49  ;;  %4051 = vmatmul.msk.f32.gmra.mxu1 %vm288_vm1, %v1919_v26  ;;  %v2247_v26 = vld [vmem:[#allocation2 + $0x13e] sm:$0xff] }
 0x2a2   : > { %v3607_v14 = vadd.f32 %v3606_v38, %v3605_v35  ;;  %v2899_v38 = vld [vmem:[#allocation2 + $0x140] sm:$0xff] }
 0x2a3   : > { %v3168_v56 = vadd.f32 %v3086_v1, %v2842_v15  ;;  %4091 = vmatmul.msk.f32.gmra.mxu2 %vm288_vm1, %v2245_v44  ;;  %v1921_v1 = vld [vmem:[#allocation2 + $0x12d] sm:$0xff] }
 0x2a4   : > { %v3089_v59 = vpop.f32.mrf.mxu0  ;;  %4132 = vmatmul.msk.f32.gmra.mxu3 %vm288_vm1, %v2572_v42 }
 0x2a5   : > { %v3434_v57 = vmul.f32 %v3311_v62, %v3168_v56  ;;  %v1922_v56 = vld [vmem:[#allocation2 + $0x135] sm:$0xff] }
 0x2a6   : > { %v2437_v34 = vpop.f32.mrf.mxu2  ;;  %v2114_v24 = vpop.f32.mrf.mxu1 }
 0x2a7   : > { %v3487_v16 = vsel %vm288_vm1, %v3434_v57, 0.0  ;;  %v3555_v50 = vmul.f32 %v3434_v57, %v3434_v57  ;;  %3679 = vst.msk [vmem:[%s4891_s16 + $0x94] sm:$0xff] %vm288_vm1, %v3434_v57  ;;  %v2517_v33 = vadd.f32 %v2437_v34, %v2191_v3  ;;  %4171 = vmatmul.msk.f32.gmra.mxu0 %vm288_vm1, %v2897_v63  ;;  %v2766_v0 = vpop.f32.mrf.mxu3  ;;  %v2192_v35 = vadd.f32 %v2114_v24, %v4690_v6  ;;  %v2574_v6 = vld [vmem:[#allocation2 + $0x147] sm:$0xff] }
 0x2a8   : > { %v3488_v39 = vadd.f32 %v3487_v16, %v3486_v19  ;;  %v2248_v24 = vld [vmem:[#allocation2 + $0x146] sm:$0xff] }
 0x2a9   : > { %v3608_v4 = vsel %vm288_vm1, %v3555_v50, 0.0  ;;  %v2843_v23 = vadd.f32 %v2763_v31, %v2517_v33  ;;  %4052 = vmatmul.msk.f32.gmra.mxu1 %vm288_vm1, %v1920_v36  ;;  %v3321_v31 = vpop.permute.xlu0 %3320  ;;  %v3326_v33 = vpop.permute.xlu1 %3325 }
 0x2aa   : > { %v3609_v43 = vadd.f32 %v3608_v4, %v3607_v14 }
 0x2ab   : > { %v3169_v7 = vadd.f32 %v3089_v59, %v2843_v23  ;;  %4092 = vmatmul.msk.f32.gmra.mxu2 %vm288_vm1, %v2246_v32  ;;  %v2900_v32 = vld [vmem:[#allocation2 + $0x148] sm:$0xff] }
 0x2ac   : > { %v3092_v9 = vpop.f32.mrf.mxu0  ;;  %4133 = vmatmul.msk.f32.gmra.mxu3 %vm288_vm1, %v2573_v55 }
 0x2ad   : > { %v3435_v45 = vmul.f32 %v3316_v41, %v3169_v7  ;;  %v1923_v41 = vld [vmem:[#allocation2 + $0x13d] sm:$0xff] }
 0x2ae   : > { %v2440_v30 = vpop.f32.mrf.mxu2  ;;  %v2117_v13 = vpop.f32.mrf.mxu1 }
 0x2af   : > { %v3489_v8 = vsel %vm288_vm1, %v3435_v45, 0.0  ;;  %v3556_v20 = vmul.f32 %v3435_v45, %v3435_v45  ;;  %3680 = vst.msk [vmem:[%s4891_s16 + $0x9c] sm:$0xff] %vm288_vm1, %v3435_v45  ;;  %v2518_v25 = vadd.f32 %v2440_v30, %v2192_v35  ;;  %4172 = vmatmul.msk.f32.gmra.mxu0 %vm288_vm1, %v2898_v27  ;;  %v2769_v51 = vpop.f32.mrf.mxu3  ;;  %v2193_v15 = vadd.f32 %v2117_v13, %v4697_v47  ;;  %v2575_v47 = vld [vmem:[#allocation2 + $0x14f] sm:$0xff] }
 0x2b0   : > { %v3490_v28 = vadd.f32 %v3489_v8, %v3488_v39  ;;  %v2249_v30 = vld [vmem:[#allocation2 + $0x14e] sm:$0xff]  ;;  %v3331_v8 = vpop.permute.xlu2 %3330 }
 0x2b1   : > { %v3610_v12 = vsel %vm288_vm1, %v3556_v20, 0.0  ;;  %v2844_v17 = vadd.f32 %v2766_v0, %v2518_v25  ;;  %4053 = vmatmul.msk.f32.gmra.mxu1 %vm288_vm1, %v1921_v1 }
 0x2b2   : > { %v3611_v49 = vadd.f32 %v3610_v12, %v3609_v43 }
 0x2b3   : > { %v3170_v19 = vadd.f32 %v3092_v9, %v2844_v17  ;;  %4093 = vmatmul.msk.f32.gmra.mxu2 %vm288_vm1, %v2247_v26 }
 0x2b4   : > { %v3095_v44 = vpop.f32.mrf.mxu0  ;;  %4134 = vmatmul.msk.f32.gmra.mxu3 %vm288_vm1, %v2574_v6 }
 0x2b5   : > { %v3436_v42 = vmul.f32 %v3321_v31, %v3170_v19 }
 0x2b6   : > { %v2443_v14 = vpop.f32.mrf.mxu2  ;;  %v2120_v62 = vpop.f32.mrf.mxu1 }
 0x2b7   : > { %v3491_v59 = vsel %vm288_vm1, %v3436_v42, 0.0  ;;  %v3557_v63 = vmul.f32 %v3436_v42, %v3436_v42  ;;  %3681 = vst.msk [vmem:[%s4891_s16 + $0xa4] sm:$0xff] %vm288_vm1, %v3436_v42  ;;  %v2519_v3 = vadd.f32 %v2443_v14, %v2193_v15  ;;  %4173 = vmatmul.msk.f32.gmra.mxu0 %vm288_vm1, %v2899_v38  ;;  %v2772_v57 = vpop.f32.mrf.mxu3  ;;  %v2194_v4 = vadd.f32 %v2120_v62, %v4707_v53 }
 0x2b8   : > { %v3492_v34 = vadd.f32 %v3491_v59, %v3490_v28 }
 0x2b9   : > { %v3612_v36 = vsel %vm288_vm1, %v3557_v63, 0.0  ;;  %v2845_v16 = vadd.f32 %v2769_v51, %v2519_v3  ;;  %4054 = vmatmul.msk.f32.gmra.mxu1 %vm288_vm1, %v1922_v56  ;;  %v2901_v51 = vld [vmem:[#allocation2 + $0x150] sm:$0xff] }
 0x2ba   : > { %v3613_v50 = vadd.f32 %v3612_v36, %v3611_v49 }
 0x2bb   : > { %v3171_v0 = vadd.f32 %v3095_v44, %v2845_v16  ;;  %4094 = vmatmul.msk.f32.gmra.mxu2 %vm288_vm1, %v2248_v24 }
 0x2bc   : > { %v3098_v39 = vpop.f32.mrf.mxu0  ;;  %4135 = vmatmul.msk.f32.gmra.mxu3 %vm288_vm1, %v2575_v47 }
 0x2bd   : > { %v3437_v23 = vmul.f32 %v3326_v33, %v3171_v0 }
 0x2be   : > { %v2446_v55 = vpop.f32.mrf.mxu2  ;;  %v2123_v43 = vpop.f32.mrf.mxu1 }
 0x2bf   : > { %v3493_v7 = vsel %vm288_vm1, %v3437_v23, 0.0  ;;  %v3558_v9 = vmul.f32 %v3437_v23, %v3437_v23  ;;  %3682 = vst.msk [vmem:[%s4891_s16 + $0xac] sm:$0xff] %vm288_vm1, %v3437_v23  ;;  %v2520_v27 = vadd.f32 %v2446_v55, %v2194_v4  ;;  %4174 = vmatmul.msk.f32.gmra.mxu0 %vm288_vm1, %v2900_v32  ;;  %v2775_v35 = vpop.f32.mrf.mxu3  ;;  %v2195_v28 = vadd.f32 %v2123_v43, %v4717_v58  ;;  %v3336_v58 = vpop.permute.xlu0 %3335 }
 0x2c0   : > { %v3494_v45 = vadd.f32 %v3493_v7, %v3492_v34 }
 0x2c1   : > { %v3614_v13 = vsel %vm288_vm1, %v3558_v9, 0.0  ;;  %v2846_v1 = vadd.f32 %v2772_v57, %v2520_v27  ;;  %4055 = vmatmul.msk.f32.gmra.mxu1 %vm288_vm1, %v1923_v41 }
 0x2c2   : > { %v3615_v53 = vadd.f32 %v3614_v13, %v3613_v50 }
 0x2c3   : > { %v3172_v20 = vadd.f32 %v3098_v39, %v2846_v1  ;;  %4095 = vmatmul.msk.f32.gmra.mxu2 %vm288_vm1, %v2249_v30  ;;  %v3341_v39 = vpop.permute.xlu1 %3340  ;;  %v3346_v1 = vpop.permute.xlu2 %3345 }
 0x2c4   : > { %v3101_v25 = vpop.f32.mrf.mxu0 }
 0x2c5   : > { %v3438_v26 = vmul.f32 %v3331_v8, %v3172_v20 }
 0x2c6   : > { %v2449_v12 = vpop.f32.mrf.mxu2  ;;  %v2126_v17 = vpop.f32.mrf.mxu1 }
 0x2c7   : > { %v3495_v6 = vsel %vm288_vm1, %v3438_v26, 0.0  ;;  %v3559_v49 = vmul.f32 %v3438_v26, %v3438_v26  ;;  %3683 = vst.msk [vmem:[%s4891_s16 + $0xb4] sm:$0xff] %vm288_vm1, %v3438_v26  ;;  %v2521_v31 = vadd.f32 %v2449_v12, %v2195_v28  ;;  %4175 = vmatmul.msk.f32.gmra.mxu0 %vm288_vm1, %v2901_v51  ;;  %v2778_v19 = vpop.f32.mrf.mxu3  ;;  %v2196_v56 = vadd.f32 %v2126_v17, %v4728_v54 }
 0x2c8   : > { %v3496_v44 = vadd.f32 %v3495_v6, %v3494_v45 }
 0x2c9   : > { %v3616_v38 = vsel %vm288_vm1, %v3559_v49, 0.0  ;;  %v2847_v15 = vadd.f32 %v2775_v35, %v2521_v31 }
 0x2ca   : > { %v3617_v42 = vadd.f32 %v3616_v38, %v3615_v53 }
 0x2cb   : > { %v3173_v14 = vadd.f32 %v3101_v25, %v2847_v15 }
 0x2cc   : > { %v3104_v62 = vpop.f32.mrf.mxu0 }
 0x2cd   : > { %v3439_v59 = vmul.f32 %v3336_v58, %v3173_v14 }
 0x2ce   : > { %v2452_v63 = vpop.f32.mrf.mxu2  ;;  %v2129_v3 = vpop.f32.mrf.mxu1 }
 0x2cf   : > { %v3497_v57 = vsel %vm288_vm1, %v3439_v59, 0.0  ;;  %v3560_v34 = vmul.f32 %v3439_v59, %v3439_v59  ;;  %3684 = vst.msk [vmem:[%s4891_s16 + $0xbc] sm:$0xff] %vm288_vm1, %v3439_v59  ;;  %v2522_v24 = vadd.f32 %v2452_v63, %v2196_v56  ;;  %v2781_v36 = vpop.f32.mrf.mxu3  ;;  %v2197_v54 = vadd.f32 %v2129_v3, %v4738_v61 }
 0x2d0   : > { %v3498_v16 = vadd.f32 %v3497_v57, %v3496_v44  ;;  %v3351_v44 = vpop.permute.xlu0 %3350 }
 0x2d1   : > { %v3618_v47 = vsel %vm288_vm1, %v3560_v34, 0.0  ;;  %v2848_v50 = vadd.f32 %v2778_v19, %v2522_v24 }
 0x2d2   : > { %v3619_v33 = vadd.f32 %v3618_v47, %v3617_v42 }
 0x2d3   : > { %v3174_v0 = vadd.f32 %v3104_v62, %v2848_v50 }
 0x2d4   : > { %v3107_v32 = vpop.f32.mrf.mxu0 }
 0x2d5   : > { %v3440_v4 = vmul.f32 %v3341_v39, %v3174_v0 }
 0x2d6   : > { %v2455_v23 = vpop.f32.mrf.mxu2  ;;  %v2132_v55 = vpop.f32.mrf.mxu1 }
 0x2d7   : > { %v3499_v43 = vsel %vm288_vm1, %v3440_v4, 0.0  ;;  %v3561_v41 = vmul.f32 %v3440_v4, %v3440_v4  ;;  %3685 = vst.msk [vmem:[%s4891_s16 + $0xc4] sm:$0xff] %vm288_vm1, %v3440_v4  ;;  %v2523_v7 = vadd.f32 %v2455_v23, %v2197_v54  ;;  %v2784_v9 = vpop.f32.mrf.mxu3  ;;  %v2198_v61 = vadd.f32 %v2132_v55, %v4745_v5 }
 0x2d8   : > { %v3500_v27 = vadd.f32 %v3499_v43, %v3498_v16 }
 0x2d9   : > { %v3620_v35 = vsel %vm288_vm1, %v3561_v41, 0.0  ;;  %v2849_v45 = vadd.f32 %v2781_v36, %v2523_v7  ;;  %v3356_v36 = vpop.permute.xlu1 %3355  ;;  %v3361_v7 = vpop.permute.xlu2 %3360 }
 0x2da   : > { %v3621_v30 = vadd.f32 %v3620_v35, %v3619_v33 }
 0x2db   : > { %v3175_v13 = vadd.f32 %v3107_v32, %v2849_v45 }
 0x2dc   : > { %v3110_v53 = vpop.f32.mrf.mxu0 }
 0x2dd   : > { %v3441_v8 = vmul.f32 %v3346_v1, %v3175_v13 }
 0x2de   : > { %v2458_v20 = vpop.f32.mrf.mxu2  ;;  %v2135_v25 = vpop.f32.mrf.mxu1 }
 0x2df   : > { %v3501_v51 = vsel %vm288_vm1, %v3441_v8, 0.0  ;;  %v3562_v28 = vmul.f32 %v3441_v8, %v3441_v8  ;;  %3686 = vst.msk [vmem:[%s4891_s16 + $0xcc] sm:$0xff] %vm288_vm1, %v3441_v8  ;;  %v2524_v26 = vadd.f32 %v2458_v20, %v2198_v61  ;;  %v2787_v12 = vpop.f32.mrf.mxu3  ;;  %v2199_v5 = vadd.f32 %v2135_v25, %v4752_v29 }
 0x2e0   : > { %v3502_v17 = vadd.f32 %v3501_v51, %v3500_v27 }
 0x2e1   : > { %v3622_v6 = vsel %vm288_vm1, %v3562_v28, 0.0  ;;  %v2850_v49 = vadd.f32 %v2784_v9, %v2524_v26  ;;  %v3366_v28 = vpop.permute.xlu0 %3365 }
 0x2e2   : > { %v3623_v31 = vadd.f32 %v3622_v6, %v3621_v30 }
 0x2e3   : > { %v3176_v19 = vadd.f32 %v3110_v53, %v2850_v49 }
 0x2e4   : > { %v3113_v38 = vpop.f32.mrf.mxu0 }
 0x2e5   : > { %v3442_v15 = vmul.f32 %v3351_v44, %v3176_v19 }
 0x2e6   : > { %v2461_v42 = vpop.f32.mrf.mxu2  ;;  %v2138_v14 = vpop.f32.mrf.mxu1 }
 0x2e7   : > { %v3503_v58 = vsel %vm288_vm1, %v3442_v15, 0.0  ;;  %v3563_v62 = vmul.f32 %v3442_v15, %v3442_v15  ;;  %3687 = vst.msk [vmem:[%s4891_s16 + $0xd4] sm:$0xff] %vm288_vm1, %v3442_v15  ;;  %v2525_v56 = vadd.f32 %v2461_v42, %v2199_v5  ;;  %v2790_v59 = vpop.f32.mrf.mxu3  ;;  %v2200_v29 = vadd.f32 %v2138_v14, %v4762_v21 }
 0x2e8   : > { %v3504_v63 = vadd.f32 %v3503_v58, %v3502_v17  ;;  %v3371_v58 = vpop.permute.xlu1 %3370 }
 0x2e9   : > { %v3624_v3 = vsel %vm288_vm1, %v3563_v62, 0.0  ;;  %v2851_v57 = vadd.f32 %v2787_v12, %v2525_v56 }
 0x2ea   : > { %v3625_v34 = vadd.f32 %v3624_v3, %v3623_v31 }
 0x2eb   : > { %v3177_v24 = vadd.f32 %v3113_v38, %v2851_v57 }
 0x2ec   : > { %v3116_v16 = vpop.f32.mrf.mxu0 }
 0x2ed   : > { %v3443_v47 = vmul.f32 %v3356_v36, %v3177_v24 }
 0x2ee   : > { %v2464_v50 = vpop.f32.mrf.mxu2  ;;  %v2141_v33 = vpop.f32.mrf.mxu1 }
 0x2ef   : > { %v3505_v0 = vsel %vm288_vm1, %v3443_v47, 0.0  ;;  %v3564_v39 = vmul.f32 %v3443_v47, %v3443_v47  ;;  %3688 = vst.msk [vmem:[%s4891_s16 + $0xdc] sm:$0xff] %vm288_vm1, %v3443_v47  ;;  %v2526_v32 = vadd.f32 %v2464_v50, %v2200_v29  ;;  %v2793_v54 = vpop.f32.mrf.mxu3  ;;  %v2201_v21 = vadd.f32 %v2141_v33, %v4775_v52  ;;  %v3376_v33 = vpop.permute.xlu2 %3375 }
 0x2f0   : > { %v3506_v4 = vadd.f32 %v3505_v0, %v3504_v63 }
 0x2f1   : > { %v3626_v23 = vsel %vm288_vm1, %v3564_v39, 0.0  ;;  %v2852_v55 = vadd.f32 %v2790_v59, %v2526_v32 }
 0x2f2   : > { %v3627_v43 = vadd.f32 %v3626_v23, %v3625_v34 }
 0x2f3   : > { %v3178_v41 = vadd.f32 %v3116_v16, %v2852_v55 }
 0x2f4   : > { %v3119_v9 = vpop.f32.mrf.mxu0 }
 0x2f5   : > { %v3444_v27 = vmul.f32 %v3361_v7, %v3178_v41 }
 0x2f6   : > { %v2467_v35 = vpop.f32.mrf.mxu2  ;;  %v2144_v45 = vpop.f32.mrf.mxu1 }
 0x2f7   : > { %v3507_v30 = vsel %vm288_vm1, %v3444_v27, 0.0  ;;  %v3565_v13 = vmul.f32 %v3444_v27, %v3444_v27  ;;  %3689 = vst.msk [vmem:[%s4891_s16 + $0xe4] sm:$0xff] %vm288_vm1, %v3444_v27  ;;  %v2527_v1 = vadd.f32 %v2467_v35, %v2201_v21  ;;  %v2796_v53 = vpop.f32.mrf.mxu3  ;;  %v2202_v52 = vadd.f32 %v2144_v45, %v4785_v37  ;;  %v3381_v35 = vpop.permute.xlu0 %3380 }
 0x2f8   : > { %v3508_v61 = vadd.f32 %v3507_v30, %v3506_v4 }
 0x2f9   : > { %v3628_v8 = vsel %vm288_vm1, %v3565_v13, 0.0  ;;  %v2853_v20 = vadd.f32 %v2793_v54, %v2527_v1 }
 0x2fa   : > { %v3629_v25 = vadd.f32 %v3628_v8, %v3627_v43 }
 0x2fb   : > { %v3179_v51 = vadd.f32 %v3119_v9, %v2853_v20 }
 0x2fc   : > { %v3122_v26 = vpop.f32.mrf.mxu0 }
 0x2fd   : > { %v3445_v12 = vmul.f32 %v3366_v28, %v3179_v51 }
 0x2fe   : > { %v2470_v17 = vpop.f32.mrf.mxu2  ;;  %v2147_v6 = vpop.f32.mrf.mxu1 }
 0x2ff   : > { %v3509_v49 = vsel %vm288_vm1, %v3445_v12, 0.0  ;;  %v3566_v31 = vmul.f32 %v3445_v12, %v3445_v12  ;;  %3690 = vst.msk [vmem:[%s4891_s16 + $0xec] sm:$0xff] %vm288_vm1, %v3445_v12  ;;  %v2528_v19 = vadd.f32 %v2470_v17, %v2202_v52  ;;  %v2799_v44 = vpop.f32.mrf.mxu3  ;;  %v2203_v37 = vadd.f32 %v2147_v6, %v4795_v46  ;;  %v3386_v12 = vpop.permute.xlu1 %3385 }
 0x300   : > { %v3510_v38 = vadd.f32 %v3509_v49, %v3508_v61 }
 0x301   : > { %v3630_v5 = vsel %vm288_vm1, %v3566_v31, 0.0  ;;  %v2854_v15 = vadd.f32 %v2796_v53, %v2528_v19 }
 0x302   : > { %v3631_v42 = vadd.f32 %v3630_v5, %v3629_v25 }
 0x303   : > { %v3180_v14 = vadd.f32 %v3122_v26, %v2854_v15 }
 0x304   : > { %v3125_v62 = vpop.f32.mrf.mxu0 }
 0x305   : > { %v3446_v56 = vmul.f32 %v3371_v58, %v3180_v14 }
 0x306   : > { %v2473_v59 = vpop.f32.mrf.mxu2  ;;  %v2150_v63 = vpop.f32.mrf.mxu1 }
 0x307   : > { %v3511_v3 = vsel %vm288_vm1, %v3446_v56, 0.0  ;;  %v3567_v57 = vmul.f32 %v3446_v56, %v3446_v56  ;;  %3691 = vst.msk [vmem:[%s4891_s16 + $0xf4] sm:$0xff] %vm288_vm1, %v3446_v56  ;;  %v2529_v34 = vadd.f32 %v2473_v59, %v2203_v37  ;;  %v2802_v24 = vpop.f32.mrf.mxu3  ;;  %v2204_v46 = vadd.f32 %v2150_v63, %v4805_v22  ;;  %v3391_v37 = vpop.permute.xlu2 %3390 }
 0x308   : > { %v3512_v36 = vadd.f32 %v3511_v3, %v3510_v38 }
 0x309   : > { %v3632_v16 = vsel %vm288_vm1, %v3567_v57, 0.0  ;;  %v2855_v29 = vadd.f32 %v2799_v44, %v2529_v34 }
 0x30a   : > { %v3633_v47 = vadd.f32 %v3632_v16, %v3631_v42 }
 0x30b   : > { %v3181_v50 = vadd.f32 %v3125_v62, %v2855_v29 }
 0x30c   : > { %v3128_v0 = vpop.f32.mrf.mxu0 }
 0x30d   : > { %v3447_v39 = vmul.f32 %v3376_v33, %v3181_v50 }
 0x30e   : > { %v2476_v32 = vpop.f32.mrf.mxu2  ;;  %v2153_v54 = vpop.f32.mrf.mxu1 }
 0x30f   : > { %v3513_v4 = vsel %vm288_vm1, %v3447_v39, 0.0  ;;  %v3568_v23 = vmul.f32 %v3447_v39, %v3447_v39  ;;  %3692 = vst.msk [vmem:[%s4891_s16 + $0xfc] sm:$0xff] %vm288_vm1, %v3447_v39  ;;  %v2530_v55 = vadd.f32 %v2476_v32, %v2204_v46  ;;  %v2805_v43 = vpop.f32.mrf.mxu3  ;;  %v2205_v22 = vadd.f32 %v2153_v54, %v4815_v48 }
 0x310   : > { %v3514_v41 = vadd.f32 %v3513_v4, %v3512_v36 }
 0x311   : > { %v3634_v7 = vsel %vm288_vm1, %v3568_v23, 0.0  ;;  %v2856_v9 = vadd.f32 %v2802_v24, %v2530_v55 }
 0x312   : > { %v3635_v21 = vadd.f32 %v3634_v7, %v3633_v47 }
 0x313   : > { %v3182_v27 = vadd.f32 %v3128_v0, %v2856_v9  ;;  %v3396_v0 = vpop.permute.xlu0 %3395 }
 0x314   : > { %v3131_v45 = vpop.f32.mrf.mxu0 }
 0x315   : > { %v3448_v30 = vmul.f32 %v3381_v35, %v3182_v27  ;;  %v3401_v35 = vpop.permute.xlu1 %3400 }
 0x316   : > { %v2479_v13 = vpop.f32.mrf.mxu2  ;;  %v2156_v1 = vpop.f32.mrf.mxu1 }
 0x317   : > { %v3515_v53 = vsel %vm288_vm1, %v3448_v30, 0.0  ;;  %v3569_v61 = vmul.f32 %v3448_v30, %v3448_v30  ;;  %3693 = vst.msk [vmem:[%s4891_s16 + $0x104] sm:$0xff] %vm288_vm1, %v3448_v30  ;;  %v2531_v8 = vadd.f32 %v2479_v13, %v2205_v22  ;;  %v2808_v20 = vpop.f32.mrf.mxu3  ;;  %v2206_v48 = vadd.f32 %v2156_v1, %v4825_v60 }
 0x318   : > { %v3516_v25 = vadd.f32 %v3515_v53, %v3514_v41 }
 0x319   : > { %v3636_v51 = vsel %vm288_vm1, %v3569_v61, 0.0  ;;  %v2857_v28 = vadd.f32 %v2805_v43, %v2531_v8 }
 0x31a   : > { %v3637_v26 = vadd.f32 %v3636_v51, %v3635_v21 }
 0x31b   : > { %v3183_v52 = vadd.f32 %v3131_v45, %v2857_v28 }
 0x31c   : > { %v3134_v17 = vpop.f32.mrf.mxu0 }
 0x31d   : > { %v3449_v6 = vmul.f32 %v3386_v12, %v3183_v52 }
 0x31e   : > { %v2482_v49 = vpop.f32.mrf.mxu2  ;;  %v2159_v31 = vpop.f32.mrf.mxu1 }
 0x31f   : > { %v3517_v19 = vsel %vm288_vm1, %v3449_v6, 0.0  ;;  %v3570_v44 = vmul.f32 %v3449_v6, %v3449_v6  ;;  %3694 = vst.msk [vmem:[%s4891_s16 + $0x10c] sm:$0xff] %vm288_vm1, %v3449_v6  ;;  %v2532_v38 = vadd.f32 %v2482_v49, %v2206_v48  ;;  %v2811_v5 = vpop.f32.mrf.mxu3  ;;  %v2207_v60 = vadd.f32 %v2159_v31, %v4835_v2 }
 0x320   : > { %v3518_v15 = vadd.f32 %v3517_v19, %v3516_v25 }
 0x321   : > { %v3638_v42 = vsel %vm288_vm1, %v3570_v44, 0.0  ;;  %v2858_v14 = vadd.f32 %v2808_v20, %v2532_v38 }
 0x322   : > { %v3639_v58 = vadd.f32 %v3638_v42, %v3637_v26  ;;  %v3406_v26 = vpop.permute.xlu2 %3405 }
 0x323   : > { %v3184_v62 = vadd.f32 %v3134_v17, %v2858_v14  ;;  %v3411_v14 = vpop.permute.xlu0 %3410 }
 0x324   : > { %v3137_v56 = vpop.f32.mrf.mxu0 }
 0x325   : > { %v3450_v59 = vmul.f32 %v3391_v37, %v3184_v62 }
 0x326   : > { %v2485_v63 = vpop.f32.mrf.mxu2  ;;  %v2162_v3 = vpop.f32.mrf.mxu1 }
 0x327   : > { %v3519_v57 = vsel %vm288_vm1, %v3450_v59, 0.0  ;;  %v3571_v34 = vmul.f32 %v3450_v59, %v3450_v59  ;;  %3695 = vst.msk [vmem:[%s4891_s16 + $0x114] sm:$0xff] %vm288_vm1, %v3450_v59  ;;  %v2533_v24 = vadd.f32 %v2485_v63, %v2207_v60  ;;  %v2814_v16 = vpop.f32.mrf.mxu3  ;;  %v2208_v2 = vadd.f32 %v2162_v3, %v4845_v10 }
 0x328   : > { %v3520_v36 = vadd.f32 %v3519_v57, %v3518_v15 }
 0x329   : > { %v3640_v29 = vsel %vm288_vm1, %v3571_v34, 0.0  ;;  %v2859_v47 = vadd.f32 %v2811_v5, %v2533_v24 }
 0x32a   : > { %v3641_v50 = vadd.f32 %v3640_v29, %v3639_v58 }
 0x32b   : > { %v3185_v33 = vadd.f32 %v3137_v56, %v2859_v47 }
 0x32c   : > { %v3140_v46 = vpop.f32.mrf.mxu0 }
 0x32d   : > { %v3451_v39 = vmul.f32 %v3396_v0, %v3185_v33 }
 0x32e   : > { %v2488_v32 = vpop.f32.mrf.mxu2  ;;  %v2165_v54 = vpop.f32.mrf.mxu1 }
 0x32f   : > { %v3521_v4 = vsel %vm288_vm1, %v3451_v39, 0.0  ;;  %v3572_v23 = vmul.f32 %v3451_v39, %v3451_v39  ;;  %3696 = vst.msk [vmem:[%s4891_s16 + $0x11c] sm:$0xff] %vm288_vm1, %v3451_v39  ;;  %v2534_v55 = vadd.f32 %v2488_v32, %v2208_v2  ;;  %v2817_v21 = vpop.f32.mrf.mxu3  ;;  %v2209_v10 = vadd.f32 %v2165_v54, %v4855_v40 }
 0x330   : > { %v3522_v43 = vadd.f32 %v3521_v4, %v3520_v36 }
 0x331   : > { %v3642_v41 = vsel %vm288_vm1, %v3572_v23, 0.0  ;;  %v2860_v7 = vadd.f32 %v2814_v16, %v2534_v55  ;;  %v3416_v16 = vpop.permute.xlu1 %3415 }
 0x332   : > { %v3643_v9 = vadd.f32 %v3642_v41, %v3641_v50 }
 0x333   : > { %v3186_v27 = vadd.f32 %v3140_v46, %v2860_v7 }
 0x334   : > { %v3143_v45 = vpop.f32.mrf.mxu0 }
 0x335   : > { %v3452_v22 = vmul.f32 %v3401_v35, %v3186_v27 }
 0x336   : > { %v2491_v30 = vpop.f32.mrf.mxu2  ;;  %v2168_v8 = vpop.f32.mrf.mxu1 }
 0x337   : > { %v3523_v13 = vsel %vm288_vm1, %v3452_v22, 0.0  ;;  %v3573_v1 = vmul.f32 %v3452_v22, %v3452_v22  ;;  %3697 = vst.msk [vmem:[%s4891_s16 + $0x124] sm:$0xff] %vm288_vm1, %v3452_v22  ;;  %v2535_v53 = vadd.f32 %v2491_v30, %v2209_v10  ;;  %v2820_v52 = vpop.f32.mrf.mxu3  ;;  %v2210_v40 = vadd.f32 %v2168_v8, %v4865_v11 }
 0x338   : > { %v3524_v61 = vadd.f32 %v3523_v13, %v3522_v43  ;;  %v4203_v11 = vmov 0.0  }
 0x339   : > { %v3644_v20 = vsel %vm288_vm1, %v3573_v1, 0.0  ;;  %v2861_v25 = vadd.f32 %v2817_v21, %v2535_v53  ;;  %3659 = vst.msk [vmem:[%s4891_s16] sm:$0xff] %vm288_vm1, %v4203_v11 }
 0x33a   : > { %v3645_v51 = vadd.f32 %v3644_v20, %v3643_v9  ;;  %3660 = vst.msk [vmem:[%s4891_s16 + $0x8] sm:$0xff] %vm288_vm1, %v4203_v11 }
 0x33b   : > { %v3187_v28 = vadd.f32 %v3143_v45, %v2861_v25  ;;  %3662 = vst.msk [vmem:[%s4891_s16 + $0x10] sm:$0xf] %vm3661_vm2, %v4203_v11 }
 0x33c   : > { %v3146_v48 = vpop.f32.mrf.mxu0  ;;  %3701 = vst.msk [vmem:[%s4891_s16 + $0x144] sm:$0xff] %vm288_vm1, %v4203_v11 }
 0x33d   : > { %v3453_v12 = vmul.f32 %v3406_v26, %v3187_v28  ;;  %3702 = vst.msk [vmem:[%s4891_s16 + $0x14c] sm:$0xff] %vm288_vm1, %v4203_v11 }
 0x33e   : > { %v2494_v17 = vpop.f32.mrf.mxu2  ;;  %v2171_v15 = vpop.f32.mrf.mxu1  ;;  %3703 = vst.msk [vmem:[%s4891_s16 + $0x154] sm:$0xf] %vm3661_vm2, %v4203_v11 }
 0x33f   : > { %v3525_v6 = vsel %vm288_vm1, %v3453_v12, 0.0  ;;  %v3574_v49 = vmul.f32 %v3453_v12, %v3453_v12  ;;  %3698 = vst.msk [vmem:[%s4891_s16 + $0x12c] sm:$0xff] %vm288_vm1, %v3453_v12  ;;  %v2536_v31 = vadd.f32 %v2494_v17, %v2210_v40  ;;  %v2211_v58 = vadd.f32 %v2171_v15, %v4875_v18  ;;  %v2823_v56 = vpop.f32.mrf.mxu3 }
 0x340   : > { %v3526_v19 = vadd.f32 %v3525_v6, %v3524_v61 }
 0x341   : > { %v3646_v44 = vsel %vm288_vm1, %v3574_v49, 0.0  ;;  %v2862_v38 = vadd.f32 %v2820_v52, %v2536_v31 }
 0x342   : > { %v3647_v5 = vadd.f32 %v3646_v44, %v3645_v51 }
 0x343   : > { %v3188_v42 = vadd.f32 %v3146_v48, %v2862_v38 }
 0x344   : > { %v3149_v57 = vpop.f32.mrf.mxu0 }
 0x345   : > { %v3454_v62 = vmul.f32 %v3411_v14, %v3188_v42 }
 0x346   : > { %v2497_v37 = vpop.f32.mrf.mxu2 }
 0x347   : > { %v3527_v60 = vsel %vm288_vm1, %v3454_v62, 0.0  ;;  %v3575_v59 = vmul.f32 %v3454_v62, %v3454_v62  ;;  %3699 = vst.msk [vmem:[%s4891_s16 + $0x134] sm:$0xff] %vm288_vm1, %v3454_v62  ;;  %v2537_v63 = vadd.f32 %v2497_v37, %v2211_v58 }
 0x348   : > { %v3528_v3 = vadd.f32 %v3527_v60, %v3526_v19 }
 0x349   : > { %v3648_v34 = vsel %vm288_vm1, %v3575_v59, 0.0  ;;  %v2863_v18 = vadd.f32 %v2823_v56, %v2537_v63 }
 0x34a   : > { %v3649_v24 = vadd.f32 %v3648_v34, %v3647_v5 }
 0x34b   : > { %v3189_v36 = vadd.f32 %v3149_v57, %v2863_v18 }
 0x34d   : > { %v3455_v29 = vmul.f32 %v3416_v16, %v3189_v36 }
 0x34f   : > { %v3529_v47 = vsel %vm288_vm1, %v3455_v29, 0.0  ;;  %v3576_v50 = vmul.f32 %v3455_v29, %v3455_v29  ;;  %3700 = vst.msk [vmem:[%s4891_s16 + $0x13c] sm:$0xff] %vm288_vm1, %v3455_v29 }
 0x350   : > { %v3530_v33 = vadd.f32 %v3529_v47, %v3528_v3 }
 0x351   : > { %v3650_v0 = vsel %vm288_vm1, %v3576_v50, 0.0 }
 0x352   : > { %v3531_v46 = vrot.slane %v3530_v33, 4  ;;  %v3651_v2 = vadd.f32 %v3650_v0, %v3649_v24 }
 0x354   : > { %v3532_v39 = vadd.f32 %v3531_v46, %v3530_v33  ;;  %v3652_v32 = vrot.slane %v3651_v2, 4 }
 0x356   : > { %v3533_v54 = vrot.slane %v3532_v39, 2  ;;  %v3653_v4 = vadd.f32 %v3652_v32, %v3651_v2 }
 0x358   : > { %v3534_v23 = vadd.f32 %v3533_v54, %v3532_v39  ;;  %v3654_v55 = vrot.slane %v3653_v4, 2 }
 0x35a   : > { %v3535_v43 = vrot.slane %v3534_v23, 1  ;;  %v3655_v41 = vadd.f32 %v3654_v55, %v3653_v4 }
 0x35c   : > { %v3536_v7 = vadd.f32 %v3535_v43, %v3534_v23  ;;  %v3656_v9 = vrot.slane %v3655_v41, 1 }
 0x35e   : > { %3538 = vst.msk [vmem:[%s241_s15] sm:$0x1] %vm3537_vm3, %v3536_v7  ;;  %v3657_v21 = vadd.f32 %v3656_v9, %v3655_v41 }
 0x360   : > { %3658 = vst.msk [vmem:[%s244_s6] sm:$0x1] %vm3537_vm3, %v3657_v21 }
 0x361 PF: > { %s16_s18 = sadd.s32 1, %s4200_s18  }
 0x362   : > { %p13_p5 = scmp.ge.s32.totalorder %s16_s18, 4  }
 0x364   :  { %15 = sbr.rel (!%p13_p5) target bundleno = 1 (0x1), region = 94 }

// kernel: residual_block.4
= control target key start
LH: loop header
LB: loop body
LE: loop exit
PB: predicated region body
PF: predicated region fallthrough
CT: control target
= control target key end

     0   :  { %s4770_s27 = smov 0   ;;  %s6031_s0 = inlined_call_operand.vmem [shape: f32[688,4], index: 0, kind: input, shape index: {}]   ;;  %s6032_s1 = inlined_call_operand.vmem [shape: f32[1,4], index: 1, kind: input, shape index: {}]   ;;  %s6033_s2 = inlined_call_operand.vmem [shape: f32[1,4], index: 2, kind: input, shape index: {}]   ;;  %s6034_s3 = inlined_call_operand.vmem [shape: f32[9,4,4], index: 3, kind: input, shape index: {}]   ;;  %s6035_s4 = inlined_call_operand.vmem [shape: f32[344,1], index: 4, kind: input, shape index: {}]   ;;  %s6036_s5 = inlined_call_operand.vmem [shape: f32[304,1], index: 5, kind: input, shape index: {}]   ;;  %s6037_s6 = inlined_call_operand.vmem [shape: f32[688,4], index: 6, kind: output, shape index: {0}]   ;;  %s6038_s7 = inlined_call_operand.vmem [shape: f32[2,1,4], index: 7, kind: output, shape index: {1}]   ;;  %s6039_s8 = inlined_call_operand.vmem [shape: f32[2,1,4], index: 8, kind: output, shape index: {2}]  }
   0x1 LB: > { %s4776_s28 = sadd.s32 4294967295, %s4721_s27   ;;  %p4333_p0 = scmp.ge.s32.totalorder %s4721_s27, 1  ;;  %s4721_s27 = sphi %s4770_s27, %s19_s27  }
   0x2   : > { %p268_p1 = scmp.lt.s32.totalorder %s4721_s27, 3 }
   0x4   : > { %p269_p2 = pnand %p4333_p0, %p268_p1 }
   0x5   : > { %s308_s15 = smul.u32 (!%p269_p2), 43, %s4776_s28  ;;  %p320_p4 = scmp.lt.s32.totalorder (!%p269_p2), %s4776_s28, 1 }
   0x6   : > { %272 = sbr.rel (%p269_p2) target bundleno = 1006 (0x3ee), region = 44 }
   0x7   : > { %p309_p3 = scmp.lt.s32.totalorder (!%p269_p2), %s308_s15, 85 }
   0xb   : > { %v528_v0 = vld [vmem:[%s6035_s4 + $0xb0] sm:$0xff]  ;;  %v526_v1 = vld [vmem:[%s6035_s4 + $0xa0] sm:$0xff]  ;;  %v4723_v3 = vmov 0   ;;  %v527_v5 = vld [vmem:[%s6035_s4 + $0xa8] sm:$0xff]  ;;  %s6041_s15 = smov (!%p309_p3, %s308_s15), 85  ;;  %vm807_vm0 = vcmask 31744  }
   0xc   : > { %v516_v2 = vld [vmem:[%s6035_s4 + $0x50] sm:$0xff]  ;;  %4712 = vset.pattern.permute.xlu2 %v4723_v3  ;;  %4711 = vset.pattern.permute.xlu1 %v4723_v3  ;;  %v506_v4 = vld [vmem:[%s6035_s4] sm:$0xff]  ;;  %v517_v6 = vld [vmem:[%s6035_s4 + $0x58] sm:$0xff]  ;;  %s4334_s30 = sshll.u32 %s6041_s15, 3  ;;  %vm1044_vm1 = vcmask 1043456   ;;  %vm4180_vm2 = vcmask 27648  }
   0xd   : > { %4710 = vset.pattern.permute.xlu0 %v4723_v3  ;;  %661 = vperm.xlu2 %4712, %v528_v0   ;;  %v529_v7 = vld [vmem:[%s6035_s4 + $0xb8] sm:$0xff]  ;;  %v518_v8 = vld [vmem:[%s6035_s4 + $0x60] sm:$0xff]  ;;  %v507_v9 = vld [vmem:[%s6035_s4 + $0x8] sm:$0xff]  ;;  %s4879_s11 = scalar_lea.vmem %s6031_s0, %s4334_s30  ;;  %s5735_s19 = scalar_lea.vmem %s6037_s6, %s4334_s30  ;;  %vm4056_vm3 = vcmask 24576  }
   0xe   : > { %651 = vperm.xlu0 %4710, %v526_v1   ;;  %601 = vperm.xlu1 %4711, %v516_v2   ;;  %v537_v10 = vld [vmem:[%s6035_s4 + $0xf8] sm:$0xff]  ;;  %v536_v11 = vld [vmem:[%s6035_s4 + $0xf0] sm:$0xff]  ;;  %v530_v14 = vld [vmem:[%s6035_s4 + $0xc0] sm:$0xff]  ;;  %s6043_s28 = smov (!%p320_p4, %s4776_s28), 1 }
   0xf   : > { %v508_v12 = vld [vmem:[%s6035_s4 + $0x10] sm:$0xff]  ;;  %v509_v13 = vld [vmem:[%s6035_s4 + $0x18] sm:$0xff]  ;;  %v519_v15 = vld [vmem:[%s6035_s4 + $0x68] sm:$0xff]  ;;  %s322_s20 = scalar_lea.vmem %s6038_s7, %s6043_s28  ;;  %s325_s23 = scalar_lea.vmem %s6039_s8, %s6043_s28 }
  0x10   : > { %v531_v16 = vld [vmem:[%s6035_s4 + $0xc8] sm:$0xff]  ;;  %v520_v17 = vld [vmem:[%s6035_s4 + $0x70] sm:$0xff]  ;;  %v538_v18 = vld [vmem:[%s6035_s4 + $0x100] sm:$0xff] }
  0x11   : > { %v521_v19 = vld [vmem:[%s6035_s4 + $0x78] sm:$0xff]  ;;  %v539_v20 = vld [vmem:[%s6035_s4 + $0x108] sm:$0xff]  ;;  %v510_v21 = vld [vmem:[%s6035_s4 + $0x20] sm:$0xff] }
  0x12   : > { %v540_v22 = vld [vmem:[%s6035_s4 + $0x110] sm:$0xff]  ;;  %v511_v23 = vld [vmem:[%s6035_s4 + $0x28] sm:$0xff]  ;;  %v533_v26 = vld [vmem:[%s6035_s4 + $0xd8] sm:$0xff] }
  0x13   : > { %v532_v24 = vld [vmem:[%s6035_s4 + $0xd0] sm:$0xff]  ;;  %v522_v27 = vld [vmem:[%s6035_s4 + $0x80] sm:$0xff]  ;;  %v523_v29 = vld [vmem:[%s6035_s4 + $0x88] sm:$0xff] }
  0x14   : > { %v512_v25 = vld [vmem:[%s6035_s4 + $0x30] sm:$0xff]  ;;  %v534_v28 = vld [vmem:[%s6035_s4 + $0xe0] sm:$0xff]  ;;  %v541_v30 = vld [vmem:[%s6035_s4 + $0x118] sm:$0xff] }
  0x15   : > { %551 = vperm.xlu2 %4712, %v506_v4   ;;  %v348_v31 = vld [vmem:[%s4879_s11 + $0xb0] sm:$0xff]  ;;  %v4888_v33 = vld [vmem:[%s6032_s1] ss:$0 sm:$0xff]  ;;  %v513_v35 = vld [vmem:[%s6035_s4 + $0x38] sm:$0xff] }
  0x16   : > { %656 = vperm.xlu0 %4710, %v527_v5   ;;  %606 = vperm.xlu1 %4711, %v517_v6   ;;  %v524_v32 = vld [vmem:[%s6035_s4 + $0x90] sm:$0xff]  ;;  %v542_v34 = vld [vmem:[%s6035_s4 + $0x120] sm:$0xff]  ;;  %v395_v36 = vmul.f32 %v4888_v33, %v348_v31  ;;  %v543_v40 = vld [vmem:[%s6035_s4 + $0x128] sm:$0xff] }
  0x17   : > { %v4900_v37 = vld [vmem:[%s6033_s2] ss:$0 sm:$0xff]  ;;  %v535_v42 = vld [vmem:[%s6035_s4 + $0xe8] sm:$0xff]  ;;  %v349_v48 = vld [vmem:[%s4879_s11 + $0xb8] sm:$0xff] }
  0x18   : > { %v442_v38 = vadd.f32 %v4900_v37, %v395_v36  ;;  %v326_v39 = vld [vmem:[%s4879_s11] sm:$0xff]  ;;  %v544_v49 = vld [vmem:[%s6035_s4 + $0x130] sm:$0xff]  ;;  %v515_v50 = vld [vmem:[%s6035_s4 + $0x48] sm:$0xff]  ;;  %v396_v53 = vmul.f32 %v4888_v33, %v349_v48 }
  0x19   : > { %v514_v41 = vld [vmem:[%s6035_s4 + $0x40] sm:$0xff]  ;;  %v373_v44 = vmul.f32 %v4888_v33, %v326_v39  ;;  %v525_v51 = vld [vmem:[%s6035_s4 + $0x98] sm:$0xff]  ;;  %v547_v57 = vld [vmem:[%s6035_s4 + $0x148] sm:$0xff] }
  0x1a   : > { %v485_v43 = vmax.f32 %v442_v38, 0.0  ;;  %v443_v56 = vadd.f32 %v4900_v37, %v396_v53  ;;  %v357_v58 = vld [vmem:[%s4879_s11 + $0xf8] sm:$0xff]  ;;  %v346_v59 = vld [vmem:[%s4879_s11 + $0xa0] sm:$0xff]  ;;  %v336_v60 = vld [vmem:[%s4879_s11 + $0x50] sm:$0xff] }
  0x1b   : > { %v420_v47 = vadd.f32 %v4900_v37, %v373_v44  ;;  %v4336_v61 = vld [vmem:[%s6034_s3 + $0x4] sm:$0xf]  ;;  %v545_v63 = vld [vmem:[%s6035_s4 + $0x138] sm:$0xff]  ;;  %v404_v1 = vmul.f32 %v4888_v33, %v357_v58  ;;  %v393_v2 = vmul.f32 %v4888_v33, %v346_v59  ;;  %v383_v3 = vmul.f32 %v4888_v33, %v336_v60  ;;  %v3711_v36 = vld [vmem:[%s6036_s5 + $0x10] sm:$0xff] }
  0x1c   : > { %v546_v62 = vld [vmem:[%s6035_s4 + $0x140] sm:$0xff]  ;;  %4697 = vmatpush.msk.msra.mxu1 %vm1044_vm1, %v4336_v61  ;;  %4698 = vmatpush.msk.msra.mxu2 %vm1044_vm1, %v4336_v61  ;;  %v486_v0 = vmax.f32 %v443_v56, 0.0  ;;  %v4415_v44 = vld [vmem:[%s6034_s3 + $0x8] sm:$0xf]  ;;  %v356_v56 = vld [vmem:[%s4879_s11 + $0xf0] sm:$0xff] }
  0x1d   : > { %666 = vperm.xlu2 %4712, %v529_v7   ;;  %v463_v52 = vmax.f32 %v420_v47, 0.0  ;;  %4337 = vmatpush.msk.msra.mxu0 %vm1044_vm1, %v4336_v61  ;;  %v451_v6 = vadd.f32 %v4900_v37, %v404_v1  ;;  %v440_v7 = vadd.f32 %v4900_v37, %v393_v2  ;;  %v3713_v31 = vld [vmem:[%s6036_s5 + $0x20] sm:$0xff]  ;;  %v3715_v58 = vld [vmem:[%s6036_s5 + $0x30] sm:$0xff]  ;;  %v3714_v59 = vld [vmem:[%s6036_s5 + $0x28] sm:$0xff]  ;;  %v403_v1 = vmul.f32 %v4888_v33, %v356_v56 }
  0x1e   : > { %611 = vperm.xlu1 %4711, %v518_v8   ;;  %556 = vperm.xlu0 %4710, %v507_v9   ;;  %v430_v8 = vadd.f32 %v4900_v37, %v383_v3  ;;  %v329_v9 = vld [vmem:[%s4879_s11 + $0x18] sm:$0xff] }
  0x1f   : > { %4699 = vmatpush.msk.msra.mxu3 %vm1044_vm1, %v4336_v61  ;;  %4416 = vmatpush.msk.msrb.mxu2 %vm1044_vm1, %v4415_v44 }
  0x25   : > { %706 = vperm.xlu2 %4712, %v537_v10   ;;  %v3710_v10 = vld [vmem:[%s6036_s5 + $0x8] sm:$0xff] }
  0x26   : > { %701 = vperm.xlu1 %4711, %v536_v11   ;;  %561 = vperm.xlu0 %4710, %v508_v12   ;;  %v347_v11 = vld [vmem:[%s4879_s11 + $0xa8] sm:$0xff]  ;;  %v337_v12 = vld [vmem:[%s4879_s11 + $0x58] sm:$0xff] }
  0x2d   : > { %566 = vperm.xlu2 %4712, %v509_v13   ;;  %v3709_v13 = vld [vmem:[%s6036_s5] sm:$0xff] }
  0x2e   : > { %671 = vperm.xlu1 %4711, %v530_v14   ;;  %616 = vperm.xlu0 %4710, %v519_v15   ;;  %v548_v14 = vld [vmem:[%s6035_s4 + $0x150] sm:$0xff]  ;;  %v494_v15 = vmax.f32 %v451_v6, 0.0 }
  0x35   : > { %676 = vperm.xlu2 %4712, %v531_v16   ;;  %v376_v16 = vmul.f32 %v4888_v33, %v329_v9 }
  0x36   : > { %621 = vperm.xlu1 %4711, %v520_v17   ;;  %711 = vperm.xlu0 %4710, %v538_v18   ;;  %v483_v17 = vmax.f32 %v440_v7, 0.0  ;;  %v473_v18 = vmax.f32 %v430_v8, 0.0 }
  0x3d   : > { %626 = vperm.xlu2 %4712, %v521_v19   ;;  %v394_v19 = vmul.f32 %v4888_v33, %v347_v11  ;;  %v450_v11 = vadd.f32 %v4900_v37, %v403_v1  ;;  %v354_v1 = vld [vmem:[%s4879_s11 + $0xe0] sm:$0xff] }
  0x3e   : > { %716 = vperm.xlu1 %4711, %v539_v20   ;;  %571 = vperm.xlu0 %4710, %v510_v21   ;;  %v384_v20 = vmul.f32 %v4888_v33, %v337_v12 }
  0x45   : > { %721 = vperm.xlu2 %4712, %v540_v22  }
  0x46   : > { %576 = vperm.xlu1 %4711, %v511_v23   ;;  %681 = vperm.xlu0 %4710, %v532_v24  }
  0x4d   : > { %581 = vperm.xlu2 %4712, %v512_v25   ;;  %v423_v25 = vadd.f32 %v4900_v37, %v376_v16  ;;  %v339_v16 = vld [vmem:[%s4879_s11 + $0x68] sm:$0xff] }
  0x4e   : > { %686 = vperm.xlu1 %4711, %v533_v26   ;;  %631 = vperm.xlu0 %4710, %v522_v27  }
  0x4f   : > { %v466_v38 = vmax.f32 %v423_v25, 0.0 }
  0x55   : > { %691 = vperm.xlu2 %4712, %v534_v28   ;;  %v441_v28 = vadd.f32 %v4900_v37, %v394_v19  ;;  %v3717_v19 = vld [vmem:[%s6036_s5 + $0x40] sm:$0xff] }
  0x56   : > { %636 = vperm.xlu1 %4711, %v523_v29   ;;  %726 = vperm.xlu0 %4710, %v541_v30   ;;  %v431_v29 = vadd.f32 %v4900_v37, %v384_v20  ;;  %v351_v30 = vld [vmem:[%s4879_s11 + $0xc8] sm:$0xff] }
  0x57   : > { %v398_v39 = vmul.f32 %v4888_v33, %v351_v30 }
  0x5d   : > { %641 = vperm.xlu2 %4712, %v524_v32   ;;  %v338_v32 = vld [vmem:[%s4879_s11 + $0x60] sm:$0xff] }
  0x5e   : > { %731 = vperm.xlu1 %4711, %v542_v34   ;;  %586 = vperm.xlu0 %4710, %v513_v35   ;;  %v327_v34 = vld [vmem:[%s4879_s11 + $0x8] sm:$0xff]  ;;  %v3712_v35 = vld [vmem:[%s6036_s5 + $0x18] sm:$0xff] }
  0x65   : > { %736 = vperm.xlu2 %4712, %v543_v40   ;;  %v484_v40 = vmax.f32 %v441_v28, 0.0 }
  0x66   : > { %591 = vperm.xlu1 %4711, %v514_v41   ;;  %696 = vperm.xlu0 %4710, %v535_v42   ;;  %v474_v41 = vmax.f32 %v431_v29, 0.0  ;;  %v385_v42 = vmul.f32 %v4888_v33, %v338_v32 }
  0x67   : > { %v662_v45 = vpop.permute.xlu2 %661 }
  0x68   : > { %v786_v46 = vmul.f32 %v662_v45, %v485_v43  ;;  %v374_v43 = vmul.f32 %v4888_v33, %v327_v34 }
  0x6a   : > { %830 = vst.msk [vmem:[#allocation2 + $0xb0] sm:$0xff] %vm807_vm0, %v786_v46  ;;  %v421_v53 = vadd.f32 %v4900_v37, %v374_v43  ;;  %v358_v43 = vld [vmem:[%s4879_s11 + $0x100] sm:$0xff] }
  0x6d   : > { %741 = vperm.xlu2 %4712, %v544_v49   ;;  %v445_v49 = vadd.f32 %v4900_v37, %v398_v39  ;;  %v340_v39 = vld [vmem:[%s4879_s11 + $0x70] sm:$0xff] }
  0x6e   : > { %596 = vperm.xlu1 %4711, %v515_v50   ;;  %646 = vperm.xlu0 %4710, %v525_v51  }
  0x6f   : > { %v552_v54 = vpop.permute.xlu2 %551  ;;  %v488_v60 = vmax.f32 %v445_v49, 0.0  ;;  %v4455_v49 = vld [vmem:[%s6034_s3 + $0xc] sm:$0xf] }
  0x70   : > { %v764_v55 = vmul.f32 %v552_v54, %v463_v52  ;;  %v432_v52 = vadd.f32 %v4900_v37, %v385_v42  ;;  %v341_v54 = vld [vmem:[%s4879_s11 + $0x78] sm:$0xff]  ;;  %4456 = vmatpush.msk.msrb.mxu3 %vm1044_vm1, %v4455_v49 }
  0x71   : > { %v388_v61 = vmul.f32 %v4888_v33, %v341_v54 }
  0x72   : > { %808 = vst.msk [vmem:[#allocation2] sm:$0xff] %vm807_vm0, %v764_v55  ;;  %v3716_v55 = vld [vmem:[%s6036_s5 + $0x38] sm:$0xff] }
  0x73   : > { %v435_v7 = vadd.f32 %v4900_v37, %v388_v61 }
  0x75   : > { %756 = vperm.xlu2 %4712, %v547_v57   ;;  %v328_v57 = vld [vmem:[%s4879_s11 + $0x10] sm:$0xff]  ;;  %v478_v20 = vmax.f32 %v435_v7, 0.0 }
  0x76   : > { %751 = vperm.xlu1 %4711, %v546_v62   ;;  %746 = vperm.xlu0 %4710, %v545_v63   ;;  %v889_v62 = vld [vmem:[%s6034_s3] sm:$0xf]  ;;  %v475_v63 = vmax.f32 %v432_v52, 0.0  ;;  %v375_v2 = vmul.f32 %v4888_v33, %v328_v57  ;;  %v387_v52 = vmul.f32 %v4888_v33, %v340_v39  ;;  %v3723_v7 = vld [vmem:[%s6036_s5 + $0x70] sm:$0xff] }
  0x77   : > { %v667_v4 = vpop.permute.xlu2 %666  ;;  %4376 = vmatpush.msk.msrb.mxu1 %vm1044_vm1, %v889_v62  ;;  %v3725_v62 = vld [vmem:[%s6036_s5 + $0x80] sm:$0xff] }
  0x78   : > { %v787_v5 = vmul.f32 %v667_v4, %v486_v0  ;;  %v464_v0 = vmax.f32 %v421_v53, 0.0  ;;  %v422_v12 = vadd.f32 %v4900_v37, %v375_v2  ;;  %v405_v53 = vmul.f32 %v4888_v33, %v358_v43 }
  0x7a   : > { %831 = vst.msk [vmem:[#allocation2 + $0xb8] sm:$0xff] %vm807_vm0, %v787_v5 }
  0x7d   : > { %3754 = vperm.xlu2 %4712, %v3710_v10   ;;  %v3719_v10 = vld [vmem:[%s6036_s5 + $0x50] sm:$0xff] }
  0x7e   : > { %3749 = vperm.xlu1 %4711, %v3709_v13   ;;  %761 = vperm.xlu0 %4710, %v548_v14   ;;  %v360_v13 = vld [vmem:[%s4879_s11 + $0x110] sm:$0xff] }
  0x7f   : > { %v707_v21 = vpop.permute.xlu2 %706 }
  0x80   : > { %v652_v22 = vpop.permute.xlu0 %651  ;;  %v602_v23 = vpop.permute.xlu1 %601  ;;  %v795_v24 = vmul.f32 %v707_v21, %v494_v15  ;;  %v350_v15 = vld [vmem:[%s4879_s11 + $0xc0] sm:$0xff]  ;;  %v407_v21 = vmul.f32 %v4888_v33, %v360_v13 }
  0x81   : > { %v784_v26 = vmul.f32 %v652_v22, %v483_v17  ;;  %v774_v27 = vmul.f32 %v602_v23, %v473_v18  ;;  %v3718_v18 = vld [vmem:[%s6036_s5 + $0x48] sm:$0xff]  ;;  %v4495_v22 = vld [vmem:[%s6034_s3 + $0x10] sm:$0xf]  ;;  %v493_v23 = vmax.f32 %v450_v11, 0.0  ;;  %v397_v25 = vmul.f32 %v4888_v33, %v350_v15 }
  0x82   : > { %839 = vst.msk [vmem:[#allocation2 + $0xf8] sm:$0xff] %vm807_vm0, %v795_v24  ;;  %v465_v24 = vmax.f32 %v422_v12, 0.0  ;;  %4496 = vmatpush.msk.msrb.mxu0 %vm1044_vm1, %v4495_v22  ;;  %v912_v61 = vld [vmem:[#allocation2 + $0xb1] sm:$0xff] }
  0x83   : > { %828 = vst.msk [vmem:[#allocation2 + $0xa0] sm:$0xff] %vm807_vm0, %v784_v26  ;;  %v386_v26 = vmul.f32 %v4888_v33, %v339_v16  ;;  %v3728_v22 = vld [vmem:[%s6036_s5 + $0x98] sm:$0xff] }
  0x84   : > { %818 = vst.msk [vmem:[#allocation2 + $0x50] sm:$0xff] %vm807_vm0, %v774_v27 }
  0x85   : > { %3769 = vperm.xlu2 %4712, %v3713_v31   ;;  %v454_v31 = vadd.f32 %v4900_v37, %v407_v21  ;;  %v3727_v21 = vld [vmem:[%s6036_s5 + $0x90] sm:$0xff] }
  0x86   : > { %3764 = vperm.xlu1 %4711, %v3712_v35   ;;  %3759 = vperm.xlu0 %4710, %v3711_v36   ;;  %v3722_v35 = vld [vmem:[%s6036_s5 + $0x68] sm:$0xff]  ;;  %v444_v36 = vadd.f32 %v4900_v37, %v397_v25  ;;  %v344_v25 = vld [vmem:[%s4879_s11 + $0x90] sm:$0xff] }
  0x87   : > { %v567_v45 = vpop.permute.xlu2 %566 }
  0x88   : > { %v657_v46 = vpop.permute.xlu0 %656  ;;  %v607_v47 = vpop.permute.xlu1 %606  ;;  %v767_v48 = vmul.f32 %v567_v45, %v466_v38  ;;  %v433_v38 = vadd.f32 %v4900_v37, %v386_v26  ;;  %v3721_v45 = vld [vmem:[%s6036_s5 + $0x60] sm:$0xff] }
  0x89   : > { %v785_v50 = vmul.f32 %v657_v46, %v484_v40  ;;  %v775_v51 = vmul.f32 %v607_v47, %v474_v41  ;;  %v332_v40 = vld [vmem:[%s4879_s11 + $0x30] sm:$0xff]  ;;  %v3720_v46 = vld [vmem:[%s6036_s5 + $0x58] sm:$0xff]  ;;  %v497_v47 = vmax.f32 %v454_v31, 0.0  ;;  %v3726_v31 = vld [vmem:[%s6036_s5 + $0x88] sm:$0xff] }
  0x8a   : > { %811 = vst.msk [vmem:[#allocation2 + $0x18] sm:$0xff] %vm807_vm0, %v767_v48  ;;  %v379_v48 = vmul.f32 %v4888_v33, %v332_v40 }
  0x8b   : > { %829 = vst.msk [vmem:[#allocation2 + $0xa8] sm:$0xff] %vm807_vm0, %v785_v50  ;;  %v487_v50 = vmax.f32 %v444_v36, 0.0 }
  0x8c   : > { %819 = vst.msk [vmem:[#allocation2 + $0x58] sm:$0xff] %vm807_vm0, %v775_v51  ;;  %v476_v51 = vmax.f32 %v433_v38, 0.0 }
  0x8d   : > { %3784 = vperm.xlu2 %4712, %v3716_v55  }
  0x8e   : > { %3779 = vperm.xlu1 %4711, %v3715_v58   ;;  %3774 = vperm.xlu0 %4710, %v3714_v59   ;;  %v426_v58 = vadd.f32 %v4900_v37, %v379_v48 }
  0x8f   : > { %v677_v3 = vpop.permute.xlu2 %676 }
  0x90   : > { %v612_v4 = vpop.permute.xlu1 %611  ;;  %v557_v5 = vpop.permute.xlu0 %556  ;;  %v789_v6 = vmul.f32 %v677_v3, %v488_v60  ;;  %v359_v3 = vld [vmem:[%s4879_s11 + $0x108] sm:$0xff] }
  0x91   : > { %v776_v8 = vmul.f32 %v612_v4, %v475_v63  ;;  %v765_v9 = vmul.f32 %v557_v5, %v464_v0  ;;  %v434_v63 = vadd.f32 %v4900_v37, %v387_v52  ;;  %v452_v0 = vadd.f32 %v4900_v37, %v405_v53  ;;  %v330_v4 = vld [vmem:[%s4879_s11 + $0x20] sm:$0xff] }
  0x92   : > { %833 = vst.msk [vmem:[#allocation2 + $0xc8] sm:$0xff] %vm807_vm0, %v789_v6  ;;  %v910_v14 = vld [vmem:[#allocation2 + $0xa1] sm:$0xff]  ;;  %v911_v42 = vld [vmem:[#allocation2 + $0xa9] sm:$0xff]  ;;  %v3724_v6 = vld [vmem:[%s6036_s5 + $0x78] sm:$0xff]  ;;  %v406_v12 = vmul.f32 %v4888_v33, %v359_v3  ;;  %v377_v13 = vmul.f32 %v4888_v33, %v330_v4 }
  0x93   : > { %820 = vst.msk [vmem:[#allocation2 + $0x60] sm:$0xff] %vm807_vm0, %v776_v8  ;;  %v900_v17 = vld [vmem:[#allocation2 + $0x51] sm:$0xff]  ;;  %4358 = vmatmul.msk.f32.vlgmr.msra.gmra.mxu2 %vm807_vm0, %v910_v14  ;;  %v469_v8 = vmax.f32 %v426_v58, 0.0  ;;  %v495_v11 = vmax.f32 %v452_v0, 0.0 }
  0x94   : > { %809 = vst.msk [vmem:[#allocation2 + $0x8] sm:$0xff] %vm807_vm0, %v765_v9  ;;  %4348 = vmatmul.msk.f32.vlgmr.msra.gmra.mxu1 %vm807_vm0, %v900_v17  ;;  %v401_v9 = vmul.f32 %v4888_v33, %v354_v1 }
  0x95   : > { %3799 = vperm.xlu2 %4712, %v3719_v10   ;;  %v477_v10 = vmax.f32 %v434_v63, 0.0 }
  0x96   : > { %3794 = vperm.xlu1 %4711, %v3718_v18   ;;  %3789 = vperm.xlu0 %4710, %v3717_v19   ;;  %v448_v18 = vadd.f32 %v4900_v37, %v401_v9 }
  0x97   : > { %v627_v27 = vpop.permute.xlu2 %626 }
  0x98   : > { %v702_v28 = vpop.permute.xlu1 %701  ;;  %v562_v29 = vpop.permute.xlu0 %561  ;;  %v779_v30 = vmul.f32 %v627_v27, %v478_v20  ;;  %v331_v27 = vld [vmem:[%s4879_s11 + $0x28] sm:$0xff] }
  0x99   : > { %v794_v32 = vmul.f32 %v702_v28, %v493_v23  ;;  %v766_v34 = vmul.f32 %v562_v29, %v465_v24  ;;  %v453_v23 = vadd.f32 %v4900_v37, %v406_v12  ;;  %v424_v24 = vadd.f32 %v4900_v37, %v377_v13  ;;  %v352_v28 = vld [vmem:[%s4879_s11 + $0xd0] sm:$0xff]  ;;  %v343_v13 = vld [vmem:[%s4879_s11 + $0x88] sm:$0xff] }
  0x9a   : > { %823 = vst.msk [vmem:[#allocation2 + $0x78] sm:$0xff] %vm807_vm0, %v779_v30  ;;  %v901_v41 = vld [vmem:[#allocation2 + $0x59] sm:$0xff]  ;;  %v378_v38 = vmul.f32 %v4888_v33, %v331_v27  ;;  %v399_v39 = vmul.f32 %v4888_v33, %v352_v28 }
  0x9b   : > { %838 = vst.msk [vmem:[#allocation2 + $0xf0] sm:$0xff] %vm807_vm0, %v794_v32  ;;  %v890_v44 = vld [vmem:[#allocation2 + $0x1] sm:$0xff]  ;;  %4359 = vmatmul.msk.f32.gmra.mxu2 %vm807_vm0, %v911_v42  ;;  %v491_v32 = vmax.f32 %v448_v18, 0.0  ;;  %v467_v36 = vmax.f32 %v424_v24, 0.0 }
  0x9c   : > { %810 = vst.msk [vmem:[#allocation2 + $0x10] sm:$0xff] %vm807_vm0, %v766_v34  ;;  %4338 = vmatmul.msk.f32.vlgmr.msra.gmra.mxu0 %vm807_vm0, %v890_v44  ;;  %4349 = vmatmul.msk.f32.gmra.mxu1 %vm807_vm0, %v901_v41  ;;  %v391_v34 = vmul.f32 %v4888_v33, %v344_v25  ;;  %v425_v48 = vadd.f32 %v4900_v37, %v378_v38  ;;  %v362_v38 = vld [vmem:[%s4879_s11 + $0x120] sm:$0xff] }
  0x9d   : > { %3814 = vperm.xlu2 %4712, %v3722_v35   ;;  %v496_v35 = vmax.f32 %v453_v23, 0.0  ;;  %v446_v49 = vadd.f32 %v4900_v37, %v399_v39  ;;  %v333_v39 = vld [vmem:[%s4879_s11 + $0x38] sm:$0xff] }
  0x9e   : > { %3809 = vperm.xlu1 %4711, %v3721_v45   ;;  %3804 = vperm.xlu0 %4710, %v3720_v46   ;;  %v438_v44 = vadd.f32 %v4900_v37, %v391_v34 }
  0x9f   : > { %v722_v54 = vpop.permute.xlu2 %721 }
  0xa0   : > { %v672_v55 = vpop.permute.xlu1 %671  ;;  %v617_v56 = vpop.permute.xlu0 %616  ;;  %v798_v57 = vmul.f32 %v722_v54, %v497_v47  ;;  %v3731_v47 = vld [vmem:[%s6036_s5 + $0xb0] sm:$0xff]  ;;  %v342_v54 = vld [vmem:[%s4879_s11 + $0x80] sm:$0xff]  ;;  %v481_v58 = vmax.f32 %v438_v44, 0.0 }
  0xa1   : > { %v788_v59 = vmul.f32 %v672_v55, %v487_v50  ;;  %v777_v60 = vmul.f32 %v617_v56, %v476_v51  ;;  %v353_v50 = vld [vmem:[%s4879_s11 + $0xd8] sm:$0xff]  ;;  %v363_v51 = vld [vmem:[%s4879_s11 + $0x128] sm:$0xff]  ;;  %v389_v63 = vmul.f32 %v4888_v33, %v342_v54 }
  0xa2   : > { %842 = vst.msk [vmem:[#allocation2 + $0x110] sm:$0xff] %vm807_vm0, %v798_v57  ;;  %v920_v2 = vld [vmem:[#allocation2 + $0xf1] sm:$0xff]  ;;  %v3730_v56 = vld [vmem:[%s6036_s5 + $0xa8] sm:$0xff]  ;;  %v3729_v57 = vld [vmem:[%s6036_s5 + $0xa0] sm:$0xff] }
  0xa3   : > { %832 = vst.msk [vmem:[#allocation2 + $0xc0] sm:$0xff] %vm807_vm0, %v788_v59  ;;  %v891_v5 = vld [vmem:[#allocation2 + $0x9] sm:$0xff]  ;;  %4360 = vmatmul.msk.f32.gmra.mxu2 %vm807_vm0, %v912_v61  ;;  %4368 = vmatmul.msk.f32.vlgmr.msra.gmra.mxu3 %vm807_vm0, %v920_v2  ;;  %v892_v29 = vld [vmem:[#allocation2 + $0x11] sm:$0xff]  ;;  %v410_v59 = vmul.f32 %v4888_v33, %v363_v51  ;;  %v489_v61 = vmax.f32 %v446_v49, 0.0  ;;  %v380_v49 = vmul.f32 %v4888_v33, %v333_v39 }
  0xa4   : > { %821 = vst.msk [vmem:[#allocation2 + $0x68] sm:$0xff] %vm807_vm0, %v777_v60  ;;  %4339 = vmatmul.msk.f32.gmra.mxu0 %vm807_vm0, %v891_v5  ;;  %v468_v60 = vmax.f32 %v425_v48, 0.0  ;;  %v409_v48 = vmul.f32 %v4888_v33, %v362_v38 }
  0xa5   : > { %3829 = vperm.xlu2 %4712, %v3725_v62   ;;  %v400_v62 = vmul.f32 %v4888_v33, %v353_v50  ;;  %v457_v4 = vadd.f32 %v4900_v37, %v410_v59 }
  0xa6   : > { %3824 = vperm.xlu1 %4711, %v3724_v6   ;;  %3819 = vperm.xlu0 %4710, %v3723_v7   ;;  %v3733_v7 = vld [vmem:[%s6036_s5 + $0xc0] sm:$0xff]  ;;  %v456_v59 = vadd.f32 %v4900_v37, %v409_v48 }
  0xa7   : > { %v582_v14 = vpop.permute.xlu2 %581  ;;  %v447_v9 = vadd.f32 %v4900_v37, %v400_v62  ;;  %v500_v18 = vmax.f32 %v457_v4, 0.0  ;;  %v334_v62 = vld [vmem:[%s4879_s11 + $0x40] sm:$0xff] }
  0xa8   : > { %v622_v15 = vpop.permute.xlu1 %621  ;;  %v712_v16 = vpop.permute.xlu0 %711  ;;  %v770_v17 = vmul.f32 %v582_v14, %v469_v8  ;;  %v3734_v8 = vld [vmem:[%s6036_s5 + $0xc8] sm:$0xff]  ;;  %v361_v14 = vld [vmem:[%s4879_s11 + $0x118] sm:$0xff]  ;;  %v499_v4 = vmax.f32 %v456_v59, 0.0  ;;  %v368_v59 = vld [vmem:[%s4879_s11 + $0x150] sm:$0xff] }
  0xa9   : > { %v778_v19 = vmul.f32 %v622_v15, %v477_v10  ;;  %v796_v20 = vmul.f32 %v712_v16, %v495_v11  ;;  %v436_v10 = vadd.f32 %v4900_v37, %v389_v63  ;;  %v364_v11 = vld [vmem:[%s4879_s11 + $0x130] sm:$0xff]  ;;  %v408_v23 = vmul.f32 %v4888_v33, %v361_v14  ;;  %v355_v63 = vld [vmem:[%s4879_s11 + $0xe8] sm:$0xff] }
  0xaa   : > { %814 = vst.msk [vmem:[#allocation2 + $0x30] sm:$0xff] %vm807_vm0, %v770_v17  ;;  %v913_v26 = vld [vmem:[#allocation2 + $0xb9] sm:$0xff]  ;;  %v914_v53 = vld [vmem:[#allocation2 + $0xc1] sm:$0xff]  ;;  %v3743_v14 = vld [vmem:[%s6036_s5 + $0x110] sm:$0xff] }
  0xab   : > { %822 = vst.msk [vmem:[#allocation2 + $0x70] sm:$0xff] %vm807_vm0, %v778_v19  ;;  %v902_v30 = vld [vmem:[#allocation2 + $0x61] sm:$0xff]  ;;  %4361 = vmatmul.msk.f32.gmra.mxu2 %vm807_vm0, %v913_v26  ;;  %v3732_v17 = vld [vmem:[%s6036_s5 + $0xb8] sm:$0xff]  ;;  %v411_v19 = vmul.f32 %v4888_v33, %v364_v11  ;;  %v455_v34 = vadd.f32 %v4900_v37, %v408_v23 }
  0xac   : > { %840 = vst.msk [vmem:[#allocation2 + $0x100] sm:$0xff] %vm807_vm0, %v796_v20  ;;  %4340 = vmatmul.msk.f32.gmra.mxu0 %vm807_vm0, %v892_v29  ;;  %4350 = vmatmul.msk.f32.gmra.mxu1 %vm807_vm0, %v902_v30  ;;  %v490_v20 = vmax.f32 %v447_v9, 0.0 }
  0xad   : > { %3844 = vperm.xlu2 %4712, %v3728_v22   ;;  %v390_v22 = vmul.f32 %v4888_v33, %v343_v13  ;;  %v458_v28 = vadd.f32 %v4900_v37, %v411_v19  ;;  %v345_v19 = vld [vmem:[%s4879_s11 + $0x98] sm:$0xff] }
  0xae   : > { %3839 = vperm.xlu1 %4711, %v3727_v21   ;;  %3834 = vperm.xlu0 %4710, %v3726_v31   ;;  %v479_v21 = vmax.f32 %v436_v10, 0.0  ;;  %v3737_v31 = vld [vmem:[%s6036_s5 + $0xe0] sm:$0xff] }
  0xaf   : > { %v692_v40 = vpop.permute.xlu2 %691  ;;  %v501_v44 = vmax.f32 %v458_v28, 0.0  ;;  %v4575_v28 = vld [vmem:[%s6034_s3 + $0x18] sm:$0xf] }
  0xb0   : > { %v717_v41 = vpop.permute.xlu1 %716  ;;  %v572_v42 = vpop.permute.xlu0 %571  ;;  %v792_v43 = vmul.f32 %v692_v40, %v491_v32  ;;  %v437_v32 = vadd.f32 %v4900_v37, %v390_v22  ;;  %v3741_v22 = vld [vmem:[%s6036_s5 + $0x100] sm:$0xff]  ;;  %4576 = vmatpush.msk.msra.mxu2 %vm1044_vm1, %v4575_v28 }
  0xb1   : > { %v797_v45 = vmul.f32 %v717_v41, %v496_v35  ;;  %v768_v46 = vmul.f32 %v572_v42, %v467_v36  ;;  %v367_v35 = vld [vmem:[%s4879_s11 + $0x148] sm:$0xff]  ;;  %v3736_v41 = vld [vmem:[%s6036_s5 + $0xd8] sm:$0xff]  ;;  %v3735_v42 = vld [vmem:[%s6036_s5 + $0xd0] sm:$0xff] }
  0xb2   : > { %836 = vst.msk [vmem:[#allocation2 + $0xe0] sm:$0xff] %vm807_vm0, %v792_v43  ;;  %v903_v52 = vld [vmem:[#allocation2 + $0x69] sm:$0xff]  ;;  %v904_v16 = vld [vmem:[#allocation2 + $0x71] sm:$0xff] }
  0xb3   : > { %841 = vst.msk [vmem:[#allocation2 + $0x108] sm:$0xff] %vm807_vm0, %v797_v45  ;;  %4362 = vmatmul.msk.f32.gmra.mxu2 %vm807_vm0, %v914_v53  ;;  %v921_v55 = vld [vmem:[#allocation2 + $0xf9] sm:$0xff]  ;;  %v414_v45 = vmul.f32 %v4888_v33, %v367_v35 }
  0xb4   : > { %812 = vst.msk [vmem:[#allocation2 + $0x20] sm:$0xff] %vm807_vm0, %v768_v46  ;;  %4351 = vmatmul.msk.f32.gmra.mxu1 %vm807_vm0, %v903_v52  ;;  %4369 = vmatmul.msk.f32.gmra.mxu3 %vm807_vm0, %v921_v55  ;;  %v480_v46 = vmax.f32 %v437_v32, 0.0  ;;  %v3745_v35 = vld [vmem:[%s6036_s5 + $0x120] sm:$0xff] }
  0xb5   : > { %3859 = vperm.xlu2 %4712, %v3731_v47   ;;  %v498_v47 = vmax.f32 %v455_v34, 0.0  ;;  %v461_v54 = vadd.f32 %v4900_v37, %v414_v45  ;;  %v3744_v45 = vld [vmem:[%s6036_s5 + $0x118] sm:$0xff] }
  0xb6   : > { %3854 = vperm.xlu1 %4711, %v3730_v56   ;;  %3849 = vperm.xlu0 %4710, %v3729_v57   ;;  %v3739_v57 = vld [vmem:[%s6036_s5 + $0xf0] sm:$0xff] }
  0xb7   : > { %v642_v0 = vpop.permute.xlu2 %641 }
  0xb8   : > { %v577_v1 = vpop.permute.xlu1 %576  ;;  %v682_v2 = vpop.permute.xlu0 %681  ;;  %v782_v3 = vmul.f32 %v642_v0, %v481_v58  ;;  %v3740_v58 = vld [vmem:[%s6036_s5 + $0xf8] sm:$0xff] }
  0xb9   : > { %v769_v5 = vmul.f32 %v577_v1, %v468_v60  ;;  %v790_v6 = vmul.f32 %v682_v2, %v489_v61  ;;  %v427_v60 = vadd.f32 %v4900_v37, %v380_v49  ;;  %v3738_v2 = vld [vmem:[%s6036_s5 + $0xe8] sm:$0xff] }
  0xba   : > { %826 = vst.msk [vmem:[#allocation2 + $0x90] sm:$0xff] %vm807_vm0, %v782_v3  ;;  %v922_v12 = vld [vmem:[#allocation2 + $0x101] sm:$0xff]  ;;  %v923_v43 = vld [vmem:[#allocation2 + $0x109] sm:$0xff]  ;;  %v504_v3 = vmax.f32 %v461_v54, 0.0 }
  0xbb   : > { %813 = vst.msk [vmem:[#allocation2 + $0x28] sm:$0xff] %vm807_vm0, %v769_v5  ;;  %v893_v15 = vld [vmem:[#allocation2 + $0x19] sm:$0xff]  ;;  %v470_v5 = vmax.f32 %v427_v60, 0.0 }
  0xbc   : > { %834 = vst.msk [vmem:[#allocation2 + $0xd0] sm:$0xff] %vm807_vm0, %v790_v6  ;;  %4341 = vmatmul.msk.f32.gmra.mxu0 %vm807_vm0, %v893_v15  ;;  %4352 = vmatmul.msk.f32.gmra.mxu1 %vm807_vm0, %v904_v16  ;;  %v381_v6 = vmul.f32 %v4888_v33, %v334_v62 }
  0xbd   : > { %4370 = vmatmul.msk.f32.gmra.mxu3 %vm807_vm0, %v922_v12  ;;  %3874 = vperm.xlu2 %4712, %v3734_v8  }
  0xbe   : > { %3869 = vperm.xlu1 %4711, %v3733_v7   ;;  %3864 = vperm.xlu0 %4710, %v3732_v17   ;;  %v402_v7 = vmul.f32 %v4888_v33, %v355_v63  ;;  %v428_v15 = vadd.f32 %v4900_v37, %v381_v6 }
  0xbf   : > { %v737_v24 = vpop.permute.xlu2 %736 }
  0xc0   : > { %v687_v25 = vpop.permute.xlu1 %686  ;;  %v632_v26 = vpop.permute.xlu0 %631  ;;  %v801_v27 = vmul.f32 %v737_v24, %v500_v18  ;;  %v449_v16 = vadd.f32 %v4900_v37, %v402_v7  ;;  %v335_v18 = vld [vmem:[%s4879_s11 + $0x48] sm:$0xff]  ;;  %v471_v24 = vmax.f32 %v428_v15, 0.0  ;;  %v851_v15 = vld [vmem:[#allocation2] sm:$0xff] }
  0xc1   : > { %v791_v29 = vmul.f32 %v687_v25, %v490_v20  ;;  %v780_v30 = vmul.f32 %v632_v26, %v479_v21  ;;  %v3742_v21 = vld [vmem:[%s6036_s5 + $0x108] sm:$0xff]  ;;  %v382_v26 = vmul.f32 %v4888_v33, %v335_v18  ;;  %v1754_v18 = vld [vmem:[#allocation2 + $0x1b] sm:$0xff] }
  0xc2   : > { %845 = vst.msk [vmem:[#allocation2 + $0x128] sm:$0xff] %vm807_vm0, %v801_v27  ;;  %v894_v36 = vld [vmem:[#allocation2 + $0x21] sm:$0xff]  ;;  %v895_v0 = vld [vmem:[#allocation2 + $0x29] sm:$0xff]  ;;  %v492_v25 = vmax.f32 %v449_v16, 0.0  ;;  %v392_v27 = vmul.f32 %v4888_v33, %v345_v19  ;;  %v2079_v16 = vld [vmem:[#allocation2 + $0x14] sm:$0xff] }
  0xc3   : > { %835 = vst.msk [vmem:[#allocation2 + $0xd8] sm:$0xff] %vm807_vm0, %v791_v29  ;;  %v915_v40 = vld [vmem:[#allocation2 + $0xc9] sm:$0xff]  ;;  %v429_v38 = vadd.f32 %v4900_v37, %v382_v26 }
  0xc4   : > { %824 = vst.msk [vmem:[#allocation2 + $0x80] sm:$0xff] %vm807_vm0, %v780_v30  ;;  %4342 = vmatmul.msk.f32.gmra.mxu0 %vm807_vm0, %v894_v36  ;;  %4363 = vmatmul.msk.f32.gmra.mxu2 %vm807_vm0, %v915_v40  ;;  %v3746_v36 = vld [vmem:[%s6036_s5 + $0x128] sm:$0xff]  ;;  %v439_v39 = vadd.f32 %v4900_v37, %v392_v27  ;;  %v854_v27 = vld [vmem:[#allocation2 + $0x18] sm:$0xff] }
  0xc5   : > { %4371 = vmatmul.msk.f32.gmra.mxu3 %vm807_vm0, %v923_v43  ;;  %3889 = vperm.xlu2 %4712, %v3737_v31   ;;  %v4615_v31 = vld [vmem:[%s6034_s3 + $0x1c] sm:$0xf]  ;;  %v852_v19 = vld [vmem:[#allocation2 + $0x8] sm:$0xff] }
  0xc6   : > { %3884 = vperm.xlu1 %4711, %v3736_v41   ;;  %3879 = vperm.xlu0 %4710, %v3735_v42   ;;  %v366_v41 = vld [vmem:[%s4879_s11 + $0x140] sm:$0xff]  ;;  %v365_v42 = vld [vmem:[%s4879_s11 + $0x138] sm:$0xff]  ;;  %v1756_v26 = vld [vmem:[#allocation2 + $0x2b] sm:$0xff] }
  0xc7   : > { %v742_v50 = vpop.permute.xlu2 %741  ;;  %4616 = vmatpush.msk.msra.mxu3 %vm1044_vm1, %v4615_v31  ;;  %v413_v48 = vmul.f32 %v4888_v33, %v366_v41  ;;  %v412_v49 = vmul.f32 %v4888_v33, %v365_v42  ;;  %v2082_v28 = vld [vmem:[#allocation2 + $0x2c] sm:$0xff] }
  0xc8   : > { %v637_v51 = vpop.permute.xlu1 %636  ;;  %v727_v52 = vpop.permute.xlu0 %726  ;;  %v802_v53 = vmul.f32 %v742_v50, %v501_v44  ;;  %v4535_v50 = vld [vmem:[%s6034_s3 + $0x14] sm:$0xf] }
  0xc9   : > { %v781_v55 = vmul.f32 %v637_v51, %v480_v46  ;;  %v799_v56 = vmul.f32 %v727_v52, %v498_v47  ;;  %v472_v46 = vmax.f32 %v429_v38, 0.0  ;;  %v482_v47 = vmax.f32 %v439_v39, 0.0  ;;  %4536 = vmatpush.msk.msra.mxu1 %vm1044_vm1, %v4535_v50 }
  0xca   : > { %846 = vst.msk [vmem:[#allocation2 + $0x130] sm:$0xff] %vm807_vm0, %v802_v53  ;;  %v916_v61 = vld [vmem:[#allocation2 + $0xd1] sm:$0xff]  ;;  %v917_v23 = vld [vmem:[#allocation2 + $0xd9] sm:$0xff] }
  0xcb   : > { %825 = vst.msk [vmem:[#allocation2 + $0x88] sm:$0xff] %vm807_vm0, %v781_v55  ;;  %v905_v1 = vld [vmem:[#allocation2 + $0x79] sm:$0xff] }
  0xcc   : > { %843 = vst.msk [vmem:[#allocation2 + $0x118] sm:$0xff] %vm807_vm0, %v799_v56  ;;  %4343 = vmatmul.msk.f32.gmra.mxu0 %vm807_vm0, %v895_v0  ;;  %4353 = vmatmul.msk.f32.gmra.mxu1 %vm807_vm0, %v905_v1  ;;  %v4655_v53 = vld [vmem:[%s6034_s3 + $0x20] sm:$0xf]  ;;  %v460_v56 = vadd.f32 %v4900_v37, %v413_v48  ;;  %v415_v0 = vmul.f32 %v4888_v33, %v368_v59 }
  0xcd   : > { %4364 = vmatmul.msk.f32.gmra.mxu2 %vm807_vm0, %v916_v61  ;;  %3904 = vperm.xlu2 %4712, %v3740_v58  }
  0xce   : > { %3899 = vperm.xlu1 %4711, %v3739_v57   ;;  %3894 = vperm.xlu0 %4710, %v3738_v2   ;;  %v459_v57 = vadd.f32 %v4900_v37, %v412_v49  ;;  %v503_v62 = vmax.f32 %v460_v56, 0.0 }
  0xcf   : > { %v757_v8 = vpop.permute.xlu2 %756  ;;  %4656 = vmatpush.msk.msra.mxu0 %vm1044_vm1, %v4655_v53 }
  0xd0   : > { %v732_v9 = vpop.permute.xlu1 %731  ;;  %v587_v10 = vpop.permute.xlu0 %586  ;;  %v805_v11 = vmul.f32 %v757_v8, %v504_v3  ;;  %v502_v63 = vmax.f32 %v459_v57, 0.0  ;;  %v1761_v57 = vld [vmem:[#allocation2 + $0x53] sm:$0xff] }
  0xd1   : > { %v800_v12 = vmul.f32 %v732_v9, %v499_v4  ;;  %v771_v13 = vmul.f32 %v587_v10, %v470_v5  ;;  %v462_v5 = vadd.f32 %v4900_v37, %v415_v0  ;;  %v927_v9 = vld [vmem:[#allocation2 + $0x129] sm:$0xff] }
  0xd2   : > { %849 = vst.msk [vmem:[#allocation2 + $0x148] sm:$0xff] %vm807_vm0, %v805_v11  ;;  %v906_v17 = vld [vmem:[#allocation2 + $0x81] sm:$0xff]  ;;  %v907_v44 = vld [vmem:[#allocation2 + $0x89] sm:$0xff] }
  0xd3   : > { %844 = vst.msk [vmem:[#allocation2 + $0x120] sm:$0xff] %vm807_vm0, %v800_v12  ;;  %v924_v20 = vld [vmem:[#allocation2 + $0x111] sm:$0xff]  ;;  %v505_v33 = vmax.f32 %v462_v5, 0.0  ;;  %v2088_v5 = vld [vmem:[#allocation2 + $0x5c] sm:$0xff] }
  0xd4   : > { %815 = vst.msk [vmem:[#allocation2 + $0x38] sm:$0xff] %vm807_vm0, %v771_v13  ;;  %4354 = vmatmul.msk.f32.gmra.mxu1 %vm807_vm0, %v906_v17  ;;  %4372 = vmatmul.msk.f32.gmra.mxu3 %vm807_vm0, %v924_v20  ;;  %v1427_v13 = vld [vmem:[#allocation2 + $0x2] sm:$0xff]  ;;  %v1428_v17 = vld [vmem:[#allocation2 + $0xa] sm:$0xff] }
  0xd5   : > { %4365 = vmatmul.msk.f32.gmra.mxu2 %vm807_vm0, %v917_v23  ;;  %3919 = vperm.xlu2 %4712, %v3743_v14   ;;  %v1753_v14 = vld [vmem:[#allocation2 + $0x13] sm:$0xff]  ;;  %v2080_v20 = vld [vmem:[#allocation2 + $0x1c] sm:$0xff] }
  0xd6   : > { %3914 = vperm.xlu1 %4711, %v3742_v21   ;;  %3909 = vperm.xlu0 %4710, %v3741_v22   ;;  %v1429_v21 = vld [vmem:[#allocation2 + $0x12] sm:$0xff]  ;;  %v1755_v22 = vld [vmem:[#allocation2 + $0x23] sm:$0xff] }
  0xd7   : > { %v853_v23 = vld [vmem:[#allocation2 + $0x10] sm:$0xff] }
  0xd8   : > { %v592_v29 = vpop.permute.xlu1 %591  ;;  %v697_v30 = vpop.permute.xlu0 %696 }
  0xd9   : > { %v772_v32 = vmul.f32 %v592_v29, %v471_v24  ;;  %v793_v34 = vmul.f32 %v697_v30, %v492_v25  ;;  %v2081_v24 = vld [vmem:[#allocation2 + $0x24] sm:$0xff]  ;;  %v1430_v25 = vld [vmem:[#allocation2 + $0x1a] sm:$0xff] }
  0xda   : > { %v925_v40 = vld [vmem:[#allocation2 + $0x119] sm:$0xff]  ;;  %v926_v61 = vld [vmem:[#allocation2 + $0x121] sm:$0xff] }
  0xdb   : > { %816 = vst.msk [vmem:[#allocation2 + $0x40] sm:$0xff] %vm807_vm0, %v772_v32  ;;  %v896_v43 = vld [vmem:[#allocation2 + $0x31] sm:$0xff]  ;;  %v1431_v29 = vld [vmem:[#allocation2 + $0x22] sm:$0xff] }
  0xdc   : > { %837 = vst.msk [vmem:[#allocation2 + $0xe8] sm:$0xff] %vm807_vm0, %v793_v34  ;;  %4344 = vmatmul.msk.f32.gmra.mxu0 %vm807_vm0, %v896_v43  ;;  %4355 = vmatmul.msk.f32.gmra.mxu1 %vm807_vm0, %v907_v44  ;;  %v1757_v30 = vld [vmem:[#allocation2 + $0x33] sm:$0xff]  ;;  %v855_v32 = vld [vmem:[#allocation2 + $0x20] sm:$0xff] }
  0xdd   : > { %4373 = vmatmul.msk.f32.gmra.mxu3 %vm807_vm0, %v925_v40  ;;  %3934 = vperm.xlu2 %4712, %v3746_v36   ;;  %v2083_v34 = vld [vmem:[#allocation2 + $0x34] sm:$0xff]  ;;  %v5321_v40 = vld [vmem:[#allocation2 + $0x28] sm:$0xff] }
  0xde   : > { %3929 = vperm.xlu1 %4711, %v3745_v35   ;;  %3924 = vperm.xlu0 %4710, %v3744_v45   ;;  %v1432_v35 = vld [vmem:[#allocation2 + $0x2a] sm:$0xff]  ;;  %v1433_v42 = vld [vmem:[#allocation2 + $0x32] sm:$0xff] }
  0xe0   : > { %v597_v51 = vpop.permute.xlu1 %596  ;;  %v647_v52 = vpop.permute.xlu0 %646 }
  0xe1   : > { %v773_v54 = vmul.f32 %v597_v51, %v472_v46  ;;  %v783_v55 = vmul.f32 %v647_v52, %v482_v47  ;;  %v5334_v47 = vld [vmem:[#allocation2 + $0x30] sm:$0xff] }
  0xe2   : > { %v897_v58 = vld [vmem:[#allocation2 + $0x39] sm:$0xff] }
  0xe3   : > { %817 = vst.msk [vmem:[#allocation2 + $0x48] sm:$0xff] %vm807_vm0, %v773_v54  ;;  %v918_v60 = vld [vmem:[#allocation2 + $0xe1] sm:$0xff]  ;;  %v919_v8 = vld [vmem:[#allocation2 + $0xe9] sm:$0xff]  ;;  %v5347_v54 = vld [vmem:[#allocation2 + $0x38] sm:$0xff] }
  0xe4   : > { %827 = vst.msk [vmem:[#allocation2 + $0x98] sm:$0xff] %vm807_vm0, %v783_v55  ;;  %4345 = vmatmul.msk.f32.gmra.mxu0 %vm807_vm0, %v897_v58  ;;  %4366 = vmatmul.msk.f32.gmra.mxu2 %vm807_vm0, %v918_v60  ;;  %v1758_v36 = vld [vmem:[#allocation2 + $0x3b] sm:$0xff] }
  0xe5   : > { %4374 = vmatmul.msk.f32.gmra.mxu3 %vm807_vm0, %v926_v61  ;;  %v2084_v41 = vld [vmem:[#allocation2 + $0x3c] sm:$0xff] }
  0xe6   : > { %v1434_v49 = vld [vmem:[#allocation2 + $0x3a] sm:$0xff] }
  0xe8   : > { %v752_v1 = vpop.permute.xlu1 %751  ;;  %v747_v2 = vpop.permute.xlu0 %746 }
  0xe9   : > { %v804_v3 = vmul.f32 %v752_v1, %v503_v62  ;;  %v803_v4 = vmul.f32 %v747_v2, %v502_v63  ;;  %v5362_v62 = vld [vmem:[#allocation2 + $0x40] sm:$0xff]  ;;  %v2087_v63 = vld [vmem:[#allocation2 + $0x54] sm:$0xff] }
  0xea   : > { %v898_v6 = vld [vmem:[#allocation2 + $0x41] sm:$0xff]  ;;  %v899_v37 = vld [vmem:[#allocation2 + $0x49] sm:$0xff] }
  0xeb   : > { %848 = vst.msk [vmem:[#allocation2 + $0x140] sm:$0xff] %vm807_vm0, %v804_v3  ;;  %v908_v7 = vld [vmem:[#allocation2 + $0x91] sm:$0xff]  ;;  %v909_v12 = vld [vmem:[#allocation2 + $0x99] sm:$0xff]  ;;  %v1759_v43 = vld [vmem:[#allocation2 + $0x43] sm:$0xff] }
  0xec   : > { %847 = vst.msk [vmem:[#allocation2 + $0x138] sm:$0xff] %vm807_vm0, %v803_v4  ;;  %4346 = vmatmul.msk.f32.gmra.mxu0 %vm807_vm0, %v898_v6  ;;  %4356 = vmatmul.msk.f32.gmra.mxu1 %vm807_vm0, %v908_v7  ;;  %v2085_v48 = vld [vmem:[#allocation2 + $0x44] sm:$0xff]  ;;  %v2086_v55 = vld [vmem:[#allocation2 + $0x4c] sm:$0xff]  ;;  %v1762_v1 = vld [vmem:[#allocation2 + $0x5b] sm:$0xff] }
  0xed   : > { %4367 = vmatmul.msk.f32.gmra.mxu2 %vm807_vm0, %v919_v8  ;;  %4375 = vmatmul.msk.f32.gmra.mxu3 %vm807_vm0, %v927_v9  ;;  %v1760_v50 = vld [vmem:[#allocation2 + $0x4b] sm:$0xff]  ;;  %v1435_v56 = vld [vmem:[#allocation2 + $0x42] sm:$0xff] }
  0xee   : > { %v1436_v0 = vld [vmem:[#allocation2 + $0x4a] sm:$0xff]  ;;  %v1437_v6 = vld [vmem:[#allocation2 + $0x52] sm:$0xff] }
  0xef   : > { %v5373_v4 = vld [vmem:[#allocation2 + $0x48] sm:$0xff] }
  0xf0   : > { %v762_v10 = vpop.permute.xlu0 %761  ;;  %v1763_v7 = vld [vmem:[#allocation2 + $0x63] sm:$0xff] }
  0xf1   : > { %v806_v11 = vmul.f32 %v762_v10, %v505_v33 }
  0xf3   : > { %850 = vst.msk [vmem:[#allocation2 + $0x150] sm:$0xff] %vm807_vm0, %v806_v11  ;;  %v5388_v11 = vld [vmem:[#allocation2 + $0x50] sm:$0xff] }
  0xf4   : > { %4347 = vmatmul.msk.f32.gmra.mxu0 %vm807_vm0, %v899_v37  ;;  %4357 = vmatmul.msk.f32.gmra.mxu1 %vm807_vm0, %v909_v12  ;;  %v2089_v37 = vld [vmem:[#allocation2 + $0x64] sm:$0xff]  ;;  %v1438_v12 = vld [vmem:[#allocation2 + $0x5a] sm:$0xff] }
  0xf5   : > { %4417 = vmatmul.msk.f32.vlgmr.msrb.gmra.mxu2 %vm807_vm0, %v1427_v13  ;;  %4457 = vmatmul.msk.f32.vlgmr.msrb.gmra.mxu3 %vm807_vm0, %v1753_v14  ;;  %v1764_v13 = vld [vmem:[#allocation2 + $0x6b] sm:$0xff] }
  0xfc   : > { %4377 = vmatmul.msk.f32.vlgmr.msrb.gmra.mxu1 %vm807_vm0, %v851_v15  ;;  %4497 = vmatmul.msk.f32.vlgmr.msrb.gmra.mxu0 %vm807_vm0, %v2079_v16 }
  0xfd   : > { %4418 = vmatmul.msk.f32.gmra.mxu2 %vm807_vm0, %v1428_v17  ;;  %4458 = vmatmul.msk.f32.gmra.mxu3 %vm807_vm0, %v1754_v18  ;;  %v862_v17 = vld [vmem:[#allocation2 + $0x58] sm:$0xff]  ;;  %v2090_v18 = vld [vmem:[#allocation2 + $0x6c] sm:$0xff] }
 0x104   : > { %4378 = vmatmul.msk.f32.gmra.mxu1 %vm807_vm0, %v852_v19  ;;  %4498 = vmatmul.msk.f32.gmra.mxu0 %vm807_vm0, %v2080_v20  ;;  %v1439_v19 = vld [vmem:[#allocation2 + $0x62] sm:$0xff]  ;;  %v1765_v20 = vld [vmem:[#allocation2 + $0x73] sm:$0xff] }
 0x105   : > { %4419 = vmatmul.msk.f32.gmra.mxu2 %vm807_vm0, %v1429_v21  ;;  %4459 = vmatmul.msk.f32.gmra.mxu3 %vm807_vm0, %v1755_v22 }
 0x10c   : > { %4379 = vmatmul.msk.f32.gmra.mxu1 %vm807_vm0, %v853_v23  ;;  %4499 = vmatmul.msk.f32.gmra.mxu0 %vm807_vm0, %v2081_v24 }
 0x10d   : > { %4420 = vmatmul.msk.f32.gmra.mxu2 %vm807_vm0, %v1430_v25  ;;  %4460 = vmatmul.msk.f32.gmra.mxu3 %vm807_vm0, %v1756_v26  ;;  %v863_v25 = vld [vmem:[#allocation2 + $0x60] sm:$0xff]  ;;  %v2091_v26 = vld [vmem:[#allocation2 + $0x74] sm:$0xff] }
 0x111   : > { %v5317_v38 = vpop.f32.mrf.mxu1 }
 0x114   : > { %4380 = vmatmul.msk.f32.gmra.mxu1 %vm807_vm0, %v854_v27  ;;  %4500 = vmatmul.msk.f32.gmra.mxu0 %vm807_vm0, %v2082_v28  ;;  %v1440_v27 = vld [vmem:[#allocation2 + $0x6a] sm:$0xff]  ;;  %v1766_v28 = vld [vmem:[#allocation2 + $0x7b] sm:$0xff] }
 0x115   : > { %4421 = vmatmul.msk.f32.gmra.mxu2 %vm807_vm0, %v1431_v29  ;;  %4461 = vmatmul.msk.f32.gmra.mxu3 %vm807_vm0, %v1757_v30 }
 0x116   : > { %v5311_v31 = vpop.f32.mrf.mxu2 }
 0x119   : > { %v5319_v39 = vpop.f32.mrf.mxu0  ;;  %v5330_v45 = vpop.f32.mrf.mxu1 }
 0x11c   : > { %4381 = vmatmul.msk.f32.gmra.mxu1 %vm807_vm0, %v855_v32  ;;  %4501 = vmatmul.msk.f32.gmra.mxu0 %vm807_vm0, %v2083_v34 }
 0x11d   : > { %4422 = vmatmul.msk.f32.gmra.mxu2 %vm807_vm0, %v1432_v35  ;;  %4462 = vmatmul.msk.f32.gmra.mxu3 %vm807_vm0, %v1758_v36  ;;  %v864_v35 = vld [vmem:[#allocation2 + $0x68] sm:$0xff]  ;;  %v2092_v36 = vld [vmem:[#allocation2 + $0x7c] sm:$0xff] }
 0x11e   : > { %v5326_v44 = vpop.f32.mrf.mxu2 }
 0x121   : > { %v5332_v46 = vpop.f32.mrf.mxu0 }
 0x124   : > { %4382 = vmatmul.msk.f32.gmra.mxu1 %vm807_vm0, %v5321_v40  ;;  %4502 = vmatmul.msk.f32.gmra.mxu0 %vm807_vm0, %v2084_v41  ;;  %v1441_v41 = vld [vmem:[#allocation2 + $0x72] sm:$0xff] }
 0x125   : > { %4423 = vmatmul.msk.f32.gmra.mxu2 %vm807_vm0, %v1433_v42  ;;  %4463 = vmatmul.msk.f32.gmra.mxu3 %vm807_vm0, %v1759_v43  ;;  %v1767_v42 = vld [vmem:[#allocation2 + $0x83] sm:$0xff] }
 0x126   : > { %v5341_v51 = vpop.f32.mrf.mxu2  ;;  %v5345_v53 = vpop.f32.mrf.mxu3 }
 0x129   : > { %v5343_v52 = vpop.f32.mrf.mxu1  ;;  %v5352_v58 = vpop.f32.mrf.mxu0 }
 0x12c   : > { %4383 = vmatmul.msk.f32.gmra.mxu1 %vm807_vm0, %v5334_v47  ;;  %4503 = vmatmul.msk.f32.gmra.mxu0 %vm807_vm0, %v2085_v48 }
 0x12d   : > { %4424 = vmatmul.msk.f32.gmra.mxu2 %vm807_vm0, %v1434_v49  ;;  %4464 = vmatmul.msk.f32.gmra.mxu3 %vm807_vm0, %v1760_v50 }
 0x12e   : > { %v5356_v59 = vpop.f32.mrf.mxu2 }
 0x131   : > { %v5358_v60 = vpop.f32.mrf.mxu1 }
 0x134   : > { %4384 = vmatmul.msk.f32.gmra.mxu1 %vm807_vm0, %v5347_v54  ;;  %4504 = vmatmul.msk.f32.gmra.mxu0 %vm807_vm0, %v2086_v55  ;;  %v865_v55 = vld [vmem:[#allocation2 + $0x70] sm:$0xff] }
 0x135   : > { %4425 = vmatmul.msk.f32.gmra.mxu2 %vm807_vm0, %v1435_v56  ;;  %4465 = vmatmul.msk.f32.gmra.mxu3 %vm807_vm0, %v1761_v57  ;;  %v2093_v56 = vld [vmem:[#allocation2 + $0x84] sm:$0xff]  ;;  %v1442_v57 = vld [vmem:[#allocation2 + $0x7a] sm:$0xff] }
 0x136   : > { %v5371_v3 = vpop.f32.mrf.mxu2 }
 0x137   : > { %v5360_v61 = vpop.f32.mrf.mxu3 }
 0x139   : > { %v5367_v2 = vpop.f32.mrf.mxu0  ;;  %v5378_v8 = vpop.f32.mrf.mxu1 }
 0x13c   : > { %4385 = vmatmul.msk.f32.gmra.mxu1 %vm807_vm0, %v5362_v62  ;;  %4505 = vmatmul.msk.f32.gmra.mxu0 %vm807_vm0, %v2087_v63  ;;  %v1768_v63 = vld [vmem:[#allocation2 + $0x8b] sm:$0xff] }
 0x13d   : > { %4426 = vmatmul.msk.f32.gmra.mxu2 %vm807_vm0, %v1436_v0  ;;  %4466 = vmatmul.msk.f32.gmra.mxu3 %vm807_vm0, %v1762_v1 }
 0x140   : > { %v5380_v9 = vpop.f32.mrf.mxu3 }
 0x141   : > { %v5384_v33 = vpop.f32.mrf.mxu0 }
 0x144   : > { %4386 = vmatmul.msk.f32.gmra.mxu1 %vm807_vm0, %v5373_v4  ;;  %4506 = vmatmul.msk.f32.gmra.mxu0 %vm807_vm0, %v2088_v5 }
 0x145   : > { %4427 = vmatmul.msk.f32.gmra.mxu2 %vm807_vm0, %v1437_v6  ;;  %4467 = vmatmul.msk.f32.gmra.mxu3 %vm807_vm0, %v1763_v7  ;;  %v866_v7 = vld [vmem:[#allocation2 + $0x78] sm:$0xff] }
 0x147   : > { %v5386_v10 = vpop.f32.mrf.mxu2 }
 0x148   : > { %v5397_v15 = vpop.f32.mrf.mxu3 }
 0x149   : > { %v5393_v14 = vpop.f32.mrf.mxu1  ;;  %v5399_v16 = vpop.f32.mrf.mxu0 }
 0x14c   : > { %4387 = vmatmul.msk.f32.gmra.mxu1 %vm807_vm0, %v5388_v11  ;;  %4507 = vmatmul.msk.f32.gmra.mxu0 %vm807_vm0, %v2089_v37  ;;  %v2094_v37 = vld [vmem:[#allocation2 + $0x8c] sm:$0xff] }
 0x14d   : > { %4428 = vmatmul.msk.f32.gmra.mxu2 %vm807_vm0, %v1438_v12  ;;  %4468 = vmatmul.msk.f32.gmra.mxu3 %vm807_vm0, %v1764_v13  ;;  %v1443_v12 = vld [vmem:[#allocation2 + $0x82] sm:$0xff]  ;;  %v1769_v13 = vld [vmem:[#allocation2 + $0x93] sm:$0xff] }
 0x150   : > { %v5403_v21 = vpop.f32.mrf.mxu2 }
 0x151   : > { %v5407_v22 = vpop.f32.mrf.mxu1 }
 0x154   : > { %4388 = vmatmul.msk.f32.gmra.mxu1 %vm807_vm0, %v862_v17  ;;  %4508 = vmatmul.msk.f32.gmra.mxu0 %vm807_vm0, %v2090_v18 }
 0x155   : > { %4429 = vmatmul.msk.f32.gmra.mxu2 %vm807_vm0, %v1439_v19  ;;  %4469 = vmatmul.msk.f32.gmra.mxu3 %vm807_vm0, %v1765_v20 }
 0x157   : > { %v5409_v23 = vpop.f32.mrf.mxu3 }
 0x158   : > { %v5417_v29 = vpop.f32.mrf.mxu2 }
 0x159   : > { %v5411_v24 = vpop.f32.mrf.mxu0  ;;  %v5421_v32 = vpop.f32.mrf.mxu1 }
 0x15c   : > { %4389 = vmatmul.msk.f32.gmra.mxu1 %vm807_vm0, %v863_v25  ;;  %4509 = vmatmul.msk.f32.gmra.mxu0 %vm807_vm0, %v2091_v26  ;;  %v867_v26 = vld [vmem:[#allocation2 + $0x80] sm:$0xff] }
 0x15d   : > { %4430 = vmatmul.msk.f32.gmra.mxu2 %vm807_vm0, %v1440_v27  ;;  %4470 = vmatmul.msk.f32.gmra.mxu3 %vm807_vm0, %v1766_v28  ;;  %v2095_v27 = vld [vmem:[#allocation2 + $0x94] sm:$0xff] }
 0x160   : > { %v5419_v30 = vpop.f32.mrf.mxu3 }
 0x161   : > { %v5423_v34 = vpop.f32.mrf.mxu0 }
 0x164   : > { %4390 = vmatmul.msk.f32.gmra.mxu1 %vm807_vm0, %v864_v35  ;;  %4510 = vmatmul.msk.f32.gmra.mxu0 %vm807_vm0, %v2092_v36  ;;  %v1444_v35 = vld [vmem:[#allocation2 + $0x8a] sm:$0xff]  ;;  %v1770_v36 = vld [vmem:[#allocation2 + $0x9b] sm:$0xff] }
 0x165   : > { %4431 = vmatmul.msk.f32.gmra.mxu2 %vm807_vm0, %v1441_v41  ;;  %4471 = vmatmul.msk.f32.gmra.mxu3 %vm807_vm0, %v1767_v42 }
 0x167   : > { %v5429_v43 = vpop.f32.mrf.mxu2 }
 0x168   : > { %v5431_v48 = vpop.f32.mrf.mxu3 }
 0x169   : > { %v5433_v49 = vpop.f32.mrf.mxu0  ;;  %v5435_v50 = vpop.f32.mrf.mxu1 }
 0x16c   : > { %4391 = vmatmul.msk.f32.gmra.mxu1 %vm807_vm0, %v865_v55  ;;  %4511 = vmatmul.msk.f32.gmra.mxu0 %vm807_vm0, %v2093_v56 }
 0x16d   : > { %4432 = vmatmul.msk.f32.gmra.mxu2 %vm807_vm0, %v1442_v57  ;;  %4472 = vmatmul.msk.f32.gmra.mxu3 %vm807_vm0, %v1768_v63 }
 0x170   : > { %v5441_v0 = vpop.f32.mrf.mxu2  ;;  %v5443_v1 = vpop.f32.mrf.mxu3 }
 0x171   : > { %v5445_v5 = vpop.f32.mrf.mxu0  ;;  %v5447_v6 = vpop.f32.mrf.mxu1 }
 0x174   : > { %4392 = vmatmul.msk.f32.gmra.mxu1 %vm807_vm0, %v866_v7  ;;  %4512 = vmatmul.msk.f32.gmra.mxu0 %vm807_vm0, %v2094_v37  ;;  %v868_v7 = vld [vmem:[#allocation2 + $0x88] sm:$0xff]  ;;  %v2096_v37 = vld [vmem:[#allocation2 + $0x9c] sm:$0xff] }
 0x175   : > { %4433 = vmatmul.msk.f32.gmra.mxu2 %vm807_vm0, %v1443_v12  ;;  %4473 = vmatmul.msk.f32.gmra.mxu3 %vm807_vm0, %v1769_v13  ;;  %v1445_v13 = vld [vmem:[#allocation2 + $0x92] sm:$0xff] }
 0x178   : > { %v1601_v17 = vpop.f32.mrf.mxu2  ;;  %v1927_v18 = vpop.f32.mrf.mxu3 }
 0x179   : > { %v1313_v19 = vpop.f32.mrf.mxu1  ;;  %v2253_v20 = vpop.f32.mrf.mxu0 }
 0x17a   : > { %v1314_v25 = vadd.f32 %v1313_v19, %v5319_v39 }
 0x17c   : > { %v1715_v28 = vadd.f32 %v1601_v17, %v1314_v25  ;;  %4393 = vmatmul.msk.f32.gmra.mxu1 %vm807_vm0, %v867_v26  ;;  %4513 = vmatmul.msk.f32.gmra.mxu0 %vm807_vm0, %v2095_v27  ;;  %v1771_v17 = vld [vmem:[#allocation2 + $0xa3] sm:$0xff] }
 0x17d   : > { %4434 = vmatmul.msk.f32.gmra.mxu2 %vm807_vm0, %v1444_v35  ;;  %4474 = vmatmul.msk.f32.gmra.mxu3 %vm807_vm0, %v1770_v36  ;;  %v2097_v35 = vld [vmem:[#allocation2 + $0xa4] sm:$0xff] }
 0x17e   : > { %v2041_v41 = vadd.f32 %v1927_v18, %v1715_v28  ;;  %v869_v28 = vld [vmem:[#allocation2 + $0x90] sm:$0xff] }
 0x180   : > { %v5458_v42 = vadd.f32 %v2253_v20, %v2041_v41  ;;  %v1604_v55 = vpop.f32.mrf.mxu2  ;;  %v1930_v56 = vpop.f32.mrf.mxu3  ;;  %v1446_v41 = vld [vmem:[#allocation2 + $0x9a] sm:$0xff] }
 0x181   : > { %v1316_v57 = vpop.f32.mrf.mxu1  ;;  %v2256_v39 = vpop.f32.mrf.mxu0 }
 0x182   : > { %v1317_v63 = vadd.f32 %v1316_v57, %v5332_v46 }
 0x184   : > { %v1716_v12 = vadd.f32 %v1604_v55, %v1317_v63  ;;  %4394 = vmatmul.msk.f32.gmra.mxu1 %vm807_vm0, %v868_v7  ;;  %4514 = vmatmul.msk.f32.gmra.mxu0 %vm807_vm0, %v2096_v37  ;;  %v1772_v55 = vld [vmem:[#allocation2 + $0xab] sm:$0xff] }
 0x185   : > { %4435 = vmatmul.msk.f32.gmra.mxu2 %vm807_vm0, %v1445_v13  ;;  %4475 = vmatmul.msk.f32.gmra.mxu3 %vm807_vm0, %v1771_v17  ;;  %v2098_v13 = vld [vmem:[#allocation2 + $0xac] sm:$0xff] }
 0x186   : > { %v2042_v18 = vadd.f32 %v1930_v56, %v1716_v12  ;;  %v870_v12 = vld [vmem:[#allocation2 + $0x98] sm:$0xff] }
 0x188   : > { %v5465_v19 = vadd.f32 %v2256_v39, %v2042_v18  ;;  %v1607_v20 = vpop.f32.mrf.mxu2  ;;  %v1933_v25 = vpop.f32.mrf.mxu3  ;;  %v1447_v18 = vld [vmem:[#allocation2 + $0xa2] sm:$0xff] }
 0x189   : > { %v1319_v26 = vpop.f32.mrf.mxu1  ;;  %v2259_v46 = vpop.f32.mrf.mxu0 }
 0x18a   : > { %v1320_v27 = vadd.f32 %v1319_v26, %v5352_v58 }
 0x18c   : > { %v1717_v36 = vadd.f32 %v1607_v20, %v1320_v27  ;;  %4395 = vmatmul.msk.f32.gmra.mxu1 %vm807_vm0, %v869_v28  ;;  %4515 = vmatmul.msk.f32.gmra.mxu0 %vm807_vm0, %v2097_v35  ;;  %v1773_v20 = vld [vmem:[#allocation2 + $0xb3] sm:$0xff] }
 0x18d   : > { %4436 = vmatmul.msk.f32.gmra.mxu2 %vm807_vm0, %v1446_v41  ;;  %4476 = vmatmul.msk.f32.gmra.mxu3 %vm807_vm0, %v1772_v55  ;;  %v2099_v41 = vld [vmem:[#allocation2 + $0xb4] sm:$0xff] }
 0x18e   : > { %v2043_v56 = vadd.f32 %v1933_v25, %v1717_v36  ;;  %v871_v36 = vld [vmem:[#allocation2 + $0xa0] sm:$0xff] }
 0x190   : > { %v5472_v57 = vadd.f32 %v2259_v46, %v2043_v56  ;;  %v1610_v39 = vpop.f32.mrf.mxu2  ;;  %v1936_v63 = vpop.f32.mrf.mxu3  ;;  %v1448_v56 = vld [vmem:[#allocation2 + $0xaa] sm:$0xff] }
 0x191   : > { %v1322_v7 = vpop.f32.mrf.mxu1  ;;  %v2262_v58 = vpop.f32.mrf.mxu0 }
 0x192   : > { %v1323_v37 = vadd.f32 %v1322_v7, %v5367_v2 }
 0x194   : > { %v1718_v17 = vadd.f32 %v1610_v39, %v1323_v37  ;;  %4396 = vmatmul.msk.f32.gmra.mxu1 %vm807_vm0, %v870_v12  ;;  %4516 = vmatmul.msk.f32.gmra.mxu0 %vm807_vm0, %v2098_v13  ;;  %v1774_v39 = vld [vmem:[#allocation2 + $0xbb] sm:$0xff] }
 0x195   : > { %4437 = vmatmul.msk.f32.gmra.mxu2 %vm807_vm0, %v1447_v18  ;;  %4477 = vmatmul.msk.f32.gmra.mxu3 %vm807_vm0, %v1773_v20  ;;  %v2100_v18 = vld [vmem:[#allocation2 + $0xbc] sm:$0xff] }
 0x196   : > { %v2044_v25 = vadd.f32 %v1936_v63, %v1718_v17  ;;  %v872_v17 = vld [vmem:[#allocation2 + $0xa8] sm:$0xff] }
 0x198   : > { %v5479_v26 = vadd.f32 %v2262_v58, %v2044_v25  ;;  %v1613_v46 = vpop.f32.mrf.mxu2  ;;  %v1939_v27 = vpop.f32.mrf.mxu3  ;;  %v1449_v25 = vld [vmem:[#allocation2 + $0xb2] sm:$0xff] }
 0x199   : > { %v1325_v28 = vpop.f32.mrf.mxu1  ;;  %v2265_v2 = vpop.f32.mrf.mxu0 }
 0x19a   : > { %v1326_v35 = vadd.f32 %v1325_v28, %v5384_v33 }
 0x19c   : > { %v1719_v55 = vadd.f32 %v1613_v46, %v1326_v35  ;;  %4397 = vmatmul.msk.f32.gmra.mxu1 %vm807_vm0, %v871_v36  ;;  %4517 = vmatmul.msk.f32.gmra.mxu0 %vm807_vm0, %v2099_v41  ;;  %v1775_v46 = vld [vmem:[#allocation2 + $0xc3] sm:$0xff] }
 0x19d   : > { %4438 = vmatmul.msk.f32.gmra.mxu2 %vm807_vm0, %v1448_v56  ;;  %4478 = vmatmul.msk.f32.gmra.mxu3 %vm807_vm0, %v1774_v39  ;;  %v2101_v56 = vld [vmem:[#allocation2 + $0xc4] sm:$0xff] }
 0x19e   : > { %v2045_v63 = vadd.f32 %v1939_v27, %v1719_v55  ;;  %v873_v55 = vld [vmem:[#allocation2 + $0xb0] sm:$0xff] }
 0x1a0   : > { %v5486_v7 = vadd.f32 %v2265_v2, %v2045_v63  ;;  %v1616_v58 = vpop.f32.mrf.mxu2  ;;  %v1942_v37 = vpop.f32.mrf.mxu3  ;;  %v1450_v63 = vld [vmem:[#allocation2 + $0xba] sm:$0xff] }
 0x1a1   : > { %v1328_v12 = vpop.f32.mrf.mxu1  ;;  %v2268_v33 = vpop.f32.mrf.mxu0 }
 0x1a2   : > { %v1329_v13 = vadd.f32 %v1328_v12, %v5399_v16 }
 0x1a4   : > { %v1720_v20 = vadd.f32 %v1616_v58, %v1329_v13  ;;  %4398 = vmatmul.msk.f32.gmra.mxu1 %vm807_vm0, %v872_v17  ;;  %4518 = vmatmul.msk.f32.gmra.mxu0 %vm807_vm0, %v2100_v18  ;;  %v1776_v58 = vld [vmem:[#allocation2 + $0xcb] sm:$0xff] }
 0x1a5   : > { %4439 = vmatmul.msk.f32.gmra.mxu2 %vm807_vm0, %v1449_v25  ;;  %4479 = vmatmul.msk.f32.gmra.mxu3 %vm807_vm0, %v1775_v46  ;;  %v2102_v25 = vld [vmem:[#allocation2 + $0xcc] sm:$0xff] }
 0x1a6   : > { %v2046_v27 = vadd.f32 %v1942_v37, %v1720_v20  ;;  %v874_v20 = vld [vmem:[#allocation2 + $0xb8] sm:$0xff] }
 0x1a8   : > { %v5493_v28 = vadd.f32 %v2268_v33, %v2046_v27  ;;  %v1619_v2 = vpop.f32.mrf.mxu2  ;;  %v1945_v35 = vpop.f32.mrf.mxu3  ;;  %v1451_v27 = vld [vmem:[#allocation2 + $0xc2] sm:$0xff] }
 0x1a9   : > { %v1331_v36 = vpop.f32.mrf.mxu1  ;;  %v2271_v16 = vpop.f32.mrf.mxu0 }
 0x1aa   : > { %v1332_v41 = vadd.f32 %v1331_v36, %v5411_v24 }
 0x1ac   : > { %v1721_v39 = vadd.f32 %v1619_v2, %v1332_v41  ;;  %4399 = vmatmul.msk.f32.gmra.mxu1 %vm807_vm0, %v873_v55  ;;  %4519 = vmatmul.msk.f32.gmra.mxu0 %vm807_vm0, %v2101_v56  ;;  %v1777_v2 = vld [vmem:[#allocation2 + $0xd3] sm:$0xff] }
 0x1ad   : > { %4440 = vmatmul.msk.f32.gmra.mxu2 %vm807_vm0, %v1450_v63  ;;  %4480 = vmatmul.msk.f32.gmra.mxu3 %vm807_vm0, %v1776_v58  ;;  %v2103_v63 = vld [vmem:[#allocation2 + $0xd4] sm:$0xff] }
 0x1ae   : > { %v2047_v37 = vadd.f32 %v1945_v35, %v1721_v39  ;;  %v875_v39 = vld [vmem:[#allocation2 + $0xc0] sm:$0xff] }
 0x1b0   : > { %v5500_v12 = vadd.f32 %v2271_v16, %v2047_v37  ;;  %v1622_v33 = vpop.f32.mrf.mxu2  ;;  %v1948_v13 = vpop.f32.mrf.mxu3  ;;  %v1452_v37 = vld [vmem:[#allocation2 + $0xca] sm:$0xff] }
 0x1b1   : > { %v1334_v17 = vpop.f32.mrf.mxu1  ;;  %v2274_v24 = vpop.f32.mrf.mxu0 }
 0x1b2   : > { %v1335_v18 = vadd.f32 %v1334_v17, %v5423_v34 }
 0x1b4   : > { %v1722_v46 = vadd.f32 %v1622_v33, %v1335_v18  ;;  %4400 = vmatmul.msk.f32.gmra.mxu1 %vm807_vm0, %v874_v20  ;;  %4520 = vmatmul.msk.f32.gmra.mxu0 %vm807_vm0, %v2102_v25  ;;  %v1778_v33 = vld [vmem:[#allocation2 + $0xdb] sm:$0xff] }
 0x1b5   : > { %4441 = vmatmul.msk.f32.gmra.mxu2 %vm807_vm0, %v1451_v27  ;;  %4481 = vmatmul.msk.f32.gmra.mxu3 %vm807_vm0, %v1777_v2  ;;  %v2104_v27 = vld [vmem:[#allocation2 + $0xdc] sm:$0xff] }
 0x1b6   : > { %v2048_v35 = vadd.f32 %v1948_v13, %v1722_v46  ;;  %v876_v46 = vld [vmem:[#allocation2 + $0xc8] sm:$0xff] }
 0x1b8   : > { %v5507_v36 = vadd.f32 %v2274_v24, %v2048_v35  ;;  %v1625_v16 = vpop.f32.mrf.mxu2  ;;  %v1951_v41 = vpop.f32.mrf.mxu3  ;;  %v1453_v35 = vld [vmem:[#allocation2 + $0xd2] sm:$0xff] }
 0x1b9   : > { %v1337_v55 = vpop.f32.mrf.mxu1  ;;  %v2277_v34 = vpop.f32.mrf.mxu0 }
 0x1ba   : > { %v1338_v56 = vadd.f32 %v1337_v55, %v5433_v49 }
 0x1bc   : > { %v1723_v58 = vadd.f32 %v1625_v16, %v1338_v56  ;;  %4401 = vmatmul.msk.f32.gmra.mxu1 %vm807_vm0, %v875_v39  ;;  %4521 = vmatmul.msk.f32.gmra.mxu0 %vm807_vm0, %v2103_v63  ;;  %v1779_v16 = vld [vmem:[#allocation2 + $0xe3] sm:$0xff] }
 0x1bd   : > { %4442 = vmatmul.msk.f32.gmra.mxu2 %vm807_vm0, %v1452_v37  ;;  %4482 = vmatmul.msk.f32.gmra.mxu3 %vm807_vm0, %v1778_v33  ;;  %v2105_v37 = vld [vmem:[#allocation2 + $0xe4] sm:$0xff] }
 0x1be   : > { %v2049_v13 = vadd.f32 %v1951_v41, %v1723_v58  ;;  %v877_v58 = vld [vmem:[#allocation2 + $0xd0] sm:$0xff] }
 0x1c0   : > { %v5514_v17 = vadd.f32 %v2277_v34, %v2049_v13  ;;  %v1628_v24 = vpop.f32.mrf.mxu2  ;;  %v1954_v18 = vpop.f32.mrf.mxu3  ;;  %v1454_v13 = vld [vmem:[#allocation2 + $0xda] sm:$0xff] }
 0x1c1   : > { %v1340_v20 = vpop.f32.mrf.mxu1  ;;  %v2280_v49 = vpop.f32.mrf.mxu0 }
 0x1c2   : > { %v1341_v25 = vadd.f32 %v1340_v20, %v5445_v5 }
 0x1c4   : > { %v1724_v2 = vadd.f32 %v1628_v24, %v1341_v25  ;;  %4402 = vmatmul.msk.f32.gmra.mxu1 %vm807_vm0, %v876_v46  ;;  %4522 = vmatmul.msk.f32.gmra.mxu0 %vm807_vm0, %v2104_v27  ;;  %v1780_v24 = vld [vmem:[#allocation2 + $0xeb] sm:$0xff] }
 0x1c5   : > { %4443 = vmatmul.msk.f32.gmra.mxu2 %vm807_vm0, %v1453_v35  ;;  %4483 = vmatmul.msk.f32.gmra.mxu3 %vm807_vm0, %v1779_v16  ;;  %v2106_v35 = vld [vmem:[#allocation2 + $0xec] sm:$0xff] }
 0x1c6   : > { %v2050_v41 = vadd.f32 %v1954_v18, %v1724_v2  ;;  %v878_v2 = vld [vmem:[#allocation2 + $0xd8] sm:$0xff] }
 0x1c8   : > { %v5521_v55 = vadd.f32 %v2280_v49, %v2050_v41  ;;  %v1631_v34 = vpop.f32.mrf.mxu2  ;;  %v1957_v56 = vpop.f32.mrf.mxu3  ;;  %v1455_v41 = vld [vmem:[#allocation2 + $0xe2] sm:$0xff] }
 0x1c9   : > { %v1343_v39 = vpop.f32.mrf.mxu1  ;;  %v2283_v5 = vpop.f32.mrf.mxu0 }
 0x1ca   : > { %v1344_v63 = vadd.f32 %v1343_v39, %v5317_v38 }
 0x1cc   : > { %v1725_v33 = vadd.f32 %v1631_v34, %v1344_v63  ;;  %4403 = vmatmul.msk.f32.gmra.mxu1 %vm807_vm0, %v877_v58  ;;  %4523 = vmatmul.msk.f32.gmra.mxu0 %vm807_vm0, %v2105_v37  ;;  %v1781_v34 = vld [vmem:[#allocation2 + $0xf3] sm:$0xff] }
 0x1cd   : > { %4444 = vmatmul.msk.f32.gmra.mxu2 %vm807_vm0, %v1454_v13  ;;  %4484 = vmatmul.msk.f32.gmra.mxu3 %vm807_vm0, %v1780_v24  ;;  %v2107_v13 = vld [vmem:[#allocation2 + $0xf4] sm:$0xff] }
 0x1ce   : > { %v2051_v18 = vadd.f32 %v1957_v56, %v1725_v33  ;;  %v879_v33 = vld [vmem:[#allocation2 + $0xe0] sm:$0xff] }
 0x1d0   : > { %v5528_v20 = vadd.f32 %v2283_v5, %v2051_v18  ;;  %v1634_v49 = vpop.f32.mrf.mxu2  ;;  %v1960_v25 = vpop.f32.mrf.mxu3  ;;  %v1456_v18 = vld [vmem:[#allocation2 + $0xea] sm:$0xff] }
 0x1d1   : > { %v1346_v46 = vpop.f32.mrf.mxu1  ;;  %v2286_v38 = vpop.f32.mrf.mxu0 }
 0x1d2   : > { %v1347_v27 = vadd.f32 %v1346_v46, %v5330_v45 }
 0x1d4   : > { %v1726_v16 = vadd.f32 %v1634_v49, %v1347_v27  ;;  %4404 = vmatmul.msk.f32.gmra.mxu1 %vm807_vm0, %v878_v2  ;;  %4524 = vmatmul.msk.f32.gmra.mxu0 %vm807_vm0, %v2106_v35  ;;  %v1782_v49 = vld [vmem:[#allocation2 + $0xfb] sm:$0xff] }
 0x1d5   : > { %4445 = vmatmul.msk.f32.gmra.mxu2 %vm807_vm0, %v1455_v41  ;;  %4485 = vmatmul.msk.f32.gmra.mxu3 %vm807_vm0, %v1781_v34  ;;  %v2108_v41 = vld [vmem:[#allocation2 + $0xfc] sm:$0xff] }
 0x1d6   : > { %v2052_v56 = vadd.f32 %v1960_v25, %v1726_v16  ;;  %v880_v16 = vld [vmem:[#allocation2 + $0xe8] sm:$0xff] }
 0x1d8   : > { %v5535_v39 = vadd.f32 %v2286_v38, %v2052_v56  ;;  %v1637_v5 = vpop.f32.mrf.mxu2  ;;  %v1963_v63 = vpop.f32.mrf.mxu3  ;;  %v1457_v56 = vld [vmem:[#allocation2 + $0xf2] sm:$0xff] }
 0x1d9   : > { %v1349_v58 = vpop.f32.mrf.mxu1  ;;  %v2289_v45 = vpop.f32.mrf.mxu0 }
 0x1da   : > { %v1350_v37 = vadd.f32 %v1349_v58, %v5343_v52 }
 0x1dc   : > { %v1727_v24 = vadd.f32 %v1637_v5, %v1350_v37  ;;  %4405 = vmatmul.msk.f32.gmra.mxu1 %vm807_vm0, %v879_v33  ;;  %4525 = vmatmul.msk.f32.gmra.mxu0 %vm807_vm0, %v2107_v13  ;;  %v1783_v5 = vld [vmem:[#allocation2 + $0x103] sm:$0xff] }
 0x1dd   : > { %4446 = vmatmul.msk.f32.gmra.mxu2 %vm807_vm0, %v1456_v18  ;;  %4486 = vmatmul.msk.f32.gmra.mxu3 %vm807_vm0, %v1782_v49  ;;  %v2109_v18 = vld [vmem:[#allocation2 + $0x104] sm:$0xff] }
 0x1de   : > { %v2053_v25 = vadd.f32 %v1963_v63, %v1727_v24  ;;  %v881_v24 = vld [vmem:[#allocation2 + $0xf0] sm:$0xff] }
 0x1e0   : > { %v5542_v46 = vadd.f32 %v2289_v45, %v2053_v25  ;;  %v1640_v38 = vpop.f32.mrf.mxu2  ;;  %v1966_v27 = vpop.f32.mrf.mxu3  ;;  %v1458_v25 = vld [vmem:[#allocation2 + $0xfa] sm:$0xff] }
 0x1e1   : > { %v1352_v2 = vpop.f32.mrf.mxu1  ;;  %v2292_v52 = vpop.f32.mrf.mxu0 }
 0x1e2   : > { %v1353_v35 = vadd.f32 %v1352_v2, %v5358_v60 }
 0x1e4   : > { %v1728_v34 = vadd.f32 %v1640_v38, %v1353_v35  ;;  %4406 = vmatmul.msk.f32.gmra.mxu1 %vm807_vm0, %v880_v16  ;;  %4526 = vmatmul.msk.f32.gmra.mxu0 %vm807_vm0, %v2108_v41  ;;  %v1784_v38 = vld [vmem:[#allocation2 + $0x10b] sm:$0xff] }
 0x1e5   : > { %4447 = vmatmul.msk.f32.gmra.mxu2 %vm807_vm0, %v1457_v56  ;;  %4487 = vmatmul.msk.f32.gmra.mxu3 %vm807_vm0, %v1783_v5  ;;  %v2110_v56 = vld [vmem:[#allocation2 + $0x10c] sm:$0xff] }
 0x1e6   : > { %v2054_v63 = vadd.f32 %v1966_v27, %v1728_v34  ;;  %v882_v34 = vld [vmem:[#allocation2 + $0xf8] sm:$0xff] }
 0x1e8   : > { %v5549_v58 = vadd.f32 %v2292_v52, %v2054_v63  ;;  %v1643_v45 = vpop.f32.mrf.mxu2  ;;  %v1969_v37 = vpop.f32.mrf.mxu3  ;;  %v1459_v63 = vld [vmem:[#allocation2 + $0x102] sm:$0xff] }
 0x1e9   : > { %v1355_v33 = vpop.f32.mrf.mxu1  ;;  %v2295_v60 = vpop.f32.mrf.mxu0 }
 0x1ea   : > { %v1356_v13 = vadd.f32 %v1355_v33, %v5378_v8 }
 0x1ec   : > { %v1729_v49 = vadd.f32 %v1643_v45, %v1356_v13  ;;  %4407 = vmatmul.msk.f32.gmra.mxu1 %vm807_vm0, %v881_v24  ;;  %4527 = vmatmul.msk.f32.gmra.mxu0 %vm807_vm0, %v2109_v18  ;;  %v1785_v45 = vld [vmem:[#allocation2 + $0x113] sm:$0xff] }
 0x1ed   : > { %4448 = vmatmul.msk.f32.gmra.mxu2 %vm807_vm0, %v1458_v25  ;;  %4488 = vmatmul.msk.f32.gmra.mxu3 %vm807_vm0, %v1784_v38  ;;  %v2111_v25 = vld [vmem:[#allocation2 + $0x114] sm:$0xff] }
 0x1ee   : > { %v2055_v27 = vadd.f32 %v1969_v37, %v1729_v49  ;;  %v883_v49 = vld [vmem:[#allocation2 + $0x100] sm:$0xff] }
 0x1f0   : > { %v5556_v2 = vadd.f32 %v2295_v60, %v2055_v27  ;;  %v1646_v52 = vpop.f32.mrf.mxu2  ;;  %v1972_v35 = vpop.f32.mrf.mxu3  ;;  %v1460_v27 = vld [vmem:[#allocation2 + $0x10a] sm:$0xff] }
 0x1f1   : > { %v1358_v16 = vpop.f32.mrf.mxu1  ;;  %v2298_v8 = vpop.f32.mrf.mxu0 }
 0x1f2   : > { %v1359_v41 = vadd.f32 %v1358_v16, %v5393_v14 }
 0x1f4   : > { %v1730_v5 = vadd.f32 %v1646_v52, %v1359_v41  ;;  %4408 = vmatmul.msk.f32.gmra.mxu1 %vm807_vm0, %v882_v34  ;;  %4528 = vmatmul.msk.f32.gmra.mxu0 %vm807_vm0, %v2110_v56  ;;  %v1786_v52 = vld [vmem:[#allocation2 + $0x11b] sm:$0xff] }
 0x1f5   : > { %4449 = vmatmul.msk.f32.gmra.mxu2 %vm807_vm0, %v1459_v63  ;;  %4489 = vmatmul.msk.f32.gmra.mxu3 %vm807_vm0, %v1785_v45  ;;  %v2112_v63 = vld [vmem:[#allocation2 + $0x11c] sm:$0xff] }
 0x1f6   : > { %v2056_v37 = vadd.f32 %v1972_v35, %v1730_v5  ;;  %v884_v5 = vld [vmem:[#allocation2 + $0x108] sm:$0xff] }
 0x1f8   : > { %v5563_v33 = vadd.f32 %v2298_v8, %v2056_v37  ;;  %v1649_v60 = vpop.f32.mrf.mxu2  ;;  %v1975_v13 = vpop.f32.mrf.mxu3  ;;  %v1461_v37 = vld [vmem:[#allocation2 + $0x112] sm:$0xff] }
 0x1f9   : > { %v1361_v24 = vpop.f32.mrf.mxu1  ;;  %v2301_v14 = vpop.f32.mrf.mxu0 }
 0x1fa   : > { %v1362_v18 = vadd.f32 %v1361_v24, %v5407_v22 }
 0x1fc   : > { %v1731_v38 = vadd.f32 %v1649_v60, %v1362_v18  ;;  %4409 = vmatmul.msk.f32.gmra.mxu1 %vm807_vm0, %v883_v49  ;;  %4529 = vmatmul.msk.f32.gmra.mxu0 %vm807_vm0, %v2111_v25  ;;  %v1787_v60 = vld [vmem:[#allocation2 + $0x123] sm:$0xff] }
 0x1fd   : > { %4450 = vmatmul.msk.f32.gmra.mxu2 %vm807_vm0, %v1460_v27  ;;  %4490 = vmatmul.msk.f32.gmra.mxu3 %vm807_vm0, %v1786_v52  ;;  %v2113_v27 = vld [vmem:[#allocation2 + $0x124] sm:$0xff] }
 0x1fe   : > { %v2057_v35 = vadd.f32 %v1975_v13, %v1731_v38  ;;  %v885_v38 = vld [vmem:[#allocation2 + $0x110] sm:$0xff] }
 0x200   : > { %v5570_v16 = vadd.f32 %v2301_v14, %v2057_v35  ;;  %v1652_v8 = vpop.f32.mrf.mxu2  ;;  %v1978_v41 = vpop.f32.mrf.mxu3  ;;  %v1462_v35 = vld [vmem:[#allocation2 + $0x11a] sm:$0xff] }
 0x201   : > { %v1364_v34 = vpop.f32.mrf.mxu1  ;;  %v2304_v22 = vpop.f32.mrf.mxu0 }
 0x202   : > { %v1365_v56 = vadd.f32 %v1364_v34, %v5421_v32 }
 0x204   : > { %v1732_v45 = vadd.f32 %v1652_v8, %v1365_v56  ;;  %4410 = vmatmul.msk.f32.gmra.mxu1 %vm807_vm0, %v884_v5  ;;  %4530 = vmatmul.msk.f32.gmra.mxu0 %vm807_vm0, %v2112_v63  ;;  %v1788_v8 = vld [vmem:[#allocation2 + $0x12b] sm:$0xff] }
 0x205   : > { %4451 = vmatmul.msk.f32.gmra.mxu2 %vm807_vm0, %v1461_v37  ;;  %4491 = vmatmul.msk.f32.gmra.mxu3 %vm807_vm0, %v1787_v60  ;;  %v2114_v37 = vld [vmem:[#allocation2 + $0x12c] sm:$0xff] }
 0x206   : > { %v2058_v13 = vadd.f32 %v1978_v41, %v1732_v45  ;;  %v886_v45 = vld [vmem:[#allocation2 + $0x118] sm:$0xff] }
 0x208   : > { %v5577_v24 = vadd.f32 %v2304_v22, %v2058_v13  ;;  %v1655_v14 = vpop.f32.mrf.mxu2  ;;  %v1981_v18 = vpop.f32.mrf.mxu3  ;;  %v1463_v13 = vld [vmem:[#allocation2 + $0x122] sm:$0xff] }
 0x209   : > { %v1367_v49 = vpop.f32.mrf.mxu1  ;;  %v2307_v32 = vpop.f32.mrf.mxu0 }
 0x20a   : > { %v1368_v25 = vadd.f32 %v1367_v49, %v5435_v50 }
 0x20c   : > { %v1733_v52 = vadd.f32 %v1655_v14, %v1368_v25  ;;  %4411 = vmatmul.msk.f32.gmra.mxu1 %vm807_vm0, %v885_v38  ;;  %4531 = vmatmul.msk.f32.gmra.mxu0 %vm807_vm0, %v2113_v27  ;;  %v1789_v14 = vld [vmem:[#allocation2 + $0x133] sm:$0xff] }
 0x20d   : > { %4452 = vmatmul.msk.f32.gmra.mxu2 %vm807_vm0, %v1462_v35  ;;  %4492 = vmatmul.msk.f32.gmra.mxu3 %vm807_vm0, %v1788_v8  ;;  %v2115_v35 = vld [vmem:[#allocation2 + $0x134] sm:$0xff] }
 0x20e   : > { %v2059_v41 = vadd.f32 %v1981_v18, %v1733_v52  ;;  %v887_v52 = vld [vmem:[#allocation2 + $0x120] sm:$0xff] }
 0x210   : > { %v5584_v34 = vadd.f32 %v2307_v32, %v2059_v41  ;;  %v1658_v22 = vpop.f32.mrf.mxu2  ;;  %v1984_v56 = vpop.f32.mrf.mxu3  ;;  %v1464_v41 = vld [vmem:[#allocation2 + $0x12a] sm:$0xff] }
 0x211   : > { %v1370_v5 = vpop.f32.mrf.mxu1  ;;  %v2310_v50 = vpop.f32.mrf.mxu0 }
 0x212   : > { %v1371_v63 = vadd.f32 %v1370_v5, %v5447_v6 }
 0x214   : > { %v1734_v60 = vadd.f32 %v1658_v22, %v1371_v63  ;;  %4412 = vmatmul.msk.f32.gmra.mxu1 %vm807_vm0, %v886_v45  ;;  %4532 = vmatmul.msk.f32.gmra.mxu0 %vm807_vm0, %v2114_v37  ;;  %v1790_v22 = vld [vmem:[#allocation2 + $0x13b] sm:$0xff] }
 0x215   : > { %4453 = vmatmul.msk.f32.gmra.mxu2 %vm807_vm0, %v1463_v13  ;;  %4493 = vmatmul.msk.f32.gmra.mxu3 %vm807_vm0, %v1789_v14  ;;  %v2116_v13 = vld [vmem:[#allocation2 + $0x13c] sm:$0xff] }
 0x216   : > { %v2060_v18 = vadd.f32 %v1984_v56, %v1734_v60  ;;  %v888_v60 = vld [vmem:[#allocation2 + $0x128] sm:$0xff] }
 0x218   : > { %v5591_v49 = vadd.f32 %v2310_v50, %v2060_v18  ;;  %v1661_v32 = vpop.f32.mrf.mxu2  ;;  %v1987_v25 = vpop.f32.mrf.mxu3  ;;  %v2731_v18 = vld [vmem:[#allocation2 + $0x26] sm:$0xff] }
 0x219   : > { %v1373_v38 = vpop.f32.mrf.mxu1  ;;  %v2313_v6 = vpop.f32.mrf.mxu0 }
 0x21a   : > { %v1374_v27 = vadd.f32 %v1373_v38, %v5311_v31 }
 0x21c   : > { %v1735_v8 = vadd.f32 %v1661_v32, %v1374_v27  ;;  %4413 = vmatmul.msk.f32.gmra.mxu1 %vm807_vm0, %v887_v52  ;;  %4533 = vmatmul.msk.f32.gmra.mxu0 %vm807_vm0, %v2115_v35  ;;  %v3057_v32 = vld [vmem:[#allocation2 + $0x27] sm:$0xff] }
 0x21d   : > { %4454 = vmatmul.msk.f32.gmra.mxu2 %vm807_vm0, %v1464_v41  ;;  %4494 = vmatmul.msk.f32.gmra.mxu3 %vm807_vm0, %v1790_v22  ;;  %v2732_v22 = vld [vmem:[#allocation2 + $0x2e] sm:$0xff] }
 0x21e   : > { %v2061_v56 = vadd.f32 %v1987_v25, %v1735_v8  ;;  %v2405_v8 = vld [vmem:[#allocation2 + $0x15] sm:$0xff] }
 0x220   : > { %v5598_v5 = vadd.f32 %v2313_v6, %v2061_v56  ;;  %v1664_v50 = vpop.f32.mrf.mxu2  ;;  %v1990_v63 = vpop.f32.mrf.mxu3  ;;  %v3058_v56 = vld [vmem:[#allocation2 + $0x2f] sm:$0xff] }
 0x221   : > { %v1376_v45 = vpop.f32.mrf.mxu1  ;;  %v2316_v31 = vpop.f32.mrf.mxu0 }
 0x222   : > { %v1377_v37 = vadd.f32 %v1376_v45, %v5326_v44 }
 0x224   : > { %v1736_v14 = vadd.f32 %v1664_v50, %v1377_v37  ;;  %4414 = vmatmul.msk.f32.gmra.mxu1 %vm807_vm0, %v888_v60  ;;  %4534 = vmatmul.msk.f32.gmra.mxu0 %vm807_vm0, %v2116_v13  ;;  %v2406_v13 = vld [vmem:[#allocation2 + $0x1d] sm:$0xff] }
 0x225   : > { %4577 = vmatmul.msk.f32.vlgmr.msra.gmra.mxu2 %vm807_vm0, %v2731_v18  ;;  %4617 = vmatmul.msk.f32.vlgmr.msra.gmra.mxu3 %vm807_vm0, %v3057_v32  ;;  %v2733_v18 = vld [vmem:[#allocation2 + $0x36] sm:$0xff] }
 0x226   : > { %v2062_v25 = vadd.f32 %v1990_v63, %v1736_v14  ;;  %v3059_v32 = vld [vmem:[#allocation2 + $0x37] sm:$0xff] }
 0x228   : > { %v5605_v38 = vadd.f32 %v2316_v31, %v2062_v25  ;;  %v1667_v6 = vpop.f32.mrf.mxu2  ;;  %v1993_v27 = vpop.f32.mrf.mxu3 }
 0x229   : > { %v1379_v52 = vpop.f32.mrf.mxu1  ;;  %v2319_v44 = vpop.f32.mrf.mxu0 }
 0x22a   : > { %v1380_v35 = vadd.f32 %v1379_v52, %v5341_v51 }
 0x22c   : > { %v1737_v41 = vadd.f32 %v1667_v6, %v1380_v35  ;;  %4537 = vmatmul.msk.f32.vlgmr.msra.gmra.mxu1 %vm807_vm0, %v2405_v8  ;;  %4657 = vmatmul.msk.f32.vlgmr.msra.gmra.mxu0 %vm807_vm0, %v5321_v40  ;;  %v2407_v35 = vld [vmem:[#allocation2 + $0x25] sm:$0xff] }
 0x22d   : > { %4578 = vmatmul.msk.f32.gmra.mxu2 %vm807_vm0, %v2732_v22  ;;  %4618 = vmatmul.msk.f32.gmra.mxu3 %vm807_vm0, %v3058_v56  ;;  %v3060_v22 = vld [vmem:[#allocation2 + $0x3f] sm:$0xff] }
 0x22e   : > { %v2063_v50 = vadd.f32 %v1993_v27, %v1737_v41  ;;  %v2734_v41 = vld [vmem:[#allocation2 + $0x3e] sm:$0xff] }
 0x230   : > { %v5613_v63 = vadd.f32 %v2319_v44, %v2063_v50  ;;  %v1670_v45 = vpop.f32.mrf.mxu2  ;;  %v1996_v31 = vpop.f32.mrf.mxu3 }
 0x231   : > { %v1382_v37 = vpop.f32.mrf.mxu1  ;;  %v2322_v51 = vpop.f32.mrf.mxu0 }
 0x232   : > { %v1383_v60 = vadd.f32 %v1382_v37, %v5356_v59 }
 0x234   : > { %v1738_v14 = vadd.f32 %v1670_v45, %v1383_v60  ;;  %4538 = vmatmul.msk.f32.gmra.mxu1 %vm807_vm0, %v2406_v13  ;;  %4658 = vmatmul.msk.f32.gmra.mxu0 %vm807_vm0, %v5334_v47  ;;  %v2735_v13 = vld [vmem:[#allocation2 + $0x46] sm:$0xff] }
 0x235   : > { %4579 = vmatmul.msk.f32.gmra.mxu2 %vm807_vm0, %v2733_v18  ;;  %4619 = vmatmul.msk.f32.gmra.mxu3 %vm807_vm0, %v3059_v32 }
 0x236   : > { %v2064_v40 = vadd.f32 %v1996_v31, %v1738_v14  ;;  %v3061_v14 = vld [vmem:[#allocation2 + $0x47] sm:$0xff] }
 0x238   : > { %v5621_v25 = vadd.f32 %v2322_v51, %v2064_v40  ;;  %v1673_v6 = vpop.f32.mrf.mxu2  ;;  %v1999_v27 = vpop.f32.mrf.mxu3  ;;  %v2408_v51 = vld [vmem:[#allocation2 + $0x2d] sm:$0xff] }
 0x239   : > { %v1385_v52 = vpop.f32.mrf.mxu1  ;;  %v2325_v59 = vpop.f32.mrf.mxu0 }
 0x23a   : > { %v1386_v44 = vadd.f32 %v1385_v52, %v5371_v3  ;;  %v2409_v52 = vld [vmem:[#allocation2 + $0x35] sm:$0xff] }
 0x23c   : > { %v1739_v8 = vadd.f32 %v1673_v6, %v1386_v44  ;;  %4539 = vmatmul.msk.f32.gmra.mxu1 %vm807_vm0, %v2407_v35  ;;  %4659 = vmatmul.msk.f32.gmra.mxu0 %vm807_vm0, %v5347_v54  ;;  %v2736_v44 = vld [vmem:[#allocation2 + $0x4e] sm:$0xff] }
 0x23d   : > { %4580 = vmatmul.msk.f32.gmra.mxu2 %vm807_vm0, %v2734_v41  ;;  %4620 = vmatmul.msk.f32.gmra.mxu3 %vm807_vm0, %v3060_v22  ;;  %v3062_v35 = vld [vmem:[#allocation2 + $0x4f] sm:$0xff] }
 0x23e   : > { %v2065_v47 = vadd.f32 %v1999_v27, %v1739_v8 }
 0x240   : > { %v5629_v56 = vadd.f32 %v2325_v59, %v2065_v47  ;;  %v1676_v50 = vpop.f32.mrf.mxu2  ;;  %v2002_v45 = vpop.f32.mrf.mxu3 }
 0x241   : > { %v1388_v31 = vpop.f32.mrf.mxu1  ;;  %v2328_v3 = vpop.f32.mrf.mxu0 }
 0x242   : > { %v1389_v37 = vadd.f32 %v1388_v31, %v5386_v10 }
 0x244   : > { %v1740_v60 = vadd.f32 %v1676_v50, %v1389_v37  ;;  %4540 = vmatmul.msk.f32.gmra.mxu1 %vm807_vm0, %v2408_v51  ;;  %4660 = vmatmul.msk.f32.gmra.mxu0 %vm807_vm0, %v5362_v62  ;;  %v3063_v37 = vld [vmem:[#allocation2 + $0x57] sm:$0xff] }
 0x245   : > { %4581 = vmatmul.msk.f32.gmra.mxu2 %vm807_vm0, %v2735_v13  ;;  %4621 = vmatmul.msk.f32.gmra.mxu3 %vm807_vm0, %v3061_v14 }
 0x246   : > { %v2066_v54 = vadd.f32 %v2002_v45, %v1740_v60  ;;  %v2410_v45 = vld [vmem:[#allocation2 + $0x3d] sm:$0xff] }
 0x248   : > { %v5637_v18 = vadd.f32 %v2328_v3, %v2066_v54  ;;  %v1679_v32 = vpop.f32.mrf.mxu2  ;;  %v2005_v40 = vpop.f32.mrf.mxu3  ;;  %v2737_v3 = vld [vmem:[#allocation2 + $0x56] sm:$0xff] }
 0x249   : > { %v1391_v6 = vpop.f32.mrf.mxu1  ;;  %v2331_v10 = vpop.f32.mrf.mxu0 }
 0x24a   : > { %v1392_v27 = vadd.f32 %v1391_v6, %v5403_v21 }
 0x24c   : > { %v1741_v59 = vadd.f32 %v1679_v32, %v1392_v27  ;;  %4541 = vmatmul.msk.f32.gmra.mxu1 %vm807_vm0, %v2409_v52  ;;  %4661 = vmatmul.msk.f32.gmra.mxu0 %vm807_vm0, %v5373_v4  ;;  %v2411_v32 = vld [vmem:[#allocation2 + $0x45] sm:$0xff] }
 0x24d   : > { %4582 = vmatmul.msk.f32.gmra.mxu2 %vm807_vm0, %v2736_v44  ;;  %4622 = vmatmul.msk.f32.gmra.mxu3 %vm807_vm0, %v3062_v35 }
 0x24e   : > { %v2067_v62 = vadd.f32 %v2005_v40, %v1741_v59  ;;  %v3389_v40 = vld [vmem:[#allocation2 + $0x58] sm:$0xff] }
 0x250   : > { %v5645_v8 = vadd.f32 %v2331_v10, %v2067_v62  ;;  %v1682_v41 = vpop.f32.mrf.mxu2  ;;  %v2008_v22 = vpop.f32.mrf.mxu3  ;;  %v2738_v10 = vld [vmem:[#allocation2 + $0x5e] sm:$0xff] }
 0x251   : > { %v1394_v47 = vpop.f32.mrf.mxu1  ;;  %v2334_v21 = vpop.f32.mrf.mxu0 }
 0x252   : > { %v1395_v50 = vadd.f32 %v1394_v47, %v5417_v29 }
 0x254   : > { %v1742_v31 = vadd.f32 %v1682_v41, %v1395_v50  ;;  %4542 = vmatmul.msk.f32.gmra.mxu1 %vm807_vm0, %v2410_v45  ;;  %4662 = vmatmul.msk.f32.gmra.mxu0 %vm807_vm0, %v5388_v11  ;;  %v3064_v11 = vld [vmem:[#allocation2 + $0x5f] sm:$0xff]  ;;  %v2412_v41 = vld [vmem:[#allocation2 + $0x4d] sm:$0xff] }
 0x255   : > { %4583 = vmatmul.msk.f32.gmra.mxu2 %vm807_vm0, %v2737_v3  ;;  %4623 = vmatmul.msk.f32.gmra.mxu3 %vm807_vm0, %v3063_v37  ;;  %v3065_v50 = vld [vmem:[#allocation2 + $0x67] sm:$0xff] }
 0x256   : > { %v2068_v4 = vadd.f32 %v2008_v22, %v1742_v31  ;;  %v3390_v22 = vld [vmem:[#allocation2 + $0x60] sm:$0xff] }
 0x258   : > { %v5653_v51 = vadd.f32 %v2334_v21, %v2068_v4  ;;  %v1685_v60 = vpop.f32.mrf.mxu2  ;;  %v2011_v13 = vpop.f32.mrf.mxu3  ;;  %v2739_v21 = vld [vmem:[#allocation2 + $0x66] sm:$0xff] }
 0x259   : > { %v1397_v14 = vpop.f32.mrf.mxu1  ;;  %v2337_v29 = vpop.f32.mrf.mxu0 }
 0x25a   : > { %v1398_v54 = vadd.f32 %v1397_v14, %v5429_v43  ;;  %v3391_v14 = vld [vmem:[#allocation2 + $0x68] sm:$0xff] }
 0x25c   : > { %v1743_v6 = vadd.f32 %v1685_v60, %v1398_v54  ;;  %4543 = vmatmul.msk.f32.gmra.mxu1 %vm807_vm0, %v2411_v32  ;;  %4663 = vmatmul.msk.f32.gmra.mxu0 %vm807_vm0, %v3389_v40  ;;  %v2740_v54 = vld [vmem:[#allocation2 + $0x6e] sm:$0xff] }
 0x25d   : > { %4584 = vmatmul.msk.f32.gmra.mxu2 %vm807_vm0, %v2738_v10  ;;  %4624 = vmatmul.msk.f32.gmra.mxu3 %vm807_vm0, %v3064_v11  ;;  %v3066_v32 = vld [vmem:[#allocation2 + $0x6f] sm:$0xff] }
 0x25e   : > { %v2069_v27 = vadd.f32 %v2011_v13, %v1743_v6  ;;  %v2413_v13 = vld [vmem:[#allocation2 + $0x55] sm:$0xff] }
 0x260   : > { %v5660_v52 = vadd.f32 %v2337_v29, %v2069_v27  ;;  %v1688_v59 = vpop.f32.mrf.mxu2  ;;  %v2014_v44 = vpop.f32.mrf.mxu3 }
 0x261   : > { %v1400_v35 = vpop.f32.mrf.mxu1  ;;  %v2340_v43 = vpop.f32.mrf.mxu0 }
 0x262   : > { %v1401_v62 = vadd.f32 %v1400_v35, %v5441_v0  ;;  %v3392_v35 = vld [vmem:[#allocation2 + $0x70] sm:$0xff] }
 0x264   : > { %v1744_v47 = vadd.f32 %v1688_v59, %v1401_v62  ;;  %4544 = vmatmul.msk.f32.gmra.mxu1 %vm807_vm0, %v2412_v41  ;;  %4664 = vmatmul.msk.f32.gmra.mxu0 %vm807_vm0, %v3390_v22  ;;  %v2741_v62 = vld [vmem:[#allocation2 + $0x76] sm:$0xff] }
 0x265   : > { %4585 = vmatmul.msk.f32.gmra.mxu2 %vm807_vm0, %v2739_v21  ;;  %4625 = vmatmul.msk.f32.gmra.mxu3 %vm807_vm0, %v3065_v50  ;;  %v3067_v41 = vld [vmem:[#allocation2 + $0x77] sm:$0xff] }
 0x266   : > { %v2070_v45 = vadd.f32 %v2014_v44, %v1744_v47  ;;  %v2414_v44 = vld [vmem:[#allocation2 + $0x5d] sm:$0xff] }
 0x268   : > { %v5667_v31 = vadd.f32 %v2340_v43, %v2070_v45  ;;  %v1691_v3 = vpop.f32.mrf.mxu2  ;;  %v2017_v37 = vpop.f32.mrf.mxu3 }
 0x269   : > { %v1403_v4 = vpop.f32.mrf.mxu1  ;;  %v2343_v0 = vpop.f32.mrf.mxu0 }
 0x26a   : > { %v1404_v60 = vadd.f32 %v1403_v4, %v5345_v53  ;;  %v3393_v4 = vld [vmem:[#allocation2 + $0x78] sm:$0xff] }
 0x26c   : > { %v1745_v29 = vadd.f32 %v1691_v3, %v1404_v60  ;;  %4545 = vmatmul.msk.f32.gmra.mxu1 %vm807_vm0, %v2413_v13  ;;  %4665 = vmatmul.msk.f32.gmra.mxu0 %vm807_vm0, %v3391_v14  ;;  %v2742_v60 = vld [vmem:[#allocation2 + $0x7e] sm:$0xff] }
 0x26d   : > { %4586 = vmatmul.msk.f32.gmra.mxu2 %vm807_vm0, %v2740_v54  ;;  %4626 = vmatmul.msk.f32.gmra.mxu3 %vm807_vm0, %v3066_v32  ;;  %v3068_v13 = vld [vmem:[#allocation2 + $0x7f] sm:$0xff] }
 0x26e   : > { %v2071_v40 = vadd.f32 %v2017_v37, %v1745_v29  ;;  %v2415_v37 = vld [vmem:[#allocation2 + $0x65] sm:$0xff] }
 0x270   : > { %v5674_v6 = vadd.f32 %v2343_v0, %v2071_v40  ;;  %v1694_v10 = vpop.f32.mrf.mxu2  ;;  %v2020_v11 = vpop.f32.mrf.mxu3 }
 0x271   : > { %v1406_v27 = vpop.f32.mrf.mxu1  ;;  %v2346_v53 = vpop.f32.mrf.mxu0 }
 0x272   : > { %v1407_v59 = vadd.f32 %v1406_v27, %v5360_v61  ;;  %v3394_v27 = vld [vmem:[#allocation2 + $0x80] sm:$0xff] }
 0x274   : > { %v1746_v43 = vadd.f32 %v1694_v10, %v1407_v59  ;;  %4546 = vmatmul.msk.f32.gmra.mxu1 %vm807_vm0, %v2414_v44  ;;  %4666 = vmatmul.msk.f32.gmra.mxu0 %vm807_vm0, %v3392_v35  ;;  %v2743_v59 = vld [vmem:[#allocation2 + $0x86] sm:$0xff] }
 0x275   : > { %4587 = vmatmul.msk.f32.gmra.mxu2 %vm807_vm0, %v2741_v62  ;;  %4627 = vmatmul.msk.f32.gmra.mxu3 %vm807_vm0, %v3067_v41  ;;  %v3069_v44 = vld [vmem:[#allocation2 + $0x87] sm:$0xff] }
 0x276   : > { %v2072_v22 = vadd.f32 %v2020_v11, %v1746_v43  ;;  %v2416_v11 = vld [vmem:[#allocation2 + $0x6d] sm:$0xff] }
 0x278   : > { %v5681_v47 = vadd.f32 %v2346_v53, %v2072_v22  ;;  %v1697_v21 = vpop.f32.mrf.mxu2  ;;  %v2023_v50 = vpop.f32.mrf.mxu3 }
 0x279   : > { %v1409_v45 = vpop.f32.mrf.mxu1  ;;  %v2349_v61 = vpop.f32.mrf.mxu0 }
 0x27a   : > { %v1410_v3 = vadd.f32 %v1409_v45, %v5380_v9  ;;  %v3395_v45 = vld [vmem:[#allocation2 + $0x88] sm:$0xff] }
 0x27c   : > { %v1747_v0 = vadd.f32 %v1697_v21, %v1410_v3  ;;  %4547 = vmatmul.msk.f32.gmra.mxu1 %vm807_vm0, %v2415_v37  ;;  %4667 = vmatmul.msk.f32.gmra.mxu0 %vm807_vm0, %v3393_v4  ;;  %v2744_v3 = vld [vmem:[#allocation2 + $0x8e] sm:$0xff] }
 0x27d   : > { %4588 = vmatmul.msk.f32.gmra.mxu2 %vm807_vm0, %v2742_v60  ;;  %4628 = vmatmul.msk.f32.gmra.mxu3 %vm807_vm0, %v3068_v13  ;;  %v3070_v37 = vld [vmem:[#allocation2 + $0x8f] sm:$0xff] }
 0x27e   : > { %v2073_v14 = vadd.f32 %v2023_v50, %v1747_v0  ;;  %v2417_v50 = vld [vmem:[#allocation2 + $0x75] sm:$0xff] }
 0x280   : > { %v5688_v29 = vadd.f32 %v2349_v61, %v2073_v14  ;;  %v1700_v54 = vpop.f32.mrf.mxu2  ;;  %v2026_v32 = vpop.f32.mrf.mxu3 }
 0x281   : > { %v1412_v40 = vpop.f32.mrf.mxu1  ;;  %v2352_v9 = vpop.f32.mrf.mxu0 }
 0x282   : > { %v1413_v10 = vadd.f32 %v1412_v40, %v5397_v15  ;;  %v3396_v40 = vld [vmem:[#allocation2 + $0x90] sm:$0xff] }
 0x284   : > { %v1748_v53 = vadd.f32 %v1700_v54, %v1413_v10  ;;  %4548 = vmatmul.msk.f32.gmra.mxu1 %vm807_vm0, %v2416_v11  ;;  %4668 = vmatmul.msk.f32.gmra.mxu0 %vm807_vm0, %v3394_v27  ;;  %v2745_v10 = vld [vmem:[#allocation2 + $0x96] sm:$0xff] }
 0x285   : > { %4589 = vmatmul.msk.f32.gmra.mxu2 %vm807_vm0, %v2743_v59  ;;  %4629 = vmatmul.msk.f32.gmra.mxu3 %vm807_vm0, %v3069_v44  ;;  %v3071_v11 = vld [vmem:[#allocation2 + $0x97] sm:$0xff] }
 0x286   : > { %v2074_v35 = vadd.f32 %v2026_v32, %v1748_v53  ;;  %v2418_v32 = vld [vmem:[#allocation2 + $0x7d] sm:$0xff] }
 0x288   : > { %v5695_v43 = vadd.f32 %v2352_v9, %v2074_v35  ;;  %v1703_v62 = vpop.f32.mrf.mxu2  ;;  %v2029_v41 = vpop.f32.mrf.mxu3 }
 0x289   : > { %v1415_v22 = vpop.f32.mrf.mxu1  ;;  %v2355_v15 = vpop.f32.mrf.mxu0 }
 0x28a   : > { %v1416_v21 = vadd.f32 %v1415_v22, %v5409_v23  ;;  %v3397_v22 = vld [vmem:[#allocation2 + $0x98] sm:$0xff] }
 0x28c   : > { %v1749_v61 = vadd.f32 %v1703_v62, %v1416_v21  ;;  %4549 = vmatmul.msk.f32.gmra.mxu1 %vm807_vm0, %v2417_v50  ;;  %4669 = vmatmul.msk.f32.gmra.mxu0 %vm807_vm0, %v3395_v45  ;;  %v2746_v21 = vld [vmem:[#allocation2 + $0x9e] sm:$0xff] }
 0x28d   : > { %4590 = vmatmul.msk.f32.gmra.mxu2 %vm807_vm0, %v2744_v3  ;;  %4630 = vmatmul.msk.f32.gmra.mxu3 %vm807_vm0, %v3070_v37  ;;  %v3072_v50 = vld [vmem:[#allocation2 + $0x9f] sm:$0xff] }
 0x28e   : > { %v2075_v4 = vadd.f32 %v2029_v41, %v1749_v61  ;;  %v2419_v41 = vld [vmem:[#allocation2 + $0x85] sm:$0xff] }
 0x290   : > { %v5702_v0 = vadd.f32 %v2355_v15, %v2075_v4  ;;  %v1706_v60 = vpop.f32.mrf.mxu2  ;;  %v2032_v13 = vpop.f32.mrf.mxu3 }
 0x291   : > { %v1418_v14 = vpop.f32.mrf.mxu1  ;;  %v2358_v23 = vpop.f32.mrf.mxu0 }
 0x292   : > { %v1419_v54 = vadd.f32 %v1418_v14, %v5419_v30  ;;  %v3398_v14 = vld [vmem:[#allocation2 + $0xa0] sm:$0xff] }
 0x294   : > { %v1750_v9 = vadd.f32 %v1706_v60, %v1419_v54  ;;  %4550 = vmatmul.msk.f32.gmra.mxu1 %vm807_vm0, %v2418_v32  ;;  %4670 = vmatmul.msk.f32.gmra.mxu0 %vm807_vm0, %v3396_v40  ;;  %v2747_v54 = vld [vmem:[#allocation2 + $0xa6] sm:$0xff] }
 0x295   : > { %4591 = vmatmul.msk.f32.gmra.mxu2 %vm807_vm0, %v2745_v10  ;;  %4631 = vmatmul.msk.f32.gmra.mxu3 %vm807_vm0, %v3071_v11  ;;  %v3073_v32 = vld [vmem:[#allocation2 + $0xa7] sm:$0xff] }
 0x296   : > { %v2076_v27 = vadd.f32 %v2032_v13, %v1750_v9  ;;  %v2420_v13 = vld [vmem:[#allocation2 + $0x8d] sm:$0xff] }
 0x298   : > { %v5709_v53 = vadd.f32 %v2358_v23, %v2076_v27  ;;  %v1709_v59 = vpop.f32.mrf.mxu2  ;;  %v2035_v44 = vpop.f32.mrf.mxu3 }
 0x299   : > { %v1421_v35 = vpop.f32.mrf.mxu1  ;;  %v2361_v30 = vpop.f32.mrf.mxu0 }
 0x29a   : > { %v1422_v62 = vadd.f32 %v1421_v35, %v5431_v48  ;;  %v3399_v35 = vld [vmem:[#allocation2 + $0xa8] sm:$0xff] }
 0x29c   : > { %v1751_v15 = vadd.f32 %v1709_v59, %v1422_v62  ;;  %4551 = vmatmul.msk.f32.gmra.mxu1 %vm807_vm0, %v2419_v41  ;;  %4671 = vmatmul.msk.f32.gmra.mxu0 %vm807_vm0, %v3397_v22  ;;  %v2748_v62 = vld [vmem:[#allocation2 + $0xae] sm:$0xff] }
 0x29d   : > { %4592 = vmatmul.msk.f32.gmra.mxu2 %vm807_vm0, %v2746_v21  ;;  %4632 = vmatmul.msk.f32.gmra.mxu3 %vm807_vm0, %v3072_v50  ;;  %v3074_v41 = vld [vmem:[#allocation2 + $0xaf] sm:$0xff] }
 0x29e   : > { %v2077_v45 = vadd.f32 %v2035_v44, %v1751_v15  ;;  %v2421_v44 = vld [vmem:[#allocation2 + $0x95] sm:$0xff]  ;;  %v3750_v15 = vpop.permute.xlu1 %3749 }
 0x2a0   : > { %v5716_v61 = vadd.f32 %v2361_v30, %v2077_v45  ;;  %v1712_v3 = vpop.f32.mrf.mxu2  ;;  %v2038_v37 = vpop.f32.mrf.mxu3 }
 0x2a1   : > { %v1424_v4 = vpop.f32.mrf.mxu1  ;;  %v2364_v48 = vpop.f32.mrf.mxu0 }
 0x2a2   : > { %v1425_v60 = vadd.f32 %v1424_v4, %v5443_v1 }
 0x2a4   : > { %v1752_v23 = vadd.f32 %v1712_v3, %v1425_v60  ;;  %4552 = vmatmul.msk.f32.gmra.mxu1 %vm807_vm0, %v2420_v13  ;;  %4672 = vmatmul.msk.f32.gmra.mxu0 %vm807_vm0, %v3398_v14  ;;  %v3400_v60 = vld [vmem:[#allocation2 + $0xb0] sm:$0xff] }
 0x2a5   : > { %4593 = vmatmul.msk.f32.gmra.mxu2 %vm807_vm0, %v2747_v54  ;;  %4633 = vmatmul.msk.f32.gmra.mxu3 %vm807_vm0, %v3073_v32  ;;  %v2749_v14 = vld [vmem:[#allocation2 + $0xb6] sm:$0xff]  ;;  %v3755_v32 = vpop.permute.xlu2 %3754 }
 0x2a6   : > { %v2078_v40 = vadd.f32 %v2038_v37, %v1752_v23  ;;  %v3075_v23 = vld [vmem:[#allocation2 + $0xb7] sm:$0xff] }
 0x2a8   : > { %v5723_v9 = vadd.f32 %v2364_v48, %v2078_v40  ;;  %v2905_v10 = vpop.f32.mrf.mxu2  ;;  %v3231_v11 = vpop.f32.mrf.mxu3  ;;  %v2422_v48 = vld [vmem:[#allocation2 + $0x9d] sm:$0xff] }
 0x2a9   : > { %v2579_v27 = vpop.f32.mrf.mxu1  ;;  %v3557_v1 = vpop.f32.mrf.mxu0 }
 0x2aa   : > { %v2693_v59 = vadd.f32 %v2579_v27, %v5458_v42 }
 0x2ac   : > { %v3019_v30 = vadd.f32 %v2905_v10, %v2693_v59  ;;  %4553 = vmatmul.msk.f32.gmra.mxu1 %vm807_vm0, %v2421_v44  ;;  %4673 = vmatmul.msk.f32.gmra.mxu0 %vm807_vm0, %v3399_v35  ;;  %v2423_v35 = vld [vmem:[#allocation2 + $0xa5] sm:$0xff] }
 0x2ad   : > { %4594 = vmatmul.msk.f32.gmra.mxu2 %vm807_vm0, %v2748_v62  ;;  %4634 = vmatmul.msk.f32.gmra.mxu3 %vm807_vm0, %v3074_v41 }
 0x2ae   : > { %v3345_v22 = vadd.f32 %v3231_v11, %v3019_v30  ;;  %v3401_v30 = vld [vmem:[#allocation2 + $0xb8] sm:$0xff] }
 0x2b0   : > { %v3671_v21 = vadd.f32 %v3557_v1, %v3345_v22  ;;  %v2908_v50 = vpop.f32.mrf.mxu2  ;;  %v3234_v45 = vpop.f32.mrf.mxu3 }
 0x2b1   : > { %v2582_v42 = vpop.f32.mrf.mxu1  ;;  %v3560_v3 = vpop.f32.mrf.mxu0 }
 0x2b2   : > { %v3937_v37 = vmul.f32 %v3750_v15, %v3671_v21  ;;  %v2694_v4 = vadd.f32 %v2582_v42, %v5465_v19  ;;  %v2750_v21 = vld [vmem:[#allocation2 + $0xbe] sm:$0xff] }
 0x2b4   : > { %4182 = vst.msk [vmem:[%s5735_s19 + $0x14] sm:$0xff] %vm807_vm0, %v3937_v37  ;;  %v3020_v13 = vadd.f32 %v2908_v50, %v2694_v4  ;;  %4554 = vmatmul.msk.f32.gmra.mxu1 %vm807_vm0, %v2422_v48  ;;  %4674 = vmatmul.msk.f32.gmra.mxu0 %vm807_vm0, %v3400_v60  ;;  %v4058_v1 = vmul.f32 %v3937_v37, %v3937_v37  ;;  %v3975_v62 = vsel %vm807_vm0, %v3937_v37, 0.0  ;;  %v3076_v50 = vld [vmem:[#allocation2 + $0xbf] sm:$0xff]  ;;  %v3760_v37 = vpop.permute.xlu0 %3759 }
 0x2b5   : > { %4595 = vmatmul.msk.f32.gmra.mxu2 %vm807_vm0, %v2749_v14  ;;  %4635 = vmatmul.msk.f32.gmra.mxu3 %vm807_vm0, %v3075_v23 }
 0x2b6   : > { %v3346_v54 = vadd.f32 %v3234_v45, %v3020_v13 }
 0x2b8   : > { %v3672_v40 = vadd.f32 %v3560_v3, %v3346_v54  ;;  %v2911_v19 = vpop.f32.mrf.mxu2  ;;  %v3237_v10 = vpop.f32.mrf.mxu3 }
 0x2b9   : > { %v2585_v11 = vpop.f32.mrf.mxu1  ;;  %v3563_v27 = vpop.f32.mrf.mxu0 }
 0x2ba   : > { %v3938_v59 = vmul.f32 %v3755_v32, %v3672_v40  ;;  %v2695_v44 = vadd.f32 %v2585_v11, %v5472_v57  ;;  %v4096_v57 = vsel %vm807_vm0, %v4058_v1, 0.0  ;;  %v2424_v40 = vld [vmem:[#allocation2 + $0xad] sm:$0xff] }
 0x2bc   : > { %v3976_v41 = vsel %vm807_vm0, %v3938_v59, 0.0  ;;  %v4059_v22 = vmul.f32 %v3938_v59, %v3938_v59  ;;  %4183 = vst.msk [vmem:[%s5735_s19 + $0x1c] sm:$0xff] %vm807_vm0, %v3938_v59  ;;  %v3021_v15 = vadd.f32 %v2911_v19, %v2695_v44  ;;  %4555 = vmatmul.msk.f32.gmra.mxu1 %vm807_vm0, %v2423_v35  ;;  %4675 = vmatmul.msk.f32.gmra.mxu0 %vm807_vm0, %v3401_v30  ;;  %v3402_v19 = vld [vmem:[#allocation2 + $0xc0] sm:$0xff]  ;;  %v3765_v30 = vpop.permute.xlu1 %3764 }
 0x2bd   : > { %v3977_v45 = vadd.f32 %v3976_v41, %v3975_v62  ;;  %4596 = vmatmul.msk.f32.gmra.mxu2 %vm807_vm0, %v2750_v21  ;;  %4636 = vmatmul.msk.f32.gmra.mxu3 %vm807_vm0, %v3076_v50  ;;  %v3077_v44 = vld [vmem:[#allocation2 + $0xc7] sm:$0xff] }
 0x2be   : > { %v4097_v42 = vsel %vm807_vm0, %v4059_v22, 0.0  ;;  %v3347_v3 = vadd.f32 %v3237_v10, %v3021_v15  ;;  %v2751_v10 = vld [vmem:[#allocation2 + $0xc6] sm:$0xff] }
 0x2bf   : > { %v4098_v4 = vadd.f32 %v4097_v42, %v4096_v57 }
 0x2c0   : > { %v3673_v48 = vadd.f32 %v3563_v27, %v3347_v3  ;;  %v2914_v60 = vpop.f32.mrf.mxu2  ;;  %v3240_v13 = vpop.f32.mrf.mxu3  ;;  %v2425_v3 = vld [vmem:[#allocation2 + $0xb5] sm:$0xff] }
 0x2c1   : > { %v2588_v14 = vpop.f32.mrf.mxu1  ;;  %v3566_v23 = vpop.f32.mrf.mxu0 }
 0x2c2   : > { %v3939_v54 = vmul.f32 %v3760_v37, %v3673_v48  ;;  %v2696_v32 = vadd.f32 %v2588_v14, %v5479_v26 }
 0x2c4   : > { %v3978_v11 = vsel %vm807_vm0, %v3939_v54, 0.0  ;;  %v4060_v59 = vmul.f32 %v3939_v54, %v3939_v54  ;;  %4184 = vst.msk [vmem:[%s5735_s19 + $0x24] sm:$0xff] %vm807_vm0, %v3939_v54  ;;  %v3022_v1 = vadd.f32 %v2914_v60, %v2696_v32  ;;  %4556 = vmatmul.msk.f32.gmra.mxu1 %vm807_vm0, %v2424_v40  ;;  %4676 = vmatmul.msk.f32.gmra.mxu0 %vm807_vm0, %v3402_v19  ;;  %v3770_v54 = vpop.permute.xlu2 %3769 }
 0x2c5   : > { %v3979_v27 = vadd.f32 %v3978_v11, %v3977_v45  ;;  %4597 = vmatmul.msk.f32.gmra.mxu2 %vm807_vm0, %v2751_v10  ;;  %4637 = vmatmul.msk.f32.gmra.mxu3 %vm807_vm0, %v3077_v44  ;;  %v3403_v45 = vld [vmem:[#allocation2 + $0xc8] sm:$0xff] }
 0x2c6   : > { %v4099_v26 = vsel %vm807_vm0, %v4060_v59, 0.0  ;;  %v3348_v35 = vadd.f32 %v3240_v13, %v3022_v1  ;;  %v2752_v13 = vld [vmem:[#allocation2 + $0xce] sm:$0xff] }
 0x2c7   : > { %v4100_v62 = vadd.f32 %v4099_v26, %v4098_v4  ;;  %v3078_v4 = vld [vmem:[#allocation2 + $0xcf] sm:$0xff]  ;;  %v2426_v26 = vld [vmem:[#allocation2 + $0xbd] sm:$0xff] }
 0x2c8   : > { %v3674_v41 = vadd.f32 %v3566_v23, %v3348_v35  ;;  %v2917_v22 = vpop.f32.mrf.mxu2  ;;  %v3243_v15 = vpop.f32.mrf.mxu3 }
 0x2c9   : > { %v2591_v21 = vpop.f32.mrf.mxu1  ;;  %v3569_v50 = vpop.f32.mrf.mxu0 }
 0x2ca   : > { %v3940_v57 = vmul.f32 %v3765_v30, %v3674_v41  ;;  %v2697_v42 = vadd.f32 %v2591_v21, %v5486_v7 }
 0x2cc   : > { %v3980_v37 = vsel %vm807_vm0, %v3940_v57, 0.0  ;;  %v4061_v48 = vmul.f32 %v3940_v57, %v3940_v57  ;;  %4185 = vst.msk [vmem:[%s5735_s19 + $0x2c] sm:$0xff] %vm807_vm0, %v3940_v57  ;;  %v3023_v60 = vadd.f32 %v2917_v22, %v2697_v42  ;;  %4557 = vmatmul.msk.f32.gmra.mxu1 %vm807_vm0, %v2425_v3  ;;  %4677 = vmatmul.msk.f32.gmra.mxu0 %vm807_vm0, %v3403_v45  ;;  %v2753_v22 = vld [vmem:[#allocation2 + $0xd6] sm:$0xff] }
 0x2cd   : > { %v3981_v14 = vadd.f32 %v3980_v37, %v3979_v27  ;;  %4598 = vmatmul.msk.f32.gmra.mxu2 %vm807_vm0, %v2752_v13  ;;  %4638 = vmatmul.msk.f32.gmra.mxu3 %vm807_vm0, %v3078_v4  ;;  %v3404_v27 = vld [vmem:[#allocation2 + $0xd0] sm:$0xff]  ;;  %v2427_v4 = vld [vmem:[#allocation2 + $0xc5] sm:$0xff] }
 0x2ce   : > { %v4101_v7 = vsel %vm807_vm0, %v4061_v48, 0.0  ;;  %v3349_v23 = vadd.f32 %v3243_v15, %v3023_v60 }
 0x2cf   : > { %v4102_v32 = vadd.f32 %v4101_v7, %v4100_v62  ;;  %v3079_v62 = vld [vmem:[#allocation2 + $0xd7] sm:$0xff] }
 0x2d0   : > { %v3675_v40 = vadd.f32 %v3569_v50, %v3349_v23  ;;  %v2920_v19 = vpop.f32.mrf.mxu2  ;;  %v3246_v11 = vpop.f32.mrf.mxu3 }
 0x2d1   : > { %v2594_v59 = vpop.f32.mrf.mxu1  ;;  %v3572_v1 = vpop.f32.mrf.mxu0 }
 0x2d2   : > { %v3941_v10 = vmul.f32 %v3770_v54, %v3675_v40  ;;  %v2698_v44 = vadd.f32 %v2594_v59, %v5493_v28  ;;  %v3775_v50 = vpop.permute.xlu0 %3774  ;;  %v2754_v40 = vld [vmem:[#allocation2 + $0xde] sm:$0xff]  ;;  %v3780_v59 = vpop.permute.xlu1 %3779 }
 0x2d4   : > { %v3982_v35 = vsel %vm807_vm0, %v3941_v10, 0.0  ;;  %v4062_v30 = vmul.f32 %v3941_v10, %v3941_v10  ;;  %4186 = vst.msk [vmem:[%s5735_s19 + $0x34] sm:$0xff] %vm807_vm0, %v3941_v10  ;;  %v3024_v41 = vadd.f32 %v2920_v19, %v2698_v44  ;;  %4558 = vmatmul.msk.f32.gmra.mxu1 %vm807_vm0, %v2426_v26  ;;  %4678 = vmatmul.msk.f32.gmra.mxu0 %vm807_vm0, %v3404_v27 }
 0x2d5   : > { %v3983_v15 = vadd.f32 %v3982_v35, %v3981_v14  ;;  %4599 = vmatmul.msk.f32.gmra.mxu2 %vm807_vm0, %v2753_v22  ;;  %4639 = vmatmul.msk.f32.gmra.mxu3 %vm807_vm0, %v3079_v62  ;;  %v3405_v14 = vld [vmem:[#allocation2 + $0xd8] sm:$0xff]  ;;  %v2428_v22 = vld [vmem:[#allocation2 + $0xcd] sm:$0xff]  ;;  %v3406_v62 = vld [vmem:[#allocation2 + $0xe0] sm:$0xff] }
 0x2d6   : > { %v4103_v28 = vsel %vm807_vm0, %v4062_v30, 0.0  ;;  %v3350_v21 = vadd.f32 %v3246_v11, %v3024_v41 }
 0x2d7   : > { %v4104_v57 = vadd.f32 %v4103_v28, %v4102_v32  ;;  %v3080_v32 = vld [vmem:[#allocation2 + $0xdf] sm:$0xff] }
 0x2d8   : > { %v3676_v42 = vadd.f32 %v3572_v1, %v3350_v21  ;;  %v2923_v3 = vpop.f32.mrf.mxu2  ;;  %v3249_v45 = vpop.f32.mrf.mxu3 }
 0x2d9   : > { %v2597_v37 = vpop.f32.mrf.mxu1  ;;  %v3575_v48 = vpop.f32.mrf.mxu0 }
 0x2da   : > { %v3942_v60 = vmul.f32 %v3775_v50, %v3676_v42  ;;  %v2699_v13 = vadd.f32 %v2597_v37, %v5500_v12  ;;  %v2755_v50 = vld [vmem:[#allocation2 + $0xe6] sm:$0xff] }
 0x2dc   : > { %v3984_v7 = vsel %vm807_vm0, %v3942_v60, 0.0  ;;  %v4063_v23 = vmul.f32 %v3942_v60, %v3942_v60  ;;  %4187 = vst.msk [vmem:[%s5735_s19 + $0x3c] sm:$0xff] %vm807_vm0, %v3942_v60  ;;  %v3025_v54 = vadd.f32 %v2923_v3, %v2699_v13  ;;  %4559 = vmatmul.msk.f32.gmra.mxu1 %vm807_vm0, %v2427_v4  ;;  %4679 = vmatmul.msk.f32.gmra.mxu0 %vm807_vm0, %v3405_v14 }
 0x2dd   : > { %v3985_v19 = vadd.f32 %v3984_v7, %v3983_v15  ;;  %4600 = vmatmul.msk.f32.gmra.mxu2 %vm807_vm0, %v2754_v40  ;;  %4640 = vmatmul.msk.f32.gmra.mxu3 %vm807_vm0, %v3080_v32  ;;  %v3407_v40 = vld [vmem:[#allocation2 + $0xe8] sm:$0xff] }
 0x2de   : > { %v4105_v12 = vsel %vm807_vm0, %v4063_v23, 0.0  ;;  %v3351_v11 = vadd.f32 %v3249_v45, %v3025_v54  ;;  %v3785_v45 = vpop.permute.xlu2 %3784  ;;  %v2429_v54 = vld [vmem:[#allocation2 + $0xd5] sm:$0xff] }
 0x2df   : > { %v4106_v1 = vadd.f32 %v4105_v12, %v4104_v57  ;;  %v3081_v57 = vld [vmem:[#allocation2 + $0xe7] sm:$0xff] }
 0x2e0   : > { %v3677_v10 = vadd.f32 %v3575_v48, %v3351_v11  ;;  %v2926_v44 = vpop.f32.mrf.mxu2  ;;  %v3252_v26 = vpop.f32.mrf.mxu3  ;;  %v2756_v11 = vld [vmem:[#allocation2 + $0xee] sm:$0xff] }
 0x2e1   : > { %v2600_v27 = vpop.f32.mrf.mxu1  ;;  %v3578_v35 = vpop.f32.mrf.mxu0 }
 0x2e2   : > { %v3943_v30 = vmul.f32 %v3780_v59, %v3677_v10  ;;  %v2700_v41 = vadd.f32 %v2600_v27, %v5507_v36  ;;  %v3082_v59 = vld [vmem:[#allocation2 + $0xef] sm:$0xff] }
 0x2e4   : > { %v3986_v15 = vsel %vm807_vm0, %v3943_v30, 0.0  ;;  %v4064_v28 = vmul.f32 %v3943_v30, %v3943_v30  ;;  %4188 = vst.msk [vmem:[%s5735_s19 + $0x44] sm:$0xff] %vm807_vm0, %v3943_v30  ;;  %v3026_v21 = vadd.f32 %v2926_v44, %v2700_v41  ;;  %4560 = vmatmul.msk.f32.gmra.mxu1 %vm807_vm0, %v2428_v22  ;;  %4680 = vmatmul.msk.f32.gmra.mxu0 %vm807_vm0, %v3406_v62  ;;  %v3790_v44 = vpop.permute.xlu0 %3789 }
 0x2e5   : > { %v3987_v42 = vadd.f32 %v3986_v15, %v3985_v19  ;;  %4601 = vmatmul.msk.f32.gmra.mxu2 %vm807_vm0, %v2755_v50  ;;  %4641 = vmatmul.msk.f32.gmra.mxu3 %vm807_vm0, %v3081_v57 }
 0x2e6   : > { %v4107_v36 = vsel %vm807_vm0, %v4064_v28, 0.0  ;;  %v3352_v3 = vadd.f32 %v3252_v26, %v3026_v21  ;;  %v2430_v28 = vld [vmem:[#allocation2 + $0xdd] sm:$0xff]  ;;  %v3408_v21 = vld [vmem:[#allocation2 + $0xf0] sm:$0xff] }
 0x2e7   : > { %v4108_v37 = vadd.f32 %v4107_v36, %v4106_v1  ;;  %v2757_v36 = vld [vmem:[#allocation2 + $0xf6] sm:$0xff] }
 0x2e8   : > { %v3678_v48 = vadd.f32 %v3578_v35, %v3352_v3  ;;  %v2929_v60 = vpop.f32.mrf.mxu2  ;;  %v3255_v13 = vpop.f32.mrf.mxu3  ;;  %v3083_v3 = vld [vmem:[#allocation2 + $0xf7] sm:$0xff] }
 0x2e9   : > { %v2603_v4 = vpop.f32.mrf.mxu1  ;;  %v3581_v14 = vpop.f32.mrf.mxu0 }
 0x2ea   : > { %v3944_v7 = vmul.f32 %v3785_v45, %v3678_v48  ;;  %v2701_v23 = vadd.f32 %v2603_v4, %v5514_v17  ;;  %v3795_v48 = vpop.permute.xlu1 %3794 }
 0x2ec   : > { %v3988_v32 = vsel %vm807_vm0, %v3944_v7, 0.0  ;;  %v4065_v19 = vmul.f32 %v3944_v7, %v3944_v7  ;;  %4189 = vst.msk [vmem:[%s5735_s19 + $0x4c] sm:$0xff] %vm807_vm0, %v3944_v7  ;;  %v3027_v12 = vadd.f32 %v2929_v60, %v2701_v23  ;;  %4561 = vmatmul.msk.f32.gmra.mxu1 %vm807_vm0, %v2429_v54  ;;  %4681 = vmatmul.msk.f32.gmra.mxu0 %vm807_vm0, %v3407_v40 }
 0x2ed   : > { %v3989_v1 = vadd.f32 %v3988_v32, %v3987_v42  ;;  %4602 = vmatmul.msk.f32.gmra.mxu2 %vm807_vm0, %v2756_v11  ;;  %4642 = vmatmul.msk.f32.gmra.mxu3 %vm807_vm0, %v3082_v59  ;;  %v2431_v32 = vld [vmem:[#allocation2 + $0xe5] sm:$0xff] }
 0x2ee   : > { %v4109_v17 = vsel %vm807_vm0, %v4065_v19, 0.0  ;;  %v3353_v10 = vadd.f32 %v3255_v13, %v3027_v12  ;;  %v3409_v19 = vld [vmem:[#allocation2 + $0xf8] sm:$0xff] }
 0x2ef   : > { %v4110_v26 = vadd.f32 %v4109_v17, %v4108_v37  ;;  %v3084_v17 = vld [vmem:[#allocation2 + $0xff] sm:$0xff] }
 0x2f0   : > { %v3679_v27 = vadd.f32 %v3581_v14, %v3353_v10  ;;  %v2932_v35 = vpop.f32.mrf.mxu2  ;;  %v3258_v30 = vpop.f32.mrf.mxu3 }
 0x2f1   : > { %v2606_v41 = vpop.f32.mrf.mxu1  ;;  %v3584_v22 = vpop.f32.mrf.mxu0 }
 0x2f2   : > { %v3945_v62 = vmul.f32 %v3790_v44, %v3679_v27  ;;  %v2702_v15 = vadd.f32 %v2606_v41, %v5521_v55 }
 0x2f4   : > { %v3990_v50 = vsel %vm807_vm0, %v3945_v62, 0.0  ;;  %v4066_v57 = vmul.f32 %v3945_v62, %v3945_v62  ;;  %4190 = vst.msk [vmem:[%s5735_s19 + $0x54] sm:$0xff] %vm807_vm0, %v3945_v62  ;;  %v3028_v42 = vadd.f32 %v2932_v35, %v2702_v15  ;;  %4562 = vmatmul.msk.f32.gmra.mxu1 %vm807_vm0, %v2430_v28  ;;  %4682 = vmatmul.msk.f32.gmra.mxu0 %vm807_vm0, %v3408_v21  ;;  %v2432_v21 = vld [vmem:[#allocation2 + $0xed] sm:$0xff] }
 0x2f5   : > { %v3991_v45 = vadd.f32 %v3990_v50, %v3989_v1  ;;  %4603 = vmatmul.msk.f32.gmra.mxu2 %vm807_vm0, %v2757_v36  ;;  %4643 = vmatmul.msk.f32.gmra.mxu3 %vm807_vm0, %v3083_v3  ;;  %v2758_v1 = vld [vmem:[#allocation2 + $0xfe] sm:$0xff]  ;;  %v2759_v3 = vld [vmem:[#allocation2 + $0x106] sm:$0xff] }
 0x2f6   : > { %v4111_v55 = vsel %vm807_vm0, %v4066_v57, 0.0  ;;  %v3354_v37 = vadd.f32 %v3258_v30, %v3028_v42  ;;  %v3410_v50 = vld [vmem:[#allocation2 + $0x100] sm:$0xff] }
 0x2f7   : > { %v4112_v60 = vadd.f32 %v4111_v55, %v4110_v26  ;;  %v3800_v26 = vpop.permute.xlu2 %3799 }
 0x2f8   : > { %v3680_v13 = vadd.f32 %v3584_v22, %v3354_v37  ;;  %v2935_v4 = vpop.f32.mrf.mxu2  ;;  %v3261_v14 = vpop.f32.mrf.mxu3 }
 0x2f9   : > { %v2609_v7 = vpop.f32.mrf.mxu1  ;;  %v3587_v23 = vpop.f32.mrf.mxu0 }
 0x2fa   : > { %v3946_v54 = vmul.f32 %v3795_v48, %v3680_v13  ;;  %v2703_v40 = vadd.f32 %v2609_v7, %v5528_v20  ;;  %v3805_v48 = vpop.permute.xlu0 %3804 }
 0x2fc   : > { %v3992_v12 = vsel %vm807_vm0, %v3946_v54, 0.0  ;;  %v4067_v11 = vmul.f32 %v3946_v54, %v3946_v54  ;;  %4191 = vst.msk [vmem:[%s5735_s19 + $0x5c] sm:$0xff] %vm807_vm0, %v3946_v54  ;;  %v3029_v59 = vadd.f32 %v2935_v4, %v2703_v40  ;;  %4563 = vmatmul.msk.f32.gmra.mxu1 %vm807_vm0, %v2431_v32  ;;  %4683 = vmatmul.msk.f32.gmra.mxu0 %vm807_vm0, %v3409_v19  ;;  %v2433_v32 = vld [vmem:[#allocation2 + $0xf5] sm:$0xff]  ;;  %v3411_v19 = vld [vmem:[#allocation2 + $0x108] sm:$0xff] }
 0x2fd   : > { %v3993_v10 = vadd.f32 %v3992_v12, %v3991_v45  ;;  %4604 = vmatmul.msk.f32.gmra.mxu2 %vm807_vm0, %v2758_v1  ;;  %4644 = vmatmul.msk.f32.gmra.mxu3 %vm807_vm0, %v3084_v17  ;;  %v3085_v45 = vld [vmem:[#allocation2 + $0x107] sm:$0xff]  ;;  %v3086_v17 = vld [vmem:[#allocation2 + $0x10f] sm:$0xff] }
 0x2fe   : > { %v4113_v20 = vsel %vm807_vm0, %v4067_v11, 0.0  ;;  %v3355_v44 = vadd.f32 %v3261_v14, %v3029_v59  ;;  %v2760_v1 = vld [vmem:[#allocation2 + $0x10e] sm:$0xff] }
 0x2ff   : > { %v4114_v27 = vadd.f32 %v4113_v20, %v4112_v60 }
 0x300   : > { %v3681_v35 = vadd.f32 %v3587_v23, %v3355_v44  ;;  %v2938_v30 = vpop.f32.mrf.mxu2  ;;  %v3264_v41 = vpop.f32.mrf.mxu3 }
 0x301   : > { %v2612_v22 = vpop.f32.mrf.mxu1  ;;  %v3590_v62 = vpop.f32.mrf.mxu0 }
 0x302   : > { %v3947_v15 = vmul.f32 %v3800_v26, %v3681_v35  ;;  %v2704_v28 = vadd.f32 %v2612_v22, %v5535_v39  ;;  %v3810_v44 = vpop.permute.xlu1 %3809 }
 0x304   : > { %v3994_v57 = vsel %vm807_vm0, %v3947_v15, 0.0  ;;  %v4068_v42 = vmul.f32 %v3947_v15, %v3947_v15  ;;  %4192 = vst.msk [vmem:[%s5735_s19 + $0x64] sm:$0xff] %vm807_vm0, %v3947_v15  ;;  %v3030_v36 = vadd.f32 %v2938_v30, %v2704_v28  ;;  %4564 = vmatmul.msk.f32.gmra.mxu1 %vm807_vm0, %v2432_v21  ;;  %4684 = vmatmul.msk.f32.gmra.mxu0 %vm807_vm0, %v3410_v50  ;;  %v2434_v28 = vld [vmem:[#allocation2 + $0xfd] sm:$0xff]  ;;  %v3412_v21 = vld [vmem:[#allocation2 + $0x110] sm:$0xff] }
 0x305   : > { %v3995_v55 = vadd.f32 %v3994_v57, %v3993_v10  ;;  %4605 = vmatmul.msk.f32.gmra.mxu2 %vm807_vm0, %v2759_v3  ;;  %4645 = vmatmul.msk.f32.gmra.mxu3 %vm807_vm0, %v3085_v45  ;;  %v3087_v3 = vld [vmem:[#allocation2 + $0x117] sm:$0xff] }
 0x306   : > { %v4115_v39 = vsel %vm807_vm0, %v4068_v42, 0.0  ;;  %v3356_v37 = vadd.f32 %v3264_v41, %v3030_v36  ;;  %v2761_v36 = vld [vmem:[#allocation2 + $0x116] sm:$0xff] }
 0x307   : > { %v4116_v60 = vadd.f32 %v4115_v39, %v4114_v27  ;;  %v3815_v39 = vpop.permute.xlu2 %3814 }
 0x308   : > { %v3682_v13 = vadd.f32 %v3590_v62, %v3356_v37  ;;  %v2941_v4 = vpop.f32.mrf.mxu2  ;;  %v3267_v14 = vpop.f32.mrf.mxu3 }
 0x309   : > { %v2615_v7 = vpop.f32.mrf.mxu1  ;;  %v3593_v23 = vpop.f32.mrf.mxu0 }
 0x30a   : > { %v3948_v54 = vmul.f32 %v3805_v48, %v3682_v13  ;;  %v2705_v40 = vadd.f32 %v2615_v7, %v5542_v46 }
 0x30c   : > { %v3996_v12 = vsel %vm807_vm0, %v3948_v54, 0.0  ;;  %v4069_v11 = vmul.f32 %v3948_v54, %v3948_v54  ;;  %4193 = vst.msk [vmem:[%s5735_s19 + $0x6c] sm:$0xff] %vm807_vm0, %v3948_v54  ;;  %v3031_v59 = vadd.f32 %v2941_v4, %v2705_v40  ;;  %4565 = vmatmul.msk.f32.gmra.mxu1 %vm807_vm0, %v2433_v32  ;;  %4685 = vmatmul.msk.f32.gmra.mxu0 %vm807_vm0, %v3411_v19  ;;  %v2435_v54 = vld [vmem:[#allocation2 + $0x105] sm:$0xff]  ;;  %v3413_v40 = vld [vmem:[#allocation2 + $0x118] sm:$0xff] }
 0x30d   : > { %v3997_v10 = vadd.f32 %v3996_v12, %v3995_v55  ;;  %4606 = vmatmul.msk.f32.gmra.mxu2 %vm807_vm0, %v2760_v1  ;;  %4646 = vmatmul.msk.f32.gmra.mxu3 %vm807_vm0, %v3086_v17 }
 0x30e   : > { %v4117_v46 = vsel %vm807_vm0, %v4069_v11, 0.0  ;;  %v3357_v20 = vadd.f32 %v3267_v14, %v3031_v59  ;;  %v2762_v11 = vld [vmem:[#allocation2 + $0x11e] sm:$0xff] }
 0x30f   : > { %v4118_v26 = vadd.f32 %v4117_v46, %v4116_v60  ;;  %v3088_v59 = vld [vmem:[#allocation2 + $0x11f] sm:$0xff] }
 0x310   : > { %v3683_v27 = vadd.f32 %v3593_v23, %v3357_v20  ;;  %v2944_v35 = vpop.f32.mrf.mxu2  ;;  %v3270_v30 = vpop.f32.mrf.mxu3 }
 0x311   : > { %v2618_v41 = vpop.f32.mrf.mxu1  ;;  %v3596_v22 = vpop.f32.mrf.mxu0 }
 0x312   : > { %v3949_v62 = vmul.f32 %v3810_v44, %v3683_v27  ;;  %v2706_v15 = vadd.f32 %v2618_v41, %v5549_v58 }
 0x314   : > { %v3998_v50 = vsel %vm807_vm0, %v3949_v62, 0.0  ;;  %v4070_v57 = vmul.f32 %v3949_v62, %v3949_v62  ;;  %4194 = vst.msk [vmem:[%s5735_s19 + $0x74] sm:$0xff] %vm807_vm0, %v3949_v62  ;;  %v3032_v42 = vadd.f32 %v2944_v35, %v2706_v15  ;;  %4566 = vmatmul.msk.f32.gmra.mxu1 %vm807_vm0, %v2434_v28  ;;  %4686 = vmatmul.msk.f32.gmra.mxu0 %vm807_vm0, %v3412_v21  ;;  %v3414_v62 = vld [vmem:[#allocation2 + $0x120] sm:$0xff] }
 0x315   : > { %v3999_v45 = vadd.f32 %v3998_v50, %v3997_v10  ;;  %4607 = vmatmul.msk.f32.gmra.mxu2 %vm807_vm0, %v2761_v36  ;;  %4647 = vmatmul.msk.f32.gmra.mxu3 %vm807_vm0, %v3087_v3  ;;  %v3820_v10 = vpop.permute.xlu0 %3819  ;;  %v2763_v50 = vld [vmem:[#allocation2 + $0x126] sm:$0xff]  ;;  %v3825_v3 = vpop.permute.xlu1 %3824 }
 0x316   : > { %v4119_v58 = vsel %vm807_vm0, %v4070_v57, 0.0  ;;  %v3358_v55 = vadd.f32 %v3270_v30, %v3032_v42  ;;  %v3089_v57 = vld [vmem:[#allocation2 + $0x127] sm:$0xff] }
 0x317   : > { %v4120_v37 = vadd.f32 %v4119_v58, %v4118_v26 }
 0x318   : > { %v3684_v48 = vadd.f32 %v3596_v22, %v3358_v55  ;;  %v2947_v60 = vpop.f32.mrf.mxu2  ;;  %v3273_v13 = vpop.f32.mrf.mxu3  ;;  %v2436_v22 = vld [vmem:[#allocation2 + $0x10d] sm:$0xff] }
 0x319   : > { %v2621_v4 = vpop.f32.mrf.mxu1  ;;  %v3599_v14 = vpop.f32.mrf.mxu0 }
 0x31a   : > { %v3950_v7 = vmul.f32 %v3815_v39, %v3684_v48  ;;  %v2707_v23 = vadd.f32 %v2621_v4, %v5556_v2  ;;  %v2437_v4 = vld [vmem:[#allocation2 + $0x115] sm:$0xff] }
 0x31c   : > { %v4000_v32 = vsel %vm807_vm0, %v3950_v7, 0.0  ;;  %v4071_v19 = vmul.f32 %v3950_v7, %v3950_v7  ;;  %4195 = vst.msk [vmem:[%s5735_s19 + $0x7c] sm:$0xff] %vm807_vm0, %v3950_v7  ;;  %v3033_v12 = vadd.f32 %v2947_v60, %v2707_v23  ;;  %4567 = vmatmul.msk.f32.gmra.mxu1 %vm807_vm0, %v2435_v54  ;;  %4687 = vmatmul.msk.f32.gmra.mxu0 %vm807_vm0, %v3413_v40  ;;  %v2764_v40 = vld [vmem:[#allocation2 + $0x12e] sm:$0xff] }
 0x31d   : > { %v4001_v1 = vadd.f32 %v4000_v32, %v3999_v45  ;;  %4608 = vmatmul.msk.f32.gmra.mxu2 %vm807_vm0, %v2762_v11  ;;  %4648 = vmatmul.msk.f32.gmra.mxu3 %vm807_vm0, %v3088_v59  ;;  %v3090_v32 = vld [vmem:[#allocation2 + $0x12f] sm:$0xff]  ;;  %v3830_v11 = vpop.permute.xlu2 %3829 }
 0x31e   : > { %v4121_v2 = vsel %vm807_vm0, %v4071_v19, 0.0  ;;  %v3359_v17 = vadd.f32 %v3273_v13, %v3033_v12 }
 0x31f   : > { %v4122_v46 = vadd.f32 %v4121_v2, %v4120_v37 }
 0x320   : > { %v3685_v20 = vadd.f32 %v3599_v14, %v3359_v17  ;;  %v2950_v44 = vpop.f32.mrf.mxu2  ;;  %v3276_v26 = vpop.f32.mrf.mxu3  ;;  %v3415_v14 = vld [vmem:[#allocation2 + $0x128] sm:$0xff] }
 0x321   : > { %v2624_v27 = vpop.f32.mrf.mxu1  ;;  %v3602_v35 = vpop.f32.mrf.mxu0 }
 0x322   : > { %v3951_v30 = vmul.f32 %v3820_v10, %v3685_v20  ;;  %v2708_v41 = vadd.f32 %v2624_v27, %v5563_v33  ;;  %v3416_v27 = vld [vmem:[#allocation2 + $0x130] sm:$0xff] }
 0x324   : > { %v4002_v15 = vsel %vm807_vm0, %v3951_v30, 0.0  ;;  %v4072_v28 = vmul.f32 %v3951_v30, %v3951_v30  ;;  %4196 = vst.msk [vmem:[%s5735_s19 + $0x84] sm:$0xff] %vm807_vm0, %v3951_v30  ;;  %v3034_v21 = vadd.f32 %v2950_v44, %v2708_v41  ;;  %4568 = vmatmul.msk.f32.gmra.mxu1 %vm807_vm0, %v2436_v22  ;;  %4688 = vmatmul.msk.f32.gmra.mxu0 %vm807_vm0, %v3414_v62  ;;  %v2765_v22 = vld [vmem:[#allocation2 + $0x136] sm:$0xff] }
 0x325   : > { %v4003_v42 = vadd.f32 %v4002_v15, %v4001_v1  ;;  %4609 = vmatmul.msk.f32.gmra.mxu2 %vm807_vm0, %v2763_v50  ;;  %4649 = vmatmul.msk.f32.gmra.mxu3 %vm807_vm0, %v3089_v57  ;;  %v3091_v62 = vld [vmem:[#allocation2 + $0x137] sm:$0xff] }
 0x326   : > { %v4123_v33 = vsel %vm807_vm0, %v4072_v28, 0.0  ;;  %v3360_v36 = vadd.f32 %v3276_v26, %v3034_v21  ;;  %v2438_v26 = vld [vmem:[#allocation2 + $0x11d] sm:$0xff]  ;;  %v3835_v21 = vpop.permute.xlu0 %3834 }
 0x327   : > { %v4124_v45 = vadd.f32 %v4123_v33, %v4122_v46 }
 0x328   : > { %v3686_v58 = vadd.f32 %v3602_v35, %v3360_v36  ;;  %v2953_v55 = vpop.f32.mrf.mxu2  ;;  %v3279_v39 = vpop.f32.mrf.mxu3 }
 0x329   : > { %v2627_v37 = vpop.f32.mrf.mxu1  ;;  %v3605_v48 = vpop.f32.mrf.mxu0 }
 0x32a   : > { %v3952_v60 = vmul.f32 %v3825_v3, %v3686_v58  ;;  %v2709_v13 = vadd.f32 %v2627_v37, %v5570_v16 }
 0x32c   : > { %v4004_v7 = vsel %vm807_vm0, %v3952_v60, 0.0  ;;  %v4073_v23 = vmul.f32 %v3952_v60, %v3952_v60  ;;  %4197 = vst.msk [vmem:[%s5735_s19 + $0x8c] sm:$0xff] %vm807_vm0, %v3952_v60  ;;  %v3035_v54 = vadd.f32 %v2953_v55, %v2709_v13  ;;  %4569 = vmatmul.msk.f32.gmra.mxu1 %vm807_vm0, %v2437_v4  ;;  %4689 = vmatmul.msk.f32.gmra.mxu0 %vm807_vm0, %v3415_v14  ;;  %v2439_v55 = vld [vmem:[#allocation2 + $0x125] sm:$0xff] }
 0x32d   : > { %v4005_v19 = vadd.f32 %v4004_v7, %v4003_v42  ;;  %4610 = vmatmul.msk.f32.gmra.mxu2 %vm807_vm0, %v2764_v40  ;;  %4650 = vmatmul.msk.f32.gmra.mxu3 %vm807_vm0, %v3090_v32  ;;  %v2766_v13 = vld [vmem:[#allocation2 + $0x13e] sm:$0xff] }
 0x32e   : > { %v4125_v16 = vsel %vm807_vm0, %v4073_v23, 0.0  ;;  %v3361_v12 = vadd.f32 %v3279_v39, %v3035_v54  ;;  %v3417_v39 = vld [vmem:[#allocation2 + $0x138] sm:$0xff]  ;;  %v3840_v23 = vpop.permute.xlu1 %3839 }
 0x32f   : > { %v4126_v59 = vadd.f32 %v4125_v16, %v4124_v45  ;;  %v3092_v4 = vld [vmem:[#allocation2 + $0x13f] sm:$0xff] }
 0x330   : > { %v3687_v1 = vadd.f32 %v3605_v48, %v3361_v12  ;;  %v2956_v2 = vpop.f32.mrf.mxu2  ;;  %v3282_v17 = vpop.f32.mrf.mxu3 }
 0x331   : > { %v2630_v10 = vpop.f32.mrf.mxu1  ;;  %v3608_v46 = vpop.f32.mrf.mxu0 }
 0x332   : > { %v3953_v20 = vmul.f32 %v3830_v11, %v3687_v1  ;;  %v2710_v44 = vadd.f32 %v2630_v10, %v5577_v24  ;;  %v2440_v1 = vld [vmem:[#allocation2 + $0x12d] sm:$0xff] }
 0x334   : > { %v4006_v35 = vsel %vm807_vm0, %v3953_v20, 0.0  ;;  %v4074_v30 = vmul.f32 %v3953_v20, %v3953_v20  ;;  %4198 = vst.msk [vmem:[%s5735_s19 + $0x94] sm:$0xff] %vm807_vm0, %v3953_v20  ;;  %v3036_v41 = vadd.f32 %v2956_v2, %v2710_v44  ;;  %4570 = vmatmul.msk.f32.gmra.mxu1 %vm807_vm0, %v2438_v26  ;;  %4690 = vmatmul.msk.f32.gmra.mxu0 %vm807_vm0, %v3416_v27  ;;  %v3418_v2 = vld [vmem:[#allocation2 + $0x140] sm:$0xff] }
 0x335   : > { %v4007_v15 = vadd.f32 %v4006_v35, %v4005_v19  ;;  %4611 = vmatmul.msk.f32.gmra.mxu2 %vm807_vm0, %v2765_v22  ;;  %4651 = vmatmul.msk.f32.gmra.mxu3 %vm807_vm0, %v3091_v62  ;;  %v2767_v20 = vld [vmem:[#allocation2 + $0x146] sm:$0xff]  ;;  %v3845_v35 = vpop.permute.xlu2 %3844 }
 0x336   : > { %v4127_v24 = vsel %vm807_vm0, %v4074_v30, 0.0  ;;  %v3362_v28 = vadd.f32 %v3282_v17, %v3036_v41  ;;  %v3093_v44 = vld [vmem:[#allocation2 + $0x147] sm:$0xff] }
 0x337   : > { %v4128_v50 = vadd.f32 %v4127_v24, %v4126_v59 }
 0x338   : > { %v3688_v57 = vadd.f32 %v3608_v46, %v3362_v28  ;;  %v2959_v42 = vpop.f32.mrf.mxu2  ;;  %v3285_v33 = vpop.f32.mrf.mxu3 }
 0x339   : > { %v2633_v36 = vpop.f32.mrf.mxu1  ;;  %v3611_v3 = vpop.f32.mrf.mxu0 }
 0x33a   : > { %v3954_v45 = vmul.f32 %v3835_v21, %v3688_v57  ;;  %v2711_v58 = vadd.f32 %v2633_v36, %v5584_v34  ;;  %v3419_v57 = vld [vmem:[#allocation2 + $0x148] sm:$0xff] }
 0x33c   : > { %v4008_v37 = vsel %vm807_vm0, %v3954_v45, 0.0  ;;  %v4075_v48 = vmul.f32 %v3954_v45, %v3954_v45  ;;  %4199 = vst.msk [vmem:[%s5735_s19 + $0x9c] sm:$0xff] %vm807_vm0, %v3954_v45  ;;  %v3037_v60 = vadd.f32 %v2959_v42, %v2711_v58  ;;  %4571 = vmatmul.msk.f32.gmra.mxu1 %vm807_vm0, %v2439_v55  ;;  %4691 = vmatmul.msk.f32.gmra.mxu0 %vm807_vm0, %v3417_v39  ;;  %v3094_v45 = vld [vmem:[#allocation2 + $0x14f] sm:$0xff]  ;;  %v3850_v39 = vpop.permute.xlu0 %3849 }
 0x33d   : > { %v4009_v14 = vadd.f32 %v4008_v37, %v4007_v15  ;;  %4612 = vmatmul.msk.f32.gmra.mxu2 %vm807_vm0, %v2766_v13  ;;  %4652 = vmatmul.msk.f32.gmra.mxu3 %vm807_vm0, %v3092_v4 }
 0x33e   : > { %v4129_v34 = vsel %vm807_vm0, %v4075_v48, 0.0  ;;  %v3363_v7 = vadd.f32 %v3285_v33, %v3037_v60 }
 0x33f   : > { %v4130_v54 = vadd.f32 %v4129_v34, %v4128_v50  ;;  %v2441_v50 = vld [vmem:[#allocation2 + $0x135] sm:$0xff] }
 0x340   : > { %v3689_v40 = vadd.f32 %v3611_v3, %v3363_v7  ;;  %v2962_v32 = vpop.f32.mrf.mxu2  ;;  %v3288_v19 = vpop.f32.mrf.mxu3  ;;  %v2768_v3 = vld [vmem:[#allocation2 + $0x14e] sm:$0xff] }
 0x341   : > { %v2636_v16 = vpop.f32.mrf.mxu1  ;;  %v3614_v12 = vpop.f32.mrf.mxu0 }
 0x342   : > { %v3955_v11 = vmul.f32 %v3840_v23, %v3689_v40  ;;  %v2712_v59 = vadd.f32 %v2636_v16, %v5591_v49  ;;  %v2442_v23 = vld [vmem:[#allocation2 + $0x13d] sm:$0xff] }
 0x344   : > { %v4010_v17 = vsel %vm807_vm0, %v3955_v11, 0.0  ;;  %v4076_v10 = vmul.f32 %v3955_v11, %v3955_v11  ;;  %4200 = vst.msk [vmem:[%s5735_s19 + $0xa4] sm:$0xff] %vm807_vm0, %v3955_v11  ;;  %v3038_v46 = vadd.f32 %v2962_v32, %v2712_v59  ;;  %4572 = vmatmul.msk.f32.gmra.mxu1 %vm807_vm0, %v2440_v1  ;;  %4692 = vmatmul.msk.f32.gmra.mxu0 %vm807_vm0, %v3418_v2  ;;  %v3855_v59 = vpop.permute.xlu1 %3854 }
 0x345   : > { %v4011_v26 = vadd.f32 %v4010_v17, %v4009_v14  ;;  %4613 = vmatmul.msk.f32.gmra.mxu2 %vm807_vm0, %v2767_v20  ;;  %4653 = vmatmul.msk.f32.gmra.mxu3 %vm807_vm0, %v3093_v44 }
 0x346   : > { %v4131_v49 = vsel %vm807_vm0, %v4076_v10, 0.0  ;;  %v3364_v27 = vadd.f32 %v3288_v19, %v3038_v46 }
 0x347   : > { %v4132_v30 = vadd.f32 %v4131_v49, %v4130_v54  ;;  %v3420_v54 = vld [vmem:[#allocation2 + $0x150] sm:$0xff] }
 0x348   : > { %v3690_v41 = vadd.f32 %v3614_v12, %v3364_v27  ;;  %v2965_v22 = vpop.f32.mrf.mxu2  ;;  %v3291_v62 = vpop.f32.mrf.mxu3 }
 0x349   : > { %v2639_v15 = vpop.f32.mrf.mxu1  ;;  %v3617_v24 = vpop.f32.mrf.mxu0 }
 0x34a   : > { %v3956_v28 = vmul.f32 %v3845_v35, %v3690_v41  ;;  %v2713_v21 = vadd.f32 %v2639_v15, %v5598_v5 }
 0x34c   : > { %v4012_v42 = vsel %vm807_vm0, %v3956_v28, 0.0  ;;  %v4077_v33 = vmul.f32 %v3956_v28, %v3956_v28  ;;  %4201 = vst.msk [vmem:[%s5735_s19 + $0xac] sm:$0xff] %vm807_vm0, %v3956_v28  ;;  %v3039_v36 = vadd.f32 %v2965_v22, %v2713_v21  ;;  %4573 = vmatmul.msk.f32.gmra.mxu1 %vm807_vm0, %v2441_v50  ;;  %4693 = vmatmul.msk.f32.gmra.mxu0 %vm807_vm0, %v3419_v57  ;;  %v3860_v22 = vpop.permute.xlu2 %3859 }
 0x34d   : > { %v4013_v58 = vadd.f32 %v4012_v42, %v4011_v26  ;;  %4614 = vmatmul.msk.f32.gmra.mxu2 %vm807_vm0, %v2768_v3  ;;  %4654 = vmatmul.msk.f32.gmra.mxu3 %vm807_vm0, %v3094_v45 }
 0x34e   : > { %v4133_v5 = vsel %vm807_vm0, %v4077_v33, 0.0  ;;  %v3365_v55 = vadd.f32 %v3291_v62, %v3039_v36 }
 0x34f   : > { %v4134_v37 = vadd.f32 %v4133_v5, %v4132_v30  ;;  %v3865_v5 = vpop.permute.xlu0 %3864 }
 0x350   : > { %v3691_v48 = vadd.f32 %v3617_v24, %v3365_v55  ;;  %v2968_v60 = vpop.f32.mrf.mxu2  ;;  %v3294_v13 = vpop.f32.mrf.mxu3 }
 0x351   : > { %v2642_v4 = vpop.f32.mrf.mxu1  ;;  %v3620_v14 = vpop.f32.mrf.mxu0 }
 0x352   : > { %v3957_v34 = vmul.f32 %v3850_v39, %v3691_v48  ;;  %v2714_v7 = vadd.f32 %v2642_v4, %v5605_v38 }
 0x354   : > { %v4014_v40 = vsel %vm807_vm0, %v3957_v34, 0.0  ;;  %v4078_v32 = vmul.f32 %v3957_v34, %v3957_v34  ;;  %4202 = vst.msk [vmem:[%s5735_s19 + $0xb4] sm:$0xff] %vm807_vm0, %v3957_v34  ;;  %v3040_v19 = vadd.f32 %v2968_v60, %v2714_v7  ;;  %4574 = vmatmul.msk.f32.gmra.mxu1 %vm807_vm0, %v2442_v23  ;;  %4694 = vmatmul.msk.f32.gmra.mxu0 %vm807_vm0, %v3420_v54 }
 0x355   : > { %v4015_v16 = vadd.f32 %v4014_v40, %v4013_v58 }
 0x356   : > { %v4135_v12 = vsel %vm807_vm0, %v4078_v32, 0.0  ;;  %v3366_v11 = vadd.f32 %v3294_v13, %v3040_v19  ;;  %v3870_v32 = vpop.permute.xlu1 %3869 }
 0x357   : > { %v4136_v1 = vadd.f32 %v4135_v12, %v4134_v37 }
 0x358   : > { %v3692_v38 = vadd.f32 %v3620_v14, %v3366_v11  ;;  %v2971_v2 = vpop.f32.mrf.mxu2  ;;  %v3297_v17 = vpop.f32.mrf.mxu3 }
 0x359   : > { %v2645_v10 = vpop.f32.mrf.mxu1  ;;  %v3623_v46 = vpop.f32.mrf.mxu0 }
 0x35a   : > { %v3958_v20 = vmul.f32 %v3855_v59, %v3692_v38  ;;  %v2715_v44 = vadd.f32 %v2645_v10, %v5613_v63 }
 0x35c   : > { %v4016_v26 = vsel %vm807_vm0, %v3958_v20, 0.0  ;;  %v4079_v49 = vmul.f32 %v3958_v20, %v3958_v20  ;;  %4203 = vst.msk [vmem:[%s5735_s19 + $0xbc] sm:$0xff] %vm807_vm0, %v3958_v20  ;;  %v3041_v27 = vadd.f32 %v2971_v2, %v2715_v44 }
 0x35d   : > { %v4017_v35 = vadd.f32 %v4016_v26, %v4015_v16  ;;  %v3875_v26 = vpop.permute.xlu2 %3874 }
 0x35e   : > { %v4137_v30 = vsel %vm807_vm0, %v4079_v49, 0.0  ;;  %v3367_v41 = vadd.f32 %v3297_v17, %v3041_v27 }
 0x35f   : > { %v4138_v62 = vadd.f32 %v4137_v30, %v4136_v1 }
 0x360   : > { %v3693_v15 = vadd.f32 %v3623_v46, %v3367_v41  ;;  %v2974_v24 = vpop.f32.mrf.mxu2  ;;  %v3300_v28 = vpop.f32.mrf.mxu3 }
 0x361   : > { %v2648_v21 = vpop.f32.mrf.mxu1  ;;  %v3626_v50 = vpop.f32.mrf.mxu0 }
 0x362   : > { %v3959_v57 = vmul.f32 %v3860_v22, %v3693_v15  ;;  %v2716_v63 = vadd.f32 %v2648_v21, %v5621_v25 }
 0x364   : > { %v4018_v42 = vsel %vm807_vm0, %v3959_v57, 0.0  ;;  %v4080_v33 = vmul.f32 %v3959_v57, %v3959_v57  ;;  %4204 = vst.msk [vmem:[%s5735_s19 + $0xc4] sm:$0xff] %vm807_vm0, %v3959_v57  ;;  %v3042_v36 = vadd.f32 %v2974_v24, %v2716_v63  ;;  %v3880_v63 = vpop.permute.xlu0 %3879 }
 0x365   : > { %v4019_v3 = vadd.f32 %v4018_v42, %v4017_v35 }
 0x366   : > { %v4139_v45 = vsel %vm807_vm0, %v4080_v33, 0.0  ;;  %v3368_v58 = vadd.f32 %v3300_v28, %v3042_v36 }
 0x367   : > { %v4140_v55 = vadd.f32 %v4139_v45, %v4138_v62 }
 0x368   : > { %v3694_v39 = vadd.f32 %v3626_v50, %v3368_v58  ;;  %v2977_v37 = vpop.f32.mrf.mxu2  ;;  %v3303_v48 = vpop.f32.mrf.mxu3 }
 0x369   : > { %v2651_v60 = vpop.f32.mrf.mxu1  ;;  %v3629_v13 = vpop.f32.mrf.mxu0 }
 0x36a   : > { %v3960_v4 = vmul.f32 %v3865_v5, %v3694_v39  ;;  %v2717_v25 = vadd.f32 %v2651_v60, %v5629_v56 }
 0x36c   : > { %v4020_v14 = vsel %vm807_vm0, %v3960_v4, 0.0  ;;  %v4081_v34 = vmul.f32 %v3960_v4, %v3960_v4  ;;  %4205 = vst.msk [vmem:[%s5735_s19 + $0xcc] sm:$0xff] %vm807_vm0, %v3960_v4  ;;  %v3043_v7 = vadd.f32 %v2977_v37, %v2717_v25  ;;  %v3885_v4 = vpop.permute.xlu1 %3884 }
 0x36d   : > { %v4021_v23 = vadd.f32 %v4020_v14, %v4019_v3 }
 0x36e   : > { %v4141_v54 = vsel %vm807_vm0, %v4081_v34, 0.0  ;;  %v3369_v40 = vadd.f32 %v3303_v48, %v3043_v7 }
 0x36f   : > { %v4142_v19 = vadd.f32 %v4141_v54, %v4140_v55 }
 0x370   : > { %v3695_v16 = vadd.f32 %v3629_v13, %v3369_v40  ;;  %v2980_v12 = vpop.f32.mrf.mxu2  ;;  %v3306_v11 = vpop.f32.mrf.mxu3 }
 0x371   : > { %v2654_v59 = vpop.f32.mrf.mxu1  ;;  %v3632_v1 = vpop.f32.mrf.mxu0 }
 0x372   : > { %v3961_v38 = vmul.f32 %v3870_v32, %v3695_v16  ;;  %v2718_v56 = vadd.f32 %v2654_v59, %v5637_v18 }
 0x374   : > { %v4022_v2 = vsel %vm807_vm0, %v3961_v38, 0.0  ;;  %v4082_v17 = vmul.f32 %v3961_v38, %v3961_v38  ;;  %4206 = vst.msk [vmem:[%s5735_s19 + $0xd4] sm:$0xff] %vm807_vm0, %v3961_v38  ;;  %v3044_v10 = vadd.f32 %v2980_v12, %v2718_v56 }
 0x375   : > { %v4023_v46 = vadd.f32 %v4022_v2, %v4021_v23 }
 0x376   : > { %v4143_v20 = vsel %vm807_vm0, %v4082_v17, 0.0  ;;  %v3370_v44 = vadd.f32 %v3306_v11, %v3044_v10 }
 0x377   : > { %v4144_v49 = vadd.f32 %v4143_v20, %v4142_v19 }
 0x378   : > { %v3696_v27 = vadd.f32 %v3632_v1, %v3370_v44  ;;  %v2983_v35 = vpop.f32.mrf.mxu2  ;;  %v3309_v30 = vpop.f32.mrf.mxu3 }
 0x379   : > { %v2657_v41 = vpop.f32.mrf.mxu1  ;;  %v3635_v22 = vpop.f32.mrf.mxu0 }
 0x37a   : > { %v3962_v62 = vmul.f32 %v3875_v26, %v3696_v27  ;;  %v2719_v18 = vadd.f32 %v2657_v41, %v5645_v8  ;;  %v3890_v1 = vpop.permute.xlu2 %3889  ;;  %v3895_v41 = vpop.permute.xlu0 %3894 }
 0x37c   : > { %v4024_v15 = vsel %vm807_vm0, %v3962_v62, 0.0  ;;  %v4083_v24 = vmul.f32 %v3962_v62, %v3962_v62  ;;  %4207 = vst.msk [vmem:[%s5735_s19 + $0xdc] sm:$0xff] %vm807_vm0, %v3962_v62  ;;  %v3045_v28 = vadd.f32 %v2983_v35, %v2719_v18 }
 0x37d   : > { %v4025_v21 = vadd.f32 %v4024_v15, %v4023_v46 }
 0x37e   : > { %v4145_v50 = vsel %vm807_vm0, %v4083_v24, 0.0  ;;  %v3371_v57 = vadd.f32 %v3309_v30, %v3045_v28 }
 0x37f   : > { %v4146_v42 = vadd.f32 %v4145_v50, %v4144_v49 }
 0x380   : > { %v3697_v33 = vadd.f32 %v3635_v22, %v3371_v57  ;;  %v2986_v36 = vpop.f32.mrf.mxu2  ;;  %v3312_v3 = vpop.f32.mrf.mxu3 }
 0x381   : > { %v2660_v45 = vpop.f32.mrf.mxu1  ;;  %v3638_v58 = vpop.f32.mrf.mxu0 }
 0x382   : > { %v3963_v5 = vmul.f32 %v3880_v63, %v3697_v33  ;;  %v2720_v8 = vadd.f32 %v2660_v45, %v5653_v51 }
 0x384   : > { %v4026_v55 = vsel %vm807_vm0, %v3963_v5, 0.0  ;;  %v4084_v39 = vmul.f32 %v3963_v5, %v3963_v5  ;;  %4208 = vst.msk [vmem:[%s5735_s19 + $0xe4] sm:$0xff] %vm807_vm0, %v3963_v5  ;;  %v3046_v37 = vadd.f32 %v2986_v36, %v2720_v8 }
 0x385   : > { %v4027_v48 = vadd.f32 %v4026_v55, %v4025_v21 }
 0x386   : > { %v4147_v60 = vsel %vm807_vm0, %v4084_v39, 0.0  ;;  %v3372_v13 = vadd.f32 %v3312_v3, %v3046_v37  ;;  %v3900_v3 = vpop.permute.xlu1 %3899 }
 0x387   : > { %v4148_v25 = vadd.f32 %v4147_v60, %v4146_v42 }
 0x388   : > { %v3698_v14 = vadd.f32 %v3638_v58, %v3372_v13  ;;  %v2989_v34 = vpop.f32.mrf.mxu2  ;;  %v3315_v7 = vpop.f32.mrf.mxu3 }
 0x389   : > { %v2663_v23 = vpop.f32.mrf.mxu1  ;;  %v3641_v54 = vpop.f32.mrf.mxu0 }
 0x38a   : > { %v3964_v40 = vmul.f32 %v3885_v4, %v3698_v14  ;;  %v2721_v51 = vadd.f32 %v2663_v23, %v5660_v52 }
 0x38c   : > { %v4028_v32 = vsel %vm807_vm0, %v3964_v40, 0.0  ;;  %v4085_v19 = vmul.f32 %v3964_v40, %v3964_v40  ;;  %4209 = vst.msk [vmem:[%s5735_s19 + $0xec] sm:$0xff] %vm807_vm0, %v3964_v40  ;;  %v3047_v16 = vadd.f32 %v2989_v34, %v2721_v51  ;;  %v3905_v34 = vpop.permute.xlu2 %3904 }
 0x38d   : > { %v4029_v12 = vadd.f32 %v4028_v32, %v4027_v48 }
 0x38e   : > { %v4149_v11 = vsel %vm807_vm0, %v4085_v19, 0.0  ;;  %v3373_v59 = vadd.f32 %v3315_v7, %v3047_v16 }
 0x38f   : > { %v4150_v38 = vadd.f32 %v4149_v11, %v4148_v25 }
 0x390   : > { %v3699_v56 = vadd.f32 %v3641_v54, %v3373_v59  ;;  %v2992_v2 = vpop.f32.mrf.mxu2  ;;  %v3318_v17 = vpop.f32.mrf.mxu3 }
 0x391   : > { %v2666_v10 = vpop.f32.mrf.mxu1  ;;  %v3644_v46 = vpop.f32.mrf.mxu0 }
 0x392   : > { %v3965_v20 = vmul.f32 %v3890_v1, %v3699_v56  ;;  %v2722_v52 = vadd.f32 %v2666_v10, %v5667_v31  ;;  %v3910_v56 = vpop.permute.xlu0 %3909 }
 0x394   : > { %v4030_v44 = vsel %vm807_vm0, %v3965_v20, 0.0  ;;  %v4086_v26 = vmul.f32 %v3965_v20, %v3965_v20  ;;  %4210 = vst.msk [vmem:[%s5735_s19 + $0xf4] sm:$0xff] %vm807_vm0, %v3965_v20  ;;  %v3048_v49 = vadd.f32 %v2992_v2, %v2722_v52 }
 0x395   : > { %v4031_v27 = vadd.f32 %v4030_v44, %v4029_v12 }
 0x396   : > { %v4151_v35 = vsel %vm807_vm0, %v4086_v26, 0.0  ;;  %v3374_v30 = vadd.f32 %v3318_v17, %v3048_v49 }
 0x397   : > { %v4152_v22 = vadd.f32 %v4151_v35, %v4150_v38 }
 0x398   : > { %v3700_v62 = vadd.f32 %v3644_v46, %v3374_v30  ;;  %v2995_v18 = vpop.f32.mrf.mxu2  ;;  %v3321_v15 = vpop.f32.mrf.mxu3 }
 0x399   : > { %v2669_v24 = vpop.f32.mrf.mxu1  ;;  %v3647_v28 = vpop.f32.mrf.mxu0 }
 0x39a   : > { %v3966_v21 = vmul.f32 %v3895_v41, %v3700_v62  ;;  %v2723_v31 = vadd.f32 %v2669_v24, %v5674_v6 }
 0x39c   : > { %v4032_v50 = vsel %vm807_vm0, %v3966_v21, 0.0  ;;  %v4087_v57 = vmul.f32 %v3966_v21, %v3966_v21  ;;  %4211 = vst.msk [vmem:[%s5735_s19 + $0xfc] sm:$0xff] %vm807_vm0, %v3966_v21  ;;  %v3049_v63 = vadd.f32 %v2995_v18, %v2723_v31 }
 0x39d   : > { %v4033_v42 = vadd.f32 %v4032_v50, %v4031_v27 }
 0x39e   : > { %v4153_v33 = vsel %vm807_vm0, %v4087_v57, 0.0  ;;  %v3375_v36 = vadd.f32 %v3321_v15, %v3049_v63 }
 0x39f   : > { %v4154_v45 = vadd.f32 %v4153_v33, %v4152_v22  ;;  %v3915_v22 = vpop.permute.xlu1 %3914 }
 0x3a0   : > { %v3701_v58 = vadd.f32 %v3647_v28, %v3375_v36  ;;  %v2998_v5 = vpop.f32.mrf.mxu2  ;;  %v3324_v8 = vpop.f32.mrf.mxu3 }
 0x3a1   : > { %v2672_v55 = vpop.f32.mrf.mxu1  ;;  %v3650_v39 = vpop.f32.mrf.mxu0 }
 0x3a2   : > { %v3967_v37 = vmul.f32 %v3900_v3, %v3701_v58  ;;  %v2724_v6 = vadd.f32 %v2672_v55, %v5681_v47 }
 0x3a4   : > { %v4034_v48 = vsel %vm807_vm0, %v3967_v37, 0.0  ;;  %v4088_v60 = vmul.f32 %v3967_v37, %v3967_v37  ;;  %4212 = vst.msk [vmem:[%s5735_s19 + $0x104] sm:$0xff] %vm807_vm0, %v3967_v37  ;;  %v3050_v13 = vadd.f32 %v2998_v5, %v2724_v6 }
 0x3a5   : > { %v4035_v4 = vadd.f32 %v4034_v48, %v4033_v42 }
 0x3a6   : > { %v4155_v25 = vsel %vm807_vm0, %v4088_v60, 0.0  ;;  %v3376_v14 = vadd.f32 %v3324_v8, %v3050_v13 }
 0x3a7   : > { %v4156_v7 = vadd.f32 %v4155_v25, %v4154_v45  ;;  %v3920_v45 = vpop.permute.xlu2 %3919 }
 0x3a8   : > { %v3702_v23 = vadd.f32 %v3650_v39, %v3376_v14  ;;  %v3001_v54 = vpop.f32.mrf.mxu2  ;;  %v3327_v40 = vpop.f32.mrf.mxu3 }
 0x3a9   : > { %v2675_v51 = vpop.f32.mrf.mxu1  ;;  %v3653_v32 = vpop.f32.mrf.mxu0 }
 0x3aa   : > { %v3968_v19 = vmul.f32 %v3905_v34, %v3702_v23  ;;  %v2725_v47 = vadd.f32 %v2675_v51, %v5688_v29  ;;  %v3925_v34 = vpop.permute.xlu0 %3924 }
 0x3ac   : > { %v4036_v16 = vsel %vm807_vm0, %v3968_v19, 0.0  ;;  %v4089_v12 = vmul.f32 %v3968_v19, %v3968_v19  ;;  %4213 = vst.msk [vmem:[%s5735_s19 + $0x10c] sm:$0xff] %vm807_vm0, %v3968_v19  ;;  %v3051_v11 = vadd.f32 %v3001_v54, %v2725_v47 }
 0x3ad   : > { %v4037_v59 = vadd.f32 %v4036_v16, %v4035_v4 }
 0x3ae   : > { %v4157_v1 = vsel %vm807_vm0, %v4089_v12, 0.0  ;;  %v3377_v38 = vadd.f32 %v3327_v40, %v3051_v11 }
 0x3af   : > { %v4158_v2 = vadd.f32 %v4157_v1, %v4156_v7  ;;  %v4724_v1 = vmov 0.0  }
 0x3b0   : > { %v3703_v17 = vadd.f32 %v3653_v32, %v3377_v38  ;;  %v3004_v10 = vpop.f32.mrf.mxu2  ;;  %v3330_v46 = vpop.f32.mrf.mxu3  ;;  %4178 = vst.msk [vmem:[%s5735_s19] sm:$0xff] %vm807_vm0, %v4724_v1 }
 0x3b1   : > { %v2678_v20 = vpop.f32.mrf.mxu1  ;;  %v3656_v52 = vpop.f32.mrf.mxu0  ;;  %4179 = vst.msk [vmem:[%s5735_s19 + $0x8] sm:$0xff] %vm807_vm0, %v4724_v1 }
 0x3b2   : > { %v3969_v44 = vmul.f32 %v3910_v56, %v3703_v17  ;;  %v2726_v29 = vadd.f32 %v2678_v20, %v5695_v43  ;;  %4181 = vst.msk [vmem:[%s5735_s19 + $0x10] sm:$0xf] %vm4180_vm2, %v4724_v1  ;;  %v3930_v56 = vpop.permute.xlu1 %3929 }
 0x3b3   : > { %4220 = vst.msk [vmem:[%s5735_s19 + $0x144] sm:$0xff] %vm807_vm0, %v4724_v1 }
 0x3b4   : > { %v4038_v26 = vsel %vm807_vm0, %v3969_v44, 0.0  ;;  %v4090_v49 = vmul.f32 %v3969_v44, %v3969_v44  ;;  %4214 = vst.msk [vmem:[%s5735_s19 + $0x114] sm:$0xff] %vm807_vm0, %v3969_v44  ;;  %v3052_v27 = vadd.f32 %v3004_v10, %v2726_v29 }
 0x3b5   : > { %v4039_v35 = vadd.f32 %v4038_v26, %v4037_v59  ;;  %4221 = vst.msk [vmem:[%s5735_s19 + $0x14c] sm:$0xff] %vm807_vm0, %v4724_v1 }
 0x3b6   : > { %v4159_v30 = vsel %vm807_vm0, %v4090_v49, 0.0  ;;  %v3378_v41 = vadd.f32 %v3330_v46, %v3052_v27  ;;  %4222 = vst.msk [vmem:[%s5735_s19 + $0x154] sm:$0xf] %vm4180_vm2, %v4724_v1 }
 0x3b7   : > { %v4160_v62 = vadd.f32 %v4159_v30, %v4158_v2 }
 0x3b8   : > { %v3704_v18 = vadd.f32 %v3656_v52, %v3378_v41  ;;  %v3007_v15 = vpop.f32.mrf.mxu2  ;;  %v3333_v24 = vpop.f32.mrf.mxu3 }
 0x3b9   : > { %v2681_v28 = vpop.f32.mrf.mxu1  ;;  %v3659_v21 = vpop.f32.mrf.mxu0 }
 0x3ba   : > { %v3970_v31 = vmul.f32 %v3915_v22, %v3704_v18  ;;  %v2727_v43 = vadd.f32 %v2681_v28, %v5702_v0  ;;  %v3935_v41 = vpop.permute.xlu2 %3934 }
 0x3bc   : > { %v4040_v50 = vsel %vm807_vm0, %v3970_v31, 0.0  ;;  %v4091_v57 = vmul.f32 %v3970_v31, %v3970_v31  ;;  %4215 = vst.msk [vmem:[%s5735_s19 + $0x11c] sm:$0xff] %vm807_vm0, %v3970_v31  ;;  %v3053_v63 = vadd.f32 %v3007_v15, %v2727_v43 }
 0x3bd   : > { %v4041_v42 = vadd.f32 %v4040_v50, %v4039_v35 }
 0x3be   : > { %v4161_v33 = vsel %vm807_vm0, %v4091_v57, 0.0  ;;  %v3379_v36 = vadd.f32 %v3333_v24, %v3053_v63 }
 0x3bf   : > { %v4162_v3 = vadd.f32 %v4161_v33, %v4160_v62 }
 0x3c0   : > { %v3705_v58 = vadd.f32 %v3659_v21, %v3379_v36  ;;  %v3010_v5 = vpop.f32.mrf.mxu2  ;;  %v3336_v8 = vpop.f32.mrf.mxu3 }
 0x3c1   : > { %v2684_v55 = vpop.f32.mrf.mxu1  ;;  %v3662_v37 = vpop.f32.mrf.mxu0 }
 0x3c2   : > { %v3971_v39 = vmul.f32 %v3920_v45, %v3705_v58  ;;  %v2728_v0 = vadd.f32 %v2684_v55, %v5709_v53 }
 0x3c4   : > { %v4042_v6 = vsel %vm807_vm0, %v3971_v39, 0.0  ;;  %v4092_v48 = vmul.f32 %v3971_v39, %v3971_v39  ;;  %4216 = vst.msk [vmem:[%s5735_s19 + $0x124] sm:$0xff] %vm807_vm0, %v3971_v39  ;;  %v3054_v60 = vadd.f32 %v3010_v5, %v2728_v0 }
 0x3c5   : > { %v4043_v13 = vadd.f32 %v4042_v6, %v4041_v42 }
 0x3c6   : > { %v4163_v4 = vsel %vm807_vm0, %v4092_v48, 0.0  ;;  %v3380_v25 = vadd.f32 %v3336_v8, %v3054_v60 }
 0x3c7   : > { %v4164_v14 = vadd.f32 %v4163_v4, %v4162_v3 }
 0x3c8   : > { %v3706_v7 = vadd.f32 %v3662_v37, %v3380_v25  ;;  %v3013_v23 = vpop.f32.mrf.mxu2  ;;  %v3339_v51 = vpop.f32.mrf.mxu3 }
 0x3c9   : > { %v2687_v54 = vpop.f32.mrf.mxu1  ;;  %v3665_v12 = vpop.f32.mrf.mxu0 }
 0x3ca   : > { %v3972_v53 = vmul.f32 %v3925_v34, %v3706_v7  ;;  %v2729_v40 = vadd.f32 %v2687_v54, %v5716_v61 }
 0x3cc   : > { %v4044_v32 = vsel %vm807_vm0, %v3972_v53, 0.0  ;;  %v4093_v19 = vmul.f32 %v3972_v53, %v3972_v53  ;;  %4217 = vst.msk [vmem:[%s5735_s19 + $0x12c] sm:$0xff] %vm807_vm0, %v3972_v53  ;;  %v3055_v47 = vadd.f32 %v3013_v23, %v2729_v40 }
 0x3cd   : > { %v4045_v16 = vadd.f32 %v4044_v32, %v4043_v13 }
 0x3ce   : > { %v4165_v11 = vsel %vm807_vm0, %v4093_v19, 0.0  ;;  %v3381_v59 = vadd.f32 %v3339_v51, %v3055_v47 }
 0x3cf   : > { %v4166_v61 = vadd.f32 %v4165_v11, %v4164_v14 }
 0x3d0   : > { %v3707_v38 = vadd.f32 %v3665_v12, %v3381_v59  ;;  %v3016_v46 = vpop.f32.mrf.mxu2  ;;  %v3342_v26 = vpop.f32.mrf.mxu3 }
 0x3d1   : > { %v2690_v2 = vpop.f32.mrf.mxu1 }
 0x3d2   : > { %v3973_v17 = vmul.f32 %v3930_v56, %v3707_v38  ;;  %v2730_v10 = vadd.f32 %v2690_v2, %v5723_v9  ;;  %v3668_v9 = vpop.f32.mrf.mxu0 }
 0x3d4   : > { %v4046_v20 = vsel %vm807_vm0, %v3973_v17, 0.0  ;;  %v4094_v52 = vmul.f32 %v3973_v17, %v3973_v17  ;;  %4218 = vst.msk [vmem:[%s5735_s19 + $0x134] sm:$0xff] %vm807_vm0, %v3973_v17  ;;  %v3056_v44 = vadd.f32 %v3016_v46, %v2730_v10 }
 0x3d5   : > { %v4047_v29 = vadd.f32 %v4046_v20, %v4045_v16 }
 0x3d6   : > { %v4167_v49 = vsel %vm807_vm0, %v4094_v52, 0.0  ;;  %v3382_v27 = vadd.f32 %v3342_v26, %v3056_v44 }
 0x3d7   : > { %v4168_v35 = vadd.f32 %v4167_v49, %v4166_v61 }
 0x3d8   : > { %v3708_v30 = vadd.f32 %v3668_v9, %v3382_v27 }
 0x3da   : > { %v3974_v22 = vmul.f32 %v3935_v41, %v3708_v30 }
 0x3dc   : > { %v4048_v62 = vsel %vm807_vm0, %v3974_v22, 0.0  ;;  %v4095_v18 = vmul.f32 %v3974_v22, %v3974_v22  ;;  %4219 = vst.msk [vmem:[%s5735_s19 + $0x13c] sm:$0xff] %vm807_vm0, %v3974_v22 }
 0x3dd   : > { %v4049_v15 = vadd.f32 %v4048_v62, %v4047_v29 }
 0x3de   : > { %v4169_v24 = vsel %vm807_vm0, %v4095_v18, 0.0 }
 0x3df   : > { %v4050_v28 = vrot.slane %v4049_v15, 4  ;;  %v4170_v21 = vadd.f32 %v4169_v24, %v4168_v35 }
 0x3e1   : > { %v4051_v31 = vadd.f32 %v4050_v28, %v4049_v15  ;;  %v4171_v43 = vrot.slane %v4170_v21, 4 }
 0x3e3   : > { %v4052_v50 = vrot.slane %v4051_v31, 2  ;;  %v4172_v57 = vadd.f32 %v4171_v43, %v4170_v21 }
 0x3e5   : > { %v4053_v63 = vadd.f32 %v4052_v50, %v4051_v31  ;;  %v4173_v42 = vrot.slane %v4172_v57, 2 }
 0x3e7   : > { %v4054_v33 = vrot.slane %v4053_v63, 1  ;;  %v4174_v36 = vadd.f32 %v4173_v42, %v4172_v57 }
 0x3e9   : > { %v4055_v3 = vadd.f32 %v4054_v33, %v4053_v63  ;;  %v4175_v45 = vrot.slane %v4174_v36, 1 }
 0x3eb   : > { %4057 = vst.msk [vmem:[%s322_s20] sm:$0x1] %vm4056_vm3, %v4055_v3  ;;  %v4176_v58 = vadd.f32 %v4175_v45, %v4174_v36 }
 0x3ed   : > { %4177 = vst.msk [vmem:[%s325_s23] sm:$0x1] %vm4056_vm3, %v4176_v58 }
 0x3ee PF: > { %s19_s27 = sadd.s32 1, %s4721_s27  }
 0x3ef   : > { %p16_p5 = scmp.ge.s32.totalorder %s19_s27, 4  }
 0x3f1   :  { %18 = sbr.rel (!%p16_p5) target bundleno = 1 (0x1), region = 106 }

</bundles_post_ra>
